<compile_context>
chip_gen: v5e
topology: v5e:2x2
jax: 0.10.0
libtpu: 0.0.40
codegen_flags: <defaults>
</compile_context>

<pallas_src>
import functools

import jax
import jax.numpy as jnp
from jax import lax
from jax.experimental import pallas as pl
from jax.experimental.pallas import tpu as pltpu

_BN_EPS = 1e-5
_Y_CHUNK = 8  # output rows (y) per conv-accumulation chunk (keeps the f32 acc in vregs)


# ----------------------------------- kernel -----------------------------------------
def _conv_block5x5_kernel(x_ref, w_ref, b_ref, out_ref, hbuf_ref, *,
                          h, w, wp, pool_type):
    """One image per grid step.

    x_ref   : (1, Hp*Wp + 4, Cin) bf16  zero-padded (pad=2) image, flattened to rows =
                                        (y_pad, x_pad) channels-last, plus a 2-row margin
                                        on each end so every tap slice stays in bounds.
    w_ref   : (25, Cin, Cout)     bf16  conv weights, tap-major (ky*5+kx, Cin, Cout),
                                        with the folded BN scale pre-multiplied.
    b_ref   : (1, Cout)           f32   folded BN shift.
    out_ref : (1, Ho*Wo, Cout)    f32   pooled output, rows = (yo, xo).
    hbuf_ref: (h*Wp, Cout)        f32   scratch holding conv+bn+relu at rows = (y, x_pad);
                                        the 2-wide x border columns hold junk that the
                                        pooling reads never touch.
    """
    ho, wo = h // 2, w // 2
    cout = out_ref.shape[-1]

    # ---- conv 5x5 (stride 1, pad 2, no bias) + folded BN shift + ReLU ---------------
    # Computed at every padded x position (junk at the x border, discarded below).
    for y0 in range(0, h, _Y_CHUNK):
        rows = min(_Y_CHUNK, h - y0) * wp
        acc = jnp.zeros((rows, cout), jnp.float32)
        for t in range(25):                       # unrolled static tap loop (LLO-friendly)
            ky, kx = t // 5, t % 5
            start = (y0 + ky) * wp + kx           # static contiguous slice per tap
            xs = x_ref[0, pl.ds(start, rows), :]  # (rows, Cin) bf16
            acc += jnp.dot(xs, w_ref[t], preferred_element_type=jnp.float32)
        hbuf_ref[pl.ds(y0 * wp, rows), :] = jnp.maximum(acc + b_ref[...], 0.0)

    # ---- fused 2x2 pooling over the valid region -------------------------------------
    for yo in range(ho):
        r0 = (2 * yo) * wp + 2                    # valid x starts at padded column 2
        r1 = r0 + wp
        p00 = hbuf_ref[pl.ds(r0, wo, stride=2), :]
        p01 = hbuf_ref[pl.ds(r0 + 1, wo, stride=2), :]
        p10 = hbuf_ref[pl.ds(r1, wo, stride=2), :]
        p11 = hbuf_ref[pl.ds(r1 + 1, wo, stride=2), :]
        if pool_type == "avg":
            pooled = (p00 + p01 + p10 + p11) * 0.25
        elif pool_type == "max":
            pooled = jnp.maximum(jnp.maximum(p00, p01), jnp.maximum(p10, p11))
        elif pool_type == "avg+max":
            pooled = ((p00 + p01 + p10 + p11) * 0.25
                      + jnp.maximum(jnp.maximum(p00, p01), jnp.maximum(p10, p11)))
        else:  # matches the module's `raise Exception('Incorrect argument!')`
            raise ValueError("Incorrect pool_type argument: %s" % pool_type)
        out_ref[0, pl.ds(yo * wo, wo), :] = pooled


# ----------------------------------- wrapper -----------------------------------------
def _fold_bn(gamma, beta, mean, var):
    scale = gamma / jnp.sqrt(var + _BN_EPS)
    shift = beta - mean * scale
    return scale.astype(jnp.float32), shift.astype(jnp.float32)


def conv_block5x5_pallas(x_nchw, params, pool_size=(2, 2), pool_type="avg"):
    """Eval-mode forward of ConvBlock5x5 (NCHW in, NCHW out)."""
    assert tuple(pool_size) == (2, 2), "kernel is specialized for the default 2x2 pool"
    assert pool_type in ("avg", "max", "avg+max"), "Incorrect pool_type argument"

    w_oihw = params["conv1_w"]                       # (Cout, Cin, 5, 5) PyTorch OIHW
    n, c, h, w = x_nchw.shape
    p = w_oihw.shape[0]
    hp, wp = h + 4, w + 4
    rp = hp * wp
    ho, wo = h // 2, w // 2                          # avg/max_pool2d floors odd dims

    # --- layout glue (plain JAX): NCHW -> flattened channels-last padded rows, bf16 ---
    x_nhwc = jnp.transpose(x_nchw.astype(jnp.float32), (0, 2, 3, 1))
    x_pad = jnp.pad(x_nhwc, ((0, 0), (2, 2), (2, 2), (0, 0)))
    x_flat = x_pad.reshape(n, rp, c)
    x_big = jnp.pad(x_flat, ((0, 0), (2, 2), (0, 0))).astype(jnp.bfloat16)  # (n, rp+4, c)

    # --- weights: OIHW -> (tap, Cin, Cout), BN scale folded in, bf16 -------------------
    scale, shift = _fold_bn(*params["bn1"])
    w_taps = jnp.transpose(w_oihw.astype(jnp.float32), (2, 3, 1, 0))        # (5,5,Cin,Cout)
    w_folded = (w_taps * scale[None, None, None, :]).reshape(25, c, p).astype(jnp.bfloat16)
    shift2d = shift.reshape(1, p)

    kernel = functools.partial(_conv_block5x5_kernel,
                               h=h, w=w, wp=wp, pool_type=pool_type)

    # Per-grid-step VMEM: double-buffered pipelined input/output tiles + resident
    # weights/shift + scratch, plus headroom.  Explicit so larger shapes don't silently
    # hit the 16/32 MiB default scoped limits.
    x_tile = (rp + 4) * c * 2
    out_tile = ho * wo * p * 4
    hbuf_bytes = h * wp * p * 4
    w_bytes = 25 * c * p * 2 + p * 4
    vmem_limit = int(min(max(2 * (x_tile + out_tile) + hbuf_bytes + w_bytes + (4 << 20),
                             16 << 20), 64 << 20))

    out_flat = pl.pallas_call(
        kernel,
        out_shape=jax.ShapeDtypeStruct((n, ho * wo, p), jnp.float32),
        grid_spec=pltpu.PrefetchScalarGridSpec(
            num_scalar_prefetch=0,
            grid=(n,),
            in_specs=[
                pl.BlockSpec((1, rp + 4, c), lambda i: (i, 0, 0)),   # per-image input
                pl.BlockSpec((25, c, p), lambda i: (0, 0, 0)),       # weights (resident)
                pl.BlockSpec((1, p), lambda i: (0, 0)),              # BN shift
            ],
            out_specs=pl.BlockSpec((1, ho * wo, p), lambda i: (i, 0, 0)),
            scratch_shapes=[pltpu.VMEM((h * wp, p), jnp.float32)],
        ),
        compiler_params=pltpu.CompilerParams(
            dimension_semantics=("parallel",),       # batch axis: shard across TCs (v7x)
            vmem_limit_bytes=vmem_limit,
        ),
    )(x_big, w_folded, shift2d)

    # --- glue back: (n, Ho*Wo, P) -> NCHW ----------------------------------------------
    return jnp.transpose(out_flat.reshape(n, ho, wo, p), (0, 3, 1, 2))


# ----------------------------- pure-JAX reference -------------------------------------
def conv_block5x5_ref(x, params, pool_size=(2, 2), pool_type="avg"):
    y = lax.conv_general_dilated(
        x, params["conv1_w"], window_strides=(1, 1), padding=((2, 2), (2, 2)),
        dimension_numbers=("NCHW", "OIHW", "NCHW"), precision=lax.Precision.HIGHEST)
    g, b, m, v = params["bn1"]
    inv = g / jnp.sqrt(v + _BN_EPS)
    y = jnp.maximum(y * inv[None, :, None, None]
                    + (b - m * inv)[None, :, None, None], 0.0)
    n, c, h, w = y.shape
    ph, pw = pool_size
    y6 = y[:, :, :(h // ph) * ph, :(w // pw) * pw].reshape(n, c, h // ph, ph, w // pw, pw)
    avg, mx = y6.mean(axis=(3, 5)), y6.max(axis=(3, 5))
    if pool_type == "avg":
        return avg
    if pool_type == "max":
        return mx
    return avg + mx


# ------------------------- deterministic parameter init -------------------------------
def init_params(key, in_channels, out_channels):
    # ConvBlock5x5.init_weight(): xavier_uniform conv (bias=False), bn gamma=1 / beta=0,
    # fresh running stats mean=0 / var=1 (inference-mode BatchNorm).
    fan_in, fan_out = in_channels * 25, out_channels * 25
    bound = (6.0 / (fan_in + fan_out)) ** 0.5
    conv_w = jax.random.uniform(key, (out_channels, in_channels, 5, 5), jnp.float32,
                                -bound, bound)
    bn = (jnp.ones(out_channels), jnp.zeros(out_channels),
          jnp.zeros(out_channels), jnp.ones(out_channels))
    return dict(conv1_w=conv_w, bn1=bn)


def _rand_bn(key, c):
    kg, kb, km, kv = jax.random.split(key, 4)
    return (1.0 + 0.2 * jax.random.normal(kg, (c,), jnp.float32),
            0.1 * jax.random.normal(kb, (c,), jnp.float32),
            0.1 * jax.random.normal(km, (c,), jnp.float32),
            1.0 + 0.2 * jnp.abs(jax.random.normal(kv, (c,), jnp.float32)))


if __name__ == "__main__":
    key = jax.random.PRNGKey(0)
    kx, kp, kb1, kx2, kp2, kb2 = jax.random.split(key, 6)

    # Tolerance accounts for bf16 activations/weights with f32 accumulation.
    ATOL = RTOL = 2e-2

    # 1) Default config, module-faithful init, default pool_type='avg'.
    N, C, H, W = 2, 4, 16, 16
    x = jax.random.normal(kx, (N, C, H, W), jnp.float32)
    params = init_params(kp, C, C)
    out = jax.block_until_ready(conv_block5x5_pallas(x, params))
    ref = conv_block5x5_ref(x, params)
    assert out.shape == (N, C, H // 2, W // 2) and out.dtype == jnp.float32
    assert bool(jnp.allclose(out, ref, atol=ATOL, rtol=RTOL)), "mismatch (avg pool)"

    # 2) Non-trivial BatchNorm parameters (exercises the weight-folded BN path), and
    #    both 'avg' and 'max' pooling.
    params2 = dict(params, bn1=_rand_bn(kb1, C))
    out2a = jax.block_until_ready(conv_block5x5_pallas(x, params2, pool_type="avg"))
    ref2a = conv_block5x5_ref(x, params2, pool_type="avg")
    assert bool(jnp.allclose(out2a, ref2a, atol=ATOL, rtol=RTOL)), "mismatch (avg, rand BN)"
    out2m = jax.block_until_ready(conv_block5x5_pallas(x, params2, pool_type="max"))
    ref2m = conv_block5x5_ref(x, params2, pool_type="max")
    assert bool(jnp.allclose(out2m, ref2m, atol=ATOL, rtol=RTOL)), "mismatch (max, rand BN)"

    # 3) in_channels != out_channels and non-square / non-multiple-of-8 spatial dims.
    Cin, Cout, H3, W3 = 3, 8, 12, 10
    x3 = jax.random.normal(kx2, (1, Cin, H3, W3), jnp.float32)
    params3 = dict(init_params(kp2, Cin, Cout), bn1=_rand_bn(kb2, Cout))
    out3 = jax.block_until_ready(conv_block5x5_pallas(x3, params3))
    ref3 = conv_block5x5_ref(x3, params3)
    assert out3.shape == (1, Cout, H3 // 2, W3 // 2)
    assert bool(jnp.allclose(out3, ref3, atol=ATOL, rtol=RTOL)), "mismatch (Cin!=Cout)"

    print("KERNEL_OK")
</pallas_src>

<mosaic_0001>
module attributes {stable_mosaic.version = 11 : i64} {
  func.func @_conv_block5x5_kernel(%arg0: i32, %arg1: memref<1x404x4xbf16, #tpu.memory_space<vmem>>, %arg2: memref<25x4x4xbf16, #tpu.memory_space<vmem>>, %arg3: memref<1x4xf32, #tpu.memory_space<vmem>>, %arg4: memref<1x64x4xf32, #tpu.memory_space<vmem>>, %arg5: memref<320x4xf32, #tpu.memory_space<vmem>>) attributes {dimension_semantics = [#tpu.dimension_semantics<parallel>], iteration_bounds = array<i64: 2>, scalar_prefetch = 0 : i64, scratch_operands = 1 : i64, tpu.core_type = #tpu.core_type<tc>, window_params = [{transform_indices = @transform_0, window_bounds = array<i64: 1, 404, 4>}, {pipeline_mode = #tpu.pipeline_mode<synchronous>, transform_indices = @transform_1, window_bounds = array<i64: 25, 4, 4>}, {pipeline_mode = #tpu.pipeline_mode<synchronous>, transform_indices = @transform_2, window_bounds = array<i64: 1, 4>}, {transform_indices = @transform_3, window_bounds = array<i64: 1, 64, 4>}]} {
    %cst = arith.constant 0.000000e+00 : f32
    %0 = vector.broadcast %cst : f32 to vector<160x4xf32>
    %c0 = arith.constant 0 : index
    %c0_0 = arith.constant 0 : index
    %c0_1 = arith.constant 0 : index
    %1 = vector.load %arg1[%c0, %c0_0, %c0_1] : memref<1x404x4xbf16, #tpu.memory_space<vmem>>, vector<1x160x4xbf16>
    %2 = vector.shape_cast %1 : vector<1x160x4xbf16> to vector<160x4xbf16>
    %c0_2 = arith.constant 0 : index
    %c0_3 = arith.constant 0 : index
    %c0_4 = arith.constant 0 : index
    %3 = vector.load %arg2[%c0_2, %c0_3, %c0_4] : memref<25x4x4xbf16, #tpu.memory_space<vmem>>, vector<1x4x4xbf16>
    %4 = vector.shape_cast %3 : vector<1x4x4xbf16> to vector<4x4xbf16>
    %cst_5 = arith.constant dense<0.000000e+00> : vector<160x4xf32>
    %5 = tpu.matmul %2, %4, %cst_5 {dimension_numbers = #tpu.dot_dimension_numbers<[1], [0], [0], [1], [0, 0, 1, 1], [], []>} : vector<160x4xbf16>, vector<4x4xbf16>, vector<160x4xf32> -> vector<160x4xf32>
    %6 = arith.addf %0, %5 : vector<160x4xf32>
    %c0_6 = arith.constant 0 : index
    %c1 = arith.constant 1 : index
    %c0_7 = arith.constant 0 : index
    %7 = vector.load %arg1[%c0_6, %c1, %c0_7] : memref<1x404x4xbf16, #tpu.memory_space<vmem>>, vector<1x160x4xbf16>
    %8 = vector.shape_cast %7 : vector<1x160x4xbf16> to vector<160x4xbf16>
    %c1_8 = arith.constant 1 : index
    %c0_9 = arith.constant 0 : index
    %c0_10 = arith.constant 0 : index
    %9 = vector.load %arg2[%c1_8, %c0_9, %c0_10] : memref<25x4x4xbf16, #tpu.memory_space<vmem>>, vector<1x4x4xbf16>
    %10 = vector.shape_cast %9 : vector<1x4x4xbf16> to vector<4x4xbf16>
    %cst_11 = arith.constant dense<0.000000e+00> : vector<160x4xf32>
    %11 = tpu.matmul %8, %10, %cst_11 {dimension_numbers = #tpu.dot_dimension_numbers<[1], [0], [0], [1], [0, 0, 1, 1], [], []>} : vector<160x4xbf16>, vector<4x4xbf16>, vector<160x4xf32> -> vector<160x4xf32>
    %12 = arith.addf %6, %11 : vector<160x4xf32>
    %c0_12 = arith.constant 0 : index
    %c2 = arith.constant 2 : index
    %c0_13 = arith.constant 0 : index
    %13 = vector.load %arg1[%c0_12, %c2, %c0_13] : memref<1x404x4xbf16, #tpu.memory_space<vmem>>, vector<1x160x4xbf16>
    %14 = vector.shape_cast %13 : vector<1x160x4xbf16> to vector<160x4xbf16>
    %c2_14 = arith.constant 2 : index
    %c0_15 = arith.constant 0 : index
    %c0_16 = arith.constant 0 : index
    %15 = vector.load %arg2[%c2_14, %c0_15, %c0_16] : memref<25x4x4xbf16, #tpu.memory_space<vmem>>, vector<1x4x4xbf16>
    %16 = vector.shape_cast %15 : vector<1x4x4xbf16> to vector<4x4xbf16>
    %cst_17 = arith.constant dense<0.000000e+00> : vector<160x4xf32>
    %17 = tpu.matmul %14, %16, %cst_17 {dimension_numbers = #tpu.dot_dimension_numbers<[1], [0], [0], [1], [0, 0, 1, 1], [], []>} : vector<160x4xbf16>, vector<4x4xbf16>, vector<160x4xf32> -> vector<160x4xf32>
    %18 = arith.addf %12, %17 : vector<160x4xf32>
    %c0_18 = arith.constant 0 : index
    %c3 = arith.constant 3 : index
    %c0_19 = arith.constant 0 : index
    %19 = vector.load %arg1[%c0_18, %c3, %c0_19] : memref<1x404x4xbf16, #tpu.memory_space<vmem>>, vector<1x160x4xbf16>
    %20 = vector.shape_cast %19 : vector<1x160x4xbf16> to vector<160x4xbf16>
    %c3_20 = arith.constant 3 : index
    %c0_21 = arith.constant 0 : index
    %c0_22 = arith.constant 0 : index
    %21 = vector.load %arg2[%c3_20, %c0_21, %c0_22] : memref<25x4x4xbf16, #tpu.memory_space<vmem>>, vector<1x4x4xbf16>
    %22 = vector.shape_cast %21 : vector<1x4x4xbf16> to vector<4x4xbf16>
    %cst_23 = arith.constant dense<0.000000e+00> : vector<160x4xf32>
    %23 = tpu.matmul %20, %22, %cst_23 {dimension_numbers = #tpu.dot_dimension_numbers<[1], [0], [0], [1], [0, 0, 1, 1], [], []>} : vector<160x4xbf16>, vector<4x4xbf16>, vector<160x4xf32> -> vector<160x4xf32>
    %24 = arith.addf %18, %23 : vector<160x4xf32>
    %c0_24 = arith.constant 0 : index
    %c4 = arith.constant 4 : index
    %c0_25 = arith.constant 0 : index
    %25 = vector.load %arg1[%c0_24, %c4, %c0_25] : memref<1x404x4xbf16, #tpu.memory_space<vmem>>, vector<1x160x4xbf16>
    %26 = vector.shape_cast %25 : vector<1x160x4xbf16> to vector<160x4xbf16>
    %c4_26 = arith.constant 4 : index
    %c0_27 = arith.constant 0 : index
    %c0_28 = arith.constant 0 : index
    %27 = vector.load %arg2[%c4_26, %c0_27, %c0_28] : memref<25x4x4xbf16, #tpu.memory_space<vmem>>, vector<1x4x4xbf16>
    %28 = vector.shape_cast %27 : vector<1x4x4xbf16> to vector<4x4xbf16>
    %cst_29 = arith.constant dense<0.000000e+00> : vector<160x4xf32>
    %29 = tpu.matmul %26, %28, %cst_29 {dimension_numbers = #tpu.dot_dimension_numbers<[1], [0], [0], [1], [0, 0, 1, 1], [], []>} : vector<160x4xbf16>, vector<4x4xbf16>, vector<160x4xf32> -> vector<160x4xf32>
    %30 = arith.addf %24, %29 : vector<160x4xf32>
    %c0_30 = arith.constant 0 : index
    %c20 = arith.constant 20 : index
    %c0_31 = arith.constant 0 : index
    %31 = vector.load %arg1[%c0_30, %c20, %c0_31] : memref<1x404x4xbf16, #tpu.memory_space<vmem>>, vector<1x160x4xbf16>
    %32 = vector.shape_cast %31 : vector<1x160x4xbf16> to vector<160x4xbf16>
    %c5 = arith.constant 5 : index
    %c0_32 = arith.constant 0 : index
    %c0_33 = arith.constant 0 : index
    %33 = vector.load %arg2[%c5, %c0_32, %c0_33] : memref<25x4x4xbf16, #tpu.memory_space<vmem>>, vector<1x4x4xbf16>
    %34 = vector.shape_cast %33 : vector<1x4x4xbf16> to vector<4x4xbf16>
    %cst_34 = arith.constant dense<0.000000e+00> : vector<160x4xf32>
    %35 = tpu.matmul %32, %34, %cst_34 {dimension_numbers = #tpu.dot_dimension_numbers<[1], [0], [0], [1], [0, 0, 1, 1], [], []>} : vector<160x4xbf16>, vector<4x4xbf16>, vector<160x4xf32> -> vector<160x4xf32>
    %36 = arith.addf %30, %35 : vector<160x4xf32>
    %c0_35 = arith.constant 0 : index
    %c21 = arith.constant 21 : index
    %c0_36 = arith.constant 0 : index
    %37 = vector.load %arg1[%c0_35, %c21, %c0_36] : memref<1x404x4xbf16, #tpu.memory_space<vmem>>, vector<1x160x4xbf16>
    %38 = vector.shape_cast %37 : vector<1x160x4xbf16> to vector<160x4xbf16>
    %c6 = arith.constant 6 : index
    %c0_37 = arith.constant 0 : index
    %c0_38 = arith.constant 0 : index
    %39 = vector.load %arg2[%c6, %c0_37, %c0_38] : memref<25x4x4xbf16, #tpu.memory_space<vmem>>, vector<1x4x4xbf16>
    %40 = vector.shape_cast %39 : vector<1x4x4xbf16> to vector<4x4xbf16>
    %cst_39 = arith.constant dense<0.000000e+00> : vector<160x4xf32>
    %41 = tpu.matmul %38, %40, %cst_39 {dimension_numbers = #tpu.dot_dimension_numbers<[1], [0], [0], [1], [0, 0, 1, 1], [], []>} : vector<160x4xbf16>, vector<4x4xbf16>, vector<160x4xf32> -> vector<160x4xf32>
    %42 = arith.addf %36, %41 : vector<160x4xf32>
    %c0_40 = arith.constant 0 : index
    %c22 = arith.constant 22 : index
    %c0_41 = arith.constant 0 : index
    %43 = vector.load %arg1[%c0_40, %c22, %c0_41] : memref<1x404x4xbf16, #tpu.memory_space<vmem>>, vector<1x160x4xbf16>
    %44 = vector.shape_cast %43 : vector<1x160x4xbf16> to vector<160x4xbf16>
    %c7 = arith.constant 7 : index
    %c0_42 = arith.constant 0 : index
    %c0_43 = arith.constant 0 : index
    %45 = vector.load %arg2[%c7, %c0_42, %c0_43] : memref<25x4x4xbf16, #tpu.memory_space<vmem>>, vector<1x4x4xbf16>
    %46 = vector.shape_cast %45 : vector<1x4x4xbf16> to vector<4x4xbf16>
    %cst_44 = arith.constant dense<0.000000e+00> : vector<160x4xf32>
    %47 = tpu.matmul %44, %46, %cst_44 {dimension_numbers = #tpu.dot_dimension_numbers<[1], [0], [0], [1], [0, 0, 1, 1], [], []>} : vector<160x4xbf16>, vector<4x4xbf16>, vector<160x4xf32> -> vector<160x4xf32>
    %48 = arith.addf %42, %47 : vector<160x4xf32>
    %c0_45 = arith.constant 0 : index
    %c23 = arith.constant 23 : index
    %c0_46 = arith.constant 0 : index
    %49 = vector.load %arg1[%c0_45, %c23, %c0_46] : memref<1x404x4xbf16, #tpu.memory_space<vmem>>, vector<1x160x4xbf16>
    %50 = vector.shape_cast %49 : vector<1x160x4xbf16> to vector<160x4xbf16>
    %c8 = arith.constant 8 : index
    %c0_47 = arith.constant 0 : index
    %c0_48 = arith.constant 0 : index
    %51 = vector.load %arg2[%c8, %c0_47, %c0_48] : memref<25x4x4xbf16, #tpu.memory_space<vmem>>, vector<1x4x4xbf16>
    %52 = vector.shape_cast %51 : vector<1x4x4xbf16> to vector<4x4xbf16>
    %cst_49 = arith.constant dense<0.000000e+00> : vector<160x4xf32>
    %53 = tpu.matmul %50, %52, %cst_49 {dimension_numbers = #tpu.dot_dimension_numbers<[1], [0], [0], [1], [0, 0, 1, 1], [], []>} : vector<160x4xbf16>, vector<4x4xbf16>, vector<160x4xf32> -> vector<160x4xf32>
    %54 = arith.addf %48, %53 : vector<160x4xf32>
    %c0_50 = arith.constant 0 : index
    %c24 = arith.constant 24 : index
    %c0_51 = arith.constant 0 : index
    %55 = vector.load %arg1[%c0_50, %c24, %c0_51] : memref<1x404x4xbf16, #tpu.memory_space<vmem>>, vector<1x160x4xbf16>
    %56 = vector.shape_cast %55 : vector<1x160x4xbf16> to vector<160x4xbf16>
    %c9 = arith.constant 9 : index
    %c0_52 = arith.constant 0 : index
    %c0_53 = arith.constant 0 : index
    %57 = vector.load %arg2[%c9, %c0_52, %c0_53] : memref<25x4x4xbf16, #tpu.memory_space<vmem>>, vector<1x4x4xbf16>
    %58 = vector.shape_cast %57 : vector<1x4x4xbf16> to vector<4x4xbf16>
    %cst_54 = arith.constant dense<0.000000e+00> : vector<160x4xf32>
    %59 = tpu.matmul %56, %58, %cst_54 {dimension_numbers = #tpu.dot_dimension_numbers<[1], [0], [0], [1], [0, 0, 1, 1], [], []>} : vector<160x4xbf16>, vector<4x4xbf16>, vector<160x4xf32> -> vector<160x4xf32>
    %60 = arith.addf %54, %59 : vector<160x4xf32>
    %c0_55 = arith.constant 0 : index
    %c40 = arith.constant 40 : index
    %c0_56 = arith.constant 0 : index
    %61 = vector.load %arg1[%c0_55, %c40, %c0_56] : memref<1x404x4xbf16, #tpu.memory_space<vmem>>, vector<1x160x4xbf16>
    %62 = vector.shape_cast %61 : vector<1x160x4xbf16> to vector<160x4xbf16>
    %c10 = arith.constant 10 : index
    %c0_57 = arith.constant 0 : index
    %c0_58 = arith.constant 0 : index
    %63 = vector.load %arg2[%c10, %c0_57, %c0_58] : memref<25x4x4xbf16, #tpu.memory_space<vmem>>, vector<1x4x4xbf16>
    %64 = vector.shape_cast %63 : vector<1x4x4xbf16> to vector<4x4xbf16>
    %cst_59 = arith.constant dense<0.000000e+00> : vector<160x4xf32>
    %65 = tpu.matmul %62, %64, %cst_59 {dimension_numbers = #tpu.dot_dimension_numbers<[1], [0], [0], [1], [0, 0, 1, 1], [], []>} : vector<160x4xbf16>, vector<4x4xbf16>, vector<160x4xf32> -> vector<160x4xf32>
    %66 = arith.addf %60, %65 : vector<160x4xf32>
    %c0_60 = arith.constant 0 : index
    %c41 = arith.constant 41 : index
    %c0_61 = arith.constant 0 : index
    %67 = vector.load %arg1[%c0_60, %c41, %c0_61] : memref<1x404x4xbf16, #tpu.memory_space<vmem>>, vector<1x160x4xbf16>
    %68 = vector.shape_cast %67 : vector<1x160x4xbf16> to vector<160x4xbf16>
    %c11 = arith.constant 11 : index
    %c0_62 = arith.constant 0 : index
    %c0_63 = arith.constant 0 : index
    %69 = vector.load %arg2[%c11, %c0_62, %c0_63] : memref<25x4x4xbf16, #tpu.memory_space<vmem>>, vector<1x4x4xbf16>
    %70 = vector.shape_cast %69 : vector<1x4x4xbf16> to vector<4x4xbf16>
    %cst_64 = arith.constant dense<0.000000e+00> : vector<160x4xf32>
    %71 = tpu.matmul %68, %70, %cst_64 {dimension_numbers = #tpu.dot_dimension_numbers<[1], [0], [0], [1], [0, 0, 1, 1], [], []>} : vector<160x4xbf16>, vector<4x4xbf16>, vector<160x4xf32> -> vector<160x4xf32>
    %72 = arith.addf %66, %71 : vector<160x4xf32>
    %c0_65 = arith.constant 0 : index
    %c42 = arith.constant 42 : index
    %c0_66 = arith.constant 0 : index
    %73 = vector.load %arg1[%c0_65, %c42, %c0_66] : memref<1x404x4xbf16, #tpu.memory_space<vmem>>, vector<1x160x4xbf16>
    %74 = vector.shape_cast %73 : vector<1x160x4xbf16> to vector<160x4xbf16>
    %c12 = arith.constant 12 : index
    %c0_67 = arith.constant 0 : index
    %c0_68 = arith.constant 0 : index
    %75 = vector.load %arg2[%c12, %c0_67, %c0_68] : memref<25x4x4xbf16, #tpu.memory_space<vmem>>, vector<1x4x4xbf16>
    %76 = vector.shape_cast %75 : vector<1x4x4xbf16> to vector<4x4xbf16>
    %cst_69 = arith.constant dense<0.000000e+00> : vector<160x4xf32>
    %77 = tpu.matmul %74, %76, %cst_69 {dimension_numbers = #tpu.dot_dimension_numbers<[1], [0], [0], [1], [0, 0, 1, 1], [], []>} : vector<160x4xbf16>, vector<4x4xbf16>, vector<160x4xf32> -> vector<160x4xf32>
    %78 = arith.addf %72, %77 : vector<160x4xf32>
    %c0_70 = arith.constant 0 : index
    %c43 = arith.constant 43 : index
    %c0_71 = arith.constant 0 : index
    %79 = vector.load %arg1[%c0_70, %c43, %c0_71] : memref<1x404x4xbf16, #tpu.memory_space<vmem>>, vector<1x160x4xbf16>
    %80 = vector.shape_cast %79 : vector<1x160x4xbf16> to vector<160x4xbf16>
    %c13 = arith.constant 13 : index
    %c0_72 = arith.constant 0 : index
    %c0_73 = arith.constant 0 : index
    %81 = vector.load %arg2[%c13, %c0_72, %c0_73] : memref<25x4x4xbf16, #tpu.memory_space<vmem>>, vector<1x4x4xbf16>
    %82 = vector.shape_cast %81 : vector<1x4x4xbf16> to vector<4x4xbf16>
    %cst_74 = arith.constant dense<0.000000e+00> : vector<160x4xf32>
    %83 = tpu.matmul %80, %82, %cst_74 {dimension_numbers = #tpu.dot_dimension_numbers<[1], [0], [0], [1], [0, 0, 1, 1], [], []>} : vector<160x4xbf16>, vector<4x4xbf16>, vector<160x4xf32> -> vector<160x4xf32>
    %84 = arith.addf %78, %83 : vector<160x4xf32>
    %c0_75 = arith.constant 0 : index
    %c44 = arith.constant 44 : index
    %c0_76 = arith.constant 0 : index
    %85 = vector.load %arg1[%c0_75, %c44, %c0_76] : memref<1x404x4xbf16, #tpu.memory_space<vmem>>, vector<1x160x4xbf16>
    %86 = vector.shape_cast %85 : vector<1x160x4xbf16> to vector<160x4xbf16>
    %c14 = arith.constant 14 : index
    %c0_77 = arith.constant 0 : index
    %c0_78 = arith.constant 0 : index
    %87 = vector.load %arg2[%c14, %c0_77, %c0_78] : memref<25x4x4xbf16, #tpu.memory_space<vmem>>, vector<1x4x4xbf16>
    %88 = vector.shape_cast %87 : vector<1x4x4xbf16> to vector<4x4xbf16>
    %cst_79 = arith.constant dense<0.000000e+00> : vector<160x4xf32>
    %89 = tpu.matmul %86, %88, %cst_79 {dimension_numbers = #tpu.dot_dimension_numbers<[1], [0], [0], [1], [0, 0, 1, 1], [], []>} : vector<160x4xbf16>, vector<4x4xbf16>, vector<160x4xf32> -> vector<160x4xf32>
    %90 = arith.addf %84, %89 : vector<160x4xf32>
    %c0_80 = arith.constant 0 : index
    %c60 = arith.constant 60 : index
    %c0_81 = arith.constant 0 : index
    %91 = vector.load %arg1[%c0_80, %c60, %c0_81] : memref<1x404x4xbf16, #tpu.memory_space<vmem>>, vector<1x160x4xbf16>
    %92 = vector.shape_cast %91 : vector<1x160x4xbf16> to vector<160x4xbf16>
    %c15 = arith.constant 15 : index
    %c0_82 = arith.constant 0 : index
    %c0_83 = arith.constant 0 : index
    %93 = vector.load %arg2[%c15, %c0_82, %c0_83] : memref<25x4x4xbf16, #tpu.memory_space<vmem>>, vector<1x4x4xbf16>
    %94 = vector.shape_cast %93 : vector<1x4x4xbf16> to vector<4x4xbf16>
    %cst_84 = arith.constant dense<0.000000e+00> : vector<160x4xf32>
    %95 = tpu.matmul %92, %94, %cst_84 {dimension_numbers = #tpu.dot_dimension_numbers<[1], [0], [0], [1], [0, 0, 1, 1], [], []>} : vector<160x4xbf16>, vector<4x4xbf16>, vector<160x4xf32> -> vector<160x4xf32>
    %96 = arith.addf %90, %95 : vector<160x4xf32>
    %c0_85 = arith.constant 0 : index
    %c61 = arith.constant 61 : index
    %c0_86 = arith.constant 0 : index
    %97 = vector.load %arg1[%c0_85, %c61, %c0_86] : memref<1x404x4xbf16, #tpu.memory_space<vmem>>, vector<1x160x4xbf16>
    %98 = vector.shape_cast %97 : vector<1x160x4xbf16> to vector<160x4xbf16>
    %c16 = arith.constant 16 : index
    %c0_87 = arith.constant 0 : index
    %c0_88 = arith.constant 0 : index
    %99 = vector.load %arg2[%c16, %c0_87, %c0_88] : memref<25x4x4xbf16, #tpu.memory_space<vmem>>, vector<1x4x4xbf16>
    %100 = vector.shape_cast %99 : vector<1x4x4xbf16> to vector<4x4xbf16>
    %cst_89 = arith.constant dense<0.000000e+00> : vector<160x4xf32>
    %101 = tpu.matmul %98, %100, %cst_89 {dimension_numbers = #tpu.dot_dimension_numbers<[1], [0], [0], [1], [0, 0, 1, 1], [], []>} : vector<160x4xbf16>, vector<4x4xbf16>, vector<160x4xf32> -> vector<160x4xf32>
    %102 = arith.addf %96, %101 : vector<160x4xf32>
    %c0_90 = arith.constant 0 : index
    %c62 = arith.constant 62 : index
    %c0_91 = arith.constant 0 : index
    %103 = vector.load %arg1[%c0_90, %c62, %c0_91] : memref<1x404x4xbf16, #tpu.memory_space<vmem>>, vector<1x160x4xbf16>
    %104 = vector.shape_cast %103 : vector<1x160x4xbf16> to vector<160x4xbf16>
    %c17 = arith.constant 17 : index
    %c0_92 = arith.constant 0 : index
    %c0_93 = arith.constant 0 : index
    %105 = vector.load %arg2[%c17, %c0_92, %c0_93] : memref<25x4x4xbf16, #tpu.memory_space<vmem>>, vector<1x4x4xbf16>
    %106 = vector.shape_cast %105 : vector<1x4x4xbf16> to vector<4x4xbf16>
    %cst_94 = arith.constant dense<0.000000e+00> : vector<160x4xf32>
    %107 = tpu.matmul %104, %106, %cst_94 {dimension_numbers = #tpu.dot_dimension_numbers<[1], [0], [0], [1], [0, 0, 1, 1], [], []>} : vector<160x4xbf16>, vector<4x4xbf16>, vector<160x4xf32> -> vector<160x4xf32>
    %108 = arith.addf %102, %107 : vector<160x4xf32>
    %c0_95 = arith.constant 0 : index
    %c63 = arith.constant 63 : index
    %c0_96 = arith.constant 0 : index
    %109 = vector.load %arg1[%c0_95, %c63, %c0_96] : memref<1x404x4xbf16, #tpu.memory_space<vmem>>, vector<1x160x4xbf16>
    %110 = vector.shape_cast %109 : vector<1x160x4xbf16> to vector<160x4xbf16>
    %c18 = arith.constant 18 : index
    %c0_97 = arith.constant 0 : index
    %c0_98 = arith.constant 0 : index
    %111 = vector.load %arg2[%c18, %c0_97, %c0_98] : memref<25x4x4xbf16, #tpu.memory_space<vmem>>, vector<1x4x4xbf16>
    %112 = vector.shape_cast %111 : vector<1x4x4xbf16> to vector<4x4xbf16>
    %cst_99 = arith.constant dense<0.000000e+00> : vector<160x4xf32>
    %113 = tpu.matmul %110, %112, %cst_99 {dimension_numbers = #tpu.dot_dimension_numbers<[1], [0], [0], [1], [0, 0, 1, 1], [], []>} : vector<160x4xbf16>, vector<4x4xbf16>, vector<160x4xf32> -> vector<160x4xf32>
    %114 = arith.addf %108, %113 : vector<160x4xf32>
    %c0_100 = arith.constant 0 : index
    %c64 = arith.constant 64 : index
    %c0_101 = arith.constant 0 : index
    %115 = vector.load %arg1[%c0_100, %c64, %c0_101] : memref<1x404x4xbf16, #tpu.memory_space<vmem>>, vector<1x160x4xbf16>
    %116 = vector.shape_cast %115 : vector<1x160x4xbf16> to vector<160x4xbf16>
    %c19 = arith.constant 19 : index
    %c0_102 = arith.constant 0 : index
    %c0_103 = arith.constant 0 : index
    %117 = vector.load %arg2[%c19, %c0_102, %c0_103] : memref<25x4x4xbf16, #tpu.memory_space<vmem>>, vector<1x4x4xbf16>
    %118 = vector.shape_cast %117 : vector<1x4x4xbf16> to vector<4x4xbf16>
    %cst_104 = arith.constant dense<0.000000e+00> : vector<160x4xf32>
    %119 = tpu.matmul %116, %118, %cst_104 {dimension_numbers = #tpu.dot_dimension_numbers<[1], [0], [0], [1], [0, 0, 1, 1], [], []>} : vector<160x4xbf16>, vector<4x4xbf16>, vector<160x4xf32> -> vector<160x4xf32>
    %120 = arith.addf %114, %119 : vector<160x4xf32>
    %c0_105 = arith.constant 0 : index
    %c80 = arith.constant 80 : index
    %c0_106 = arith.constant 0 : index
    %121 = vector.load %arg1[%c0_105, %c80, %c0_106] : memref<1x404x4xbf16, #tpu.memory_space<vmem>>, vector<1x160x4xbf16>
    %122 = vector.shape_cast %121 : vector<1x160x4xbf16> to vector<160x4xbf16>
    %c20_107 = arith.constant 20 : index
    %c0_108 = arith.constant 0 : index
    %c0_109 = arith.constant 0 : index
    %123 = vector.load %arg2[%c20_107, %c0_108, %c0_109] : memref<25x4x4xbf16, #tpu.memory_space<vmem>>, vector<1x4x4xbf16>
    %124 = vector.shape_cast %123 : vector<1x4x4xbf16> to vector<4x4xbf16>
    %cst_110 = arith.constant dense<0.000000e+00> : vector<160x4xf32>
    %125 = tpu.matmul %122, %124, %cst_110 {dimension_numbers = #tpu.dot_dimension_numbers<[1], [0], [0], [1], [0, 0, 1, 1], [], []>} : vector<160x4xbf16>, vector<4x4xbf16>, vector<160x4xf32> -> vector<160x4xf32>
    %126 = arith.addf %120, %125 : vector<160x4xf32>
    %c0_111 = arith.constant 0 : index
    %c81 = arith.constant 81 : index
    %c0_112 = arith.constant 0 : index
    %127 = vector.load %arg1[%c0_111, %c81, %c0_112] : memref<1x404x4xbf16, #tpu.memory_space<vmem>>, vector<1x160x4xbf16>
    %128 = vector.shape_cast %127 : vector<1x160x4xbf16> to vector<160x4xbf16>
    %c21_113 = arith.constant 21 : index
    %c0_114 = arith.constant 0 : index
    %c0_115 = arith.constant 0 : index
    %129 = vector.load %arg2[%c21_113, %c0_114, %c0_115] : memref<25x4x4xbf16, #tpu.memory_space<vmem>>, vector<1x4x4xbf16>
    %130 = vector.shape_cast %129 : vector<1x4x4xbf16> to vector<4x4xbf16>
    %cst_116 = arith.constant dense<0.000000e+00> : vector<160x4xf32>
    %131 = tpu.matmul %128, %130, %cst_116 {dimension_numbers = #tpu.dot_dimension_numbers<[1], [0], [0], [1], [0, 0, 1, 1], [], []>} : vector<160x4xbf16>, vector<4x4xbf16>, vector<160x4xf32> -> vector<160x4xf32>
    %132 = arith.addf %126, %131 : vector<160x4xf32>
    %c0_117 = arith.constant 0 : index
    %c82 = arith.constant 82 : index
    %c0_118 = arith.constant 0 : index
    %133 = vector.load %arg1[%c0_117, %c82, %c0_118] : memref<1x404x4xbf16, #tpu.memory_space<vmem>>, vector<1x160x4xbf16>
    %134 = vector.shape_cast %133 : vector<1x160x4xbf16> to vector<160x4xbf16>
    %c22_119 = arith.constant 22 : index
    %c0_120 = arith.constant 0 : index
    %c0_121 = arith.constant 0 : index
    %135 = vector.load %arg2[%c22_119, %c0_120, %c0_121] : memref<25x4x4xbf16, #tpu.memory_space<vmem>>, vector<1x4x4xbf16>
    %136 = vector.shape_cast %135 : vector<1x4x4xbf16> to vector<4x4xbf16>
    %cst_122 = arith.constant dense<0.000000e+00> : vector<160x4xf32>
    %137 = tpu.matmul %134, %136, %cst_122 {dimension_numbers = #tpu.dot_dimension_numbers<[1], [0], [0], [1], [0, 0, 1, 1], [], []>} : vector<160x4xbf16>, vector<4x4xbf16>, vector<160x4xf32> -> vector<160x4xf32>
    %138 = arith.addf %132, %137 : vector<160x4xf32>
    %c0_123 = arith.constant 0 : index
    %c83 = arith.constant 83 : index
    %c0_124 = arith.constant 0 : index
    %139 = vector.load %arg1[%c0_123, %c83, %c0_124] : memref<1x404x4xbf16, #tpu.memory_space<vmem>>, vector<1x160x4xbf16>
    %140 = vector.shape_cast %139 : vector<1x160x4xbf16> to vector<160x4xbf16>
    %c23_125 = arith.constant 23 : index
    %c0_126 = arith.constant 0 : index
    %c0_127 = arith.constant 0 : index
    %141 = vector.load %arg2[%c23_125, %c0_126, %c0_127] : memref<25x4x4xbf16, #tpu.memory_space<vmem>>, vector<1x4x4xbf16>
    %142 = vector.shape_cast %141 : vector<1x4x4xbf16> to vector<4x4xbf16>
    %cst_128 = arith.constant dense<0.000000e+00> : vector<160x4xf32>
    %143 = tpu.matmul %140, %142, %cst_128 {dimension_numbers = #tpu.dot_dimension_numbers<[1], [0], [0], [1], [0, 0, 1, 1], [], []>} : vector<160x4xbf16>, vector<4x4xbf16>, vector<160x4xf32> -> vector<160x4xf32>
    %144 = arith.addf %138, %143 : vector<160x4xf32>
    %c0_129 = arith.constant 0 : index
    %c84 = arith.constant 84 : index
    %c0_130 = arith.constant 0 : index
    %145 = vector.load %arg1[%c0_129, %c84, %c0_130] : memref<1x404x4xbf16, #tpu.memory_space<vmem>>, vector<1x160x4xbf16>
    %146 = vector.shape_cast %145 : vector<1x160x4xbf16> to vector<160x4xbf16>
    %c24_131 = arith.constant 24 : index
    %c0_132 = arith.constant 0 : index
    %c0_133 = arith.constant 0 : index
    %147 = vector.load %arg2[%c24_131, %c0_132, %c0_133] : memref<25x4x4xbf16, #tpu.memory_space<vmem>>, vector<1x4x4xbf16>
    %148 = vector.shape_cast %147 : vector<1x4x4xbf16> to vector<4x4xbf16>
    %cst_134 = arith.constant dense<0.000000e+00> : vector<160x4xf32>
    %149 = tpu.matmul %146, %148, %cst_134 {dimension_numbers = #tpu.dot_dimension_numbers<[1], [0], [0], [1], [0, 0, 1, 1], [], []>} : vector<160x4xbf16>, vector<4x4xbf16>, vector<160x4xf32> -> vector<160x4xf32>
    %150 = arith.addf %144, %149 : vector<160x4xf32>
    %c0_135 = arith.constant 0 : index
    %c0_136 = arith.constant 0 : index
    %151 = vector.load %arg3[%c0_135, %c0_136] : memref<1x4xf32, #tpu.memory_space<vmem>>, vector<1x4xf32>
    %152 = vector.broadcast %151 : vector<1x4xf32> to vector<160x4xf32>
    %153 = arith.addf %150, %152 : vector<160x4xf32>
    %cst_137 = arith.constant 0.000000e+00 : f32
    %154 = vector.broadcast %cst_137 : f32 to vector<160x4xf32>
    %155 = arith.maximumf %153, %154 : vector<160x4xf32>
    %c0_138 = arith.constant 0 : index
    %c0_139 = arith.constant 0 : index
    %156 = vector.load %arg5[%c0_138, %c0_139] : memref<320x4xf32, #tpu.memory_space<vmem>>, vector<160x4xf32>
    tpu.vector_store %arg5[%c0_138, %c0_139], %155 {strides = array<i32>} : memref<320x4xf32, #tpu.memory_space<vmem>>, vector<160x4xf32>,
    %cst_140 = arith.constant 0.000000e+00 : f32
    %157 = vector.broadcast %cst_140 : f32 to vector<160x4xf32>
    %c0_141 = arith.constant 0 : index
    %c160 = arith.constant 160 : index
    %c0_142 = arith.constant 0 : index
    %158 = vector.load %arg1[%c0_141, %c160, %c0_142] : memref<1x404x4xbf16, #tpu.memory_space<vmem>>, vector<1x160x4xbf16>
    %159 = vector.shape_cast %158 : vector<1x160x4xbf16> to vector<160x4xbf16>
    %c0_143 = arith.constant 0 : index
    %c0_144 = arith.constant 0 : index
    %c0_145 = arith.constant 0 : index
    %160 = vector.load %arg2[%c0_143, %c0_144, %c0_145] : memref<25x4x4xbf16, #tpu.memory_space<vmem>>, vector<1x4x4xbf16>
    %161 = vector.shape_cast %160 : vector<1x4x4xbf16> to vector<4x4xbf16>
    %cst_146 = arith.constant dense<0.000000e+00> : vector<160x4xf32>
    %162 = tpu.matmul %159, %161, %cst_146 {dimension_numbers = #tpu.dot_dimension_numbers<[1], [0], [0], [1], [0, 0, 1, 1], [], []>} : vector<160x4xbf16>, vector<4x4xbf16>, vector<160x4xf32> -> vector<160x4xf32>
    %163 = arith.addf %157, %162 : vector<160x4xf32>
    %c0_147 = arith.constant 0 : index
    %c161 = arith.constant 161 : index
    %c0_148 = arith.constant 0 : index
    %164 = vector.load %arg1[%c0_147, %c161, %c0_148] : memref<1x404x4xbf16, #tpu.memory_space<vmem>>, vector<1x160x4xbf16>
    %165 = vector.shape_cast %164 : vector<1x160x4xbf16> to vector<160x4xbf16>
    %c1_149 = arith.constant 1 : index
    %c0_150 = arith.constant 0 : index
    %c0_151 = arith.constant 0 : index
    %166 = vector.load %arg2[%c1_149, %c0_150, %c0_151] : memref<25x4x4xbf16, #tpu.memory_space<vmem>>, vector<1x4x4xbf16>
    %167 = vector.shape_cast %166 : vector<1x4x4xbf16> to vector<4x4xbf16>
    %cst_152 = arith.constant dense<0.000000e+00> : vector<160x4xf32>
    %168 = tpu.matmul %165, %167, %cst_152 {dimension_numbers = #tpu.dot_dimension_numbers<[1], [0], [0], [1], [0, 0, 1, 1], [], []>} : vector<160x4xbf16>, vector<4x4xbf16>, vector<160x4xf32> -> vector<160x4xf32>
    %169 = arith.addf %163, %168 : vector<160x4xf32>
    %c0_153 = arith.constant 0 : index
    %c162 = arith.constant 162 : index
    %c0_154 = arith.constant 0 : index
    %170 = vector.load %arg1[%c0_153, %c162, %c0_154] : memref<1x404x4xbf16, #tpu.memory_space<vmem>>, vector<1x160x4xbf16>
    %171 = vector.shape_cast %170 : vector<1x160x4xbf16> to vector<160x4xbf16>
    %c2_155 = arith.constant 2 : index
    %c0_156 = arith.constant 0 : index
    %c0_157 = arith.constant 0 : index
    %172 = vector.load %arg2[%c2_155, %c0_156, %c0_157] : memref<25x4x4xbf16, #tpu.memory_space<vmem>>, vector<1x4x4xbf16>
    %173 = vector.shape_cast %172 : vector<1x4x4xbf16> to vector<4x4xbf16>
    %cst_158 = arith.constant dense<0.000000e+00> : vector<160x4xf32>
    %174 = tpu.matmul %171, %173, %cst_158 {dimension_numbers = #tpu.dot_dimension_numbers<[1], [0], [0], [1], [0, 0, 1, 1], [], []>} : vector<160x4xbf16>, vector<4x4xbf16>, vector<160x4xf32> -> vector<160x4xf32>
    %175 = arith.addf %169, %174 : vector<160x4xf32>
    %c0_159 = arith.constant 0 : index
    %c163 = arith.constant 163 : index
    %c0_160 = arith.constant 0 : index
    %176 = vector.load %arg1[%c0_159, %c163, %c0_160] : memref<1x404x4xbf16, #tpu.memory_space<vmem>>, vector<1x160x4xbf16>
    %177 = vector.shape_cast %176 : vector<1x160x4xbf16> to vector<160x4xbf16>
    %c3_161 = arith.constant 3 : index
    %c0_162 = arith.constant 0 : index
    %c0_163 = arith.constant 0 : index
    %178 = vector.load %arg2[%c3_161, %c0_162, %c0_163] : memref<25x4x4xbf16, #tpu.memory_space<vmem>>, vector<1x4x4xbf16>
    %179 = vector.shape_cast %178 : vector<1x4x4xbf16> to vector<4x4xbf16>
    %cst_164 = arith.constant dense<0.000000e+00> : vector<160x4xf32>
    %180 = tpu.matmul %177, %179, %cst_164 {dimension_numbers = #tpu.dot_dimension_numbers<[1], [0], [0], [1], [0, 0, 1, 1], [], []>} : vector<160x4xbf16>, vector<4x4xbf16>, vector<160x4xf32> -> vector<160x4xf32>
    %181 = arith.addf %175, %180 : vector<160x4xf32>
    %c0_165 = arith.constant 0 : index
    %c164 = arith.constant 164 : index
    %c0_166 = arith.constant 0 : index
    %182 = vector.load %arg1[%c0_165, %c164, %c0_166] : memref<1x404x4xbf16, #tpu.memory_space<vmem>>, vector<1x160x4xbf16>
    %183 = vector.shape_cast %182 : vector<1x160x4xbf16> to vector<160x4xbf16>
    %c4_167 = arith.constant 4 : index
    %c0_168 = arith.constant 0 : index
    %c0_169 = arith.constant 0 : index
    %184 = vector.load %arg2[%c4_167, %c0_168, %c0_169] : memref<25x4x4xbf16, #tpu.memory_space<vmem>>, vector<1x4x4xbf16>
    %185 = vector.shape_cast %184 : vector<1x4x4xbf16> to vector<4x4xbf16>
    %cst_170 = arith.constant dense<0.000000e+00> : vector<160x4xf32>
    %186 = tpu.matmul %183, %185, %cst_170 {dimension_numbers = #tpu.dot_dimension_numbers<[1], [0], [0], [1], [0, 0, 1, 1], [], []>} : vector<160x4xbf16>, vector<4x4xbf16>, vector<160x4xf32> -> vector<160x4xf32>
    %187 = arith.addf %181, %186 : vector<160x4xf32>
    %c0_171 = arith.constant 0 : index
    %c180 = arith.constant 180 : index
    %c0_172 = arith.constant 0 : index
    %188 = vector.load %arg1[%c0_171, %c180, %c0_172] : memref<1x404x4xbf16, #tpu.memory_space<vmem>>, vector<1x160x4xbf16>
    %189 = vector.shape_cast %188 : vector<1x160x4xbf16> to vector<160x4xbf16>
    %c5_173 = arith.constant 5 : index
    %c0_174 = arith.constant 0 : index
    %c0_175 = arith.constant 0 : index
    %190 = vector.load %arg2[%c5_173, %c0_174, %c0_175] : memref<25x4x4xbf16, #tpu.memory_space<vmem>>, vector<1x4x4xbf16>
    %191 = vector.shape_cast %190 : vector<1x4x4xbf16> to vector<4x4xbf16>
    %cst_176 = arith.constant dense<0.000000e+00> : vector<160x4xf32>
    %192 = tpu.matmul %189, %191, %cst_176 {dimension_numbers = #tpu.dot_dimension_numbers<[1], [0], [0], [1], [0, 0, 1, 1], [], []>} : vector<160x4xbf16>, vector<4x4xbf16>, vector<160x4xf32> -> vector<160x4xf32>
    %193 = arith.addf %187, %192 : vector<160x4xf32>
    %c0_177 = arith.constant 0 : index
    %c181 = arith.constant 181 : index
    %c0_178 = arith.constant 0 : index
    %194 = vector.load %arg1[%c0_177, %c181, %c0_178] : memref<1x404x4xbf16, #tpu.memory_space<vmem>>, vector<1x160x4xbf16>
    %195 = vector.shape_cast %194 : vector<1x160x4xbf16> to vector<160x4xbf16>
    %c6_179 = arith.constant 6 : index
    %c0_180 = arith.constant 0 : index
    %c0_181 = arith.constant 0 : index
    %196 = vector.load %arg2[%c6_179, %c0_180, %c0_181] : memref<25x4x4xbf16, #tpu.memory_space<vmem>>, vector<1x4x4xbf16>
    %197 = vector.shape_cast %196 : vector<1x4x4xbf16> to vector<4x4xbf16>
    %cst_182 = arith.constant dense<0.000000e+00> : vector<160x4xf32>
    %198 = tpu.matmul %195, %197, %cst_182 {dimension_numbers = #tpu.dot_dimension_numbers<[1], [0], [0], [1], [0, 0, 1, 1], [], []>} : vector<160x4xbf16>, vector<4x4xbf16>, vector<160x4xf32> -> vector<160x4xf32>
    %199 = arith.addf %193, %198 : vector<160x4xf32>
    %c0_183 = arith.constant 0 : index
    %c182 = arith.constant 182 : index
    %c0_184 = arith.constant 0 : index
    %200 = vector.load %arg1[%c0_183, %c182, %c0_184] : memref<1x404x4xbf16, #tpu.memory_space<vmem>>, vector<1x160x4xbf16>
    %201 = vector.shape_cast %200 : vector<1x160x4xbf16> to vector<160x4xbf16>
    %c7_185 = arith.constant 7 : index
    %c0_186 = arith.constant 0 : index
    %c0_187 = arith.constant 0 : index
    %202 = vector.load %arg2[%c7_185, %c0_186, %c0_187] : memref<25x4x4xbf16, #tpu.memory_space<vmem>>, vector<1x4x4xbf16>
    %203 = vector.shape_cast %202 : vector<1x4x4xbf16> to vector<4x4xbf16>
    %cst_188 = arith.constant dense<0.000000e+00> : vector<160x4xf32>
    %204 = tpu.matmul %201, %203, %cst_188 {dimension_numbers = #tpu.dot_dimension_numbers<[1], [0], [0], [1], [0, 0, 1, 1], [], []>} : vector<160x4xbf16>, vector<4x4xbf16>, vector<160x4xf32> -> vector<160x4xf32>
    %205 = arith.addf %199, %204 : vector<160x4xf32>
    %c0_189 = arith.constant 0 : index
    %c183 = arith.constant 183 : index
    %c0_190 = arith.constant 0 : index
    %206 = vector.load %arg1[%c0_189, %c183, %c0_190] : memref<1x404x4xbf16, #tpu.memory_space<vmem>>, vector<1x160x4xbf16>
    %207 = vector.shape_cast %206 : vector<1x160x4xbf16> to vector<160x4xbf16>
    %c8_191 = arith.constant 8 : index
    %c0_192 = arith.constant 0 : index
    %c0_193 = arith.constant 0 : index
    %208 = vector.load %arg2[%c8_191, %c0_192, %c0_193] : memref<25x4x4xbf16, #tpu.memory_space<vmem>>, vector<1x4x4xbf16>
    %209 = vector.shape_cast %208 : vector<1x4x4xbf16> to vector<4x4xbf16>
    %cst_194 = arith.constant dense<0.000000e+00> : vector<160x4xf32>
    %210 = tpu.matmul %207, %209, %cst_194 {dimension_numbers = #tpu.dot_dimension_numbers<[1], [0], [0], [1], [0, 0, 1, 1], [], []>} : vector<160x4xbf16>, vector<4x4xbf16>, vector<160x4xf32> -> vector<160x4xf32>
    %211 = arith.addf %205, %210 : vector<160x4xf32>
    %c0_195 = arith.constant 0 : index
    %c184 = arith.constant 184 : index
    %c0_196 = arith.constant 0 : index
    %212 = vector.load %arg1[%c0_195, %c184, %c0_196] : memref<1x404x4xbf16, #tpu.memory_space<vmem>>, vector<1x160x4xbf16>
    %213 = vector.shape_cast %212 : vector<1x160x4xbf16> to vector<160x4xbf16>
    %c9_197 = arith.constant 9 : index
    %c0_198 = arith.constant 0 : index
    %c0_199 = arith.constant 0 : index
    %214 = vector.load %arg2[%c9_197, %c0_198, %c0_199] : memref<25x4x4xbf16, #tpu.memory_space<vmem>>, vector<1x4x4xbf16>
    %215 = vector.shape_cast %214 : vector<1x4x4xbf16> to vector<4x4xbf16>
    %cst_200 = arith.constant dense<0.000000e+00> : vector<160x4xf32>
    %216 = tpu.matmul %213, %215, %cst_200 {dimension_numbers = #tpu.dot_dimension_numbers<[1], [0], [0], [1], [0, 0, 1, 1], [], []>} : vector<160x4xbf16>, vector<4x4xbf16>, vector<160x4xf32> -> vector<160x4xf32>
    %217 = arith.addf %211, %216 : vector<160x4xf32>
    %c0_201 = arith.constant 0 : index
    %c200 = arith.constant 200 : index
    %c0_202 = arith.constant 0 : index
    %218 = vector.load %arg1[%c0_201, %c200, %c0_202] : memref<1x404x4xbf16, #tpu.memory_space<vmem>>, vector<1x160x4xbf16>
    %219 = vector.shape_cast %218 : vector<1x160x4xbf16> to vector<160x4xbf16>
    %c10_203 = arith.constant 10 : index
    %c0_204 = arith.constant 0 : index
    %c0_205 = arith.constant 0 : index
    %220 = vector.load %arg2[%c10_203, %c0_204, %c0_205] : memref<25x4x4xbf16, #tpu.memory_space<vmem>>, vector<1x4x4xbf16>
    %221 = vector.shape_cast %220 : vector<1x4x4xbf16> to vector<4x4xbf16>
    %cst_206 = arith.constant dense<0.000000e+00> : vector<160x4xf32>
    %222 = tpu.matmul %219, %221, %cst_206 {dimension_numbers = #tpu.dot_dimension_numbers<[1], [0], [0], [1], [0, 0, 1, 1], [], []>} : vector<160x4xbf16>, vector<4x4xbf16>, vector<160x4xf32> -> vector<160x4xf32>
    %223 = arith.addf %217, %222 : vector<160x4xf32>
    %c0_207 = arith.constant 0 : index
    %c201 = arith.constant 201 : index
    %c0_208 = arith.constant 0 : index
    %224 = vector.load %arg1[%c0_207, %c201, %c0_208] : memref<1x404x4xbf16, #tpu.memory_space<vmem>>, vector<1x160x4xbf16>
    %225 = vector.shape_cast %224 : vector<1x160x4xbf16> to vector<160x4xbf16>
    %c11_209 = arith.constant 11 : index
    %c0_210 = arith.constant 0 : index
    %c0_211 = arith.constant 0 : index
    %226 = vector.load %arg2[%c11_209, %c0_210, %c0_211] : memref<25x4x4xbf16, #tpu.memory_space<vmem>>, vector<1x4x4xbf16>
    %227 = vector.shape_cast %226 : vector<1x4x4xbf16> to vector<4x4xbf16>
    %cst_212 = arith.constant dense<0.000000e+00> : vector<160x4xf32>
    %228 = tpu.matmul %225, %227, %cst_212 {dimension_numbers = #tpu.dot_dimension_numbers<[1], [0], [0], [1], [0, 0, 1, 1], [], []>} : vector<160x4xbf16>, vector<4x4xbf16>, vector<160x4xf32> -> vector<160x4xf32>
    %229 = arith.addf %223, %228 : vector<160x4xf32>
    %c0_213 = arith.constant 0 : index
    %c202 = arith.constant 202 : index
    %c0_214 = arith.constant 0 : index
    %230 = vector.load %arg1[%c0_213, %c202, %c0_214] : memref<1x404x4xbf16, #tpu.memory_space<vmem>>, vector<1x160x4xbf16>
    %231 = vector.shape_cast %230 : vector<1x160x4xbf16> to vector<160x4xbf16>
    %c12_215 = arith.constant 12 : index
    %c0_216 = arith.constant 0 : index
    %c0_217 = arith.constant 0 : index
    %232 = vector.load %arg2[%c12_215, %c0_216, %c0_217] : memref<25x4x4xbf16, #tpu.memory_space<vmem>>, vector<1x4x4xbf16>
    %233 = vector.shape_cast %232 : vector<1x4x4xbf16> to vector<4x4xbf16>
    %cst_218 = arith.constant dense<0.000000e+00> : vector<160x4xf32>
    %234 = tpu.matmul %231, %233, %cst_218 {dimension_numbers = #tpu.dot_dimension_numbers<[1], [0], [0], [1], [0, 0, 1, 1], [], []>} : vector<160x4xbf16>, vector<4x4xbf16>, vector<160x4xf32> -> vector<160x4xf32>
    %235 = arith.addf %229, %234 : vector<160x4xf32>
    %c0_219 = arith.constant 0 : index
    %c203 = arith.constant 203 : index
    %c0_220 = arith.constant 0 : index
    %236 = vector.load %arg1[%c0_219, %c203, %c0_220] : memref<1x404x4xbf16, #tpu.memory_space<vmem>>, vector<1x160x4xbf16>
    %237 = vector.shape_cast %236 : vector<1x160x4xbf16> to vector<160x4xbf16>
    %c13_221 = arith.constant 13 : index
    %c0_222 = arith.constant 0 : index
    %c0_223 = arith.constant 0 : index
    %238 = vector.load %arg2[%c13_221, %c0_222, %c0_223] : memref<25x4x4xbf16, #tpu.memory_space<vmem>>, vector<1x4x4xbf16>
    %239 = vector.shape_cast %238 : vector<1x4x4xbf16> to vector<4x4xbf16>
    %cst_224 = arith.constant dense<0.000000e+00> : vector<160x4xf32>
    %240 = tpu.matmul %237, %239, %cst_224 {dimension_numbers = #tpu.dot_dimension_numbers<[1], [0], [0], [1], [0, 0, 1, 1], [], []>} : vector<160x4xbf16>, vector<4x4xbf16>, vector<160x4xf32> -> vector<160x4xf32>
    %241 = arith.addf %235, %240 : vector<160x4xf32>
    %c0_225 = arith.constant 0 : index
    %c204 = arith.constant 204 : index
    %c0_226 = arith.constant 0 : index
    %242 = vector.load %arg1[%c0_225, %c204, %c0_226] : memref<1x404x4xbf16, #tpu.memory_space<vmem>>, vector<1x160x4xbf16>
    %243 = vector.shape_cast %242 : vector<1x160x4xbf16> to vector<160x4xbf16>
    %c14_227 = arith.constant 14 : index
    %c0_228 = arith.constant 0 : index
    %c0_229 = arith.constant 0 : index
    %244 = vector.load %arg2[%c14_227, %c0_228, %c0_229] : memref<25x4x4xbf16, #tpu.memory_space<vmem>>, vector<1x4x4xbf16>
    %245 = vector.shape_cast %244 : vector<1x4x4xbf16> to vector<4x4xbf16>
    %cst_230 = arith.constant dense<0.000000e+00> : vector<160x4xf32>
    %246 = tpu.matmul %243, %245, %cst_230 {dimension_numbers = #tpu.dot_dimension_numbers<[1], [0], [0], [1], [0, 0, 1, 1], [], []>} : vector<160x4xbf16>, vector<4x4xbf16>, vector<160x4xf32> -> vector<160x4xf32>
    %247 = arith.addf %241, %246 : vector<160x4xf32>
    %c0_231 = arith.constant 0 : index
    %c220 = arith.constant 220 : index
    %c0_232 = arith.constant 0 : index
    %248 = vector.load %arg1[%c0_231, %c220, %c0_232] : memref<1x404x4xbf16, #tpu.memory_space<vmem>>, vector<1x160x4xbf16>
    %249 = vector.shape_cast %248 : vector<1x160x4xbf16> to vector<160x4xbf16>
    %c15_233 = arith.constant 15 : index
    %c0_234 = arith.constant 0 : index
    %c0_235 = arith.constant 0 : index
    %250 = vector.load %arg2[%c15_233, %c0_234, %c0_235] : memref<25x4x4xbf16, #tpu.memory_space<vmem>>, vector<1x4x4xbf16>
    %251 = vector.shape_cast %250 : vector<1x4x4xbf16> to vector<4x4xbf16>
    %cst_236 = arith.constant dense<0.000000e+00> : vector<160x4xf32>
    %252 = tpu.matmul %249, %251, %cst_236 {dimension_numbers = #tpu.dot_dimension_numbers<[1], [0], [0], [1], [0, 0, 1, 1], [], []>} : vector<160x4xbf16>, vector<4x4xbf16>, vector<160x4xf32> -> vector<160x4xf32>
    %253 = arith.addf %247, %252 : vector<160x4xf32>
    %c0_237 = arith.constant 0 : index
    %c221 = arith.constant 221 : index
    %c0_238 = arith.constant 0 : index
    %254 = vector.load %arg1[%c0_237, %c221, %c0_238] : memref<1x404x4xbf16, #tpu.memory_space<vmem>>, vector<1x160x4xbf16>
    %255 = vector.shape_cast %254 : vector<1x160x4xbf16> to vector<160x4xbf16>
    %c16_239 = arith.constant 16 : index
    %c0_240 = arith.constant 0 : index
    %c0_241 = arith.constant 0 : index
    %256 = vector.load %arg2[%c16_239, %c0_240, %c0_241] : memref<25x4x4xbf16, #tpu.memory_space<vmem>>, vector<1x4x4xbf16>
    %257 = vector.shape_cast %256 : vector<1x4x4xbf16> to vector<4x4xbf16>
    %cst_242 = arith.constant dense<0.000000e+00> : vector<160x4xf32>
    %258 = tpu.matmul %255, %257, %cst_242 {dimension_numbers = #tpu.dot_dimension_numbers<[1], [0], [0], [1], [0, 0, 1, 1], [], []>} : vector<160x4xbf16>, vector<4x4xbf16>, vector<160x4xf32> -> vector<160x4xf32>
    %259 = arith.addf %253, %258 : vector<160x4xf32>
    %c0_243 = arith.constant 0 : index
    %c222 = arith.constant 222 : index
    %c0_244 = arith.constant 0 : index
    %260 = vector.load %arg1[%c0_243, %c222, %c0_244] : memref<1x404x4xbf16, #tpu.memory_space<vmem>>, vector<1x160x4xbf16>
    %261 = vector.shape_cast %260 : vector<1x160x4xbf16> to vector<160x4xbf16>
    %c17_245 = arith.constant 17 : index
    %c0_246 = arith.constant 0 : index
    %c0_247 = arith.constant 0 : index
    %262 = vector.load %arg2[%c17_245, %c0_246, %c0_247] : memref<25x4x4xbf16, #tpu.memory_space<vmem>>, vector<1x4x4xbf16>
    %263 = vector.shape_cast %262 : vector<1x4x4xbf16> to vector<4x4xbf16>
    %cst_248 = arith.constant dense<0.000000e+00> : vector<160x4xf32>
    %264 = tpu.matmul %261, %263, %cst_248 {dimension_numbers = #tpu.dot_dimension_numbers<[1], [0], [0], [1], [0, 0, 1, 1], [], []>} : vector<160x4xbf16>, vector<4x4xbf16>, vector<160x4xf32> -> vector<160x4xf32>
    %265 = arith.addf %259, %264 : vector<160x4xf32>
    %c0_249 = arith.constant 0 : index
    %c223 = arith.constant 223 : index
    %c0_250 = arith.constant 0 : index
    %266 = vector.load %arg1[%c0_249, %c223, %c0_250] : memref<1x404x4xbf16, #tpu.memory_space<vmem>>, vector<1x160x4xbf16>
    %267 = vector.shape_cast %266 : vector<1x160x4xbf16> to vector<160x4xbf16>
    %c18_251 = arith.constant 18 : index
    %c0_252 = arith.constant 0 : index
    %c0_253 = arith.constant 0 : index
    %268 = vector.load %arg2[%c18_251, %c0_252, %c0_253] : memref<25x4x4xbf16, #tpu.memory_space<vmem>>, vector<1x4x4xbf16>
    %269 = vector.shape_cast %268 : vector<1x4x4xbf16> to vector<4x4xbf16>
    %cst_254 = arith.constant dense<0.000000e+00> : vector<160x4xf32>
    %270 = tpu.matmul %267, %269, %cst_254 {dimension_numbers = #tpu.dot_dimension_numbers<[1], [0], [0], [1], [0, 0, 1, 1], [], []>} : vector<160x4xbf16>, vector<4x4xbf16>, vector<160x4xf32> -> vector<160x4xf32>
    %271 = arith.addf %265, %270 : vector<160x4xf32>
    %c0_255 = arith.constant 0 : index
    %c224 = arith.constant 224 : index
    %c0_256 = arith.constant 0 : index
    %272 = vector.load %arg1[%c0_255, %c224, %c0_256] : memref<1x404x4xbf16, #tpu.memory_space<vmem>>, vector<1x160x4xbf16>
    %273 = vector.shape_cast %272 : vector<1x160x4xbf16> to vector<160x4xbf16>
    %c19_257 = arith.constant 19 : index
    %c0_258 = arith.constant 0 : index
    %c0_259 = arith.constant 0 : index
    %274 = vector.load %arg2[%c19_257, %c0_258, %c0_259] : memref<25x4x4xbf16, #tpu.memory_space<vmem>>, vector<1x4x4xbf16>
    %275 = vector.shape_cast %274 : vector<1x4x4xbf16> to vector<4x4xbf16>
    %cst_260 = arith.constant dense<0.000000e+00> : vector<160x4xf32>
    %276 = tpu.matmul %273, %275, %cst_260 {dimension_numbers = #tpu.dot_dimension_numbers<[1], [0], [0], [1], [0, 0, 1, 1], [], []>} : vector<160x4xbf16>, vector<4x4xbf16>, vector<160x4xf32> -> vector<160x4xf32>
    %277 = arith.addf %271, %276 : vector<160x4xf32>
    %c0_261 = arith.constant 0 : index
    %c240 = arith.constant 240 : index
    %c0_262 = arith.constant 0 : index
    %278 = vector.load %arg1[%c0_261, %c240, %c0_262] : memref<1x404x4xbf16, #tpu.memory_space<vmem>>, vector<1x160x4xbf16>
    %279 = vector.shape_cast %278 : vector<1x160x4xbf16> to vector<160x4xbf16>
    %c20_263 = arith.constant 20 : index
    %c0_264 = arith.constant 0 : index
    %c0_265 = arith.constant 0 : index
    %280 = vector.load %arg2[%c20_263, %c0_264, %c0_265] : memref<25x4x4xbf16, #tpu.memory_space<vmem>>, vector<1x4x4xbf16>
    %281 = vector.shape_cast %280 : vector<1x4x4xbf16> to vector<4x4xbf16>
    %cst_266 = arith.constant dense<0.000000e+00> : vector<160x4xf32>
    %282 = tpu.matmul %279, %281, %cst_266 {dimension_numbers = #tpu.dot_dimension_numbers<[1], [0], [0], [1], [0, 0, 1, 1], [], []>} : vector<160x4xbf16>, vector<4x4xbf16>, vector<160x4xf32> -> vector<160x4xf32>
    %283 = arith.addf %277, %282 : vector<160x4xf32>
    %c0_267 = arith.constant 0 : index
    %c241 = arith.constant 241 : index
    %c0_268 = arith.constant 0 : index
    %284 = vector.load %arg1[%c0_267, %c241, %c0_268] : memref<1x404x4xbf16, #tpu.memory_space<vmem>>, vector<1x160x4xbf16>
    %285 = vector.shape_cast %284 : vector<1x160x4xbf16> to vector<160x4xbf16>
    %c21_269 = arith.constant 21 : index
    %c0_270 = arith.constant 0 : index
    %c0_271 = arith.constant 0 : index
    %286 = vector.load %arg2[%c21_269, %c0_270, %c0_271] : memref<25x4x4xbf16, #tpu.memory_space<vmem>>, vector<1x4x4xbf16>
    %287 = vector.shape_cast %286 : vector<1x4x4xbf16> to vector<4x4xbf16>
    %cst_272 = arith.constant dense<0.000000e+00> : vector<160x4xf32>
    %288 = tpu.matmul %285, %287, %cst_272 {dimension_numbers = #tpu.dot_dimension_numbers<[1], [0], [0], [1], [0, 0, 1, 1], [], []>} : vector<160x4xbf16>, vector<4x4xbf16>, vector<160x4xf32> -> vector<160x4xf32>
    %289 = arith.addf %283, %288 : vector<160x4xf32>
    %c0_273 = arith.constant 0 : index
    %c242 = arith.constant 242 : index
    %c0_274 = arith.constant 0 : index
    %290 = vector.load %arg1[%c0_273, %c242, %c0_274] : memref<1x404x4xbf16, #tpu.memory_space<vmem>>, vector<1x160x4xbf16>
    %291 = vector.shape_cast %290 : vector<1x160x4xbf16> to vector<160x4xbf16>
    %c22_275 = arith.constant 22 : index
    %c0_276 = arith.constant 0 : index
    %c0_277 = arith.constant 0 : index
    %292 = vector.load %arg2[%c22_275, %c0_276, %c0_277] : memref<25x4x4xbf16, #tpu.memory_space<vmem>>, vector<1x4x4xbf16>
    %293 = vector.shape_cast %292 : vector<1x4x4xbf16> to vector<4x4xbf16>
    %cst_278 = arith.constant dense<0.000000e+00> : vector<160x4xf32>
    %294 = tpu.matmul %291, %293, %cst_278 {dimension_numbers = #tpu.dot_dimension_numbers<[1], [0], [0], [1], [0, 0, 1, 1], [], []>} : vector<160x4xbf16>, vector<4x4xbf16>, vector<160x4xf32> -> vector<160x4xf32>
    %295 = arith.addf %289, %294 : vector<160x4xf32>
    %c0_279 = arith.constant 0 : index
    %c243 = arith.constant 243 : index
    %c0_280 = arith.constant 0 : index
    %296 = vector.load %arg1[%c0_279, %c243, %c0_280] : memref<1x404x4xbf16, #tpu.memory_space<vmem>>, vector<1x160x4xbf16>
    %297 = vector.shape_cast %296 : vector<1x160x4xbf16> to vector<160x4xbf16>
    %c23_281 = arith.constant 23 : index
    %c0_282 = arith.constant 0 : index
    %c0_283 = arith.constant 0 : index
    %298 = vector.load %arg2[%c23_281, %c0_282, %c0_283] : memref<25x4x4xbf16, #tpu.memory_space<vmem>>, vector<1x4x4xbf16>
    %299 = vector.shape_cast %298 : vector<1x4x4xbf16> to vector<4x4xbf16>
    %cst_284 = arith.constant dense<0.000000e+00> : vector<160x4xf32>
    %300 = tpu.matmul %297, %299, %cst_284 {dimension_numbers = #tpu.dot_dimension_numbers<[1], [0], [0], [1], [0, 0, 1, 1], [], []>} : vector<160x4xbf16>, vector<4x4xbf16>, vector<160x4xf32> -> vector<160x4xf32>
    %301 = arith.addf %295, %300 : vector<160x4xf32>
    %c0_285 = arith.constant 0 : index
    %c244 = arith.constant 244 : index
    %c0_286 = arith.constant 0 : index
    %302 = vector.load %arg1[%c0_285, %c244, %c0_286] : memref<1x404x4xbf16, #tpu.memory_space<vmem>>, vector<1x160x4xbf16>
    %303 = vector.shape_cast %302 : vector<1x160x4xbf16> to vector<160x4xbf16>
    %c24_287 = arith.constant 24 : index
    %c0_288 = arith.constant 0 : index
    %c0_289 = arith.constant 0 : index
    %304 = vector.load %arg2[%c24_287, %c0_288, %c0_289] : memref<25x4x4xbf16, #tpu.memory_space<vmem>>, vector<1x4x4xbf16>
    %305 = vector.shape_cast %304 : vector<1x4x4xbf16> to vector<4x4xbf16>
    %cst_290 = arith.constant dense<0.000000e+00> : vector<160x4xf32>
    %306 = tpu.matmul %303, %305, %cst_290 {dimension_numbers = #tpu.dot_dimension_numbers<[1], [0], [0], [1], [0, 0, 1, 1], [], []>} : vector<160x4xbf16>, vector<4x4xbf16>, vector<160x4xf32> -> vector<160x4xf32>
    %307 = arith.addf %301, %306 : vector<160x4xf32>
    %c0_291 = arith.constant 0 : index
    %c0_292 = arith.constant 0 : index
    %308 = vector.load %arg3[%c0_291, %c0_292] : memref<1x4xf32, #tpu.memory_space<vmem>>, vector<1x4xf32>
    %309 = vector.broadcast %308 : vector<1x4xf32> to vector<160x4xf32>
    %310 = arith.addf %307, %309 : vector<160x4xf32>
    %cst_293 = arith.constant 0.000000e+00 : f32
    %311 = vector.broadcast %cst_293 : f32 to vector<160x4xf32>
    %312 = arith.maximumf %310, %311 : vector<160x4xf32>
    %c160_294 = arith.constant 160 : index
    %c0_295 = arith.constant 0 : index
    %313 = vector.load %arg5[%c160_294, %c0_295] : memref<320x4xf32, #tpu.memory_space<vmem>>, vector<160x4xf32>
    tpu.vector_store %arg5[%c160_294, %c0_295], %312 {strides = array<i32>} : memref<320x4xf32, #tpu.memory_space<vmem>>, vector<160x4xf32>,
    %c2_296 = arith.constant 2 : index
    %c0_297 = arith.constant 0 : index
    %314 = tpu.strided_load %arg5[%c2_296, %c0_297] {strides = array<i32: 2, 1>} : memref<320x4xf32, #tpu.memory_space<vmem>>, vector<8x4xf32>
    %c3_298 = arith.constant 3 : index
    %c0_299 = arith.constant 0 : index
    %315 = tpu.strided_load %arg5[%c3_298, %c0_299] {strides = array<i32: 2, 1>} : memref<320x4xf32, #tpu.memory_space<vmem>>, vector<8x4xf32>
    %c22_300 = arith.constant 22 : index
    %c0_301 = arith.constant 0 : index
    %316 = tpu.strided_load %arg5[%c22_300, %c0_301] {strides = array<i32: 2, 1>} : memref<320x4xf32, #tpu.memory_space<vmem>>, vector<8x4xf32>
    %c23_302 = arith.constant 23 : index
    %c0_303 = arith.constant 0 : index
    %317 = tpu.strided_load %arg5[%c23_302, %c0_303] {strides = array<i32: 2, 1>} : memref<320x4xf32, #tpu.memory_space<vmem>>, vector<8x4xf32>
    %318 = arith.addf %314, %315 : vector<8x4xf32>
    %319 = arith.addf %318, %316 : vector<8x4xf32>
    %320 = arith.addf %319, %317 : vector<8x4xf32>
    %cst_304 = arith.constant 2.500000e-01 : f32
    %321 = vector.broadcast %cst_304 : f32 to vector<8x4xf32>
    %322 = arith.mulf %320, %321 : vector<8x4xf32>
    %c0_305 = arith.constant 0 : index
    %c0_306 = arith.constant 0 : index
    %c0_307 = arith.constant 0 : index
    %323 = vector.load %arg4[%c0_305, %c0_306, %c0_307] : memref<1x64x4xf32, #tpu.memory_space<vmem>>, vector<1x8x4xf32>
    %324 = vector.shape_cast %323 : vector<1x8x4xf32> to vector<8x4xf32>
    %325 = vector.shape_cast %322 : vector<8x4xf32> to vector<1x8x4xf32>
    tpu.vector_store %arg4[%c0_305, %c0_306, %c0_307], %325 {strides = array<i32>} : memref<1x64x4xf32, #tpu.memory_space<vmem>>, vector<1x8x4xf32>,
    %c42_308 = arith.constant 42 : index
    %c0_309 = arith.constant 0 : index
    %326 = tpu.strided_load %arg5[%c42_308, %c0_309] {strides = array<i32: 2, 1>} : memref<320x4xf32, #tpu.memory_space<vmem>>, vector<8x4xf32>
    %c43_310 = arith.constant 43 : index
    %c0_311 = arith.constant 0 : index
    %327 = tpu.strided_load %arg5[%c43_310, %c0_311] {strides = array<i32: 2, 1>} : memref<320x4xf32, #tpu.memory_space<vmem>>, vector<8x4xf32>
    %c62_312 = arith.constant 62 : index
    %c0_313 = arith.constant 0 : index
    %328 = tpu.strided_load %arg5[%c62_312, %c0_313] {strides = array<i32: 2, 1>} : memref<320x4xf32, #tpu.memory_space<vmem>>, vector<8x4xf32>
    %c63_314 = arith.constant 63 : index
    %c0_315 = arith.constant 0 : index
    %329 = tpu.strided_load %arg5[%c63_314, %c0_315] {strides = array<i32: 2, 1>} : memref<320x4xf32, #tpu.memory_space<vmem>>, vector<8x4xf32>
    %330 = arith.addf %326, %327 : vector<8x4xf32>
    %331 = arith.addf %330, %328 : vector<8x4xf32>
    %332 = arith.addf %331, %329 : vector<8x4xf32>
    %cst_316 = arith.constant 2.500000e-01 : f32
    %333 = vector.broadcast %cst_316 : f32 to vector<8x4xf32>
    %334 = arith.mulf %332, %333 : vector<8x4xf32>
    %c0_317 = arith.constant 0 : index
    %c8_318 = arith.constant 8 : index
    %c0_319 = arith.constant 0 : index
    %335 = vector.load %arg4[%c0_317, %c8_318, %c0_319] : memref<1x64x4xf32, #tpu.memory_space<vmem>>, vector<1x8x4xf32>
    %336 = vector.shape_cast %335 : vector<1x8x4xf32> to vector<8x4xf32>
    %337 = vector.shape_cast %334 : vector<8x4xf32> to vector<1x8x4xf32>
    tpu.vector_store %arg4[%c0_317, %c8_318, %c0_319], %337 {strides = array<i32>} : memref<1x64x4xf32, #tpu.memory_space<vmem>>, vector<1x8x4xf32>,
    %c82_320 = arith.constant 82 : index
    %c0_321 = arith.constant 0 : index
    %338 = tpu.strided_load %arg5[%c82_320, %c0_321] {strides = array<i32: 2, 1>} : memref<320x4xf32, #tpu.memory_space<vmem>>, vector<8x4xf32>
    %c83_322 = arith.constant 83 : index
    %c0_323 = arith.constant 0 : index
    %339 = tpu.strided_load %arg5[%c83_322, %c0_323] {strides = array<i32: 2, 1>} : memref<320x4xf32, #tpu.memory_space<vmem>>, vector<8x4xf32>
    %c102 = arith.constant 102 : index
    %c0_324 = arith.constant 0 : index
    %340 = tpu.strided_load %arg5[%c102, %c0_324] {strides = array<i32: 2, 1>} : memref<320x4xf32, #tpu.memory_space<vmem>>, vector<8x4xf32>
    %c103 = arith.constant 103 : index
    %c0_325 = arith.constant 0 : index
    %341 = tpu.strided_load %arg5[%c103, %c0_325] {strides = array<i32: 2, 1>} : memref<320x4xf32, #tpu.memory_space<vmem>>, vector<8x4xf32>
    %342 = arith.addf %338, %339 : vector<8x4xf32>
    %343 = arith.addf %342, %340 : vector<8x4xf32>
    %344 = arith.addf %343, %341 : vector<8x4xf32>
    %cst_326 = arith.constant 2.500000e-01 : f32
    %345 = vector.broadcast %cst_326 : f32 to vector<8x4xf32>
    %346 = arith.mulf %344, %345 : vector<8x4xf32>
    %c0_327 = arith.constant 0 : index
    %c16_328 = arith.constant 16 : index
    %c0_329 = arith.constant 0 : index
    %347 = vector.load %arg4[%c0_327, %c16_328, %c0_329] : memref<1x64x4xf32, #tpu.memory_space<vmem>>, vector<1x8x4xf32>
    %348 = vector.shape_cast %347 : vector<1x8x4xf32> to vector<8x4xf32>
    %349 = vector.shape_cast %346 : vector<8x4xf32> to vector<1x8x4xf32>
    tpu.vector_store %arg4[%c0_327, %c16_328, %c0_329], %349 {strides = array<i32>} : memref<1x64x4xf32, #tpu.memory_space<vmem>>, vector<1x8x4xf32>,
    %c122 = arith.constant 122 : index
    %c0_330 = arith.constant 0 : index
    %350 = tpu.strided_load %arg5[%c122, %c0_330] {strides = array<i32: 2, 1>} : memref<320x4xf32, #tpu.memory_space<vmem>>, vector<8x4xf32>
    %c123 = arith.constant 123 : index
    %c0_331 = arith.constant 0 : index
    %351 = tpu.strided_load %arg5[%c123, %c0_331] {strides = array<i32: 2, 1>} : memref<320x4xf32, #tpu.memory_space<vmem>>, vector<8x4xf32>
    %c142 = arith.constant 142 : index
    %c0_332 = arith.constant 0 : index
    %352 = tpu.strided_load %arg5[%c142, %c0_332] {strides = array<i32: 2, 1>} : memref<320x4xf32, #tpu.memory_space<vmem>>, vector<8x4xf32>
    %c143 = arith.constant 143 : index
    %c0_333 = arith.constant 0 : index
    %353 = tpu.strided_load %arg5[%c143, %c0_333] {strides = array<i32: 2, 1>} : memref<320x4xf32, #tpu.memory_space<vmem>>, vector<8x4xf32>
    %354 = arith.addf %350, %351 : vector<8x4xf32>
    %355 = arith.addf %354, %352 : vector<8x4xf32>
    %356 = arith.addf %355, %353 : vector<8x4xf32>
    %cst_334 = arith.constant 2.500000e-01 : f32
    %357 = vector.broadcast %cst_334 : f32 to vector<8x4xf32>
    %358 = arith.mulf %356, %357 : vector<8x4xf32>
    %c0_335 = arith.constant 0 : index
    %c24_336 = arith.constant 24 : index
    %c0_337 = arith.constant 0 : index
    %359 = vector.load %arg4[%c0_335, %c24_336, %c0_337] : memref<1x64x4xf32, #tpu.memory_space<vmem>>, vector<1x8x4xf32>
    %360 = vector.shape_cast %359 : vector<1x8x4xf32> to vector<8x4xf32>
    %361 = vector.shape_cast %358 : vector<8x4xf32> to vector<1x8x4xf32>
    tpu.vector_store %arg4[%c0_335, %c24_336, %c0_337], %361 {strides = array<i32>} : memref<1x64x4xf32, #tpu.memory_space<vmem>>, vector<1x8x4xf32>,
    %c162_338 = arith.constant 162 : index
    %c0_339 = arith.constant 0 : index
    %362 = tpu.strided_load %arg5[%c162_338, %c0_339] {strides = array<i32: 2, 1>} : memref<320x4xf32, #tpu.memory_space<vmem>>, vector<8x4xf32>
    %c163_340 = arith.constant 163 : index
    %c0_341 = arith.constant 0 : index
    %363 = tpu.strided_load %arg5[%c163_340, %c0_341] {strides = array<i32: 2, 1>} : memref<320x4xf32, #tpu.memory_space<vmem>>, vector<8x4xf32>
    %c182_342 = arith.constant 182 : index
    %c0_343 = arith.constant 0 : index
    %364 = tpu.strided_load %arg5[%c182_342, %c0_343] {strides = array<i32: 2, 1>} : memref<320x4xf32, #tpu.memory_space<vmem>>, vector<8x4xf32>
    %c183_344 = arith.constant 183 : index
    %c0_345 = arith.constant 0 : index
    %365 = tpu.strided_load %arg5[%c183_344, %c0_345] {strides = array<i32: 2, 1>} : memref<320x4xf32, #tpu.memory_space<vmem>>, vector<8x4xf32>
    %366 = arith.addf %362, %363 : vector<8x4xf32>
    %367 = arith.addf %366, %364 : vector<8x4xf32>
    %368 = arith.addf %367, %365 : vector<8x4xf32>
    %cst_346 = arith.constant 2.500000e-01 : f32
    %369 = vector.broadcast %cst_346 : f32 to vector<8x4xf32>
    %370 = arith.mulf %368, %369 : vector<8x4xf32>
    %c0_347 = arith.constant 0 : index
    %c32 = arith.constant 32 : index
    %c0_348 = arith.constant 0 : index
    %371 = vector.load %arg4[%c0_347, %c32, %c0_348] : memref<1x64x4xf32, #tpu.memory_space<vmem>>, vector<1x8x4xf32>
    %372 = vector.shape_cast %371 : vector<1x8x4xf32> to vector<8x4xf32>
    %373 = vector.shape_cast %370 : vector<8x4xf32> to vector<1x8x4xf32>
    tpu.vector_store %arg4[%c0_347, %c32, %c0_348], %373 {strides = array<i32>} : memref<1x64x4xf32, #tpu.memory_space<vmem>>, vector<1x8x4xf32>,
    %c202_349 = arith.constant 202 : index
    %c0_350 = arith.constant 0 : index
    %374 = tpu.strided_load %arg5[%c202_349, %c0_350] {strides = array<i32: 2, 1>} : memref<320x4xf32, #tpu.memory_space<vmem>>, vector<8x4xf32>
    %c203_351 = arith.constant 203 : index
    %c0_352 = arith.constant 0 : index
    %375 = tpu.strided_load %arg5[%c203_351, %c0_352] {strides = array<i32: 2, 1>} : memref<320x4xf32, #tpu.memory_space<vmem>>, vector<8x4xf32>
    %c222_353 = arith.constant 222 : index
    %c0_354 = arith.constant 0 : index
    %376 = tpu.strided_load %arg5[%c222_353, %c0_354] {strides = array<i32: 2, 1>} : memref<320x4xf32, #tpu.memory_space<vmem>>, vector<8x4xf32>
    %c223_355 = arith.constant 223 : index
    %c0_356 = arith.constant 0 : index
    %377 = tpu.strided_load %arg5[%c223_355, %c0_356] {strides = array<i32: 2, 1>} : memref<320x4xf32, #tpu.memory_space<vmem>>, vector<8x4xf32>
    %378 = arith.addf %374, %375 : vector<8x4xf32>
    %379 = arith.addf %378, %376 : vector<8x4xf32>
    %380 = arith.addf %379, %377 : vector<8x4xf32>
    %cst_357 = arith.constant 2.500000e-01 : f32
    %381 = vector.broadcast %cst_357 : f32 to vector<8x4xf32>
    %382 = arith.mulf %380, %381 : vector<8x4xf32>
    %c0_358 = arith.constant 0 : index
    %c40_359 = arith.constant 40 : index
    %c0_360 = arith.constant 0 : index
    %383 = vector.load %arg4[%c0_358, %c40_359, %c0_360] : memref<1x64x4xf32, #tpu.memory_space<vmem>>, vector<1x8x4xf32>
    %384 = vector.shape_cast %383 : vector<1x8x4xf32> to vector<8x4xf32>
    %385 = vector.shape_cast %382 : vector<8x4xf32> to vector<1x8x4xf32>
    tpu.vector_store %arg4[%c0_358, %c40_359, %c0_360], %385 {strides = array<i32>} : memref<1x64x4xf32, #tpu.memory_space<vmem>>, vector<1x8x4xf32>,
    %c242_361 = arith.constant 242 : index
    %c0_362 = arith.constant 0 : index
    %386 = tpu.strided_load %arg5[%c242_361, %c0_362] {strides = array<i32: 2, 1>} : memref<320x4xf32, #tpu.memory_space<vmem>>, vector<8x4xf32>
    %c243_363 = arith.constant 243 : index
    %c0_364 = arith.constant 0 : index
    %387 = tpu.strided_load %arg5[%c243_363, %c0_364] {strides = array<i32: 2, 1>} : memref<320x4xf32, #tpu.memory_space<vmem>>, vector<8x4xf32>
    %c262 = arith.constant 262 : index
    %c0_365 = arith.constant 0 : index
    %388 = tpu.strided_load %arg5[%c262, %c0_365] {strides = array<i32: 2, 1>} : memref<320x4xf32, #tpu.memory_space<vmem>>, vector<8x4xf32>
    %c263 = arith.constant 263 : index
    %c0_366 = arith.constant 0 : index
    %389 = tpu.strided_load %arg5[%c263, %c0_366] {strides = array<i32: 2, 1>} : memref<320x4xf32, #tpu.memory_space<vmem>>, vector<8x4xf32>
    %390 = arith.addf %386, %387 : vector<8x4xf32>
    %391 = arith.addf %390, %388 : vector<8x4xf32>
    %392 = arith.addf %391, %389 : vector<8x4xf32>
    %cst_367 = arith.constant 2.500000e-01 : f32
    %393 = vector.broadcast %cst_367 : f32 to vector<8x4xf32>
    %394 = arith.mulf %392, %393 : vector<8x4xf32>
    %c0_368 = arith.constant 0 : index
    %c48 = arith.constant 48 : index
    %c0_369 = arith.constant 0 : index
    %395 = vector.load %arg4[%c0_368, %c48, %c0_369] : memref<1x64x4xf32, #tpu.memory_space<vmem>>, vector<1x8x4xf32>
    %396 = vector.shape_cast %395 : vector<1x8x4xf32> to vector<8x4xf32>
    %397 = vector.shape_cast %394 : vector<8x4xf32> to vector<1x8x4xf32>
    tpu.vector_store %arg4[%c0_368, %c48, %c0_369], %397 {strides = array<i32>} : memref<1x64x4xf32, #tpu.memory_space<vmem>>, vector<1x8x4xf32>,
    %c282 = arith.constant 282 : index
    %c0_370 = arith.constant 0 : index
    %398 = tpu.strided_load %arg5[%c282, %c0_370] {strides = array<i32: 2, 1>} : memref<320x4xf32, #tpu.memory_space<vmem>>, vector<8x4xf32>
    %c283 = arith.constant 283 : index
    %c0_371 = arith.constant 0 : index
    %399 = tpu.strided_load %arg5[%c283, %c0_371] {strides = array<i32: 2, 1>} : memref<320x4xf32, #tpu.memory_space<vmem>>, vector<8x4xf32>
    %c302 = arith.constant 302 : index
    %c0_372 = arith.constant 0 : index
    %400 = tpu.strided_load %arg5[%c302, %c0_372] {strides = array<i32: 2, 1>} : memref<320x4xf32, #tpu.memory_space<vmem>>, vector<8x4xf32>
    %c303 = arith.constant 303 : index
    %c0_373 = arith.constant 0 : index
    %401 = tpu.strided_load %arg5[%c303, %c0_373] {strides = array<i32: 2, 1>} : memref<320x4xf32, #tpu.memory_space<vmem>>, vector<8x4xf32>
    %402 = arith.addf %398, %399 : vector<8x4xf32>
    %403 = arith.addf %402, %400 : vector<8x4xf32>
    %404 = arith.addf %403, %401 : vector<8x4xf32>
    %cst_374 = arith.constant 2.500000e-01 : f32
    %405 = vector.broadcast %cst_374 : f32 to vector<8x4xf32>
    %406 = arith.mulf %404, %405 : vector<8x4xf32>
    %c0_375 = arith.constant 0 : index
    %c56 = arith.constant 56 : index
    %c0_376 = arith.constant 0 : index
    %407 = vector.load %arg4[%c0_375, %c56, %c0_376] : memref<1x64x4xf32, #tpu.memory_space<vmem>>, vector<1x8x4xf32>
    %408 = vector.shape_cast %407 : vector<1x8x4xf32> to vector<8x4xf32>
    %409 = vector.shape_cast %406 : vector<8x4xf32> to vector<1x8x4xf32>
    tpu.vector_store %arg4[%c0_375, %c56, %c0_376], %409 {strides = array<i32>} : memref<1x64x4xf32, #tpu.memory_space<vmem>>, vector<1x8x4xf32>,
    return
  }
  func.func @transform_0(%arg0: i32) -> (i32, i32, i32) {
    %c0_i32 = arith.constant 0 : i32
    %c0_i32_0 = arith.constant 0 : i32
    %c0_i32_1 = arith.constant 0 : i32
    return %arg0, %c0_i32, %c0_i32_0 : i32, i32, i32
  }
  func.func @transform_1(%arg0: i32) -> (i32, i32, i32) {
    %c0_i32 = arith.constant 0 : i32
    %c0_i32_0 = arith.constant 0 : i32
    %c0_i32_1 = arith.constant 0 : i32
    %c0_i32_2 = arith.constant 0 : i32
    return %c0_i32, %c0_i32_0, %c0_i32_1 : i32, i32, i32
  }
  func.func @transform_2(%arg0: i32) -> (i32, i32) {
    %c0_i32 = arith.constant 0 : i32
    %c0_i32_0 = arith.constant 0 : i32
    %c0_i32_1 = arith.constant 0 : i32
    return %c0_i32, %c0_i32_0 : i32, i32
  }
  func.func @transform_3(%arg0: i32) -> (i32, i32, i32) {
    %c0_i32 = arith.constant 0 : i32
    %c0_i32_0 = arith.constant 0 : i32
    %c0_i32_1 = arith.constant 0 : i32
    return %arg0, %c0_i32, %c0_i32_0 : i32, i32, i32
  }
}

</mosaic_0001>

<bundles_post_ra>
// kernel: tpu_custom_call.1
= control target key start
LH: loop header
LB: loop body
LE: loop exit
PB: predicated region body
PF: predicated region fallthrough
CT: control target
= control target key end

     0   :  { %s10562_s12 = smov 0   ;;  %s13931_s0 = inlined_call_operand.vmem [shape: bf16[2,404,4], index: 0, kind: input, shape index: {}]   ;;  %s13932_s1 = inlined_call_operand.vmem [shape: bf16[25,4,4], index: 1, kind: input, shape index: {}]   ;;  %s13933_s2 = inlined_call_operand.vmem [shape: f32[1,4], index: 2, kind: input, shape index: {}]   ;;  %s13934_s3 = inlined_call_operand.vmem [shape: f32[2,64,4], index: 3, kind: output, shape index: {}]  }
   0x1 LB: > { %s9068_s13 = sadd.s32 4294967295, %s10540_s12   ;;  %p9072_p0 = scmp.ge.s32.totalorder %s10540_s12, 1  ;;  %s10540_s12 = sphi %s10562_s12, %s13_s12  }
   0x2   : > { %p137_p1 = scmp.lt.s32.totalorder %s10540_s12, 3 }
   0x4   : > { %p138_p2 = pnand %p9072_p0, %p137_p1 }
   0x5   : > { %p161_p3 = scmp.lt.s32.totalorder (!%p138_p2), %s9068_s13, 1 }
   0x6   : > { %141 = sbr.rel (%p138_p2) target bundleno = 2176 (0x880), region = 32 }
   0xb   : > { %v192_v0 = vld [vmem:[%s13932_s1] sm:$0x3]  ;;  %vm365_vm0 = vcmask 1041408   ;;  %v9076_v2 = vld [vmem:[%s13932_s1 + $0x2] sm:$0x3]  ;;  %s14104_s13 = smov (!%p161_p3, %s9068_s13), 1 }
   0xc   : > { %v449_v1 = vsel %vm365_vm0, %v192_v0, 0  ;;  %v367_v3 = vsel %vm365_vm0, %v9076_v2, 0  ;;  %v9133_v4 = vld [vmem:[%s13932_s1 + $0x4] sm:$0x3]  ;;  %v9144_v5 = vld [vmem:[%s13932_s1 + $0x6] sm:$0x3] }
   0xd   : > { %10489 = vmatpush.bf16.msra.mxu3 %v449_v1  ;;  %458 = vmatpush.bf16.msra.mxu1 %v449_v1  ;;  %v569_v6 = vsel %vm365_vm0, %v9133_v4, 0  ;;  %v741_v7 = vsel %vm365_vm0, %v9144_v5, 0  ;;  %v9155_v8 = vld [vmem:[%s13932_s1 + $0x8] sm:$0x3]  ;;  %v9166_v9 = vld [vmem:[%s13932_s1 + $0xa] sm:$0x3] }
   0xe   : > { %10488 = vmatpush.bf16.msra.mxu2 %v367_v3  ;;  %376 = vmatpush.bf16.msra.mxu0 %v367_v3  ;;  %s10522_s26 = smul.u32 204, %s14104_s13  ;;  %v881_v10 = vsel %vm365_vm0, %v9155_v8, 0  ;;  %v1090_v11 = vsel %vm365_vm0, %v9166_v9, 0  ;;  %vm334_vm1 = vcmask 31744   ;;  %vm249_vm2 = vsmask.f32 7424 }
   0xf   : > { %vm656_vm3 = vsmask.f32 6400  ;;  %vm516_vm4 = vcmask 1046528   ;;  %vm828_vm5 = vcmask 1045504   ;;  %vm1394_vm6 = vcmask 1044480   ;;  %s10002_s15 = sshll.u32 %s14104_s13, 6 }
  0x10   : > { %s10600_s29 = scalar_lea.vmem %s13931_s0, %s10522_s26  ;;  %vm1534_vm7 = vsmask.f32 4352  ;;  %vm1177_vm8 = vsmask.f32 5376  ;;  %s12419_s18 = scalar_lea.vmem %s13934_s3, %s10002_s15 }
  0x11   : > { %750 = vmatpush.bf16.msrb.mxu3 %v741_v7  ;;  %1099 = vmatpush.bf16.msrb.mxu1 %v1090_v11  ;;  %v10603_v12 = vld [vmem:[%s10600_s29 + $0x28] sm:$0xff]  ;;  %v10606_v13 = vld [vmem:[%s10600_s29 + $0x30] sm:$0xff]  ;;  %v10609_v14 = vld [vmem:[%s10600_s29] sm:$0xff]  }
  0x12   : > { %578 = vmatpush.bf16.msrb.mxu2 %v569_v6  ;;  %890 = vmatpush.bf16.msrb.mxu0 %v881_v10  ;;  %v10612_v15 = vld [vmem:[%s10600_s29 + $0x8] sm:$0xff]  ;;  %v251_v16 = vshrl.u32 %v10609_v14, 16  ;;  %v253_v17 = vshll.u32 %v10609_v14, 16  ;;  %v290_v18 = vshll.u32 %v10603_v12, 16  ;;  %v294_v19 = vshrl.u32 %v10603_v12, 16  ;;  %v10638_v30 = vld [vmem:[%s10600_s29 + $0x10] sm:$0xff] }
  0x13   : > { %9123 = vmatmul.msk.bf16.vlgmr.msra.gmra.mxu1 %vm334_vm1, %v10609_v14  ;;  %9128 = vmatmul.msk.bf16.vlgmr.msra.gmra.mxu3 %vm334_vm1, %v10603_v12  ;;  %v298_v20 = vshll.u32 %v10606_v13, 16  ;;  %v258_v22 = vshll.u32 %v10612_v15, 16  ;;  %v10641_v31 = vld [vmem:[%s10600_s29 + $0x38] sm:$0xff]  ;;  %v262_v32 = vshrl.u32 %v10612_v15, 16  ;;  %v266_v33 = vshll.u32 %v10638_v30, 16  ;;  %v10665_v43 = vld [vmem:[%s10600_s29 + $0x40] sm:$0xff] }
  0x14   : > { %v255_v21 = vrot.slane %v253_v17, 1  ;;  %v10626_v23 = vrot.slane %v290_v18, 1  ;;  %v302_v34 = vshrl.u32 %v10606_v13, 16  ;;  %v306_v35 = vshll.u32 %v10641_v31, 16  ;;  %v10662_v42 = vld [vmem:[%s10600_s29 + $0x18] sm:$0xff]  ;;  %v10690_v57 = vld [vmem:[%s10600_s29 + $0x48] sm:$0xff] }
  0x15   : > { %v300_v24 = vrot.slane %v298_v20, 1  ;;  %v260_v26 = vrot.slane %v258_v22, 1  ;;  %v268_v37 = vrot.slane %v266_v33, 1  ;;  %v270_v44 = vshrl.u32 %v10638_v30, 16  ;;  %v510_v55 = vld [vmem:[%s10600_s29] sm:$0xe] }
  0x16   : > { %v256_v25 = vor.u32 %v255_v21, %v251_v16  ;;  %v296_v27 = vor.u32 %v294_v19, %v10626_v23  ;;  %v308_v39 = vrot.slane %v306_v35, 1  ;;  %v274_v45 = vshll.u32 %v10662_v42, 16  ;;  %v10693_v58 = vld [vmem:[%s10600_s29 + $0x20] sm:$0xff]  ;;  %v193_v21 = vld [vmem:[%s10600_s29 + $0x50] sm:$0x1] }
  0x17   : > { %v264_v36 = vor.u32 %v262_v32, %v260_v26  ;;  %v304_v38 = vor.u32 %v302_v34, %v300_v24  ;;  %v310_v46 = vshrl.u32 %v10641_v31, 16  ;;  %v314_v47 = vshll.u32 %v10665_v43, 16 }
  0x18   : > { %v261_v28 = vsel %vm249_vm2, %v256_v25, %v260_v26  ;;  %v301_v29 = vsel %vm249_vm2, %v296_v27, %v300_v24  ;;  %v272_v48 = vor.u32 %v270_v44, %v268_v37  ;;  %v276_v49 = vrot.slane %v274_v45, 1 }
  0x19   : > { %9113 = vmatmul.msk.bf16.vlgmr.msra.gmra.mxu0 %vm334_vm1, %v261_v28  ;;  %9118 = vmatmul.msk.bf16.vlgmr.msra.gmra.mxu2 %vm334_vm1, %v301_v29  ;;  %v269_v40 = vsel %vm249_vm2, %v264_v36, %v268_v37  ;;  %v309_v41 = vsel %vm249_vm2, %v304_v38, %v308_v39  ;;  %v312_v50 = vor.u32 %v310_v46, %v308_v39  ;;  %v316_v51 = vrot.slane %v314_v47, 1  ;;  %v9177_v37 = vld [vmem:[%s13932_s1 + $0xc] sm:$0x3]  ;;  %v9188_v38 = vld [vmem:[%s13932_s1 + $0xe] sm:$0x3] }
  0x1a   : > { %v277_v52 = vsel %vm249_vm2, %v272_v48, %v276_v49  ;;  %v10100_v53 = vunpack.c.h.b16 %v10609_v14  ;;  %v514_v56 = vunpack.c.l.b16 %v510_v55  ;;  %v665_v60 = vrot.slane %v262_v32, 1  ;;  %v962_v55 = vld [vmem:[%s10600_s29 + $0x8] sm:$0xc] }
  0x1b   : > { %v317_v54 = vsel %vm249_vm2, %v312_v50, %v316_v51  ;;  %v666_v61 = vrot.slane %v258_v22, 2  ;;  %v318_v0 = vshrl.u32 %v10665_v43, 16  ;;  %v322_v1 = vshll.u32 %v10690_v57, 16  ;;  %v822_v22 = vld [vmem:[%s10600_s29] sm:$0xc] }
  0x1c   : > { %v515_v59 = vpack.c.b16 %v10100_v53, %v514_v56  ;;  %v278_v2 = vshrl.u32 %v10662_v42, 16  ;;  %v282_v3 = vshll.u32 %v10693_v58, 16  ;;  %v518_v17 = vrot.slane %v10612_v15, 1  ;;  %v963_v56 = vld [vmem:[%s10600_s29 + $0xc] sm:$0xf] }
  0x1d   : > { %v667_v6 = vor.u32 %v666_v61, %v665_v60  ;;  %v320_v8 = vor.u32 %v318_v0, %v316_v51  ;;  %v324_v9 = vrot.slane %v322_v1, 1  ;;  %v826_v25 = vunpack.c.l.b16 %v822_v22 }
  0x1e   : > { %v658_v62 = vshrl.u32 %v515_v59, 16  ;;  %v661_v63 = vshll.u32 %v515_v59, 16  ;;  %v280_v10 = vor.u32 %v278_v2, %v276_v49  ;;  %v284_v11 = vrot.slane %v282_v3, 1 }
  0x1f   : > { %v517_v16 = vrot.slane %v515_v59, 1  ;;  %v325_v27 = vsel %vm249_vm2, %v320_v8, %v324_v9  ;;  %v237_v28 = vunpack.c.l.b16 %v193_v21  ;;  %v827_v29 = vpack.c.b16 %v10100_v53, %v826_v25 }
  0x20   : > { %v660_v4 = vrot.slane %v658_v62, 1  ;;  %v663_v5 = vrot.slane %v661_v63, 2  ;;  %v285_v26 = vsel %vm249_vm2, %v280_v10, %v284_v11  ;;  %v830_v36 = vrot.slane %v10612_v15, 2  ;;  %v9199_v63 = vld [vmem:[%s13932_s1 + $0x10] sm:$0x3] }
  0x21   : > { %v519_v24 = vsel %vm516_vm4, %v517_v16, %v518_v17  ;;  %v829_v32 = vrot.slane %v827_v29, 2  ;;  %v10729_v39 = vpack.c.b16 %v237_v28, %v237_v28  ;;  %v1447_v48 = vsel %vm365_vm0, %v9188_v38, 0  ;;  %v10767_v10 = vld [vmem:[%s10600_s29 + $0x10] sm:$0xff]  }
  0x22   : > { %v664_v7 = vor.u32 %v663_v5, %v660_v4  ;;  %1456 = vmatpush.bf16.msra.mxu3 %v1447_v48  ;;  %v669_v49 = vrot.slane %v270_v44, 1  ;;  %v670_v50 = vrot.slane %v266_v33, 2  ;;  %v286_v51 = vshrl.u32 %v10693_v58, 16  ;;  %v9210_v4 = vld [vmem:[%s13932_s1 + $0x12] sm:$0x3]  ;;  %v10812_v48 = vld [vmem:[%s10600_s29 + $0x28] sm:$0xff]  }
  0x23   : > { %9124 = vmatmul.msk.bf16.gmra.mxu1 %vm334_vm1, %v10612_v15  ;;  %9129 = vmatmul.msk.bf16.gmra.mxu3 %vm334_vm1, %v10606_v13  ;;  %v326_v53 = vshrl.u32 %v10690_v57, 16  ;;  %v1006_v61 = vunpack.c.l.b16 %v962_v55  ;;  %v10750_v62 = vunpack.c.l.b16 %v963_v56  ;;  %v1619_v5 = vsel %vm365_vm0, %v9199_v63, 0 }
  0x24   : > { %v668_v14 = vsel %vm656_vm3, %v664_v7, %v667_v6  ;;  %v288_v60 = vor.u32 %v286_v51, %v284_v11  ;;  %1628 = vmatpush.bf16.msra.mxu0 %v1619_v5  ;;  %v673_v11 = vrot.slane %v278_v2, 1  ;;  %v674_v16 = vrot.slane %v274_v45, 2 }
  0x25   : > { %v328_v33 = vor.u32 %v326_v53, %v324_v9  ;;  %v10764_v9 = vpack.c.b16 %v10750_v62, %v1006_v61  ;;  %v832_v28 = vrot.slane %v10638_v30, 2  ;;  %v520_v29 = vrot.slane %v10638_v30, 1 }
  0x26   : > { %v293_v7 = vsel %vm249_vm2, %v288_v60, %v10626_v23  ;;  %v1039_v23 = vrot.slane %v10767_v10, 2  ;;  %v675_v22 = vor.u32 %v674_v16, %v673_v11  ;;  %v522_v15 = vrot.slane %v10662_v42, 1 }
  0x27   : > { %v1038_v21 = vrot.slane %v10764_v9, 2  ;;  %v681_v61 = vrot.slane %v294_v19, 1  ;;  %v682_v63 = vrot.slane %v290_v18, 2 }
  0x29   : > { %9114 = vmatmul.msk.bf16.gmra.mxu0 %vm334_vm1, %v269_v40  ;;  %9119 = vmatmul.msk.bf16.gmra.mxu2 %vm334_vm1, %v309_v41  ;;  %v1307_v40 = vsel %vm365_vm0, %v9177_v37, 0  ;;  %v831_v41 = vsel %vm828_vm5, %v829_v32, %v830_v36  ;;  %v521_v32 = vsel %vm516_vm4, %v518_v17, %v520_v29  ;;  %v523_v17 = vsel %vm516_vm4, %v520_v29, %v522_v15 }
  0x2a   : > { %1316 = vmatpush.bf16.msra.mxu2 %v1307_v40  ;;  %v834_v40 = vrot.slane %v10662_v42, 2  ;;  %v683_v5 = vor.u32 %v682_v63, %v681_v61  ;;  %v689_v61 = vrot.slane %v310_v46, 1  ;;  %v690_v63 = vrot.slane %v306_v35, 2 }
  0x33   : > { %9125 = vmatmul.msk.bf16.gmra.mxu1 %vm334_vm1, %v10638_v30  ;;  %9130 = vmatmul.msk.bf16.gmra.mxu3 %vm334_vm1, %v10641_v31  ;;  %v835_v30 = vsel %vm828_vm5, %v832_v28, %v834_v40 }
  0x39   : > { %9115 = vmatmul.msk.bf16.gmra.mxu0 %vm334_vm1, %v277_v52  ;;  %9120 = vmatmul.msk.bf16.gmra.mxu2 %vm334_vm1, %v317_v54  ;;  %v671_v52 = vor.u32 %v670_v50, %v669_v49  ;;  %v330_v54 = vshll.u32 %v10729_v39, 16  ;;  %v1045_v49 = vrot.slane %v10812_v48, 2 }
  0x3b   : > { %v672_v59 = vsel %vm656_vm3, %v667_v6, %v671_v52  ;;  %v332_v44 = vrot.slane %v330_v54, 1  ;;  %v1743_v6 = vsel %vm365_vm0, %v9210_v4, 0  ;;  %v676_v25 = vsel %vm656_vm3, %v671_v52, %v675_v22  ;;  %v10832_v4 = vld [vmem:[%s10600_s29 + $0x30] sm:$0xff]  }
  0x3c   : > { %1752 = vmatpush.bf16.msra.mxu1 %v1743_v6 }
  0x3d   : > { %v333_v8 = vsel %vm249_vm2, %v328_v33, %v332_v44 }
  0x43   : > { %9126 = vmatmul.msk.bf16.gmra.mxu1 %vm334_vm1, %v10662_v42  ;;  %9131 = vmatmul.msk.bf16.gmra.mxu3 %vm334_vm1, %v10665_v43 }
  0x49   : > { %9116 = vmatmul.msk.bf16.gmra.mxu0 %vm334_vm1, %v285_v26  ;;  %9121 = vmatmul.msk.bf16.gmra.mxu2 %vm334_vm1, %v325_v27  ;;  %v1040_v26 = vsel %vm828_vm5, %v1038_v21, %v1039_v23  ;;  %v10782_v27 = vld [vmem:[%s10600_s29 + $0x18] sm:$0xff]  }
  0x4a   : > { %v1041_v45 = vrot.slane %v10782_v27, 2 }
  0x4c   : > { %v1042_v2 = vsel %vm828_vm5, %v1039_v23, %v1041_v45  ;;  %v838_v23 = vrot.slane %v10603_v12, 2 }
  0x53   : > { %9127 = vmatmul.msk.bf16.gmra.mxu1 %vm334_vm1, %v10693_v58  ;;  %9132 = vmatmul.msk.bf16.gmra.mxu3 %vm334_vm1, %v10690_v57 }
  0x59   : > { %9117 = vmatmul.msk.bf16.gmra.mxu0 %vm334_vm1, %v293_v7  ;;  %9122 = vmatmul.msk.bf16.gmra.mxu2 %vm334_vm1, %v333_v8 }
  0x63   : > { %9167 = vmatmul.msk.bf16.vlgmr.msrb.gmra.mxu1 %vm334_vm1, %v1040_v26  ;;  %9145 = vmatmul.msk.bf16.vlgmr.msrb.gmra.mxu3 %vm334_vm1, %v668_v14  ;;  %v833_v14 = vsel %vm828_vm5, %v830_v36, %v832_v28  ;;  %v677_v36 = vrot.slane %v286_v51, 1  ;;  %v836_v51 = vrot.slane %v10693_v58, 2 }
  0x65   : > { %v839_v28 = vsel %vm828_vm5, %v836_v51, %v838_v23 }
  0x69   : > { %9156 = vmatmul.msk.bf16.vlgmr.msrb.gmra.mxu0 %vm334_vm1, %v831_v41  ;;  %9134 = vmatmul.msk.bf16.vlgmr.msrb.gmra.mxu2 %vm334_vm1, %v519_v24  ;;  %v10797_v24 = vld [vmem:[%s10600_s29 + $0x20] sm:$0xff]   ;;  %v678_v41 = vrot.slane %v282_v3, 2  ;;  %v524_v3 = vrot.slane %v10693_v58, 1  ;;  %v1047_v58 = vrot.slane %v10832_v4, 2 }
  0x6a   : > { %v1043_v37 = vrot.slane %v10797_v24, 2 }
  0x6b   : > { %v679_v50 = vor.u32 %v678_v41, %v677_v36  ;;  %v525_v33 = vsel %vm516_vm4, %v522_v15, %v524_v3  ;;  %v1048_v21 = vsel %vm828_vm5, %v1045_v49, %v1047_v58 }
  0x6c   : > { %v1044_v38 = vsel %vm828_vm5, %v1041_v45, %v1043_v37  ;;  %v1046_v42 = vsel %vm828_vm5, %v1043_v37, %v1045_v49  ;;  %v685_v37 = vrot.slane %v302_v34, 1 }
  0x6d   : > { %v680_v54 = vsel %vm656_vm3, %v675_v22, %v679_v50  ;;  %v684_v18 = vsel %vm656_vm3, %v679_v50, %v683_v5  ;;  %v526_v22 = vrot.slane %v10603_v12, 1 }
  0x73   : > { %9168 = vmatmul.msk.bf16.gmra.mxu1 %vm334_vm1, %v1042_v2  ;;  %9146 = vmatmul.msk.bf16.gmra.mxu3 %vm334_vm1, %v672_v59  ;;  %v837_v59 = vsel %vm828_vm5, %v834_v40, %v836_v51  ;;  %v10858_v40 = vld [vmem:[%s10600_s29 + $0x38] sm:$0xff]  }
  0x74   : > { %v1049_v12 = vrot.slane %v10858_v40, 2 }
  0x76   : > { %v1050_v50 = vsel %vm828_vm5, %v1047_v58, %v1049_v12  ;;  %v10884_v58 = vld [vmem:[%s10600_s29 + $0x40] sm:$0xff]  }
  0x79   : > { %9157 = vmatmul.msk.bf16.gmra.mxu0 %vm334_vm1, %v833_v14  ;;  %9135 = vmatmul.msk.bf16.gmra.mxu2 %vm334_vm1, %v521_v32  ;;  %v527_v14 = vsel %vm516_vm4, %v524_v3, %v526_v22 }
  0x83   : > { %9169 = vmatmul.msk.bf16.gmra.mxu1 %vm334_vm1, %v1044_v38  ;;  %9147 = vmatmul.msk.bf16.gmra.mxu3 %vm334_vm1, %v676_v25  ;;  %v686_v38 = vrot.slane %v298_v20, 2 }
  0x85   : > { %v687_v15 = vor.u32 %v686_v38, %v685_v37 }
  0x87   : > { %v688_v20 = vsel %vm656_vm3, %v683_v5, %v687_v15  ;;  %v691_v5 = vor.u32 %v690_v63, %v689_v61 }
  0x89   : > { %9158 = vmatmul.msk.bf16.gmra.mxu0 %vm334_vm1, %v835_v30  ;;  %9136 = vmatmul.msk.bf16.gmra.mxu2 %vm334_vm1, %v523_v17  ;;  %v692_v35 = vsel %vm656_vm3, %v687_v15, %v691_v5  ;;  %v694_v15 = vrot.slane %v314_v47, 2 }
  0x90   : > { %v460_v52 = vpop.f32.mrf.mxu1 }
  0x93   : > { %9170 = vmatmul.msk.bf16.gmra.mxu1 %vm334_vm1, %v1046_v42  ;;  %9148 = vmatmul.msk.bf16.gmra.mxu3 %vm334_vm1, %v680_v54  ;;  %v528_v42 = vrot.slane %v10606_v13, 1 }
  0x96   : > { %v485_v55 = vpop.f32.mrf.mxu3  ;;  %v378_v56 = vpop.f32.mrf.mxu0 }
  0x97   : > { %v10824_v60 = vadd.f32 %v460_v52, %v378_v56  ;;  %v840_v52 = vrot.slane %v10606_v13, 2  ;;  %v1051_v13 = vrot.slane %v10884_v58, 2 }
  0x98   : > { %v462_v44 = vpop.f32.mrf.mxu1 }
  0x99   : > { %9159 = vmatmul.msk.bf16.gmra.mxu0 %vm334_vm1, %v837_v59  ;;  %9137 = vmatmul.msk.bf16.gmra.mxu2 %vm334_vm1, %v525_v33  ;;  %v841_v56 = vsel %vm828_vm5, %v838_v23, %v840_v52  ;;  %v529_v33 = vsel %vm516_vm4, %v526_v22, %v528_v42  ;;  %v842_v23 = vrot.slane %v10641_v31, 2  ;;  %v530_v22 = vrot.slane %v10641_v31, 1 }
  0x9b   : > { %v531_v37 = vsel %vm516_vm4, %v528_v42, %v530_v22 }
  0x9c   : > { %v403_v6 = vpop.f32.mrf.mxu2 }
  0x9d   : > { %v10837_v7 = vadd.f32 %v485_v55, %v403_v6 }
  0x9e   : > { %v487_v8 = vpop.f32.mrf.mxu3  ;;  %v380_v11 = vpop.f32.mrf.mxu0 }
  0x9f   : > { %v10839_v16 = vadd.f32 %v462_v44, %v380_v11 }
  0xa0   : > { %v465_v19 = vpop.f32.mrf.mxu1 }
  0xa3   : > { %9171 = vmatmul.msk.bf16.gmra.mxu1 %vm334_vm1, %v1048_v21  ;;  %9149 = vmatmul.msk.bf16.gmra.mxu3 %vm334_vm1, %v684_v18  ;;  %v1052_v18 = vsel %vm828_vm5, %v1049_v12, %v1051_v13  ;;  %v693_v12 = vrot.slane %v318_v0, 1 }
  0xa4   : > { %v405_v25 = vpop.f32.mrf.mxu2 }
  0xa5   : > { %v10847_v26 = vadd.f32 %v487_v8, %v405_v25 }
  0xa6   : > { %v490_v45 = vpop.f32.mrf.mxu3  ;;  %v383_v2 = vpop.f32.mrf.mxu0 }
  0xa7   : > { %v10850_v29 = vadd.f32 %v465_v19, %v383_v2 }
  0xa8   : > { %v467_v32 = vpop.f32.mrf.mxu1 }
  0xa9   : > { %9160 = vmatmul.msk.bf16.gmra.mxu0 %vm334_vm1, %v839_v28  ;;  %9138 = vmatmul.msk.bf16.gmra.mxu2 %vm334_vm1, %v527_v14  ;;  %v843_v14 = vsel %vm828_vm5, %v840_v52, %v842_v23 }
  0xac   : > { %v408_v30 = vpop.f32.mrf.mxu2 }
  0xad   : > { %v10863_v17 = vadd.f32 %v490_v45, %v408_v30  ;;  %v10910_v30 = vld [vmem:[%s10600_s29 + $0x48] sm:$0xff]  }
  0xae   : > { %v492_v36 = vpop.f32.mrf.mxu3  ;;  %v385_v41 = vpop.f32.mrf.mxu0  ;;  %v1053_v31 = vrot.slane %v10910_v30, 2 }
  0xaf   : > { %v10865_v49 = vadd.f32 %v467_v32, %v385_v41 }
  0xb0   : > { %v470_v34 = vpop.f32.mrf.mxu1  ;;  %v1054_v42 = vsel %vm828_vm5, %v1051_v13, %v1053_v31 }
  0xb3   : > { %9172 = vmatmul.msk.bf16.gmra.mxu1 %vm334_vm1, %v1050_v50  ;;  %9150 = vmatmul.msk.bf16.gmra.mxu3 %vm334_vm1, %v688_v20 }
  0xb4   : > { %v410_v54 = vpop.f32.mrf.mxu2 }
  0xb5   : > { %v10873_v51 = vadd.f32 %v492_v36, %v410_v54  ;;  %v695_v36 = vor.u32 %v694_v15, %v693_v12  ;;  %v844_v54 = vrot.slane %v10665_v43, 2  ;;  %v846_v12 = vrot.slane %v10690_v57, 2 }
  0xb6   : > { %v495_v3 = vpop.f32.mrf.mxu3  ;;  %v388_v55 = vpop.f32.mrf.mxu0  ;;  %v534_v15 = vrot.slane %v10690_v57, 1  ;;  %v9221_v57 = vld [vmem:[%s13932_s1 + $0x14] sm:$0x3] }
  0xb7   : > { %v10876_v59 = vadd.f32 %v470_v34, %v388_v55  ;;  %v696_v47 = vsel %vm656_vm3, %v691_v5, %v695_v36  ;;  %v845_v61 = vsel %vm828_vm5, %v842_v23, %v844_v54 }
  0xb8   : > { %v472_v44 = vpop.f32.mrf.mxu1 }
  0xb9   : > { %9161 = vmatmul.msk.bf16.gmra.mxu0 %vm334_vm1, %v841_v56  ;;  %9139 = vmatmul.msk.bf16.gmra.mxu2 %vm334_vm1, %v529_v33 }
  0xbc   : > { %v413_v6 = vpop.f32.mrf.mxu2 }
  0xbd   : > { %v10889_v8 = vadd.f32 %v495_v3, %v413_v6  ;;  %v532_v3 = vrot.slane %v10665_v43, 1  ;;  %v697_v6 = vrot.slane %v326_v53, 1  ;;  %v650_v43 = vld [vmem:[%s10600_s29 + $0x50] sm:$0x3] }
  0xbe   : > { %v497_v11 = vpop.f32.mrf.mxu3  ;;  %v390_v19 = vpop.f32.mrf.mxu0 }
  0xbf   : > { %v10891_v21 = vadd.f32 %v472_v44, %v390_v19  ;;  %v533_v13 = vsel %vm516_vm4, %v530_v22, %v532_v3  ;;  %v10936_v19 = vld [vmem:[%s10600_s29 + $0x50] sm:$0xff]  }
  0xc0   : > { %v475_v46 = vpop.f32.mrf.mxu1 }
  0xc3   : > { %9173 = vmatmul.msk.bf16.gmra.mxu1 %vm334_vm1, %v1052_v18  ;;  %9151 = vmatmul.msk.bf16.gmra.mxu3 %vm334_vm1, %v692_v35  ;;  %v654_v35 = vunpack.c.l.b16 %v650_v43 }
  0xc4   : > { %v415_v25 = vpop.f32.mrf.mxu2 }
  0xc5   : > { %v10899_v45 = vadd.f32 %v497_v11, %v415_v25  ;;  %v698_v11 = vrot.slane %v322_v1, 2 }
  0xc6   : > { %v500_v2 = vpop.f32.mrf.mxu3  ;;  %v393_v28 = vpop.f32.mrf.mxu0 }
  0xc7   : > { %v10902_v32 = vadd.f32 %v475_v46, %v393_v28  ;;  %v1055_v46 = vrot.slane %v10936_v19, 2  ;;  %v699_v18 = vor.u32 %v698_v11, %v697_v6 }
  0xc8   : > { %v477_v38 = vpop.f32.mrf.mxu1 }
  0xc9   : > { %9162 = vmatmul.msk.bf16.gmra.mxu0 %vm334_vm1, %v843_v14  ;;  %9140 = vmatmul.msk.bf16.gmra.mxu2 %vm334_vm1, %v531_v37  ;;  %v1056_v28 = vsel %vm828_vm5, %v1053_v31, %v1055_v46  ;;  %v700_v14 = vsel %vm656_vm3, %v695_v36, %v699_v18  ;;  %v655_v37 = vpack.c.b16 %v654_v35, %v654_v35 }
  0xca   : > { %v847_v36 = vsel %vm828_vm5, %v844_v54, %v846_v12 }
  0xcc   : > { %v418_v41 = vpop.f32.mrf.mxu2 }
  0xcd   : > { %v10915_v34 = vadd.f32 %v500_v2, %v418_v41 }
  0xce   : > { %v502_v50 = vpop.f32.mrf.mxu3  ;;  %v395_v20 = vpop.f32.mrf.mxu0 }
  0xcf   : > { %v10917_v52 = vadd.f32 %v477_v38, %v395_v20  ;;  %v982_v38 = vld [vmem:[%s10600_s29 + $0x58] sm:$0x3]  ;;  %v705_v20 = vshll.u32 %v655_v37, 16 }
  0xd0   : > { %v480_v0 = vpop.f32.mrf.mxu1  ;;  %v1026_v41 = vunpack.c.l.b16 %v982_v38 }
  0xd3   : > { %9174 = vmatmul.msk.bf16.gmra.mxu1 %vm334_vm1, %v1054_v42  ;;  %9152 = vmatmul.msk.bf16.gmra.mxu3 %vm334_vm1, %v696_v47 }
  0xd4   : > { %v420_v55 = vpop.f32.mrf.mxu2 }
  0xd5   : > { %v10925_v56 = vadd.f32 %v502_v50, %v420_v55  ;;  %v702_v50 = vshrl.u32 %v655_v37, 16  ;;  %v535_v55 = vsel %vm516_vm4, %v532_v3, %v534_v15  ;;  %v1927_v3 = vsel %vm365_vm0, %v9221_v57, 0 }
  0xd6   : > { %v505_v33 = vpop.f32.mrf.mxu3  ;;  %v398_v44 = vpop.f32.mrf.mxu0  ;;  %1936 = vmatpush.bf16.msrb.mxu2 %v1927_v3  ;;  %v1179_v3 = vshrl.u32 %v10764_v9, 16 }
  0xd7   : > { %v10928_v63 = vadd.f32 %v480_v0, %v398_v44  ;;  %v1037_v44 = vpack.c.b16 %v1026_v41, %v1026_v41  ;;  %v1388_v41 = vld [vmem:[%s10600_s29 + $0x8] sm:$0x8] }
  0xd8   : > { %v482_v5 = vpop.f32.mrf.mxu1 }
  0xd9   : > { %9163 = vmatmul.msk.bf16.gmra.mxu0 %vm334_vm1, %v845_v61  ;;  %9141 = vmatmul.msk.bf16.gmra.mxu2 %vm334_vm1, %v533_v13  ;;  %v704_v61 = vrot.slane %v702_v50, 1  ;;  %v707_v13 = vrot.slane %v705_v20, 2  ;;  %v1057_v54 = vrot.slane %v1037_v44, 2  ;;  %v848_v50 = vrot.slane %v655_v37, 2 }
  0xdb   : > { %v708_v11 = vor.u32 %v707_v13, %v704_v61 }
  0xdc   : > { %v423_v23 = vpop.f32.mrf.mxu2 }
  0xdd   : > { %v10942_v22 = vadd.f32 %v505_v33, %v423_v23  ;;  %v709_v38 = vsel %vm656_vm3, %v699_v18, %v708_v11  ;;  %v1187_v11 = vshrl.u32 %v10767_v10, 16 }
  0xde   : > { %v507_v25 = vpop.f32.mrf.mxu3  ;;  %v400_v53 = vpop.f32.mrf.mxu0 }
  0xdf   : > { %v10944_v2 = vadd.f32 %v482_v5, %v400_v53  ;;  %v9272_v5 = vld [vmem:[%s13932_s1 + $0x16] sm:$0x3] }
  0xe0   : > { %v1101_v1 = vpop.f32.mrf.mxu1  ;;  %v2199_v6 = vsel %vm365_vm0, %v9272_v5, 0  ;;  %v9330_v5 = vld [vmem:[%s13932_s1 + $0x1a] sm:$0x3] }
  0xe1   : > { %2208 = vmatpush.bf16.msrb.mxu3 %v2199_v6  ;;  %v1182_v6 = vshll.u32 %v10764_v9, 16 }
  0xe3   : > { %9175 = vmatmul.msk.bf16.gmra.mxu1 %vm334_vm1, %v1056_v28  ;;  %9153 = vmatmul.msk.bf16.gmra.mxu3 %vm334_vm1, %v700_v14  ;;  %v1058_v28 = vsel %vm828_vm5, %v1055_v46, %v1057_v54  ;;  %v2509_v54 = vsel %vm365_vm0, %v9330_v5, 0 }
  0xe4   : > { %v425_v0 = vpop.f32.mrf.mxu2  ;;  %2518 = vmatpush.bf16.msrb.mxu1 %v2509_v54 }
  0xe5   : > { %v10953_v42 = vadd.f32 %v507_v25, %v425_v0  ;;  %v536_v0 = vrot.slane %v10729_v39, 1 }
  0xe6   : > { %v752_v47 = vpop.f32.mrf.mxu3  ;;  %v892_v31 = vpop.f32.mrf.mxu0 }
  0xe7   : > { %v537_v61 = vsel %vm516_vm4, %v534_v15, %v536_v0 }
  0xe8   : > { %v1103_v33 = vpop.f32.mrf.mxu1 }
  0xe9   : > { %9164 = vmatmul.msk.bf16.gmra.mxu0 %vm334_vm1, %v847_v36  ;;  %9142 = vmatmul.msk.bf16.gmra.mxu2 %vm334_vm1, %v535_v55  ;;  %v1392_v36 = vunpack.c.l.b16 %v1388_v41  ;;  %v1543_v41 = vrot.slane %v1187_v11, 3 }
  0xeb   : > { %v1393_v13 = vpack.c.b16 %v10750_v62, %v1392_v36 }
  0xec   : > { %v580_v43 = vpop.f32.mrf.mxu2 }
  0xed   : > { %v630_v35 = vadd.f32 %v580_v43, %v10824_v60  ;;  %v9319_v60 = vld [vmem:[%s13932_s1 + $0x18] sm:$0x3]  ;;  %v1190_v43 = vshll.u32 %v10767_v10, 16 }
  0xee   : > { %v754_v23 = vpop.f32.mrf.mxu3  ;;  %v894_v25 = vpop.f32.mrf.mxu0  ;;  %v2338_v55 = vsel %vm365_vm0, %v9319_v60, 0  ;;  %v1181_v60 = vrot.slane %v1179_v3, 2 }
  0xef   : > { %v802_v14 = vadd.f32 %v752_v47, %v630_v35  ;;  %2347 = vmatpush.bf16.msrb.mxu0 %v2338_v55  ;;  %v1395_v35 = vrot.slane %v1393_v13, 3  ;;  %v1544_v36 = vrot.slane %v1190_v43, 4  ;;  %v1184_v55 = vrot.slane %v1182_v6, 3 }
  0xf0   : > { %v10968_v53 = vpop.f32.mrf.mxu1 }
  0xf1   : > { %v942_v20 = vadd.f32 %v892_v31, %v802_v14  ;;  %v849_v31 = vsel %vm828_vm5, %v846_v12, %v848_v50  ;;  %v10103_v12 = vunpack.c.l.b16 %v10767_v10 }
  0xf3   : > { %9176 = vmatmul.msk.bf16.gmra.mxu1 %vm334_vm1, %v1058_v28  ;;  %9154 = vmatmul.msk.bf16.gmra.mxu3 %vm334_vm1, %v709_v38  ;;  %v10980_v46 = vadd.f32 %v1101_v1, %v942_v20  ;;  %v1536_v1 = vshrl.u32 %v1393_v13, 16  ;;  %v1702_v9 = vpack.c.b16 %v10103_v12, %v10750_v62 }
  0xf4   : > { %v582_v47 = vpop.f32.mrf.mxu2 }
  0xf5   : > { %v631_v18 = vadd.f32 %v582_v47, %v10839_v16  ;;  %v1539_v16 = vshll.u32 %v1393_v13, 16  ;;  %v1538_v38 = vrot.slane %v1536_v1, 3  ;;  %v1189_v47 = vrot.slane %v1187_v11, 2 }
  0xf6   : > { %v757_v37 = vpop.f32.mrf.mxu3  ;;  %v897_v44 = vpop.f32.mrf.mxu0  ;;  %v1545_v13 = vor.u32 %v1544_v36, %v1543_v41  ;;  %v1199_v11 = vshll.u32 %v10782_v27, 16 }
  0xf7   : > { %v803_v57 = vadd.f32 %v754_v23, %v631_v18  ;;  %v1396_v23 = vrot.slane %v10767_v10, 3  ;;  %v1541_v0 = vrot.slane %v1539_v16, 4  ;;  %v1192_v18 = vrot.slane %v1190_v43, 3 }
  0xf8   : > { %v1108_v39 = vpop.f32.mrf.mxu1 }
  0xf9   : > { %9165 = vmatmul.msk.bf16.gmra.mxu0 %vm334_vm1, %v849_v31  ;;  %9143 = vmatmul.msk.bf16.gmra.mxu2 %vm334_vm1, %v537_v61  ;;  %v943_v15 = vadd.f32 %v894_v25, %v803_v57  ;;  %v1542_v61 = vor.u32 %v1541_v0, %v1538_v38  ;;  %v1193_v5 = vor.u32 %v1192_v18, %v1189_v47  ;;  %v10378_v0 = vld [vmem:[%s10600_s29 + $0x14] sm:$0xff]  }
  0xfb   : > { %v10998_v28 = vadd.f32 %v1103_v33, %v943_v15  ;;  %v1397_v33 = vsel %vm1394_vm6, %v1395_v35, %v1396_v23  ;;  %v1546_v12 = vsel %vm1534_vm7, %v1542_v61, %v1545_v13 }
  0xfc   : > { %v585_v14 = vpop.f32.mrf.mxu2 }
  0xfd   : > { %v632_v50 = vadd.f32 %v585_v14, %v10850_v29  ;;  %v1185_v29 = vor.u32 %v1184_v55, %v1181_v60 }
  0xfe   : > { %v759_v25 = vpop.f32.mrf.mxu3  ;;  %v899_v20 = vpop.f32.mrf.mxu0 }
  0xff   : > { %v804_v10 = vadd.f32 %v757_v37, %v632_v50  ;;  %v1194_v15 = vsel %vm1177_vm8, %v1185_v29, %v1193_v5 }
 0x100   : > { %v1111_v31 = vpop.f32.mrf.mxu1 }
 0x101   : > { %v944_v57 = vadd.f32 %v897_v44, %v804_v10 }
 0x103   : > { %9211 = vmatmul.msk.bf16.vlgmr.msra.gmra.mxu1 %vm334_vm1, %v1702_v9  ;;  %9189 = vmatmul.msk.bf16.vlgmr.msra.gmra.mxu3 %vm334_vm1, %v1397_v33  ;;  %v11006_v62 = vadd.f32 %v10968_v53, %v944_v57  ;;  %v1196_v53 = vshrl.u32 %v10782_v27, 16  ;;  %v1201_v9 = vrot.slane %v1199_v11, 3 }
 0x104   : > { %v587_v1 = vpop.f32.mrf.mxu2 }
 0x105   : > { %v633_v54 = vadd.f32 %v587_v1, %v10865_v49  ;;  %v1398_v49 = vrot.slane %v10782_v27, 3  ;;  %v1547_v50 = vrot.slane %v1196_v53, 3  ;;  %v1198_v36 = vrot.slane %v1196_v53, 2  ;;  %v10380_v53 = vld [vmem:[%s10600_s29 + $0x1c] sm:$0xff]  }
 0x106   : > { %v762_v37 = vpop.f32.mrf.mxu3  ;;  %v902_v16 = vpop.f32.mrf.mxu0 }
 0x107   : > { %v805_v3 = vadd.f32 %v759_v25, %v633_v54  ;;  %v1548_v25 = vrot.slane %v1199_v11, 4  ;;  %v1399_v55 = vsel %vm1394_vm6, %v1396_v23, %v1398_v49 }
 0x108   : > { %v1113_v44 = vpop.f32.mrf.mxu1 }
 0x109   : > { %9200 = vmatmul.msk.bf16.vlgmr.msra.gmra.mxu0 %vm334_vm1, %v1546_v12  ;;  %9178 = vmatmul.msk.bf16.vlgmr.msra.gmra.mxu2 %vm334_vm1, %v1194_v15  ;;  %v945_v6 = vadd.f32 %v899_v20, %v805_v3  ;;  %v1549_v47 = vor.u32 %v1548_v25, %v1547_v50 }
 0x10b   : > { %v11016_v43 = vadd.f32 %v1108_v39, %v945_v6  ;;  %v1202_v39 = vor.u32 %v1201_v9, %v1198_v36  ;;  %v1550_v57 = vsel %vm1534_vm7, %v1545_v13, %v1549_v47 }
 0x10c   : > { %v590_v35 = vpop.f32.mrf.mxu2 }
 0x10d   : > { %v634_v14 = vadd.f32 %v590_v35, %v10876_v59  ;;  %v1203_v29 = vsel %vm1177_vm8, %v1193_v5, %v1202_v39 }
 0x10e   : > { %v764_v38 = vpop.f32.mrf.mxu3  ;;  %v904_v41 = vpop.f32.mrf.mxu0 }
 0x10f   : > { %v806_v20 = vadd.f32 %v762_v37, %v634_v14  ;;  %v1208_v37 = vshll.u32 %v10797_v24, 16 }
 0x110   : > { %v1116_v60 = vpop.f32.mrf.mxu1 }
 0x111   : > { %v946_v27 = vadd.f32 %v902_v16, %v806_v20  ;;  %v1552_v6 = vrot.slane %v1208_v37, 4  ;;  %v1210_v35 = vrot.slane %v1208_v37, 3 }
 0x113   : > { %9212 = vmatmul.msk.bf16.gmra.mxu1 %vm334_vm1, %v10378_v0  ;;  %9190 = vmatmul.msk.bf16.gmra.mxu3 %vm334_vm1, %v1399_v55  ;;  %v11023_v18 = vadd.f32 %v1111_v31, %v946_v27  ;;  %v1205_v31 = vshrl.u32 %v10797_v24, 16 }
 0x114   : > { %v592_v59 = vpop.f32.mrf.mxu2 }
 0x115   : > { %v635_v10 = vadd.f32 %v592_v59, %v10891_v21  ;;  %v1400_v21 = vrot.slane %v10797_v24, 3  ;;  %v1551_v3 = vrot.slane %v1205_v31, 3  ;;  %v1207_v11 = vrot.slane %v1205_v31, 2 }
 0x116   : > { %v767_v33 = vpop.f32.mrf.mxu3  ;;  %v907_v61 = vpop.f32.mrf.mxu0 }
 0x117   : > { %v807_v1 = vadd.f32 %v764_v38, %v635_v10  ;;  %v1553_v50 = vor.u32 %v1552_v6, %v1551_v3  ;;  %v1217_v10 = vshll.u32 %v10812_v48, 16 }
 0x118   : > { %v1118_v23 = vpop.f32.mrf.mxu1 }
 0x119   : > { %9201 = vmatmul.msk.bf16.gmra.mxu0 %vm334_vm1, %v1550_v57  ;;  %9179 = vmatmul.msk.bf16.gmra.mxu2 %vm334_vm1, %v1203_v29  ;;  %v947_v54 = vadd.f32 %v904_v41, %v807_v1  ;;  %v1401_v41 = vsel %vm1394_vm6, %v1398_v49, %v1400_v21  ;;  %v1554_v20 = vsel %vm1534_vm7, %v1549_v47, %v1553_v50  ;;  %v1556_v1 = vrot.slane %v1217_v10, 4 }
 0x11a   : > { %v1219_v37 = vrot.slane %v1217_v10, 3 }
 0x11b   : > { %v11033_v16 = vadd.f32 %v1113_v44, %v947_v54  ;;  %v1211_v44 = vor.u32 %v1210_v35, %v1207_v11  ;;  %v10382_v54 = vld [vmem:[%s10600_s29 + $0x24] sm:$0xff]  }
 0x11c   : > { %v595_v12 = vpop.f32.mrf.mxu2 }
 0x11d   : > { %v636_v13 = vadd.f32 %v595_v12, %v10902_v32  ;;  %v1212_v55 = vsel %vm1177_vm8, %v1202_v39, %v1211_v44 }
 0x11e   : > { %v769_v5 = vpop.f32.mrf.mxu3  ;;  %v909_v15 = vpop.f32.mrf.mxu0 }
 0x11f   : > { %v808_v38 = vadd.f32 %v767_v33, %v636_v13 }
 0x120   : > { %v1121_v14 = vpop.f32.mrf.mxu1 }
 0x121   : > { %v948_v24 = vadd.f32 %v907_v61, %v808_v38 }
 0x123   : > { %9213 = vmatmul.msk.bf16.gmra.mxu1 %vm334_vm1, %v10380_v53  ;;  %9191 = vmatmul.msk.bf16.gmra.mxu3 %vm334_vm1, %v1401_v41  ;;  %v11040_v25 = vadd.f32 %v1116_v60, %v948_v24  ;;  %v1214_v60 = vshrl.u32 %v10812_v48, 16 }
 0x124   : > { %v597_v32 = vpop.f32.mrf.mxu2 }
 0x125   : > { %v637_v0 = vadd.f32 %v597_v32, %v10917_v52  ;;  %v1402_v52 = vrot.slane %v10812_v48, 3  ;;  %v1555_v29 = vrot.slane %v1214_v60, 3  ;;  %v1216_v31 = vrot.slane %v1214_v60, 2 }
 0x126   : > { %v772_v36 = vpop.f32.mrf.mxu3  ;;  %v912_v9 = vpop.f32.mrf.mxu0  ;;  %v1226_v32 = vshll.u32 %v10832_v4, 16 }
 0x127   : > { %v809_v27 = vadd.f32 %v769_v5, %v637_v0  ;;  %v1403_v5 = vsel %vm1394_vm6, %v1400_v21, %v1402_v52 }
 0x128   : > { %v1123_v49 = vpop.f32.mrf.mxu1  ;;  %v1228_v60 = vrot.slane %v1226_v32, 3 }
 0x129   : > { %9202 = vmatmul.msk.bf16.gmra.mxu0 %vm334_vm1, %v1554_v20  ;;  %9180 = vmatmul.msk.bf16.gmra.mxu2 %vm334_vm1, %v1212_v55  ;;  %v949_v59 = vadd.f32 %v909_v15, %v809_v27  ;;  %v1557_v15 = vor.u32 %v1556_v1, %v1555_v29  ;;  %v1560_v55 = vrot.slane %v1226_v32, 4  ;;  %v10384_v27 = vld [vmem:[%s10600_s29 + $0x2c] sm:$0xff]  }
 0x12b   : > { %v11050_v33 = vadd.f32 %v1118_v23, %v949_v59  ;;  %v1220_v23 = vor.u32 %v1219_v37, %v1216_v31  ;;  %v1558_v35 = vsel %vm1534_vm7, %v1553_v50, %v1557_v15 }
 0x12c   : > { %v600_v61 = vpop.f32.mrf.mxu2 }
 0x12d   : > { %v638_v47 = vadd.f32 %v600_v61, %v10928_v63  ;;  %v1221_v38 = vsel %vm1177_vm8, %v1211_v44, %v1220_v23 }
 0x12e   : > { %v774_v39 = vpop.f32.mrf.mxu3  ;;  %v914_v57 = vpop.f32.mrf.mxu0 }
 0x12f   : > { %v810_v13 = vadd.f32 %v772_v36, %v638_v47 }
 0x130   : > { %v1126_v12 = vpop.f32.mrf.mxu1 }
 0x131   : > { %v950_v48 = vadd.f32 %v912_v9, %v810_v13 }
 0x133   : > { %9214 = vmatmul.msk.bf16.gmra.mxu1 %vm334_vm1, %v10382_v54  ;;  %9192 = vmatmul.msk.bf16.gmra.mxu3 %vm334_vm1, %v1403_v5  ;;  %v11057_v3 = vadd.f32 %v1121_v14, %v950_v48  ;;  %v1223_v14 = vshrl.u32 %v10832_v4, 16  ;;  %v1235_v48 = vshll.u32 %v10858_v40, 16 }
 0x134   : > { %v602_v63 = vpop.f32.mrf.mxu2 }
 0x135   : > { %v639_v6 = vadd.f32 %v602_v63, %v10944_v2  ;;  %v1404_v2 = vrot.slane %v10832_v4, 3  ;;  %v1559_v20 = vrot.slane %v1223_v14, 3  ;;  %v1225_v59 = vrot.slane %v1223_v14, 2 }
 0x136   : > { %v777_v53 = vpop.f32.mrf.mxu3  ;;  %v917_v11 = vpop.f32.mrf.mxu0 }
 0x137   : > { %v811_v41 = vadd.f32 %v774_v39, %v639_v6  ;;  %v1405_v47 = vsel %vm1394_vm6, %v1402_v52, %v1404_v2  ;;  %v1561_v39 = vor.u32 %v1560_v55, %v1559_v20 }
 0x138   : > { %v1128_v21 = vpop.f32.mrf.mxu1 }
 0x139   : > { %9203 = vmatmul.msk.bf16.gmra.mxu0 %vm334_vm1, %v1558_v35  ;;  %9181 = vmatmul.msk.bf16.gmra.mxu2 %vm334_vm1, %v1221_v38  ;;  %v951_v24 = vadd.f32 %v914_v57, %v811_v41  ;;  %v1562_v31 = vsel %vm1534_vm7, %v1557_v15, %v1561_v39  ;;  %v1564_v35 = vrot.slane %v1235_v48, 4  ;;  %v10386_v38 = vld [vmem:[%s10600_s29 + $0x34] sm:$0xff]  }
 0x13b   : > { %v11067_v0 = vadd.f32 %v1123_v49, %v951_v24  ;;  %v1229_v49 = vor.u32 %v1228_v60, %v1225_v59  ;;  %v1237_v24 = vrot.slane %v1235_v48, 3 }
 0x13c   : > { %v605_v36 = vpop.f32.mrf.mxu2 }
 0x13d   : > { %v640_v50 = vadd.f32 %v605_v36, %v10837_v7  ;;  %v1230_v37 = vsel %vm1177_vm8, %v1220_v23, %v1229_v49 }
 0x13e   : > { %v779_v44 = vpop.f32.mrf.mxu3  ;;  %v919_v9 = vpop.f32.mrf.mxu0 }
 0x13f   : > { %v812_v61 = vadd.f32 %v777_v53, %v640_v50 }
 0x140   : > { %v1131_v10 = vpop.f32.mrf.mxu1 }
 0x141   : > { %v952_v4 = vadd.f32 %v917_v11, %v812_v61 }
 0x143   : > { %9215 = vmatmul.msk.bf16.gmra.mxu1 %vm334_vm1, %v10384_v27  ;;  %9193 = vmatmul.msk.bf16.gmra.mxu3 %vm334_vm1, %v1405_v47  ;;  %v11074_v57 = vadd.f32 %v1126_v12, %v952_v4  ;;  %v1232_v12 = vshrl.u32 %v10858_v40, 16  ;;  %v1244_v47 = vshll.u32 %v10884_v58, 16 }
 0x144   : > { %v607_v7 = vpop.f32.mrf.mxu2 }
 0x145   : > { %v641_v29 = vadd.f32 %v607_v7, %v10847_v26  ;;  %v1406_v26 = vrot.slane %v10858_v40, 3  ;;  %v1563_v11 = vrot.slane %v1232_v12, 3  ;;  %v1234_v41 = vrot.slane %v1232_v12, 2 }
 0x146   : > { %v782_v1 = vpop.f32.mrf.mxu3  ;;  %v922_v54 = vpop.f32.mrf.mxu0 }
 0x147   : > { %v813_v13 = vadd.f32 %v779_v44, %v641_v29  ;;  %v1407_v36 = vsel %vm1394_vm6, %v1404_v2, %v1406_v26  ;;  %v1565_v50 = vor.u32 %v1564_v35, %v1563_v11 }
 0x148   : > { %v1133_v52 = vpop.f32.mrf.mxu1 }
 0x149   : > { %9204 = vmatmul.msk.bf16.gmra.mxu0 %vm334_vm1, %v1562_v31  ;;  %9182 = vmatmul.msk.bf16.gmra.mxu2 %vm334_vm1, %v1230_v37  ;;  %v953_v5 = vadd.f32 %v919_v9, %v813_v13  ;;  %v1566_v27 = vsel %vm1534_vm7, %v1561_v39, %v1565_v50  ;;  %v10388_v31 = vld [vmem:[%s10600_s29 + $0x3c] sm:$0xff]   ;;  %v1246_v13 = vrot.slane %v1244_v47, 3 }
 0x14b   : > { %v11084_v63 = vadd.f32 %v1128_v21, %v953_v5  ;;  %v1238_v21 = vor.u32 %v1237_v24, %v1234_v41 }
 0x14c   : > { %v610_v6 = vpop.f32.mrf.mxu2 }
 0x14d   : > { %v642_v15 = vadd.f32 %v610_v6, %v10863_v17  ;;  %v1239_v59 = vsel %vm1177_vm8, %v1229_v49, %v1238_v21 }
 0x14e   : > { %v784_v23 = vpop.f32.mrf.mxu3  ;;  %v924_v53 = vpop.f32.mrf.mxu0 }
 0x14f   : > { %v814_v32 = vadd.f32 %v782_v1, %v642_v15 }
 0x150   : > { %v1136_v14 = vpop.f32.mrf.mxu1 }
 0x151   : > { %v954_v40 = vadd.f32 %v922_v54, %v814_v32  ;;  %v1568_v54 = vrot.slane %v1244_v47, 4  ;;  %v1253_v32 = vshll.u32 %v10910_v30, 16 }
 0x153   : > { %9216 = vmatmul.msk.bf16.gmra.mxu1 %vm334_vm1, %v10386_v38  ;;  %9194 = vmatmul.msk.bf16.gmra.mxu3 %vm334_vm1, %v1407_v36  ;;  %v11091_v44 = vadd.f32 %v1131_v10, %v954_v40  ;;  %v1241_v10 = vshrl.u32 %v10884_v58, 16 }
 0x154   : > { %v612_v17 = vpop.f32.mrf.mxu2 }
 0x155   : > { %v643_v9 = vadd.f32 %v612_v17, %v10873_v51  ;;  %v1408_v51 = vrot.slane %v10884_v58, 3  ;;  %v1567_v1 = vrot.slane %v1241_v10, 3  ;;  %v1243_v37 = vrot.slane %v1241_v10, 2 }
 0x156   : > { %v787_v20 = vpop.f32.mrf.mxu3  ;;  %v927_v55 = vpop.f32.mrf.mxu0 }
 0x157   : > { %v815_v60 = vadd.f32 %v784_v23, %v643_v9  ;;  %v1409_v48 = vsel %vm1394_vm6, %v1406_v26, %v1408_v51  ;;  %v1569_v6 = vor.u32 %v1568_v54, %v1567_v1 }
 0x158   : > { %v1138_v2 = vpop.f32.mrf.mxu1 }
 0x159   : > { %9205 = vmatmul.msk.bf16.gmra.mxu0 %vm334_vm1, %v1566_v27  ;;  %9183 = vmatmul.msk.bf16.gmra.mxu2 %vm334_vm1, %v1239_v59  ;;  %v955_v61 = vadd.f32 %v924_v53, %v815_v60  ;;  %v1570_v35 = vsel %vm1534_vm7, %v1565_v50, %v1569_v6  ;;  %v1255_v59 = vrot.slane %v1253_v32, 3 }
 0x15b   : > { %v11101_v4 = vadd.f32 %v1133_v52, %v955_v61  ;;  %v1247_v52 = vor.u32 %v1246_v13, %v1243_v37  ;;  %v1259_v13 = vshrl.u32 %v10936_v19, 16 }
 0x15c   : > { %v615_v7 = vpop.f32.mrf.mxu2 }
 0x15d   : > { %v644_v39 = vadd.f32 %v615_v7, %v10889_v8  ;;  %v1248_v38 = vsel %vm1177_vm8, %v1238_v21, %v1247_v52 }
 0x15e   : > { %v789_v49 = vpop.f32.mrf.mxu3  ;;  %v929_v29 = vpop.f32.mrf.mxu0 }
 0x15f   : > { %v816_v12 = vadd.f32 %v787_v20, %v644_v39  ;;  %v1572_v20 = vrot.slane %v1253_v32, 4 }
 0x160   : > { %v1141_v5 = vpop.f32.mrf.mxu1 }
 0x161   : > { %v956_v58 = vadd.f32 %v927_v55, %v816_v12  ;;  %v10390_v55 = vld [vmem:[%s10600_s29 + $0x44] sm:$0xff]  }
 0x163   : > { %9217 = vmatmul.msk.bf16.gmra.mxu1 %vm334_vm1, %v10388_v31  ;;  %9195 = vmatmul.msk.bf16.gmra.mxu3 %vm334_vm1, %v1409_v48  ;;  %v11108_v15 = vadd.f32 %v1136_v14, %v956_v58  ;;  %v1250_v14 = vshrl.u32 %v10910_v30, 16 }
 0x164   : > { %v617_v8 = vpop.f32.mrf.mxu2 }
 0x165   : > { %v645_v23 = vadd.f32 %v617_v8, %v10899_v45  ;;  %v1410_v45 = vrot.slane %v10910_v30, 3  ;;  %v1571_v9 = vrot.slane %v1250_v14, 3  ;;  %v1252_v27 = vrot.slane %v1250_v14, 2 }
 0x166   : > { %v792_v53 = vpop.f32.mrf.mxu3  ;;  %v932_v11 = vpop.f32.mrf.mxu0  ;;  %v1575_v8 = vrot.slane %v1259_v13, 3 }
 0x167   : > { %v817_v41 = vadd.f32 %v789_v49, %v645_v23  ;;  %v1411_v10 = vsel %vm1394_vm6, %v1408_v51, %v1410_v45  ;;  %v1573_v47 = vor.u32 %v1572_v20, %v1571_v9 }
 0x168   : > { %v1143_v26 = vpop.f32.mrf.mxu1 }
 0x169   : > { %9206 = vmatmul.msk.bf16.gmra.mxu0 %vm334_vm1, %v1570_v35  ;;  %9184 = vmatmul.msk.bf16.gmra.mxu2 %vm334_vm1, %v1248_v38  ;;  %v957_v24 = vadd.f32 %v929_v29, %v817_v41  ;;  %v1574_v1 = vsel %vm1534_vm7, %v1569_v6, %v1573_v47  ;;  %v1528_v41 = vld [vmem:[%s10600_s29 + $0x58] sm:$0xf] }
 0x16b   : > { %v11118_v36 = vadd.f32 %v1138_v2, %v957_v24  ;;  %v1256_v2 = vor.u32 %v1255_v59, %v1252_v27 }
 0x16c   : > { %v620_v40 = vpop.f32.mrf.mxu2 }
 0x16d   : > { %v646_v50 = vadd.f32 %v620_v40, %v10915_v34  ;;  %v1257_v54 = vsel %vm1177_vm8, %v1247_v52, %v1256_v2 }
 0x16e   : > { %v794_v21 = vpop.f32.mrf.mxu3  ;;  %v934_v17 = vpop.f32.mrf.mxu0 }
 0x16f   : > { %v818_v61 = vadd.f32 %v792_v53, %v646_v50  ;;  %v10391_v53 = vld [vmem:[%s10600_s29 + $0x4c] sm:$0xff]  }
 0x170   : > { %v1146_v60 = vpop.f32.mrf.mxu1 }
 0x171   : > { %v958_v30 = vadd.f32 %v932_v11, %v818_v61  ;;  %v1261_v11 = vrot.slane %v1259_v13, 2 }
 0x173   : > { %9218 = vmatmul.msk.bf16.gmra.mxu1 %vm334_vm1, %v10390_v55  ;;  %9196 = vmatmul.msk.bf16.gmra.mxu3 %vm334_vm1, %v1411_v10  ;;  %v11125_v7 = vadd.f32 %v1141_v5, %v958_v30  ;;  %v1262_v5 = vshll.u32 %v10936_v19, 16 }
 0x174   : > { %v622_v34 = vpop.f32.mrf.mxu2 }
 0x175   : > { %v647_v39 = vadd.f32 %v622_v34, %v10925_v56  ;;  %v1412_v56 = vrot.slane %v10936_v19, 3  ;;  %v1576_v23 = vrot.slane %v1262_v5, 4  ;;  %v1264_v35 = vrot.slane %v1262_v5, 3 }
 0x176   : > { %v797_v49 = vpop.f32.mrf.mxu3  ;;  %v937_v29 = vpop.f32.mrf.mxu0 }
 0x177   : > { %v819_v31 = vadd.f32 %v794_v21, %v647_v39  ;;  %v1413_v14 = vsel %vm1394_vm6, %v1410_v45, %v1412_v56  ;;  %v11146_v32 = vor.u32 %v1576_v23, %v1575_v8  ;;  %v11150_v50 = vor.u32 %v1264_v35, %v1261_v11  ;;  %v2280_v39 = vld [vmem:[%s10600_s29 + $0x14] sm:$0xe] }
 0x178   : > { %v1148_v51 = vpop.f32.mrf.mxu1  ;;  %v2284_v13 = vunpack.c.l.b16 %v2280_v39 }
 0x179   : > { %9207 = vmatmul.msk.bf16.gmra.mxu0 %vm334_vm1, %v1574_v1  ;;  %9185 = vmatmul.msk.bf16.gmra.mxu2 %vm334_vm1, %v1257_v54  ;;  %v959_v37 = vadd.f32 %v934_v17, %v819_v31  ;;  %v1578_v27 = vsel %vm1534_vm7, %v1573_v47, %v11146_v32  ;;  %v1266_v61 = vsel %vm1177_vm8, %v1256_v2, %v11150_v50  ;;  %v10136_v47 = vunpack.c.h.b16 %v10936_v19  ;;  %v9341_v2 = vld [vmem:[%s13932_s1 + $0x1c] sm:$0x3]  ;;  %v9352_v54 = vld [vmem:[%s13932_s1 + $0x1e] sm:$0x3]  ;;  %v9363_v19 = vld [vmem:[%s13932_s1 + $0x20] sm:$0x3] }
 0x17a   : > { %v2857_v5 = vsel %vm365_vm0, %v9352_v54, 0 }
 0x17b   : > { %v11135_v12 = vadd.f32 %v1143_v26, %v959_v37  ;;  %v1171_v26 = vld [vmem:[%s10600_s29 + $0x58] sm:$0x7]  ;;  %v2648_v37 = vsel %vm365_vm0, %v9341_v2, 0  ;;  %2866 = vmatpush.bf16.msra.mxu3 %v2857_v5 }
 0x17c   : > { %v625_v48 = vpop.f32.mrf.mxu2  ;;  %v1175_v21 = vunpack.c.l.b16 %v1171_v26  ;;  %2657 = vmatpush.bf16.msra.mxu2 %v2648_v37 }
 0x17d   : > { %v648_v6 = vadd.f32 %v625_v48, %v10942_v22  ;;  %v1532_v22 = vunpack.c.l.b16 %v1528_v41 }
 0x17e   : > { %v799_v58 = vpop.f32.mrf.mxu3  ;;  %v939_v52 = vpop.f32.mrf.mxu0  ;;  %v1176_v30 = vpack.c.b16 %v1175_v21, %v1175_v21 }
 0x17f   : > { %v820_v24 = vadd.f32 %v797_v49, %v648_v6  ;;  %v1533_v59 = vpack.c.b16 %v1532_v22, %v1532_v22 }
 0x180   : > { %v11139_v38 = vpop.f32.mrf.mxu1  ;;  %v1271_v49 = vshll.u32 %v1176_v30, 16  ;;  %v1414_v48 = vrot.slane %v1176_v30, 3 }
 0x181   : > { %v960_v40 = vadd.f32 %v937_v29, %v820_v24  ;;  %v11164_v29 = vld [vmem:[%s10600_s29 + $0x14] sm:$0xff]   ;;  %v1583_v1 = vshll.u32 %v1533_v59, 16 }
 0x182   : > { %v2053_v6 = vunpack.c.h.b16 %v11164_v29 }
 0x183   : > { %9219 = vmatmul.msk.bf16.gmra.mxu1 %vm334_vm1, %v10391_v53  ;;  %9197 = vmatmul.msk.bf16.gmra.mxu3 %vm334_vm1, %v1413_v14  ;;  %v11152_v17 = vadd.f32 %v1146_v60, %v960_v40  ;;  %v1268_v60 = vshrl.u32 %v1176_v30, 16  ;;  %v1273_v53 = vrot.slane %v1271_v49, 3  ;;  %v1585_v24 = vrot.slane %v1583_v1, 4 }
 0x184   : > { %v627_v9 = vpop.f32.mrf.mxu2  ;;  %v1711_v14 = vpack.c.b16 %v1532_v22, %v10136_v47  ;;  %v11182_v40 = vpack.c.b16 %v2053_v6, %v2284_v13  ;;  %v2085_v13 = vshrl.u32 %v11164_v29, 16 }
 0x185   : > { %v649_v20 = vadd.f32 %v627_v9, %v10953_v42  ;;  %v1580_v42 = vshrl.u32 %v1533_v59, 16  ;;  %v1270_v23 = vrot.slane %v1268_v60, 2  ;;  %v11188_v9 = vld [vmem:[%s10600_s29 + $0x1c] sm:$0xff] }
 0x186   : > { %v1458_v45 = vpop.f32.mrf.mxu3  ;;  %v1630_v55 = vpop.f32.mrf.mxu0  ;;  %v2096_v22 = vshrl.u32 %v11188_v9, 16  ;;  %v2426_v59 = vshrl.u32 %v11182_v40, 16 }
 0x187   : > { %v821_v34 = vadd.f32 %v799_v58, %v649_v20  ;;  %v1582_v41 = vrot.slane %v1580_v42, 3  ;;  %v1274_v20 = vor.u32 %v1273_v53, %v1270_v23 }
 0x188   : > { %v11159_v10 = vpop.f32.mrf.mxu1  ;;  %v2428_v2 = vrot.slane %v2426_v59, 1  ;;  %v2287_v59 = vrot.slane %v11188_v9, 1 }
 0x189   : > { %9208 = vmatmul.msk.bf16.gmra.mxu0 %vm334_vm1, %v1578_v27  ;;  %9186 = vmatmul.msk.bf16.gmra.mxu2 %vm334_vm1, %v1266_v61  ;;  %v961_v31 = vadd.f32 %v939_v52, %v821_v34  ;;  %v1586_v27 = vor.u32 %v1585_v24, %v1582_v41  ;;  %v2429_v61 = vshll.u32 %v11182_v40, 16  ;;  %v2092_v34 = vshll.u32 %v11188_v9, 16 }
 0x18a   : > { %v1275_v42 = vsel %vm1177_vm8, %v11150_v50, %v1274_v20 }
 0x18b   : > { %v11177_v58 = vadd.f32 %v1148_v51, %v961_v31  ;;  %v1415_v51 = vsel %vm1394_vm6, %v1412_v56, %v1414_v48  ;;  %v2087_v56 = vshll.u32 %v11164_v29, 16  ;;  %v1587_v1 = vsel %vm1534_vm7, %v11146_v32, %v1586_v27 }
 0x18c   : > { %v1318_v8 = vpop.f32.mrf.mxu2  ;;  %v2431_v54 = vrot.slane %v2429_v61, 2  ;;  %v2434_v31 = vrot.slane %v2092_v34, 2  ;;  %v2094_v53 = vrot.slane %v2092_v34, 1 }
 0x18d   : > { %v1368_v11 = vadd.f32 %v1318_v8, %v10980_v46  ;;  %v2089_v5 = vrot.slane %v2087_v56, 1 }
 0x18e   : > { %v1460_v35 = vpop.f32.mrf.mxu3  ;;  %v1632_v52 = vpop.f32.mrf.mxu0  ;;  %v2432_v48 = vor.u32 %v2431_v54, %v2428_v2  ;;  %v2098_v54 = vor.u32 %v2096_v22, %v2094_v53 }
 0x18f   : > { %v1508_v21 = vadd.f32 %v1458_v45, %v1368_v11  ;;  %v3073_v45 = vsel %vm365_vm0, %v9363_v19, 0  ;;  %v2090_v23 = vor.u32 %v2089_v5, %v2085_v13 }
 0x190   : > { %v1759_v26 = vpop.f32.mrf.mxu1  ;;  %3082 = vmatpush.bf16.msra.mxu0 %v3073_v45 }
 0x191   : > { %v1680_v46 = vadd.f32 %v1630_v55, %v1508_v21  ;;  %v2095_v27 = vsel %vm249_vm2, %v2090_v23, %v2094_v53  ;;  %v11248_v23 = vld [vmem:[%s10600_s29 + $0x2c] sm:$0xff] }
 0x193   : > { %9220 = vmatmul.msk.bf16.gmra.mxu1 %vm334_vm1, %v1711_v14  ;;  %9198 = vmatmul.msk.bf16.gmra.mxu3 %vm334_vm1, %v1415_v51  ;;  %v11201_v30 = vadd.f32 %v11139_v38, %v1680_v46  ;;  %v2433_v38 = vrot.slane %v2096_v22, 1  ;;  %v2286_v46 = vrot.slane %v11182_v40, 1 }
 0x194   : > { %v1320_v55 = vpop.f32.mrf.mxu2 }
 0x195   : > { %v1369_v39 = vadd.f32 %v1320_v55, %v10998_v28  ;;  %v9374_v28 = vld [vmem:[%s13932_s1 + $0x22] sm:$0x3]  ;;  %v2435_v8 = vor.u32 %v2434_v31, %v2433_v38  ;;  %v2288_v40 = vsel %vm516_vm4, %v2286_v46, %v2287_v59 }
 0x196   : > { %v1463_v60 = vpop.f32.mrf.mxu3  ;;  %v1635_v49 = vpop.f32.mrf.mxu0  ;;  %v3212_v50 = vsel %vm365_vm0, %v9374_v28, 0 }
 0x197   : > { %v1509_v37 = vadd.f32 %v1460_v35, %v1369_v39  ;;  %3221 = vmatpush.bf16.msra.mxu1 %v3212_v50  ;;  %v2436_v51 = vsel %vm656_vm3, %v2432_v48, %v2435_v8  ;;  %v10012_v39 = vld [vmem:[%s10600_s29 + $0x14] sm:$0xff] }
 0x198   : > { %v1761_v47 = vpop.f32.mrf.mxu1 }
 0x199   : > { %9209 = vmatmul.msk.bf16.gmra.mxu0 %vm334_vm1, %v1587_v1  ;;  %9187 = vmatmul.msk.bf16.gmra.mxu2 %vm334_vm1, %v1275_v42  ;;  %v1681_v32 = vadd.f32 %v1632_v52, %v1509_v37  ;;  %v11225_v52 = vld [vmem:[%s10600_s29 + $0x24] sm:$0xff] }
 0x19a   : > { %v2100_v56 = vshll.u32 %v11225_v52, 16 }
 0x19b   : > { %v11219_v11 = vadd.f32 %v11159_v10, %v1681_v32 }
 0x19c   : > { %v1323_v35 = vpop.f32.mrf.mxu2  ;;  %v2438_v1 = vrot.slane %v2100_v56, 2 }
 0x19d   : > { %v1370_v41 = vadd.f32 %v1323_v35, %v11006_v62  ;;  %v2104_v62 = vshrl.u32 %v11225_v52, 16  ;;  %v2289_v35 = vrot.slane %v11225_v52, 1 }
 0x19e   : > { %v1465_v24 = vpop.f32.mrf.mxu3  ;;  %v1637_v14 = vpop.f32.mrf.mxu0 }
 0x19f   : > { %v1510_v20 = vadd.f32 %v1463_v60, %v1370_v41  ;;  %v2437_v42 = vrot.slane %v2104_v62, 1  ;;  %v2108_v41 = vshll.u32 %v11248_v23, 16 }
 0x1a0   : > { %v1764_v21 = vpop.f32.mrf.mxu1 }
 0x1a1   : > { %v1682_v10 = vadd.f32 %v1635_v49, %v1510_v20  ;;  %v2439_v2 = vor.u32 %v2438_v1, %v2437_v42  ;;  %v2290_v20 = vsel %vm516_vm4, %v2287_v59, %v2289_v35 }
 0x1a3   : > { %9331 = vmatmul.msk.bf16.vlgmr.msrb.gmra.mxu1 %vm334_vm1, %v2436_v51  ;;  %9309 = vmatmul.msk.bf16.vlgmr.msrb.gmra.mxu3 %vm334_vm1, %v2095_v27  ;;  %v11232_v61 = vadd.f32 %v1759_v26, %v1682_v10  ;;  %v2440_v50 = vsel %vm656_vm3, %v2435_v8, %v2439_v2  ;;  %v10013_v51 = vld [vmem:[%s10600_s29 + $0x1c] sm:$0xff]  ;;  %v2442_v10 = vrot.slane %v2108_v41, 2 }
 0x1a4   : > { %v1325_v19 = vpop.f32.mrf.mxu2 }
 0x1a5   : > { %v1371_v45 = vadd.f32 %v1325_v19, %v11016_v43  ;;  %v2102_v43 = vrot.slane %v2100_v56, 1 }
 0x1a6   : > { %v1468_v55 = vpop.f32.mrf.mxu3  ;;  %v1640_v34 = vpop.f32.mrf.mxu0 }
 0x1a7   : > { %v1511_v49 = vadd.f32 %v1465_v24, %v1371_v45  ;;  %v2103_v48 = vsel %vm249_vm2, %v2098_v54, %v2102_v43  ;;  %v2106_v45 = vor.u32 %v2104_v62, %v2102_v43  ;;  %v11268_v54 = vld [vmem:[%s10600_s29 + $0x34] sm:$0xff] }
 0x1a8   : > { %v1766_v60 = vpop.f32.mrf.mxu1 }
 0x1a9   : > { %9320 = vmatmul.msk.bf16.vlgmr.msrb.gmra.mxu0 %vm334_vm1, %v2288_v40  ;;  %9262 = vmatmul.msk.bf16.vlgmr.msrb.gmra.mxu2 %vm334_vm1, %v10012_v39  ;;  %v1683_v26 = vadd.f32 %v1637_v14, %v1511_v49 }
 0x1ab   : > { %v11242_v38 = vadd.f32 %v1761_v47, %v1683_v26 }
 0x1ac   : > { %v1328_v31 = vpop.f32.mrf.mxu2 }
 0x1ad   : > { %v1372_v37 = vadd.f32 %v1328_v31, %v11023_v18  ;;  %v2112_v18 = vshrl.u32 %v11248_v23, 16  ;;  %v2291_v31 = vrot.slane %v11248_v23, 1 }
 0x1ae   : > { %v1470_v13 = vpop.f32.mrf.mxu3  ;;  %v1642_v5 = vpop.f32.mrf.mxu0 }
 0x1af   : > { %v1512_v32 = vadd.f32 %v1468_v55, %v1372_v37  ;;  %v2441_v46 = vrot.slane %v2112_v18, 1  ;;  %v2110_v55 = vrot.slane %v2108_v41, 1  ;;  %v2116_v37 = vshll.u32 %v11268_v54, 16 }
 0x1b0   : > { %v1769_v28 = vpop.f32.mrf.mxu1 }
 0x1b1   : > { %v1684_v22 = vadd.f32 %v1640_v34, %v1512_v32  ;;  %v2443_v56 = vor.u32 %v2442_v10, %v2441_v46  ;;  %v2111_v26 = vsel %vm249_vm2, %v2106_v45, %v2110_v55  ;;  %v2292_v32 = vsel %vm516_vm4, %v2289_v35, %v2291_v31 }
 0x1b3   : > { %9332 = vmatmul.msk.bf16.gmra.mxu1 %vm334_vm1, %v2440_v50  ;;  %9310 = vmatmul.msk.bf16.gmra.mxu3 %vm334_vm1, %v2103_v48  ;;  %v11254_v47 = vadd.f32 %v1764_v21, %v1684_v22  ;;  %v2444_v1 = vsel %vm656_vm3, %v2439_v2, %v2443_v56  ;;  %v10014_v50 = vld [vmem:[%s10600_s29 + $0x24] sm:$0xff] }
 0x1b4   : > { %v1330_v53 = vpop.f32.mrf.mxu2 }
 0x1b5   : > { %v1373_v8 = vadd.f32 %v1330_v53, %v11033_v16  ;;  %v2446_v53 = vrot.slane %v2116_v37, 2 }
 0x1b6   : > { %v1473_v24 = vpop.f32.mrf.mxu3  ;;  %v1645_v14 = vpop.f32.mrf.mxu0 }
 0x1b7   : > { %v1513_v19 = vadd.f32 %v1470_v13, %v1373_v8 }
 0x1b8   : > { %v1771_v27 = vpop.f32.mrf.mxu1 }
 0x1b9   : > { %9321 = vmatmul.msk.bf16.gmra.mxu0 %vm334_vm1, %v2290_v20  ;;  %9263 = vmatmul.msk.bf16.gmra.mxu2 %vm334_vm1, %v10013_v51  ;;  %v1685_v21 = vadd.f32 %v1642_v5, %v1513_v19 }
 0x1bb   : > { %v11262_v34 = vadd.f32 %v1766_v60, %v1685_v21 }
 0x1bc   : > { %v1333_v16 = vpop.f32.mrf.mxu2 }
 0x1bd   : > { %v1374_v39 = vadd.f32 %v1333_v16, %v11040_v25  ;;  %v2120_v25 = vshrl.u32 %v11268_v54, 16  ;;  %v11288_v16 = vld [vmem:[%s10600_s29 + $0x3c] sm:$0xff] }
 0x1be   : > { %v1475_v40 = vpop.f32.mrf.mxu3  ;;  %v1647_v59 = vpop.f32.mrf.mxu0 }
 0x1bf   : > { %v1514_v49 = vadd.f32 %v1473_v24, %v1374_v39  ;;  %v2445_v22 = vrot.slane %v2120_v25, 1  ;;  %v2114_v24 = vor.u32 %v2112_v18, %v2110_v55  ;;  %v2293_v39 = vrot.slane %v11268_v54, 1 }
 0x1c0   : > { %v1774_v42 = vpop.f32.mrf.mxu1 }
 0x1c1   : > { %v1686_v62 = vadd.f32 %v1645_v14, %v1514_v49  ;;  %v2447_v8 = vor.u32 %v2446_v53, %v2445_v22  ;;  %v2118_v14 = vrot.slane %v2116_v37, 1  ;;  %v10015_v49 = vld [vmem:[%s10600_s29 + $0x2c] sm:$0xff] }
 0x1c3   : > { %9333 = vmatmul.msk.bf16.gmra.mxu1 %vm334_vm1, %v2444_v1  ;;  %9311 = vmatmul.msk.bf16.gmra.mxu3 %vm334_vm1, %v2111_v26  ;;  %v11274_v60 = vadd.f32 %v1769_v28, %v1686_v62  ;;  %v2448_v19 = vsel %vm656_vm3, %v2443_v56, %v2447_v8  ;;  %v2119_v45 = vsel %vm249_vm2, %v2114_v24, %v2118_v14 }
 0x1c4   : > { %v1335_v43 = vpop.f32.mrf.mxu2  ;;  %v2294_v26 = vsel %vm516_vm4, %v2291_v31, %v2293_v39 }
 0x1c5   : > { %v1375_v2 = vadd.f32 %v1335_v43, %v11050_v33 }
 0x1c6   : > { %v1478_v13 = vpop.f32.mrf.mxu3  ;;  %v1650_v5 = vpop.f32.mrf.mxu0 }
 0x1c7   : > { %v1515_v41 = vadd.f32 %v1475_v40, %v1375_v2  ;;  %v2124_v40 = vshll.u32 %v11288_v16, 16 }
 0x1c8   : > { %v1776_v48 = vpop.f32.mrf.mxu1 }
 0x1c9   : > { %9322 = vmatmul.msk.bf16.gmra.mxu0 %vm334_vm1, %v2292_v32  ;;  %9264 = vmatmul.msk.bf16.gmra.mxu2 %vm334_vm1, %v10014_v50  ;;  %v1687_v28 = vadd.f32 %v1647_v59, %v1515_v41  ;;  %v2450_v37 = vrot.slane %v2124_v40, 2  ;;  %v2126_v50 = vrot.slane %v2124_v40, 1 }
 0x1cb   : > { %v11282_v51 = vadd.f32 %v1771_v27, %v1687_v28 }
 0x1cc   : > { %v1338_v33 = vpop.f32.mrf.mxu2 }
 0x1cd   : > { %v1376_v20 = vadd.f32 %v1338_v33, %v11057_v3  ;;  %v2128_v3 = vshrl.u32 %v11288_v16, 16 }
 0x1ce   : > { %v1480_v46 = vpop.f32.mrf.mxu3  ;;  %v1652_v35 = vpop.f32.mrf.mxu0 }
 0x1cf   : > { %v1516_v21 = vadd.f32 %v1478_v13, %v1376_v20  ;;  %v2449_v43 = vrot.slane %v2128_v3, 1  ;;  %v11308_v20 = vld [vmem:[%s10600_s29 + $0x44] sm:$0xff] }
 0x1d0   : > { %v1779_v10 = vpop.f32.mrf.mxu1 }
 0x1d1   : > { %v1688_v18 = vadd.f32 %v1650_v5, %v1516_v21  ;;  %v2451_v13 = vor.u32 %v2450_v37, %v2449_v43  ;;  %v2122_v5 = vor.u32 %v2120_v25, %v2118_v14 }
 0x1d3   : > { %9334 = vmatmul.msk.bf16.gmra.mxu1 %vm334_vm1, %v2448_v19  ;;  %9312 = vmatmul.msk.bf16.gmra.mxu3 %vm334_vm1, %v2119_v45  ;;  %v11294_v27 = vadd.f32 %v1774_v42, %v1688_v18  ;;  %v2452_v28 = vsel %vm656_vm3, %v2447_v8, %v2451_v13  ;;  %v2127_v33 = vsel %vm249_vm2, %v2122_v5, %v2126_v50  ;;  %v10016_v45 = vld [vmem:[%s10600_s29 + $0x34] sm:$0xff] }
 0x1d4   : > { %v1340_v55 = vpop.f32.mrf.mxu2 }
 0x1d5   : > { %v1377_v56 = vadd.f32 %v1340_v55, %v11067_v0 }
 0x1d6   : > { %v1483_v59 = vpop.f32.mrf.mxu3  ;;  %v1655_v1 = vpop.f32.mrf.mxu0 }
 0x1d7   : > { %v1517_v2 = vadd.f32 %v1480_v46, %v1377_v56  ;;  %v2295_v46 = vrot.slane %v11288_v16, 1 }
 0x1d8   : > { %v1781_v62 = vpop.f32.mrf.mxu1 }
 0x1d9   : > { %9323 = vmatmul.msk.bf16.gmra.mxu0 %vm334_vm1, %v2294_v26  ;;  %9265 = vmatmul.msk.bf16.gmra.mxu2 %vm334_vm1, %v10015_v49  ;;  %v1689_v42 = vadd.f32 %v1652_v35, %v1517_v2  ;;  %v2132_v35 = vshll.u32 %v11308_v20, 16  ;;  %v2296_v18 = vsel %vm516_vm4, %v2293_v39, %v2295_v46  ;;  %v2130_v49 = vor.u32 %v2128_v3, %v2126_v50 }
 0x1db   : > { %v11302_v32 = vadd.f32 %v1776_v48, %v1689_v42  ;;  %v2454_v56 = vrot.slane %v2132_v35, 2  ;;  %v2134_v26 = vrot.slane %v2132_v35, 1 }
 0x1dc   : > { %v1343_v0 = vpop.f32.mrf.mxu2 }
 0x1dd   : > { %v1378_v22 = vadd.f32 %v1343_v0, %v11074_v57  ;;  %v2136_v57 = vshrl.u32 %v11308_v20, 16 }
 0x1de   : > { %v1485_v53 = vpop.f32.mrf.mxu3  ;;  %v1657_v31 = vpop.f32.mrf.mxu0 }
 0x1df   : > { %v1518_v24 = vadd.f32 %v1483_v59, %v1378_v22  ;;  %v2453_v40 = vrot.slane %v2136_v57, 1  ;;  %v2135_v22 = vsel %vm249_vm2, %v2130_v49, %v2134_v26 }
 0x1e0   : > { %v1784_v41 = vpop.f32.mrf.mxu1 }
 0x1e1   : > { %v1690_v25 = vadd.f32 %v1655_v1, %v1518_v24  ;;  %v2455_v1 = vor.u32 %v2454_v56, %v2453_v40 }
 0x1e3   : > { %9335 = vmatmul.msk.bf16.gmra.mxu1 %vm334_vm1, %v2452_v28  ;;  %9313 = vmatmul.msk.bf16.gmra.mxu3 %vm334_vm1, %v2127_v33  ;;  %v11314_v48 = vadd.f32 %v1779_v10, %v1690_v25  ;;  %v2456_v5 = vsel %vm656_vm3, %v2451_v13, %v2455_v1  ;;  %v10017_v25 = vld [vmem:[%s10600_s29 + $0x3c] sm:$0xff] }
 0x1e4   : > { %v1345_v14 = vpop.f32.mrf.mxu2 }
 0x1e5   : > { %v1379_v8 = vadd.f32 %v1345_v14, %v11084_v63 }
 0x1e6   : > { %v1488_v19 = vpop.f32.mrf.mxu3  ;;  %v1660_v21 = vpop.f32.mrf.mxu0 }
 0x1e7   : > { %v1519_v59 = vadd.f32 %v1485_v53, %v1379_v8  ;;  %v11328_v53 = vld [vmem:[%s10600_s29 + $0x4c] sm:$0xff] }
 0x1e8   : > { %v1786_v55 = vpop.f32.mrf.mxu1  ;;  %v2140_v28 = vshll.u32 %v11328_v53, 16 }
 0x1e9   : > { %9324 = vmatmul.msk.bf16.gmra.mxu0 %vm334_vm1, %v2296_v18  ;;  %9266 = vmatmul.msk.bf16.gmra.mxu2 %vm334_vm1, %v10016_v45  ;;  %v1691_v10 = vadd.f32 %v1657_v31, %v1519_v59  ;;  %v2297_v31 = vrot.slane %v11308_v20, 1  ;;  %v2138_v18 = vor.u32 %v2136_v57, %v2134_v26 }
 0x1ea   : > { %v2142_v40 = vrot.slane %v2140_v28, 1 }
 0x1eb   : > { %v11322_v43 = vadd.f32 %v1781_v62, %v1691_v10  ;;  %v2298_v14 = vsel %vm516_vm4, %v2295_v46, %v2297_v31 }
 0x1ec   : > { %v1348_v63 = vpop.f32.mrf.mxu2 }
 0x1ed   : > { %v1380_v37 = vadd.f32 %v1348_v63, %v11091_v44  ;;  %v2144_v44 = vshrl.u32 %v11328_v53, 16 }
 0x1ee   : > { %v1490_v2 = vpop.f32.mrf.mxu3  ;;  %v1662_v39 = vpop.f32.mrf.mxu0 }
 0x1ef   : > { %v1520_v0 = vadd.f32 %v1488_v19, %v1380_v37  ;;  %v2457_v8 = vrot.slane %v2144_v44, 1  ;;  %v2458_v19 = vrot.slane %v2140_v28, 2 }
 0x1f0   : > { %v1789_v42 = vpop.f32.mrf.mxu1 }
 0x1f1   : > { %v1692_v3 = vadd.f32 %v1660_v21, %v1520_v0  ;;  %v2459_v45 = vor.u32 %v2458_v19, %v2457_v8  ;;  %v2146_v8 = vor.u32 %v2144_v44, %v2142_v40 }
 0x1f3   : > { %9336 = vmatmul.msk.bf16.gmra.mxu1 %vm334_vm1, %v2456_v5  ;;  %9314 = vmatmul.msk.bf16.gmra.mxu3 %vm334_vm1, %v2135_v22  ;;  %v11334_v62 = vadd.f32 %v1784_v41, %v1692_v3  ;;  %v2460_v63 = vsel %vm656_vm3, %v2455_v1, %v2459_v45  ;;  %v11348_v5 = vld [vmem:[%s10600_s29 + $0x54] sm:$0xff] }
 0x1f4   : > { %v1350_v50 = vpop.f32.mrf.mxu2  ;;  %v2148_v0 = vshll.u32 %v11348_v5, 16 }
 0x1f5   : > { %v1381_v13 = vadd.f32 %v1350_v50, %v11101_v4  ;;  %v10018_v50 = vld [vmem:[%s10600_s29 + $0x44] sm:$0xff] }
 0x1f6   : > { %v1493_v24 = vpop.f32.mrf.mxu3  ;;  %v1665_v33 = vpop.f32.mrf.mxu0  ;;  %v2150_v19 = vrot.slane %v2148_v0, 1 }
 0x1f7   : > { %v1521_v21 = vadd.f32 %v1490_v2, %v1381_v13  ;;  %v2143_v2 = vsel %vm249_vm2, %v2138_v18, %v2142_v40 }
 0x1f8   : > { %v1791_v35 = vpop.f32.mrf.mxu1 }
 0x1f9   : > { %9325 = vmatmul.msk.bf16.gmra.mxu0 %vm334_vm1, %v2298_v14  ;;  %9267 = vmatmul.msk.bf16.gmra.mxu2 %vm334_vm1, %v10017_v25  ;;  %v1693_v41 = vadd.f32 %v1662_v39, %v1521_v21  ;;  %v2299_v39 = vrot.slane %v11328_v53, 1  ;;  %v2462_v25 = vrot.slane %v2148_v0, 2  ;;  %v10019_v0 = vld [vmem:[%s10600_s29 + $0x4c] sm:$0xff] }
 0x1fb   : > { %v11342_v56 = vadd.f32 %v1786_v55, %v1693_v41  ;;  %v2300_v28 = vsel %vm516_vm4, %v2297_v31, %v2299_v39 }
 0x1fc   : > { %v1353_v4 = vpop.f32.mrf.mxu2 }
 0x1fd   : > { %v1382_v59 = vadd.f32 %v1353_v4, %v11108_v15  ;;  %v2152_v15 = vshrl.u32 %v11348_v5, 16 }
 0x1fe   : > { %v1495_v10 = vpop.f32.mrf.mxu3  ;;  %v1667_v46 = vpop.f32.mrf.mxu0 }
 0x1ff   : > { %v1522_v37 = vadd.f32 %v1493_v24, %v1382_v59  ;;  %v2461_v24 = vrot.slane %v2152_v15, 1 }
 0x200   : > { %v1794_v49 = vpop.f32.mrf.mxu1 }
 0x201   : > { %v1694_v57 = vadd.f32 %v1665_v33, %v1522_v37  ;;  %v2463_v14 = vor.u32 %v2462_v25, %v2461_v24  ;;  %v11368_v37 = vld [vmem:[%s10600_s29 + $0x5c] sm:$0xff]  ;;  %v2419_v24 = vld [vmem:[%s10600_s29 + $0x64] sm:$0x3] }
 0x203   : > { %9337 = vmatmul.msk.bf16.gmra.mxu1 %vm334_vm1, %v2460_v63  ;;  %9315 = vmatmul.msk.bf16.gmra.mxu3 %vm334_vm1, %v2143_v2  ;;  %v11354_v55 = vadd.f32 %v1789_v42, %v1694_v57  ;;  %v2464_v59 = vsel %vm656_vm3, %v2459_v45, %v2463_v14  ;;  %v2151_v63 = vsel %vm249_vm2, %v2146_v8, %v2150_v19  ;;  %v2156_v45 = vshll.u32 %v11368_v37, 16 }
 0x204   : > { %v1355_v26 = vpop.f32.mrf.mxu2 }
 0x205   : > { %v1383_v1 = vadd.f32 %v1355_v26, %v11118_v36 }
 0x206   : > { %v1498_v22 = vpop.f32.mrf.mxu3  ;;  %v1670_v3 = vpop.f32.mrf.mxu0 }
 0x207   : > { %v1523_v33 = vadd.f32 %v1495_v10, %v1383_v1 }
 0x208   : > { %v1796_v13 = vpop.f32.mrf.mxu1 }
 0x209   : > { %9326 = vmatmul.msk.bf16.gmra.mxu0 %vm334_vm1, %v2300_v28  ;;  %9268 = vmatmul.msk.bf16.gmra.mxu2 %vm334_vm1, %v10018_v50  ;;  %v1695_v42 = vadd.f32 %v1667_v46, %v1523_v33  ;;  %v2301_v46 = vrot.slane %v11348_v5, 1  ;;  %v2423_v33 = vunpack.c.l.b16 %v2419_v24 }
 0x20b   : > { %v11362_v21 = vadd.f32 %v1791_v35, %v1695_v42  ;;  %v2302_v1 = vsel %vm516_vm4, %v2299_v39, %v2301_v46  ;;  %v2154_v42 = vor.u32 %v2152_v15, %v2150_v19  ;;  %v2303_v15 = vrot.slane %v11368_v37, 1 }
 0x20c   : > { %v1358_v36 = vpop.f32.mrf.mxu2 }
 0x20d   : > { %v1384_v41 = vadd.f32 %v1358_v36, %v11125_v7  ;;  %v2160_v7 = vshrl.u32 %v11368_v37, 16 }
 0x20e   : > { %v1500_v18 = vpop.f32.mrf.mxu3  ;;  %v1672_v31 = vpop.f32.mrf.mxu0 }
 0x20f   : > { %v1524_v10 = vadd.f32 %v1498_v22, %v1384_v41  ;;  %v2465_v50 = vrot.slane %v2160_v7, 1  ;;  %v2028_v41 = vld [vmem:[%s10600_s29 + $0x64] sm:$0x1] }
 0x210   : > { %v1799_v4 = vpop.f32.mrf.mxu1 }
 0x211   : > { %v1696_v44 = vadd.f32 %v1670_v3, %v1524_v10  ;;  %v2466_v3 = vrot.slane %v2156_v45, 2 }
 0x213   : > { %9338 = vmatmul.msk.bf16.gmra.mxu1 %vm334_vm1, %v2464_v59  ;;  %9316 = vmatmul.msk.bf16.gmra.mxu3 %vm334_vm1, %v2151_v63  ;;  %v11374_v35 = vadd.f32 %v1794_v49, %v1696_v44  ;;  %v2467_v25 = vor.u32 %v2466_v3, %v2465_v50  ;;  %v11388_v44 = vpack.c.b16 %v2423_v33, %v2423_v33  ;;  %v10020_v3 = vld [vmem:[%s10600_s29 + $0x54] sm:$0xff] }
 0x214   : > { %v1360_v40 = vpop.f32.mrf.mxu2 }
 0x215   : > { %v1385_v2 = vadd.f32 %v1360_v40, %v11135_v12  ;;  %v2158_v12 = vrot.slane %v2156_v45, 1  ;;  %v2473_v19 = vshll.u32 %v11388_v44, 16 }
 0x216   : > { %v1503_v57 = vpop.f32.mrf.mxu3  ;;  %v1675_v26 = vpop.f32.mrf.mxu0 }
 0x217   : > { %v1525_v28 = vadd.f32 %v1500_v18, %v1385_v2  ;;  %v2468_v18 = vsel %vm656_vm3, %v2463_v14, %v2467_v25  ;;  %v2072_v2 = vunpack.c.l.b16 %v2028_v41 }
 0x218   : > { %v1801_v22 = vpop.f32.mrf.mxu1 }
 0x219   : > { %9327 = vmatmul.msk.bf16.gmra.mxu0 %vm334_vm1, %v2302_v1  ;;  %9269 = vmatmul.msk.bf16.gmra.mxu2 %vm334_vm1, %v10019_v0  ;;  %v1697_v49 = vadd.f32 %v1672_v31, %v1525_v28  ;;  %v2159_v31 = vsel %vm249_vm2, %v2154_v42, %v2158_v12  ;;  %v2083_v45 = vpack.c.b16 %v2072_v2, %v2072_v2 }
 0x21a   : > { %v2304_v28 = vsel %vm516_vm4, %v2301_v46, %v2303_v15 }
 0x21b   : > { %v11383_v8 = vadd.f32 %v1796_v13, %v1697_v49  ;;  %v2475_v49 = vrot.slane %v2473_v19, 2  ;;  %v2164_v42 = vshll.u32 %v2083_v45, 16 }
 0x21c   : > { %v1363_v36 = vpop.f32.mrf.mxu2 }
 0x21d   : > { %v1386_v39 = vadd.f32 %v1363_v36, %v11152_v17  ;;  %v2470_v17 = vshrl.u32 %v11388_v44, 16 }
 0x21e   : > { %v1505_v59 = vpop.f32.mrf.mxu3  ;;  %v1677_v10 = vpop.f32.mrf.mxu0 }
 0x21f   : > { %v1526_v40 = vadd.f32 %v1503_v57, %v1386_v39 }
 0x220   : > { %v2520_v63 = vpop.f32.mrf.mxu1 }
 0x221   : > { %v1698_v13 = vadd.f32 %v1675_v26, %v1526_v40  ;;  %v2472_v26 = vrot.slane %v2470_v17, 1 }
 0x223   : > { %9339 = vmatmul.msk.bf16.gmra.mxu1 %vm334_vm1, %v2468_v18  ;;  %9317 = vmatmul.msk.bf16.gmra.mxu3 %vm334_vm1, %v2159_v31  ;;  %v11396_v14 = vadd.f32 %v1799_v4, %v1698_v13  ;;  %v9385_v4 = vld [vmem:[%s13932_s1 + $0x24] sm:$0x3]  ;;  %v2476_v46 = vor.u32 %v2475_v49, %v2472_v26  ;;  %v2166_v18 = vrot.slane %v2164_v42, 1 }
 0x224   : > { %v1365_v0 = vpop.f32.mrf.mxu2  ;;  %v3383_v41 = vsel %vm365_vm0, %v9385_v4, 0 }
 0x225   : > { %v1387_v57 = vadd.f32 %v1365_v0, %v11177_v58  ;;  %v9396_v58 = vld [vmem:[%s13932_s1 + $0x26] sm:$0x3]  ;;  %3392 = vmatpush.bf16.msrb.mxu2 %v3383_v41  ;;  %v2477_v19 = vsel %vm656_vm3, %v2467_v25, %v2476_v46  ;;  %v9407_v25 = vld [vmem:[%s13932_s1 + $0x28] sm:$0x3] }
 0x226   : > { %v2210_v1 = vpop.f32.mrf.mxu3  ;;  %v2349_v50 = vpop.f32.mrf.mxu0  ;;  %v3507_v39 = vsel %vm365_vm0, %v9396_v58, 0  ;;  %v10021_v58 = vld [vmem:[%s10600_s29 + $0x5c] sm:$0xff] }
 0x227   : > { %v1527_v33 = vadd.f32 %v1505_v59, %v1387_v57  ;;  %v2162_v59 = vor.u32 %v2160_v7, %v2158_v12  ;;  %3516 = vmatpush.bf16.msrb.mxu3 %v3507_v39  ;;  %v3154_v7 = vld [vmem:[%s10600_s29 + $0x1c] sm:$0x8]  ;;  %v2305_v12 = vrot.slane %v2083_v45, 1 }
 0x228   : > { %v11401_v24 = vpop.f32.mrf.mxu1  ;;  %v3158_v49 = vunpack.c.l.b16 %v3154_v7 }
 0x229   : > { %9328 = vmatmul.msk.bf16.gmra.mxu0 %vm334_vm1, %v2304_v28  ;;  %9270 = vmatmul.msk.bf16.gmra.mxu2 %vm334_vm1, %v10020_v3  ;;  %v1699_v36 = vadd.f32 %v1677_v10, %v1527_v33  ;;  %v2167_v57 = vsel %vm249_vm2, %v2162_v59, %v2166_v18  ;;  %v2729_v3 = vld [vmem:[%s10600_s29 + $0x1c] sm:$0xc]  ;;  %v11422_v28 = vld [vmem:[%s10600_s29 + $0x20] sm:$0xff]  }
 0x22a   : > { %v2773_v26 = vunpack.c.l.b16 %v2729_v3  ;;  %v11440_v18 = vld [vmem:[%s10600_s29 + $0x24] sm:$0xff]  }
 0x22b   : > { %v11413_v40 = vadd.f32 %v1801_v22, %v1699_v36  ;;  %v2306_v36 = vsel %vm516_vm4, %v2303_v15, %v2305_v12  ;;  %v3161_v7 = vrot.slane %v11440_v18, 3 }
 0x22c   : > { %v1938_v31 = vpop.f32.mrf.mxu2 }
 0x22d   : > { %v1988_v2 = vadd.f32 %v1938_v31, %v11201_v30  ;;  %v10139_v30 = vunpack.c.l.b16 %v11422_v28  ;;  %v2590_v31 = vld [vmem:[%s10600_s29 + $0x14] sm:$0xc] }
 0x22e   : > { %v2212_v13 = vpop.f32.mrf.mxu3  ;;  %v2351_v17 = vpop.f32.mrf.mxu0 }
 0x22f   : > { %v2260_v0 = vadd.f32 %v2210_v1, %v1988_v2  ;;  %v3691_v1 = vsel %vm365_vm0, %v9407_v25, 0  ;;  %v2794_v41 = vpack.c.b16 %v10139_v30, %v2773_v26  ;;  %v11437_v39 = vpack.c.b16 %v10139_v30, %v3158_v49 }
 0x230   : > { %v11416_v10 = vpop.f32.mrf.mxu1  ;;  %3700 = vmatpush.bf16.msrb.mxu0 %v3691_v1 }
 0x231   : > { %v2399_v22 = vadd.f32 %v2349_v50, %v2260_v0  ;;  %v2948_v15 = vshll.u32 %v2794_v41, 16  ;;  %v13952_v0 = vshll.u32 %v11440_v18, 16  ;;  %v3160_v3 = vrot.slane %v11437_v39, 3 }
 0x232   : > { %v2805_v12 = vrot.slane %v2794_v41, 2 }
 0x233   : > { %9340 = vmatmul.msk.bf16.gmra.mxu1 %vm334_vm1, %v2477_v19  ;;  %9318 = vmatmul.msk.bf16.gmra.mxu3 %vm334_vm1, %v2167_v57  ;;  %v11432_v33 = vadd.f32 %v2520_v63, %v2399_v22  ;;  %v9458_v63 = vld [vmem:[%s13932_s1 + $0x2a] sm:$0x3]  ;;  %v2953_v19 = vshrl.u32 %v11440_v18, 16  ;;  %v2594_v57 = vunpack.c.l.b16 %v2590_v31  ;;  %v2806_v22 = vrot.slane %v11440_v18, 2 }
 0x234   : > { %v1940_v45 = vpop.f32.mrf.mxu2  ;;  %v3963_v2 = vsel %vm365_vm0, %v9458_v63, 0 }
 0x235   : > { %v1989_v50 = vadd.f32 %v1940_v45, %v11219_v11  ;;  %v2945_v11 = vshrl.u32 %v2794_v41, 16  ;;  %3972 = vmatpush.bf16.msrb.mxu1 %v3963_v2  ;;  %v2807_v31 = vsel %vm828_vm5, %v2805_v12, %v2806_v22 }
 0x236   : > { %v2215_v42 = vpop.f32.mrf.mxu3  ;;  %v2354_v4 = vpop.f32.mrf.mxu0 }
 0x237   : > { %v2261_v59 = vadd.f32 %v2212_v13, %v1989_v50  ;;  %v2947_v49 = vrot.slane %v2945_v11, 2  ;;  %v2950_v50 = vrot.slane %v2948_v15, 3  ;;  %v2597_v15 = vrot.slane %v11188_v9, 2 }
 0x238   : > { %v2527_v46 = vpop.f32.mrf.mxu1 }
 0x239   : > { %9329 = vmatmul.msk.bf16.gmra.mxu0 %vm334_vm1, %v2306_v36  ;;  %9271 = vmatmul.msk.bf16.gmra.mxu2 %vm334_vm1, %v10021_v58  ;;  %v2400_v13 = vadd.f32 %v2351_v17, %v2261_v59  ;;  %v2955_v17 = vrot.slane %v2953_v19, 2  ;;  %v2958_v58 = vrot.slane %v13952_v0, 3  ;;  %v2595_v36 = vpack.c.b16 %v2053_v6, %v2594_v57 }
 0x23a   : > { %v2951_v63 = vor.u32 %v2950_v50, %v2947_v49 }
 0x23b   : > { %v11455_v30 = vadd.f32 %v11401_v24, %v2400_v13  ;;  %v3162_v24 = vsel %vm1394_vm6, %v3160_v3, %v3161_v7  ;;  %v2596_v2 = vrot.slane %v2595_v36, 2 }
 0x23c   : > { %v1943_v26 = vpop.f32.mrf.mxu2 }
 0x23d   : > { %v1990_v25 = vadd.f32 %v1943_v26, %v11232_v61  ;;  %v2959_v61 = vor.u32 %v2958_v58, %v2955_v17  ;;  %v2598_v12 = vsel %vm828_vm5, %v2596_v2, %v2597_v15 }
 0x23e   : > { %v2217_v1 = vpop.f32.mrf.mxu3  ;;  %v2356_v45 = vpop.f32.mrf.mxu0 }
 0x23f   : > { %v2262_v59 = vadd.f32 %v2215_v42, %v1990_v25  ;;  %v2960_v3 = vsel %vm1177_vm8, %v2951_v63, %v2959_v61 }
 0x240   : > { %v2530_v41 = vpop.f32.mrf.mxu1 }
 0x241   : > { %v2401_v11 = vadd.f32 %v2354_v4, %v2262_v59  ;;  %v11476_v4 = vld [vmem:[%s10600_s29 + $0x2c] sm:$0xff]  }
 0x242   : > { %v13950_v9 = vshrl.u32 %v11476_v4, 16  ;;  %v2808_v50 = vrot.slane %v11476_v4, 2 }
 0x243   : > { %9375 = vmatmul.msk.bf16.vlgmr.msra.gmra.mxu1 %vm334_vm1, %v3162_v24  ;;  %9353 = vmatmul.msk.bf16.vlgmr.msra.gmra.mxu3 %vm334_vm1, %v2807_v31  ;;  %v11470_v29 = vadd.f32 %v11416_v10, %v2401_v11  ;;  %v13949_v10 = vshll.u32 %v11476_v4, 16 }
 0x244   : > { %v1945_v6 = vpop.f32.mrf.mxu2  ;;  %v2964_v59 = vrot.slane %v13950_v9, 2  ;;  %v2809_v2 = vsel %vm828_vm5, %v2806_v22, %v2808_v50 }
 0x245   : > { %v1991_v13 = vadd.f32 %v1945_v6, %v11242_v38  ;;  %v3163_v38 = vrot.slane %v11476_v4, 3  ;;  %v2967_v31 = vrot.slane %v13949_v10, 3 }
 0x246   : > { %v2220_v42 = vpop.f32.mrf.mxu3  ;;  %v2359_v57 = vpop.f32.mrf.mxu0 }
 0x247   : > { %v2263_v49 = vadd.f32 %v2217_v1, %v1991_v13 }
 0x248   : > { %v2532_v26 = vpop.f32.mrf.mxu1 }
 0x249   : > { %9364 = vmatmul.msk.bf16.vlgmr.msra.gmra.mxu0 %vm334_vm1, %v2960_v3  ;;  %9342 = vmatmul.msk.bf16.vlgmr.msra.gmra.mxu2 %vm334_vm1, %v2598_v12  ;;  %v2402_v25 = vadd.f32 %v2356_v45, %v2263_v49  ;;  %v3164_v45 = vsel %vm1394_vm6, %v3161_v7, %v3163_v38 }
 0x24b   : > { %v11484_v17 = vadd.f32 %v2527_v46, %v2402_v25  ;;  %v2968_v46 = vor.u32 %v2967_v31, %v2964_v59 }
 0x24c   : > { %v1948_v58 = vpop.f32.mrf.mxu2 }
 0x24d   : > { %v1992_v1 = vadd.f32 %v1948_v58, %v11254_v47  ;;  %v2599_v47 = vrot.slane %v11225_v52, 2  ;;  %v2969_v7 = vsel %vm1177_vm8, %v2959_v61, %v2968_v46 }
 0x24e   : > { %v2222_v36 = vpop.f32.mrf.mxu3  ;;  %v2361_v24 = vpop.f32.mrf.mxu0 }
 0x24f   : > { %v2264_v11 = vadd.f32 %v2220_v42, %v1992_v1  ;;  %v2600_v42 = vsel %vm828_vm5, %v2597_v15, %v2599_v47  ;;  %v11502_v1 = vld [vmem:[%s10600_s29 + $0x34] sm:$0xff]  }
 0x250   : > { %v2535_v63 = vpop.f32.mrf.mxu1  ;;  %v13947_v52 = vshrl.u32 %v11502_v1, 16  ;;  %v2810_v59 = vrot.slane %v11502_v1, 2 }
 0x251   : > { %v2403_v6 = vadd.f32 %v2359_v57, %v2264_v11 }
 0x252   : > { %v2973_v11 = vrot.slane %v13947_v52, 2 }
 0x253   : > { %9376 = vmatmul.msk.bf16.gmra.mxu1 %vm334_vm1, %v3164_v45  ;;  %9354 = vmatmul.msk.bf16.gmra.mxu3 %vm334_vm1, %v2809_v2  ;;  %v11496_v13 = vadd.f32 %v2530_v41, %v2403_v6  ;;  %v13935_v41 = vshll.u32 %v11502_v1, 16 }
 0x254   : > { %v1950_v3 = vpop.f32.mrf.mxu2 }
 0x255   : > { %v1993_v12 = vadd.f32 %v1950_v3, %v11262_v34  ;;  %v3165_v34 = vrot.slane %v11502_v1, 3  ;;  %v2976_v2 = vrot.slane %v13935_v41, 3 }
 0x256   : > { %v2225_v49 = vpop.f32.mrf.mxu3  ;;  %v2364_v25 = vpop.f32.mrf.mxu0 }
 0x257   : > { %v2265_v58 = vadd.f32 %v2222_v36, %v1993_v12  ;;  %v2811_v12 = vsel %vm828_vm5, %v2808_v50, %v2810_v59 }
 0x258   : > { %v2537_v22 = vpop.f32.mrf.mxu1 }
 0x259   : > { %9365 = vmatmul.msk.bf16.gmra.mxu0 %vm334_vm1, %v2969_v7  ;;  %9343 = vmatmul.msk.bf16.gmra.mxu2 %vm334_vm1, %v2600_v42  ;;  %v2404_v57 = vadd.f32 %v2361_v24, %v2265_v58  ;;  %v3166_v24 = vsel %vm1394_vm6, %v3163_v38, %v3165_v34 }
 0x25b   : > { %v11510_v61 = vadd.f32 %v2532_v26, %v2404_v57  ;;  %v2977_v26 = vor.u32 %v2976_v2, %v2973_v11  ;;  %v11528_v11 = vld [vmem:[%s10600_s29 + $0x3c] sm:$0xff]  }
 0x25c   : > { %v1953_v15 = vpop.f32.mrf.mxu2  ;;  %v2812_v2 = vrot.slane %v11528_v11, 2 }
 0x25d   : > { %v1994_v36 = vadd.f32 %v1953_v15, %v11274_v60  ;;  %v2601_v60 = vrot.slane %v11248_v23, 2  ;;  %v2978_v38 = vsel %vm1177_vm8, %v2968_v46, %v2977_v26  ;;  %v13937_v23 = vshrl.u32 %v11528_v11, 16 }
 0x25e   : > { %v2227_v31 = vpop.f32.mrf.mxu3  ;;  %v2366_v45 = vpop.f32.mrf.mxu0 }
 0x25f   : > { %v2266_v3 = vadd.f32 %v2225_v49, %v1994_v36  ;;  %v2602_v49 = vsel %vm828_vm5, %v2599_v47, %v2601_v60 }
 0x260   : > { %v2540_v6 = vpop.f32.mrf.mxu1 }
 0x261   : > { %v2405_v7 = vadd.f32 %v2364_v25, %v2266_v3 }
 0x263   : > { %9377 = vmatmul.msk.bf16.gmra.mxu1 %vm334_vm1, %v3166_v24  ;;  %9355 = vmatmul.msk.bf16.gmra.mxu3 %vm334_vm1, %v2811_v12  ;;  %v11522_v42 = vadd.f32 %v2535_v63, %v2405_v7  ;;  %v13936_v63 = vshll.u32 %v11528_v11, 16  ;;  %v2982_v12 = vrot.slane %v13937_v23, 2 }
 0x264   : > { %v1955_v58 = vpop.f32.mrf.mxu2 }
 0x265   : > { %v1995_v57 = vadd.f32 %v1955_v58, %v11282_v51  ;;  %v3167_v51 = vrot.slane %v11528_v11, 3  ;;  %v2985_v7 = vrot.slane %v13936_v63, 3 }
 0x266   : > { %v2230_v15 = vpop.f32.mrf.mxu3  ;;  %v2369_v41 = vpop.f32.mrf.mxu0 }
 0x267   : > { %v2267_v36 = vadd.f32 %v2227_v31, %v1995_v57 }
 0x268   : > { %v2542_v50 = vpop.f32.mrf.mxu1 }
 0x269   : > { %9366 = vmatmul.msk.bf16.gmra.mxu0 %vm334_vm1, %v2978_v38  ;;  %9344 = vmatmul.msk.bf16.gmra.mxu2 %vm334_vm1, %v2602_v49  ;;  %v2406_v25 = vadd.f32 %v2366_v45, %v2267_v36  ;;  %v3168_v45 = vsel %vm1394_vm6, %v3165_v34, %v3167_v51  ;;  %v2813_v38 = vsel %vm828_vm5, %v2810_v59, %v2812_v2 }
 0x26b   : > { %v11536_v46 = vadd.f32 %v2537_v22, %v2406_v25  ;;  %v2986_v22 = vor.u32 %v2985_v7, %v2982_v12  ;;  %v11554_v12 = vld [vmem:[%s10600_s29 + $0x44] sm:$0xff]  }
 0x26c   : > { %v1958_v47 = vpop.f32.mrf.mxu2  ;;  %v2814_v7 = vrot.slane %v11554_v12, 2 }
 0x26d   : > { %v1996_v31 = vadd.f32 %v1958_v47, %v11294_v27  ;;  %v2603_v27 = vrot.slane %v11268_v54, 2  ;;  %v2987_v34 = vsel %vm1177_vm8, %v2977_v26, %v2986_v22  ;;  %v13939_v54 = vshrl.u32 %v11554_v12, 16 }
 0x26e   : > { %v2232_v24 = vpop.f32.mrf.mxu3  ;;  %v2371_v3 = vpop.f32.mrf.mxu0 }
 0x26f   : > { %v2268_v57 = vadd.f32 %v2230_v15, %v1996_v31  ;;  %v2604_v15 = vsel %vm828_vm5, %v2601_v60, %v2603_v27 }
 0x270   : > { %v2545_v58 = vpop.f32.mrf.mxu1 }
 0x271   : > { %v2407_v49 = vadd.f32 %v2369_v41, %v2268_v57  ;;  %v13938_v41 = vshll.u32 %v11554_v12, 16 }
 0x273   : > { %9378 = vmatmul.msk.bf16.gmra.mxu1 %vm334_vm1, %v3168_v45  ;;  %9356 = vmatmul.msk.bf16.gmra.mxu3 %vm334_vm1, %v2813_v38  ;;  %v11548_v36 = vadd.f32 %v2540_v6, %v2407_v49  ;;  %v2991_v38 = vrot.slane %v13939_v54, 2  ;;  %v2994_v49 = vrot.slane %v13938_v41, 3 }
 0x274   : > { %v1960_v25 = vpop.f32.mrf.mxu2 }
 0x275   : > { %v1997_v47 = vadd.f32 %v1960_v25, %v11302_v32  ;;  %v3169_v32 = vrot.slane %v11554_v12, 3 }
 0x276   : > { %v2235_v63 = vpop.f32.mrf.mxu3  ;;  %v2374_v23 = vpop.f32.mrf.mxu0 }
 0x277   : > { %v2269_v31 = vadd.f32 %v2232_v24, %v1997_v47 }
 0x278   : > { %v2547_v59 = vpop.f32.mrf.mxu1 }
 0x279   : > { %9367 = vmatmul.msk.bf16.gmra.mxu0 %vm334_vm1, %v2987_v34  ;;  %9345 = vmatmul.msk.bf16.gmra.mxu2 %vm334_vm1, %v2604_v15  ;;  %v2408_v6 = vadd.f32 %v2371_v3, %v2269_v31  ;;  %v3170_v3 = vsel %vm1394_vm6, %v3167_v51, %v3169_v32  ;;  %v2815_v34 = vsel %vm828_vm5, %v2812_v2, %v2814_v7 }
 0x27b   : > { %v11562_v26 = vadd.f32 %v2542_v50, %v2408_v6  ;;  %v2995_v50 = vor.u32 %v2994_v49, %v2991_v38  ;;  %v11580_v38 = vld [vmem:[%s10600_s29 + $0x4c] sm:$0xff]  }
 0x27c   : > { %v1963_v60 = vpop.f32.mrf.mxu2  ;;  %v2816_v49 = vrot.slane %v11580_v38, 2 }
 0x27d   : > { %v1998_v24 = vadd.f32 %v1963_v60, %v11314_v48  ;;  %v2605_v48 = vrot.slane %v11288_v16, 2  ;;  %v13941_v16 = vshrl.u32 %v11580_v38, 16 }
 0x27e   : > { %v2237_v45 = vpop.f32.mrf.mxu3  ;;  %v2376_v57 = vpop.f32.mrf.mxu0 }
 0x27f   : > { %v2270_v47 = vadd.f32 %v2235_v63, %v1998_v24  ;;  %v2996_v63 = vsel %vm1177_vm8, %v2986_v22, %v2995_v50  ;;  %v2606_v51 = vsel %vm828_vm5, %v2603_v27, %v2605_v48 }
 0x280   : > { %v2550_v25 = vpop.f32.mrf.mxu1 }
 0x281   : > { %v2409_v15 = vadd.f32 %v2374_v23, %v2270_v47  ;;  %v13940_v23 = vshll.u32 %v11580_v38, 16 }
 0x283   : > { %9379 = vmatmul.msk.bf16.gmra.mxu1 %vm334_vm1, %v3170_v3  ;;  %9357 = vmatmul.msk.bf16.gmra.mxu3 %vm334_vm1, %v2815_v34  ;;  %v11574_v31 = vadd.f32 %v2545_v58, %v2409_v15  ;;  %v3000_v34 = vrot.slane %v13941_v16, 2  ;;  %v3003_v15 = vrot.slane %v13940_v23, 3 }
 0x284   : > { %v1965_v6 = vpop.f32.mrf.mxu2 }
 0x285   : > { %v1999_v60 = vadd.f32 %v1965_v6, %v11322_v43  ;;  %v3171_v43 = vrot.slane %v11580_v38, 3 }
 0x286   : > { %v2240_v41 = vpop.f32.mrf.mxu3  ;;  %v2379_v54 = vpop.f32.mrf.mxu0 }
 0x287   : > { %v2271_v24 = vadd.f32 %v2237_v45, %v1999_v60 }
 0x288   : > { %v2552_v2 = vpop.f32.mrf.mxu1 }
 0x289   : > { %9368 = vmatmul.msk.bf16.gmra.mxu0 %vm334_vm1, %v2996_v63  ;;  %9346 = vmatmul.msk.bf16.gmra.mxu2 %vm334_vm1, %v2606_v51  ;;  %v2410_v58 = vadd.f32 %v2376_v57, %v2271_v24  ;;  %v3172_v57 = vsel %vm1394_vm6, %v3169_v32, %v3171_v43  ;;  %v2817_v63 = vsel %vm828_vm5, %v2814_v7, %v2816_v49 }
 0x28b   : > { %v11588_v22 = vadd.f32 %v2547_v59, %v2410_v58  ;;  %v3004_v59 = vor.u32 %v3003_v15, %v3000_v34  ;;  %v11606_v34 = vld [vmem:[%s10600_s29 + $0x54] sm:$0xff]  }
 0x28c   : > { %v1968_v27 = vpop.f32.mrf.mxu2  ;;  %v2818_v15 = vrot.slane %v11606_v34, 2 }
 0x28d   : > { %v2000_v45 = vadd.f32 %v1968_v27, %v11334_v62  ;;  %v2607_v62 = vrot.slane %v11308_v20, 2  ;;  %v13943_v20 = vshrl.u32 %v11606_v34, 16 }
 0x28e   : > { %v2242_v3 = vpop.f32.mrf.mxu3  ;;  %v2381_v47 = vpop.f32.mrf.mxu0 }
 0x28f   : > { %v2272_v60 = vadd.f32 %v2240_v41, %v2000_v45  ;;  %v3005_v41 = vsel %vm1177_vm8, %v2995_v50, %v3004_v59  ;;  %v2608_v32 = vsel %vm828_vm5, %v2605_v48, %v2607_v62 }
 0x290   : > { %v2555_v6 = vpop.f32.mrf.mxu1 }
 0x291   : > { %v2411_v51 = vadd.f32 %v2379_v54, %v2272_v60  ;;  %v13942_v54 = vshll.u32 %v11606_v34, 16 }
 0x293   : > { %9380 = vmatmul.msk.bf16.gmra.mxu1 %vm334_vm1, %v3172_v57  ;;  %9358 = vmatmul.msk.bf16.gmra.mxu3 %vm334_vm1, %v2817_v63  ;;  %v11600_v24 = vadd.f32 %v2550_v25, %v2411_v51  ;;  %v3009_v63 = vrot.slane %v13943_v20, 2  ;;  %v3012_v51 = vrot.slane %v13942_v54, 3 }
 0x294   : > { %v1970_v58 = vpop.f32.mrf.mxu2 }
 0x295   : > { %v2001_v27 = vadd.f32 %v1970_v58, %v11342_v56  ;;  %v3173_v56 = vrot.slane %v11606_v34, 3 }
 0x296   : > { %v2245_v23 = vpop.f32.mrf.mxu3  ;;  %v2384_v16 = vpop.f32.mrf.mxu0 }
 0x297   : > { %v2273_v45 = vadd.f32 %v2242_v3, %v2001_v27 }
 0x298   : > { %v2557_v7 = vpop.f32.mrf.mxu1 }
 0x299   : > { %9369 = vmatmul.msk.bf16.gmra.mxu0 %vm334_vm1, %v3005_v41  ;;  %9347 = vmatmul.msk.bf16.gmra.mxu2 %vm334_vm1, %v2608_v32  ;;  %v2412_v25 = vadd.f32 %v2381_v47, %v2273_v45  ;;  %v3174_v47 = vsel %vm1394_vm6, %v3171_v43, %v3173_v56  ;;  %v2819_v41 = vsel %vm828_vm5, %v2816_v49, %v2818_v15 }
 0x29b   : > { %v11614_v50 = vadd.f32 %v2552_v2, %v2412_v25  ;;  %v3013_v2 = vor.u32 %v3012_v51, %v3009_v63  ;;  %v11632_v63 = vld [vmem:[%s10600_s29 + $0x5c] sm:$0xff]  }
 0x29c   : > { %v1973_v48 = vpop.f32.mrf.mxu2 }
 0x29d   : > { %v2002_v3 = vadd.f32 %v1973_v48, %v11354_v55  ;;  %v2609_v55 = vrot.slane %v11328_v53, 2  ;;  %v13945_v53 = vshrl.u32 %v11632_v63, 16 }
 0x29e   : > { %v2247_v57 = vpop.f32.mrf.mxu3  ;;  %v2386_v60 = vpop.f32.mrf.mxu0 }
 0x29f   : > { %v2274_v27 = vadd.f32 %v2245_v23, %v2002_v3  ;;  %v3014_v23 = vsel %vm1177_vm8, %v3004_v59, %v3013_v2  ;;  %v2610_v43 = vsel %vm828_vm5, %v2607_v62, %v2609_v55  ;;  %v2820_v59 = vrot.slane %v11632_v63, 2 }
 0x2a0   : > { %v2560_v58 = vpop.f32.mrf.mxu1 }
 0x2a1   : > { %v2413_v32 = vadd.f32 %v2384_v16, %v2274_v27  ;;  %v13944_v16 = vshll.u32 %v11632_v63, 16 }
 0x2a3   : > { %9381 = vmatmul.msk.bf16.gmra.mxu1 %vm334_vm1, %v3174_v47  ;;  %9359 = vmatmul.msk.bf16.gmra.mxu3 %vm334_vm1, %v2819_v41  ;;  %v11626_v45 = vadd.f32 %v2555_v6, %v2413_v32  ;;  %v3175_v6 = vrot.slane %v11632_v63, 3  ;;  %v3018_v41 = vrot.slane %v13945_v53, 2  ;;  %v3021_v32 = vrot.slane %v13944_v16, 3 }
 0x2a4   : > { %v1975_v25 = vpop.f32.mrf.mxu2 }
 0x2a5   : > { %v2003_v48 = vadd.f32 %v1975_v25, %v11362_v21 }
 0x2a6   : > { %v2250_v54 = vpop.f32.mrf.mxu3  ;;  %v2389_v20 = vpop.f32.mrf.mxu0 }
 0x2a7   : > { %v2275_v3 = vadd.f32 %v2247_v57, %v2003_v48 }
 0x2a8   : > { %v2562_v49 = vpop.f32.mrf.mxu1 }
 0x2a9   : > { %9370 = vmatmul.msk.bf16.gmra.mxu0 %vm334_vm1, %v3014_v23  ;;  %9348 = vmatmul.msk.bf16.gmra.mxu2 %vm334_vm1, %v2610_v43  ;;  %v2414_v21 = vadd.f32 %v2386_v60, %v2275_v3  ;;  %v3176_v60 = vsel %vm1394_vm6, %v3173_v56, %v3175_v6  ;;  %v2821_v23 = vsel %vm828_vm5, %v2818_v15, %v2820_v59  ;;  %v11650_v43 = vld [vmem:[%s10600_s29 + $0x60] sm:$0xff]  }
 0x2aa   : > { %v3022_v3 = vor.u32 %v3021_v32, %v3018_v41 }
 0x2ab   : > { %v11640_v62 = vadd.f32 %v2557_v7, %v2414_v21  ;;  %v11653_v7 = vld [vmem:[%s10600_s29 + $0x68] sm:$0xf]  ;;  %v2611_v21 = vrot.slane %v11348_v5, 2 }
 0x2ac   : > { %v1978_v57 = vpop.f32.mrf.mxu2  ;;  %v13946_v16 = vunpack.c.l.b16 %v11653_v7  ;;  %v3023_v41 = vsel %vm1177_vm8, %v3013_v2, %v3022_v3 }
 0x2ad   : > { %v2004_v51 = vadd.f32 %v1978_v57, %v11374_v35  ;;  %v10172_v57 = vunpack.c.h.b16 %v11650_v43  ;;  %v2612_v32 = vsel %vm828_vm5, %v2609_v55, %v2611_v21 }
 0x2ae   : > { %v2252_v47 = vpop.f32.mrf.mxu3  ;;  %v2391_v27 = vpop.f32.mrf.mxu0 }
 0x2af   : > { %v2276_v48 = vadd.f32 %v2250_v54, %v2004_v51  ;;  %v11667_v5 = vpack.c.b16 %v13946_v16, %v10172_v57 }
 0x2b0   : > { %v2565_v25 = vpop.f32.mrf.mxu1 }
 0x2b1   : > { %v2415_v35 = vadd.f32 %v2389_v20, %v2276_v48  ;;  %v3177_v2 = vrot.slane %v11667_v5, 3  ;;  %v2822_v55 = vrot.slane %v11667_v5, 2 }
 0x2b3   : > { %9382 = vmatmul.msk.bf16.gmra.mxu1 %vm334_vm1, %v3176_v60  ;;  %9360 = vmatmul.msk.bf16.gmra.mxu3 %vm334_vm1, %v2821_v23  ;;  %v11660_v56 = vadd.f32 %v2560_v58, %v2415_v35  ;;  %v13948_v58 = vshrl.u32 %v11667_v5, 16  ;;  %v2823_v52 = vsel %vm828_vm5, %v2820_v59, %v2822_v55 }
 0x2b4   : > { %v1980_v54 = vpop.f32.mrf.mxu2 }
 0x2b5   : > { %v2005_v15 = vadd.f32 %v1980_v54, %v11383_v8  ;;  %v13951_v8 = vshll.u32 %v11667_v5, 16 }
 0x2b6   : > { %v2255_v51 = vpop.f32.mrf.mxu3  ;;  %v2394_v53 = vpop.f32.mrf.mxu0 }
 0x2b7   : > { %v2277_v60 = vadd.f32 %v2252_v47, %v2005_v15  ;;  %v3027_v15 = vrot.slane %v13948_v58, 2  ;;  %v2613_v58 = vrot.slane %v11368_v37, 2 }
 0x2b8   : > { %v2567_v20 = vpop.f32.mrf.mxu1 }
 0x2b9   : > { %9371 = vmatmul.msk.bf16.gmra.mxu0 %vm334_vm1, %v3023_v41  ;;  %9349 = vmatmul.msk.bf16.gmra.mxu2 %vm334_vm1, %v2612_v32  ;;  %v2416_v48 = vadd.f32 %v2391_v27, %v2277_v60  ;;  %v3030_v41 = vrot.slane %v13951_v8, 3  ;;  %v3178_v27 = vsel %vm1394_vm6, %v3175_v6, %v3177_v2  ;;  %v2938_v60 = vld [vmem:[%s10600_s29 + $0x6c] sm:$0x7] }
 0x2bb   : > { %v11675_v47 = vadd.f32 %v2562_v49, %v2416_v48  ;;  %v2749_v49 = vld [vmem:[%s10600_s29 + $0x6c] sm:$0x3]  ;;  %v3031_v48 = vor.u32 %v3030_v41, %v3027_v15  ;;  %v2614_v15 = vsel %vm828_vm5, %v2611_v21, %v2613_v58 }
 0x2bc   : > { %v1983_v23 = vpop.f32.mrf.mxu2  ;;  %v2793_v10 = vunpack.c.l.b16 %v2749_v49 }
 0x2bd   : > { %v2006_v35 = vadd.f32 %v1983_v23, %v11396_v14  ;;  %v2942_v14 = vunpack.c.l.b16 %v2938_v60  ;;  %v3032_v59 = vsel %vm1177_vm8, %v3022_v3, %v3031_v48 }
 0x2be   : > { %v2257_v57 = vpop.f32.mrf.mxu3  ;;  %v2396_v54 = vpop.f32.mrf.mxu0 }
 0x2bf   : > { %v2278_v16 = vadd.f32 %v2255_v51, %v2006_v35  ;;  %v2943_v35 = vpack.c.b16 %v2942_v14, %v2942_v14 }
 0x2c0   : > { %v3223_v32 = vpop.f32.mrf.mxu1 }
 0x2c1   : > { %v2417_v23 = vadd.f32 %v2394_v53, %v2278_v16  ;;  %v2804_v53 = vpack.c.b16 %v2793_v10, %v2793_v10  ;;  %v3034_v37 = vshrl.u32 %v2943_v35, 16  ;;  %v9516_v16 = vld [vmem:[%s13932_s1 + $0x2e] sm:$0x3]  ;;  %v3179_v3 = vrot.slane %v2943_v35, 3 }
 0x2c2   : > { %v4273_v10 = vsel %vm365_vm0, %v9516_v16, 0  ;;  %v11716_v16 = vld [vmem:[%s10600_s29 + $0x30] sm:$0xff] }
 0x2c3   : > { %9383 = vmatmul.msk.bf16.gmra.mxu1 %vm334_vm1, %v3178_v27  ;;  %9361 = vmatmul.msk.bf16.gmra.mxu3 %vm334_vm1, %v2823_v52  ;;  %v11689_v9 = vadd.f32 %v2565_v25, %v2417_v23  ;;  %v3037_v52 = vshll.u32 %v2943_v35, 16  ;;  %v3180_v35 = vsel %vm1394_vm6, %v3177_v2, %v3179_v3 }
 0x2c4   : > { %v1985_v8 = vpop.f32.mrf.mxu2  ;;  %4282 = vmatpush.bf16.msra.mxu3 %v4273_v10 }
 0x2c5   : > { %v2007_v6 = vadd.f32 %v1985_v8, %v11413_v40  ;;  %v9505_v40 = vld [vmem:[%s13932_s1 + $0x2c] sm:$0x3]  ;;  %v2824_v8 = vrot.slane %v2804_v53, 2 }
 0x2c6   : > { %v2868_v0 = vpop.f32.mrf.mxu3  ;;  %v3084_v51 = vpop.f32.mrf.mxu0  ;;  %v4102_v21 = vsel %vm365_vm0, %v9505_v40, 0  ;;  %v11710_v40 = vld [vmem:[%s10600_s29 + $0x28] sm:$0xff]  }
 0x2c7   : > { %v2279_v27 = vadd.f32 %v2257_v57, %v2007_v6  ;;  %4111 = vmatpush.bf16.msra.mxu2 %v4102_v21  ;;  %v3036_v6 = vrot.slane %v3034_v37, 2  ;;  %v3851_v37 = vshll.u32 %v11710_v40, 16 }
 0x2c8   : > { %v3225_v41 = vpop.f32.mrf.mxu1 }
 0x2c9   : > { %9372 = vmatmul.msk.bf16.gmra.mxu0 %vm334_vm1, %v3032_v59  ;;  %9350 = vmatmul.msk.bf16.gmra.mxu2 %vm334_vm1, %v2614_v15  ;;  %v2418_v25 = vadd.f32 %v2396_v54, %v2279_v27  ;;  %v3039_v59 = vrot.slane %v3037_v52, 3  ;;  %v2825_v27 = vsel %vm828_vm5, %v2822_v55, %v2824_v8  ;;  %v3849_v8 = vshrl.u32 %v11710_v40, 16 }
 0x2cb   : > { %v11704_v57 = vadd.f32 %v2567_v20, %v2418_v25  ;;  %v3040_v53 = vor.u32 %v3039_v59, %v3036_v6  ;;  %v3303_v59 = vshll.u32 %v11437_v39, 16 }
 0x2cc   : > { %v2659_v60 = vpop.f32.mrf.mxu2 }
 0x2cd   : > { %v2709_v49 = vadd.f32 %v2659_v60, %v11432_v33  ;;  %v2615_v33 = vrot.slane %v11388_v44, 2  ;;  %v3041_v44 = vsel %vm1177_vm8, %v3031_v48, %v3040_v53  ;;  %v3853_v60 = vrot.slane %v3851_v37, 1 }
 0x2ce   : > { %v2870_v14 = vpop.f32.mrf.mxu3  ;;  %v3086_v23 = vpop.f32.mrf.mxu0  ;;  %v3300_v48 = vshrl.u32 %v11437_v39, 16  ;;  %v14019_v39 = vshll.u32 %v11440_v18, 16 }
 0x2cf   : > { %v2918_v15 = vadd.f32 %v2868_v0, %v2709_v49  ;;  %v9527_v0 = vld [vmem:[%s13932_s1 + $0x30] sm:$0x3]  ;;  %v2616_v21 = vsel %vm828_vm5, %v2613_v58, %v2615_v33  ;;  %v3856_v49 = vshll.u32 %v11716_v16, 16 }
 0x2d0   : > { %v3228_v54 = vpop.f32.mrf.mxu1  ;;  %v4412_v2 = vsel %vm365_vm0, %v9527_v0, 0  ;;  %v3302_v37 = vrot.slane %v3300_v48, 3  ;;  %v3305_v0 = vrot.slane %v3303_v59, 4 }
 0x2d1   : > { %v3134_v20 = vadd.f32 %v3084_v51, %v2918_v15  ;;  %4421 = vmatpush.bf16.msra.mxu0 %v4412_v2  ;;  %v3308_v2 = vrot.slane %v14019_v39, 4 }
 0x2d3   : > { %9384 = vmatmul.msk.bf16.gmra.mxu1 %vm334_vm1, %v3180_v35  ;;  %9362 = vmatmul.msk.bf16.gmra.mxu3 %vm334_vm1, %v2825_v27  ;;  %v11723_v55 = vadd.f32 %v3223_v32, %v3134_v20  ;;  %v9538_v32 = vld [vmem:[%s13932_s1 + $0x2] sm:$0x3]  ;;  %v3854_v35 = vor.u32 %v3853_v60, %v3849_v8  ;;  %v11752_v8 = vld [vmem:[%s10600_s29 + $0x38] sm:$0xff] }
 0x2d4   : > { %v2661_v52 = vpop.f32.mrf.mxu2 }
 0x2d5   : > { %v2710_v51 = vadd.f32 %v2661_v52, %v11455_v30  ;;  %v4748_v30 = vsel %vm365_vm0, %v9538_v32, 0 }
 0x2d6   : > { %v2873_v25 = vpop.f32.mrf.mxu3  ;;  %v3089_v3 = vpop.f32.mrf.mxu0  ;;  %4757 = vmatpush.bf16.msra.mxu1 %v4748_v30 }
 0x2d7   : > { %v2919_v6 = vadd.f32 %v2870_v14, %v2710_v51  ;;  %v3858_v14 = vrot.slane %v3856_v49, 1 }
 0x2d8   : > { %v3230_v10 = vpop.f32.mrf.mxu1 }
 0x2d9   : > { %9373 = vmatmul.msk.bf16.gmra.mxu0 %vm334_vm1, %v3041_v44  ;;  %9351 = vmatmul.msk.bf16.gmra.mxu2 %vm334_vm1, %v2616_v21  ;;  %v3135_v58 = vadd.f32 %v3086_v23, %v2919_v6  ;;  %v3307_v23 = vrot.slane %v2953_v19, 3  ;;  %v3859_v51 = vsel %vm249_vm2, %v3854_v35, %v3858_v14  ;;  %v10031_v6 = vld [vmem:[%s10600_s29 + $0x28] sm:$0xff] }
 0x2db   : > { %v11740_v15 = vadd.f32 %v3225_v41, %v3135_v58  ;;  %v3309_v21 = vor.u32 %v3308_v2, %v3307_v23  ;;  %v13966_v58 = vshll.u32 %v11752_v8, 16 }
 0x2dc   : > { %v2664_v27 = vpop.f32.mrf.mxu2 }
 0x2dd   : > { %v2711_v53 = vadd.f32 %v2664_v27, %v11470_v29  ;;  %v3306_v29 = vor.u32 %v3305_v0, %v3302_v37  ;;  %v14020_v0 = vshrl.u32 %v11476_v4, 16 }
 0x2de   : > { %v2875_v20 = vpop.f32.mrf.mxu3  ;;  %v3091_v33 = vpop.f32.mrf.mxu0 }
 0x2df   : > { %v2920_v41 = vadd.f32 %v2873_v25, %v2711_v53  ;;  %v3310_v25 = vsel %vm1534_vm7, %v3306_v29, %v3309_v21  ;;  %v3311_v23 = vrot.slane %v14020_v0, 3 }
 0x2e0   : > { %v3233_v52 = vpop.f32.mrf.mxu1 }
 0x2e1   : > { %v3136_v44 = vadd.f32 %v3089_v3, %v2920_v41  ;;  %v3860_v3 = vshrl.u32 %v11716_v16, 16 }
 0x2e3   : > { %9495 = vmatmul.msk.bf16.vlgmr.msrb.gmra.mxu1 %vm334_vm1, %v3859_v51  ;;  %9397 = vmatmul.msk.bf16.vlgmr.msrb.gmra.mxu3 %vm334_vm1, %v11422_v28  ;;  %v11754_v60 = vadd.f32 %v3228_v54, %v3136_v44  ;;  %v3862_v59 = vor.u32 %v3860_v3, %v3858_v14 }
 0x2e4   : > { %v2666_v19 = vpop.f32.mrf.mxu2 }
 0x2e5   : > { %v2712_v18 = vadd.f32 %v2666_v19, %v11484_v17  ;;  %v3866_v17 = vrot.slane %v13966_v58, 1  ;;  %v10032_v19 = vld [vmem:[%s10600_s29 + $0x30] sm:$0xff]  ;;  %v4198_v58 = vrot.slane %v3856_v49, 2 }
 0x2e6   : > { %v2878_v32 = vpop.f32.mrf.mxu3  ;;  %v3094_v30 = vpop.f32.mrf.mxu0 }
 0x2e7   : > { %v2921_v28 = vadd.f32 %v2875_v20, %v2712_v18  ;;  %v3867_v14 = vsel %vm249_vm2, %v3862_v59, %v3866_v17 }
 0x2e8   : > { %v3235_v48 = vpop.f32.mrf.mxu1 }
 0x2e9   : > { %9448 = vmatmul.msk.bf16.vlgmr.msrb.gmra.mxu0 %vm334_vm1, %v10031_v6  ;;  %9386 = vmatmul.msk.bf16.vlgmr.msrb.gmra.mxu2 %vm334_vm1, %v3310_v25  ;;  %v3137_v54 = vadd.f32 %v3091_v33, %v2921_v28  ;;  %v14021_v33 = vshll.u32 %v11476_v4, 16  ;;  %v13967_v28 = vshrl.u32 %v11752_v8, 16 }
 0x2eb   : > { %v11767_v35 = vadd.f32 %v3230_v10, %v3137_v54  ;;  %v3312_v39 = vrot.slane %v14021_v33, 4  ;;  %v3870_v59 = vor.u32 %v13967_v28, %v3866_v17 }
 0x2ec   : > { %v2669_v27 = vpop.f32.mrf.mxu2 }
 0x2ed   : > { %v2713_v53 = vadd.f32 %v2669_v27, %v11496_v13  ;;  %v3313_v41 = vor.u32 %v3312_v39, %v3311_v23  ;;  %v11779_v13 = vld [vmem:[%s10600_s29 + $0x40] sm:$0xff]  ;;  %v14022_v23 = vshrl.u32 %v11502_v1, 16 }
 0x2ee   : > { %v2880_v37 = vpop.f32.mrf.mxu3  ;;  %v3096_v20 = vpop.f32.mrf.mxu0 }
 0x2ef   : > { %v2922_v51 = vadd.f32 %v2878_v32, %v2713_v53  ;;  %v3314_v25 = vsel %vm1534_vm7, %v3309_v21, %v3313_v41  ;;  %v3315_v33 = vrot.slane %v14022_v23, 3 }
 0x2f0   : > { %v3238_v2 = vpop.f32.mrf.mxu1 }
 0x2f1   : > { %v3138_v10 = vadd.f32 %v3094_v30, %v2922_v51  ;;  %v13964_v30 = vshll.u32 %v11779_v13, 16 }
 0x2f3   : > { %9496 = vmatmul.msk.bf16.gmra.mxu1 %vm334_vm1, %v3867_v14  ;;  %9398 = vmatmul.msk.bf16.gmra.mxu3 %vm334_vm1, %v11710_v40  ;;  %v11781_v44 = vadd.f32 %v3233_v52, %v3138_v10  ;;  %v10308_v10 = vld [vmem:[%s10600_s29 + $0x30] sm:$0xff]  }
 0x2f4   : > { %v2671_v29 = vpop.f32.mrf.mxu2 }
 0x2f5   : > { %v2714_v4 = vadd.f32 %v2671_v29, %v11510_v61  ;;  %v3874_v61 = vrot.slane %v13964_v30, 1  ;;  %v11806_v29 = vld [vmem:[%s10600_s29 + $0x48] sm:$0xff] }
 0x2f6   : > { %v2883_v6 = vpop.f32.mrf.mxu3  ;;  %v3099_v18 = vpop.f32.mrf.mxu0 }
 0x2f7   : > { %v2923_v54 = vadd.f32 %v2880_v37, %v2714_v4  ;;  %v3875_v17 = vsel %vm249_vm2, %v3870_v59, %v3874_v61 }
 0x2f8   : > { %v3240_v32 = vpop.f32.mrf.mxu1 }
 0x2f9   : > { %9449 = vmatmul.msk.bf16.gmra.mxu0 %vm334_vm1, %v10032_v19  ;;  %9387 = vmatmul.msk.bf16.gmra.mxu2 %vm334_vm1, %v3314_v25  ;;  %v3139_v52 = vadd.f32 %v3096_v20, %v2923_v54  ;;  %v14023_v20 = vshll.u32 %v11502_v1, 16  ;;  %v10033_v25 = vld [vmem:[%s10600_s29 + $0x38] sm:$0xff] }
 0x2fb   : > { %v11794_v21 = vadd.f32 %v3235_v48, %v3139_v52  ;;  %v3316_v39 = vrot.slane %v14023_v20, 4 }
 0x2fc   : > { %v2674_v27 = vpop.f32.mrf.mxu2 }
 0x2fd   : > { %v2715_v53 = vadd.f32 %v2674_v27, %v11522_v42  ;;  %v3317_v42 = vor.u32 %v3316_v39, %v3315_v33  ;;  %v13965_v27 = vshrl.u32 %v11779_v13, 16 }
 0x2fe   : > { %v2885_v37 = vpop.f32.mrf.mxu3  ;;  %v3101_v0 = vpop.f32.mrf.mxu0 }
 0x2ff   : > { %v2924_v51 = vadd.f32 %v2883_v6, %v2715_v53  ;;  %v3318_v59 = vsel %vm1534_vm7, %v3313_v41, %v3317_v42  ;;  %v3878_v23 = vor.u32 %v13965_v27, %v3874_v61 }
 0x300   : > { %v3243_v14 = vpop.f32.mrf.mxu1 }
 0x301   : > { %v3140_v48 = vadd.f32 %v3099_v18, %v2924_v51  ;;  %v13962_v18 = vshll.u32 %v11806_v29, 16 }
 0x303   : > { %9497 = vmatmul.msk.bf16.gmra.mxu1 %vm334_vm1, %v3875_v17  ;;  %9399 = vmatmul.msk.bf16.gmra.mxu3 %vm334_vm1, %v10308_v10  ;;  %v11808_v19 = vadd.f32 %v3238_v2, %v3140_v48  ;;  %v14024_v17 = vshrl.u32 %v11528_v11, 16 }
 0x304   : > { %v2676_v4 = vpop.f32.mrf.mxu2 }
 0x305   : > { %v2716_v1 = vadd.f32 %v2676_v4, %v11536_v46  ;;  %v3882_v46 = vrot.slane %v13962_v18, 1  ;;  %v3319_v51 = vrot.slane %v14024_v17, 3 }
 0x306   : > { %v2888_v54 = vpop.f32.mrf.mxu3  ;;  %v3104_v52 = vpop.f32.mrf.mxu0 }
 0x307   : > { %v2925_v53 = vadd.f32 %v2885_v37, %v2716_v1  ;;  %v3883_v61 = vsel %vm249_vm2, %v3878_v23, %v3882_v46  ;;  %v11833_v1 = vld [vmem:[%s10600_s29 + $0x50] sm:$0xff] }
 0x308   : > { %v3245_v6 = vpop.f32.mrf.mxu1 }
 0x309   : > { %9450 = vmatmul.msk.bf16.gmra.mxu0 %vm334_vm1, %v10033_v25  ;;  %9388 = vmatmul.msk.bf16.gmra.mxu2 %vm334_vm1, %v3318_v59  ;;  %v3141_v2 = vadd.f32 %v3101_v0, %v2925_v53  ;;  %v14025_v0 = vshll.u32 %v11528_v11, 16  ;;  %v10309_v25 = vld [vmem:[%s10600_s29 + $0x38] sm:$0xff]  }
 0x30b   : > { %v11821_v41 = vadd.f32 %v3240_v32, %v3141_v2  ;;  %v3320_v10 = vrot.slane %v14025_v0, 4  ;;  %v10034_v2 = vld [vmem:[%s10600_s29 + $0x40] sm:$0xff] }
 0x30c   : > { %v2679_v33 = vpop.f32.mrf.mxu2 }
 0x30d   : > { %v2717_v20 = vadd.f32 %v2679_v33, %v11548_v36  ;;  %v3321_v36 = vor.u32 %v3320_v10, %v3319_v51 }
 0x30e   : > { %v2890_v37 = vpop.f32.mrf.mxu3  ;;  %v3106_v39 = vpop.f32.mrf.mxu0 }
 0x30f   : > { %v2926_v4 = vadd.f32 %v2888_v54, %v2717_v20  ;;  %v3322_v23 = vsel %vm1534_vm7, %v3317_v42, %v3321_v36  ;;  %v13963_v20 = vshrl.u32 %v11806_v29, 16 }
 0x310   : > { %v3248_v48 = vpop.f32.mrf.mxu1 }
 0x311   : > { %v3142_v32 = vadd.f32 %v3104_v52, %v2926_v4  ;;  %v13953_v52 = vshll.u32 %v11833_v1, 16  ;;  %v3886_v51 = vor.u32 %v13963_v20, %v3882_v46  ;;  %v3293_v20 = vld [vmem:[%s10600_s29 + $0x6c] sm:$0xf] }
 0x313   : > { %9498 = vmatmul.msk.bf16.gmra.mxu1 %vm334_vm1, %v3883_v61  ;;  %9400 = vmatmul.msk.bf16.gmra.mxu3 %vm334_vm1, %v10309_v25  ;;  %v11835_v59 = vadd.f32 %v3243_v14, %v3142_v32  ;;  %v14026_v25 = vshrl.u32 %v11554_v12, 16 }
 0x314   : > { %v2681_v53 = vpop.f32.mrf.mxu2 }
 0x315   : > { %v2718_v11 = vadd.f32 %v2681_v53, %v11562_v26  ;;  %v3890_v26 = vrot.slane %v13953_v52, 1  ;;  %v3323_v32 = vrot.slane %v14026_v25, 3  ;;  %v10035_v25 = vld [vmem:[%s10600_s29 + $0x48] sm:$0xff] }
 0x316   : > { %v2893_v33 = vpop.f32.mrf.mxu3  ;;  %v3109_v17 = vpop.f32.mrf.mxu0 }
 0x317   : > { %v2927_v0 = vadd.f32 %v2890_v37, %v2718_v11  ;;  %v3891_v46 = vsel %vm249_vm2, %v3886_v51, %v3890_v26 }
 0x318   : > { %v3250_v54 = vpop.f32.mrf.mxu1 }
 0x319   : > { %9451 = vmatmul.msk.bf16.gmra.mxu0 %vm334_vm1, %v10034_v2  ;;  %9389 = vmatmul.msk.bf16.gmra.mxu2 %vm334_vm1, %v3322_v23  ;;  %v3143_v14 = vadd.f32 %v3106_v39, %v2927_v0  ;;  %v14027_v39 = vshll.u32 %v11554_v12, 16  ;;  %v10310_v23 = vld [vmem:[%s10600_s29 + $0x40] sm:$0xff]   ;;  %v11860_v0 = vld [vmem:[%s10600_s29 + $0x58] sm:$0xff] }
 0x31b   : > { %v11848_v42 = vadd.f32 %v3245_v6, %v3143_v14  ;;  %v3324_v53 = vrot.slane %v14027_v39, 4 }
 0x31c   : > { %v2684_v10 = vpop.f32.mrf.mxu2 }
 0x31d   : > { %v2719_v61 = vadd.f32 %v2684_v10, %v11574_v31  ;;  %v3325_v31 = vor.u32 %v3324_v53, %v3323_v32 }
 0x31e   : > { %v2895_v37 = vpop.f32.mrf.mxu3  ;;  %v3111_v4 = vpop.f32.mrf.mxu0 }
 0x31f   : > { %v2928_v11 = vadd.f32 %v2893_v33, %v2719_v61  ;;  %v3326_v51 = vsel %vm1534_vm7, %v3321_v36, %v3325_v31  ;;  %v13955_v61 = vshrl.u32 %v11833_v1, 16 }
 0x320   : > { %v3253_v2 = vpop.f32.mrf.mxu1 }
 0x321   : > { %v3144_v6 = vadd.f32 %v3109_v17, %v2928_v11  ;;  %v13954_v17 = vshll.u32 %v11860_v0, 16  ;;  %v3894_v32 = vor.u32 %v13955_v61, %v3890_v26 }
 0x323   : > { %9499 = vmatmul.msk.bf16.gmra.mxu1 %vm334_vm1, %v3891_v46  ;;  %9401 = vmatmul.msk.bf16.gmra.mxu3 %vm334_vm1, %v10310_v23  ;;  %v11862_v14 = vadd.f32 %v3248_v48, %v3144_v6  ;;  %v14028_v6 = vshrl.u32 %v11580_v38, 16 }
 0x324   : > { %v2686_v10 = vpop.f32.mrf.mxu2 }
 0x325   : > { %v2720_v12 = vadd.f32 %v2686_v10, %v11588_v22  ;;  %v3898_v22 = vrot.slane %v13954_v17, 1  ;;  %v3327_v10 = vrot.slane %v14028_v6, 3  ;;  %v10036_v6 = vld [vmem:[%s10600_s29 + $0x50] sm:$0xff] }
 0x326   : > { %v2898_v39 = vpop.f32.mrf.mxu3  ;;  %v3114_v52 = vpop.f32.mrf.mxu0 }
 0x327   : > { %v2929_v46 = vadd.f32 %v2895_v37, %v2720_v12  ;;  %v3899_v26 = vsel %vm249_vm2, %v3894_v32, %v3898_v22 }
 0x328   : > { %v3255_v33 = vpop.f32.mrf.mxu1 }
 0x329   : > { %9452 = vmatmul.msk.bf16.gmra.mxu0 %vm334_vm1, %v10035_v25  ;;  %9390 = vmatmul.msk.bf16.gmra.mxu2 %vm334_vm1, %v3326_v51  ;;  %v3145_v48 = vadd.f32 %v3111_v4, %v2929_v46  ;;  %v14029_v4 = vshll.u32 %v11580_v38, 16  ;;  %v10311_v46 = vld [vmem:[%s10600_s29 + $0x48] sm:$0xff]  }
 0x32b   : > { %v11875_v36 = vadd.f32 %v3250_v54, %v3145_v48  ;;  %v3328_v25 = vrot.slane %v14029_v4, 4  ;;  %v11887_v48 = vld [vmem:[%s10600_s29 + $0x60] sm:$0xff] }
 0x32c   : > { %v2689_v53 = vpop.f32.mrf.mxu2 }
 0x32d   : > { %v2721_v11 = vadd.f32 %v2689_v53, %v11600_v24  ;;  %v3329_v24 = vor.u32 %v3328_v25, %v3327_v10 }
 0x32e   : > { %v2900_v37 = vpop.f32.mrf.mxu3  ;;  %v3116_v23 = vpop.f32.mrf.mxu0 }
 0x32f   : > { %v2930_v51 = vadd.f32 %v2898_v39, %v2721_v11  ;;  %v3330_v32 = vsel %vm1534_vm7, %v3325_v31, %v3329_v24  ;;  %v13958_v11 = vshrl.u32 %v11860_v0, 16 }
 0x330   : > { %v3258_v12 = vpop.f32.mrf.mxu1 }
 0x331   : > { %v3146_v54 = vadd.f32 %v3114_v52, %v2930_v51  ;;  %v13956_v52 = vshll.u32 %v11887_v48, 16  ;;  %v3902_v10 = vor.u32 %v13958_v11, %v3898_v22  ;;  %v10313_v11 = vld [vmem:[%s10600_s29 + $0x58] sm:$0xff]  }
 0x333   : > { %9500 = vmatmul.msk.bf16.gmra.mxu1 %vm334_vm1, %v3899_v26  ;;  %9402 = vmatmul.msk.bf16.gmra.mxu3 %vm334_vm1, %v10311_v46  ;;  %v11889_v53 = vadd.f32 %v3253_v2, %v3146_v54  ;;  %v14030_v46 = vshrl.u32 %v11606_v34, 16 }
 0x334   : > { %v2691_v17 = vpop.f32.mrf.mxu2 }
 0x335   : > { %v2722_v38 = vadd.f32 %v2691_v17, %v11614_v50  ;;  %v3906_v50 = vrot.slane %v13956_v52, 1  ;;  %v3331_v54 = vrot.slane %v14030_v46, 3 }
 0x336   : > { %v2903_v4 = vpop.f32.mrf.mxu3  ;;  %v3119_v61 = vpop.f32.mrf.mxu0 }
 0x337   : > { %v2931_v26 = vadd.f32 %v2900_v37, %v2722_v38  ;;  %v3907_v22 = vsel %vm249_vm2, %v3902_v10, %v3906_v50 }
 0x338   : > { %v3260_v39 = vpop.f32.mrf.mxu1 }
 0x339   : > { %9453 = vmatmul.msk.bf16.gmra.mxu0 %vm334_vm1, %v10036_v6  ;;  %9391 = vmatmul.msk.bf16.gmra.mxu2 %vm334_vm1, %v3330_v32  ;;  %v3147_v2 = vadd.f32 %v3116_v23, %v2931_v26  ;;  %v14031_v23 = vshll.u32 %v11606_v34, 16  ;;  %v11911_v26 = vld [vmem:[%s10600_s29 + $0x50] sm:$0xff]   ;;  %v10037_v34 = vld [vmem:[%s10600_s29 + $0x58] sm:$0xff] }
 0x33b   : > { %v11902_v31 = vadd.f32 %v3255_v33, %v3147_v2  ;;  %v3332_v6 = vrot.slane %v14031_v23, 4  ;;  %v11917_v2 = vld [vmem:[%s10600_s29 + $0x68] sm:$0xff] }
 0x33c   : > { %v2694_v17 = vpop.f32.mrf.mxu2 }
 0x33d   : > { %v2723_v25 = vadd.f32 %v2694_v17, %v11626_v45  ;;  %v3333_v45 = vor.u32 %v3332_v6, %v3331_v54 }
 0x33e   : > { %v2905_v37 = vpop.f32.mrf.mxu3  ;;  %v3121_v51 = vpop.f32.mrf.mxu0 }
 0x33f   : > { %v2932_v32 = vadd.f32 %v2903_v4, %v2723_v25  ;;  %v3334_v4 = vsel %vm1534_vm7, %v3329_v24, %v3333_v45 }
 0x340   : > { %v3263_v38 = vpop.f32.mrf.mxu1 }
 0x341   : > { %v3148_v33 = vadd.f32 %v3119_v61, %v2932_v32  ;;  %v13959_v61 = vshll.u32 %v11917_v2, 16 }
 0x343   : > { %9501 = vmatmul.msk.bf16.gmra.mxu1 %vm334_vm1, %v3907_v22  ;;  %9403 = vmatmul.msk.bf16.gmra.mxu3 %vm334_vm1, %v11911_v26  ;;  %v11919_v17 = vadd.f32 %v3258_v12, %v3148_v33  ;;  %v13957_v22 = vshrl.u32 %v11887_v48, 16  ;;  %v3914_v54 = vrot.slane %v13959_v61, 1  ;;  %v10038_v61 = vld [vmem:[%s10600_s29 + $0x60] sm:$0xff] }
 0x344   : > { %v2696_v46 = vpop.f32.mrf.mxu2 }
 0x345   : > { %v2724_v23 = vadd.f32 %v2696_v46, %v11640_v62  ;;  %v3910_v62 = vor.u32 %v13957_v22, %v3906_v50 }
 0x346   : > { %v2908_v52 = vpop.f32.mrf.mxu3  ;;  %v3124_v10 = vpop.f32.mrf.mxu0 }
 0x347   : > { %v2933_v32 = vadd.f32 %v2905_v37, %v2724_v23  ;;  %v3915_v50 = vsel %vm249_vm2, %v3910_v62, %v3914_v54 }
 0x348   : > { %v3265_v25 = vpop.f32.mrf.mxu1 }
 0x349   : > { %9454 = vmatmul.msk.bf16.gmra.mxu0 %vm334_vm1, %v10037_v34  ;;  %9392 = vmatmul.msk.bf16.gmra.mxu2 %vm334_vm1, %v3334_v4  ;;  %v3149_v12 = vadd.f32 %v3121_v51, %v2933_v32  ;;  %v14032_v34 = vshrl.u32 %v11632_v63, 16  ;;  %v14033_v4 = vshll.u32 %v11632_v63, 16 }
 0x34b   : > { %v11932_v24 = vadd.f32 %v3260_v39, %v3149_v12  ;;  %v3335_v23 = vrot.slane %v14032_v34, 3  ;;  %v3336_v51 = vrot.slane %v14033_v4, 4  ;;  %v11943_v39 = vld [vmem:[%s10600_s29 + $0x70] sm:$0xff] }
 0x34c   : > { %v2699_v6 = vpop.f32.mrf.mxu2 }
 0x34d   : > { %v2725_v33 = vadd.f32 %v2699_v6, %v11660_v56  ;;  %v3337_v12 = vor.u32 %v3336_v51, %v3335_v23 }
 0x34e   : > { %v2910_v37 = vpop.f32.mrf.mxu3  ;;  %v3126_v46 = vpop.f32.mrf.mxu0 }
 0x34f   : > { %v2934_v22 = vadd.f32 %v2908_v52, %v2725_v33  ;;  %v13961_v52 = vshrl.u32 %v11917_v2, 16  ;;  %v13960_v33 = vshll.u32 %v11943_v39, 16 }
 0x350   : > { %v3268_v32 = vpop.f32.mrf.mxu1 }
 0x351   : > { %v3150_v56 = vadd.f32 %v3124_v10, %v2934_v22  ;;  %v3338_v10 = vsel %vm1534_vm7, %v3333_v45, %v3337_v12  ;;  %v3922_v51 = vrot.slane %v13960_v33, 1 }
 0x353   : > { %9502 = vmatmul.msk.bf16.gmra.mxu1 %vm334_vm1, %v3915_v50  ;;  %9404 = vmatmul.msk.bf16.gmra.mxu3 %vm334_vm1, %v10313_v11  ;;  %v11946_v6 = vadd.f32 %v3263_v38, %v3150_v56  ;;  %v10176_v50 = vunpack.c.h.b16 %v11710_v40  ;;  %v4044_v38 = vld [vmem:[%s10600_s29 + $0x28] sm:$0xe] }
 0x354   : > { %v2701_v34 = vpop.f32.mrf.mxu2  ;;  %v4048_v23 = vunpack.c.l.b16 %v4044_v38 }
 0x355   : > { %v2726_v63 = vadd.f32 %v2701_v34, %v11675_v47  ;;  %v3918_v47 = vor.u32 %v13961_v52, %v3914_v54  ;;  %v3792_v34 = vld [vmem:[%s10600_s29 + $0x78] sm:$0x1] }
 0x356   : > { %v2913_v4 = vpop.f32.mrf.mxu3  ;;  %v3129_v62 = vpop.f32.mrf.mxu0  ;;  %v11965_v45 = vpack.c.b16 %v10176_v50, %v4048_v23  ;;  %v14035_v23 = vshll.u32 %v11667_v5, 16 }
 0x357   : > { %v2935_v11 = vadd.f32 %v2910_v37, %v2726_v63 }
 0x358   : > { %v11954_v22 = vpop.f32.mrf.mxu1  ;;  %v4193_v54 = vshll.u32 %v11965_v45, 16  ;;  %v3340_v18 = vrot.slane %v14035_v23, 4 }
 0x359   : > { %9455 = vmatmul.msk.bf16.gmra.mxu0 %vm334_vm1, %v10038_v61  ;;  %9393 = vmatmul.msk.bf16.gmra.mxu2 %vm334_vm1, %v3338_v10  ;;  %v3151_v56 = vadd.f32 %v3126_v46, %v2935_v11  ;;  %v4197_v61 = vrot.slane %v3860_v3, 1  ;;  %v4190_v10 = vshrl.u32 %v11965_v45, 16  ;;  %v14034_v46 = vshrl.u32 %v11667_v5, 16 }
 0x35a   : > { %v3836_v3 = vunpack.c.l.b16 %v3792_v34  ;;  %v4195_v27 = vrot.slane %v4193_v54, 2 }
 0x35b   : > { %v11968_v37 = vadd.f32 %v3265_v25, %v3151_v56  ;;  %v3339_v11 = vrot.slane %v14034_v46, 3  ;;  %v3923_v25 = vsel %vm249_vm2, %v3918_v47, %v3922_v51  ;;  %v4192_v30 = vrot.slane %v4190_v10, 1 }
 0x35c   : > { %v2704_v63 = vpop.f32.mrf.mxu2  ;;  %v11983_v28 = vor.u32 %v4198_v58, %v4197_v61  ;;  %v3297_v46 = vunpack.c.l.b16 %v3293_v20  ;;  %v11988_v23 = vpack.c.b16 %v3836_v3, %v3836_v3 }
 0x35d   : > { %v2727_v38 = vadd.f32 %v2704_v63, %v11689_v9  ;;  %v4196_v63 = vor.u32 %v4195_v27, %v4192_v30  ;;  %v3341_v47 = vor.u32 %v3340_v18, %v3339_v11  ;;  %v10039_v30 = vld [vmem:[%s10600_s29 + $0x68] sm:$0xff] }
 0x35e   : > { %v2915_v33 = vpop.f32.mrf.mxu3  ;;  %v3131_v52 = vpop.f32.mrf.mxu0  ;;  %v3298_v20 = vpack.c.b16 %v3297_v46, %v3297_v46  ;;  %v3928_v18 = vshll.u32 %v11988_v23, 16 }
 0x35f   : > { %v2936_v9 = vadd.f32 %v2913_v4, %v2727_v38  ;;  %v11992_v34 = vsel %vm656_vm3, %v4196_v63, %v11983_v28 }
 0x360   : > { %v3974_v56 = vpop.f32.mrf.mxu1  ;;  %v3347_v38 = vshll.u32 %v3298_v20, 16  ;;  %v3930_v3 = vrot.slane %v3928_v18, 1 }
 0x361   : > { %v3152_v5 = vadd.f32 %v3129_v62, %v2936_v9  ;;  %v3342_v62 = vsel %vm1534_vm7, %v3337_v12, %v3341_v47  ;;  %v9595_v12 = vld [vmem:[%s13932_s1 + $0x4] sm:$0x3] }
 0x362   : > { %v4948_v9 = vsel %vm365_vm0, %v9595_v12, 0 }
 0x363   : > { %9503 = vmatmul.msk.bf16.gmra.mxu1 %vm334_vm1, %v3923_v25  ;;  %9405 = vmatmul.msk.bf16.gmra.mxu3 %vm334_vm1, %v11650_v43  ;;  %v11994_v10 = vadd.f32 %v3268_v32, %v3152_v5  ;;  %v3924_v43 = vshrl.u32 %v11943_v39, 16  ;;  %v3344_v32 = vshrl.u32 %v3298_v20, 16 }
 0x364   : > { %v2706_v49 = vpop.f32.mrf.mxu2  ;;  %4957 = vmatpush.bf16.msrb.mxu3 %v4948_v9 }
 0x365   : > { %v2728_v58 = vadd.f32 %v2706_v49, %v11704_v57  ;;  %v4577_v57 = vld [vmem:[%s13932_s1] sm:$0x3]  ;;  %v3926_v25 = vor.u32 %v3924_v43, %v3922_v51  ;;  %v3346_v51 = vrot.slane %v3344_v32, 3 }
 0x366   : > { %v3518_v27 = vpop.f32.mrf.mxu3  ;;  %v3702_v4 = vpop.f32.mrf.mxu0 }
 0x367   : > { %v2937_v54 = vadd.f32 %v2915_v33, %v2728_v58  ;;  %v4830_v33 = vsel %vm365_vm0, %v4577_v57, 0 }
 0x368   : > { %v3976_v61 = vpop.f32.mrf.mxu1  ;;  %4839 = vmatpush.bf16.msrb.mxu2 %v4830_v33 }
 0x369   : > { %9456 = vmatmul.msk.bf16.gmra.mxu0 %vm334_vm1, %v10039_v30  ;;  %9394 = vmatmul.msk.bf16.gmra.mxu2 %vm334_vm1, %v3342_v62  ;;  %v3153_v11 = vadd.f32 %v3131_v52, %v2937_v54  ;;  %v14036_v52 = vunpack.c.l.b16 %v11653_v7  ;;  %v3349_v62 = vrot.slane %v3347_v38, 4  ;;  %v3931_v54 = vsel %vm249_vm2, %v3926_v25, %v3930_v3  ;;  %v9606_v7 = vld [vmem:[%s13932_s1 + $0x6] sm:$0x3]  ;;  %v10040_v38 = vld [vmem:[%s10600_s29 + $0x70] sm:$0xff] }
 0x36b   : > { %v12014_v63 = vadd.f32 %v11954_v22, %v3153_v11  ;;  %v3475_v20 = vpack.c.b16 %v3297_v46, %v14036_v52  ;;  %v3350_v22 = vor.u32 %v3349_v62, %v3346_v51  ;;  %v4636_v11 = vshll.u32 %v11911_v26, 16 }
 0x36c   : > { %v3394_v5 = vpop.f32.mrf.mxu2  ;;  %v5118_v46 = vsel %vm365_vm0, %v9606_v7, 0 }
 0x36d   : > { %v3444_v49 = vadd.f32 %v3394_v5, %v11723_v55  ;;  %v12023_v55 = vld [vmem:[%s10600_s29 + $0x58] sm:$0xff]  ;;  %5127 = vmatpush.bf16.msrb.mxu0 %v5118_v46  ;;  %v3351_v33 = vsel %vm1534_vm7, %v3341_v47, %v3350_v22  ;;  %v4354_v5 = vld [vmem:[%s10600_s29 + $0x28] sm:$0xc]  ;;  %v4638_v52 = vrot.slane %v4636_v11, 1 }
 0x36e   : > { %v3520_v30 = vpop.f32.mrf.mxu3  ;;  %v3704_v58 = vpop.f32.mrf.mxu0  ;;  %v4358_v62 = vunpack.c.l.b16 %v4354_v5  ;;  %v4051_v5 = vrot.slane %v11716_v16, 1 }
 0x36f   : > { %v3568_v57 = vadd.f32 %v3518_v27, %v3444_v49  ;;  %v4634_v49 = vshrl.u32 %v11911_v26, 16 }
 0x370   : > { %v3979_v18 = vpop.f32.mrf.mxu1  ;;  %v4359_v46 = vpack.c.b16 %v10176_v50, %v4358_v62 }
 0x371   : > { %v3752_v12 = vadd.f32 %v3702_v4, %v3568_v57 }
 0x373   : > { %9504 = vmatmul.msk.bf16.gmra.mxu1 %vm334_vm1, %v3931_v54  ;;  %9406 = vmatmul.msk.bf16.gmra.mxu3 %vm334_vm1, %v3475_v20  ;;  %v12030_v32 = vadd.f32 %v3974_v56, %v3752_v12  ;;  %v4641_v20 = vshll.u32 %v12023_v55, 16  ;;  %v9617_v56 = vld [vmem:[%s13932_s1 + $0x8] sm:$0x3]  ;;  %v4639_v54 = vor.u32 %v4638_v52, %v4634_v49  ;;  %v12059_v49 = vld [vmem:[%s10600_s29 + $0x60] sm:$0xff] }
 0x374   : > { %v3396_v27 = vpop.f32.mrf.mxu2 }
 0x375   : > { %v3445_v4 = vadd.f32 %v3396_v27, %v11740_v15  ;;  %v5256_v15 = vsel %vm365_vm0, %v9617_v56, 0  ;;  %v4643_v57 = vrot.slane %v4641_v20, 1 }
 0x376   : > { %v3523_v25 = vpop.f32.mrf.mxu3  ;;  %v3707_v3 = vpop.f32.mrf.mxu0  ;;  %5265 = vmatpush.bf16.msrb.mxu1 %v5256_v15 }
 0x377   : > { %v3569_v51 = vadd.f32 %v3520_v30, %v3445_v4 }
 0x378   : > { %v3981_v9 = vpop.f32.mrf.mxu1 }
 0x379   : > { %9457 = vmatmul.msk.bf16.gmra.mxu0 %vm334_vm1, %v10040_v38  ;;  %9395 = vmatmul.msk.bf16.gmra.mxu2 %vm334_vm1, %v3351_v33  ;;  %v3753_v47 = vadd.f32 %v3704_v58, %v3569_v51  ;;  %v4644_v38 = vsel %vm249_vm2, %v4639_v54, %v4643_v57  ;;  %v4360_v58 = vrot.slane %v4359_v46, 2  ;;  %v4361_v33 = vrot.slane %v11716_v16, 2 }
 0x37a   : > { %v14037_v16 = vshrl.u32 %v11752_v8, 16 }
 0x37b   : > { %v12046_v12 = vadd.f32 %v3976_v61, %v3753_v47  ;;  %v4362_v56 = vsel %vm828_vm5, %v4360_v58, %v4361_v33 }
 0x37c   : > { %v3399_v30 = vpop.f32.mrf.mxu2  ;;  %v4201_v47 = vrot.slane %v14037_v16, 1 }
 0x37d   : > { %v3446_v22 = vadd.f32 %v3399_v30, %v11754_v60  ;;  %v4050_v60 = vrot.slane %v11965_v45, 1  ;;  %v4649_v45 = vshll.u32 %v12059_v49, 16 }
 0x37e   : > { %v3525_v11 = vpop.f32.mrf.mxu3  ;;  %v3709_v7 = vpop.f32.mrf.mxu0 }
 0x37f   : > { %v3570_v4 = vadd.f32 %v3523_v25, %v3446_v22  ;;  %v4651_v22 = vrot.slane %v4649_v45, 1 }
 0x380   : > { %v3984_v27 = vpop.f32.mrf.mxu1 }
 0x381   : > { %v3754_v61 = vadd.f32 %v3707_v3, %v3570_v4  ;;  %v4052_v3 = vsel %vm516_vm4, %v4050_v60, %v4051_v5 }
 0x383   : > { %9575 = vmatmul.msk.bf16.vlgmr.msra.gmra.mxu1 %vm334_vm1, %v4644_v38  ;;  %9517 = vmatmul.msk.bf16.vlgmr.msra.gmra.mxu3 %vm334_vm1, %v11992_v34  ;;  %v12061_v40 = vadd.f32 %v3979_v18, %v3754_v61  ;;  %v4645_v34 = vshrl.u32 %v12023_v55, 16  ;;  %v14038_v18 = vshll.u32 %v11752_v8, 16 }
 0x384   : > { %v3401_v50 = vpop.f32.mrf.mxu2 }
 0x385   : > { %v3447_v25 = vadd.f32 %v3401_v50, %v11767_v35  ;;  %v4202_v54 = vrot.slane %v14038_v18, 2  ;;  %v4647_v30 = vor.u32 %v4645_v34, %v4643_v57  ;;  %v4363_v57 = vrot.slane %v11752_v8, 2 }
 0x386   : > { %v3528_v52 = vpop.f32.mrf.mxu3  ;;  %v3712_v51 = vpop.f32.mrf.mxu0 }
 0x387   : > { %v3571_v62 = vadd.f32 %v3525_v11, %v3447_v25  ;;  %v4203_v46 = vor.u32 %v4202_v54, %v4201_v47  ;;  %v4652_v50 = vsel %vm249_vm2, %v4647_v30, %v4651_v22 }
 0x388   : > { %v3986_v15 = vpop.f32.mrf.mxu1 }
 0x389   : > { %9528 = vmatmul.msk.bf16.vlgmr.msra.gmra.mxu0 %vm334_vm1, %v4362_v56  ;;  %9506 = vmatmul.msk.bf16.vlgmr.msra.gmra.mxu2 %vm334_vm1, %v4052_v3  ;;  %v3755_v35 = vadd.f32 %v3709_v7, %v3571_v62  ;;  %v4204_v7 = vsel %vm656_vm3, %v11983_v28, %v4203_v46  ;;  %v12089_v3 = vld [vmem:[%s10600_s29 + $0x68] sm:$0xff]  ;;  %v4364_v28 = vsel %vm828_vm5, %v4361_v33, %v4363_v57 }
 0x38b   : > { %v12078_v11 = vadd.f32 %v3981_v9, %v3755_v35  ;;  %v4053_v9 = vrot.slane %v11752_v8, 1  ;;  %v13969_v35 = vshll.u32 %v12089_v3, 16  ;;  %v14039_v8 = vshrl.u32 %v11779_v13, 16 }
 0x38c   : > { %v3404_v38 = vpop.f32.mrf.mxu2 }
 0x38d   : > { %v3448_v4 = vadd.f32 %v3404_v38, %v11781_v44  ;;  %v4054_v18 = vsel %vm516_vm4, %v4051_v5, %v4053_v9  ;;  %v4205_v38 = vrot.slane %v14039_v8, 1  ;;  %v4659_v5 = vrot.slane %v13969_v35, 1  ;;  %v12118_v8 = vld [vmem:[%s10600_s29 + $0x70] sm:$0xff] }
 0x38e   : > { %v3530_v58 = vpop.f32.mrf.mxu3  ;;  %v3714_v61 = vpop.f32.mrf.mxu0 }
 0x38f   : > { %v3572_v25 = vadd.f32 %v3528_v52, %v3448_v4 }
 0x390   : > { %v3989_v60 = vpop.f32.mrf.mxu1 }
 0x391   : > { %v3756_v56 = vadd.f32 %v3712_v51, %v3572_v25  ;;  %v4653_v51 = vshrl.u32 %v12059_v49, 16 }
 0x393   : > { %9576 = vmatmul.msk.bf16.gmra.mxu1 %vm334_vm1, %v4652_v50  ;;  %9518 = vmatmul.msk.bf16.gmra.mxu3 %vm334_vm1, %v4204_v7  ;;  %v12091_v44 = vadd.f32 %v3984_v27, %v3756_v56  ;;  %v14040_v27 = vshll.u32 %v11779_v13, 16  ;;  %v4655_v33 = vor.u32 %v4653_v51, %v4651_v22  ;;  %v4365_v22 = vrot.slane %v11779_v13, 2 }
 0x394   : > { %v3406_v62 = vpop.f32.mrf.mxu2 }
 0x395   : > { %v3449_v16 = vadd.f32 %v3406_v62, %v11794_v21  ;;  %v4206_v4 = vrot.slane %v14040_v27, 2 }
 0x396   : > { %v3533_v52 = vpop.f32.mrf.mxu3  ;;  %v3717_v47 = vpop.f32.mrf.mxu0 }
 0x397   : > { %v3573_v30 = vadd.f32 %v3530_v58, %v3449_v16  ;;  %v4207_v50 = vor.u32 %v4206_v4, %v4205_v38 }
 0x398   : > { %v3991_v54 = vpop.f32.mrf.mxu1 }
 0x399   : > { %9529 = vmatmul.msk.bf16.gmra.mxu0 %vm334_vm1, %v4364_v28  ;;  %9507 = vmatmul.msk.bf16.gmra.mxu2 %vm334_vm1, %v4054_v18  ;;  %v3757_v21 = vadd.f32 %v3714_v61, %v3573_v30  ;;  %v4660_v28 = vsel %vm249_vm2, %v4655_v33, %v4659_v5  ;;  %v4208_v61 = vsel %vm656_vm3, %v4203_v46, %v4207_v50 }
 0x39a   : > { %v4366_v46 = vsel %vm828_vm5, %v4363_v57, %v4365_v22 }
 0x39b   : > { %v12108_v58 = vadd.f32 %v3986_v15, %v3757_v21  ;;  %v4055_v15 = vrot.slane %v11779_v13, 1  ;;  %v14041_v13 = vshrl.u32 %v11806_v29, 16 }
 0x39c   : > { %v3409_v25 = vpop.f32.mrf.mxu2 }
 0x39d   : > { %v3450_v7 = vadd.f32 %v3409_v25, %v11808_v19  ;;  %v4056_v21 = vsel %vm516_vm4, %v4053_v9, %v4055_v15  ;;  %v13968_v25 = vshll.u32 %v12118_v8, 16 }
 0x39e   : > { %v3535_v56 = vpop.f32.mrf.mxu3  ;;  %v3719_v62 = vpop.f32.mrf.mxu0 }
 0x39f   : > { %v3574_v18 = vadd.f32 %v3533_v52, %v3450_v7  ;;  %v4667_v9 = vrot.slane %v13968_v25, 1 }
 0x3a0   : > { %v3994_v16 = vpop.f32.mrf.mxu1 }
 0x3a1   : > { %v3758_v30 = vadd.f32 %v3717_v47, %v3574_v18  ;;  %v13978_v47 = vshrl.u32 %v12089_v3, 16 }
 0x3a3   : > { %9577 = vmatmul.msk.bf16.gmra.mxu1 %vm334_vm1, %v4660_v28  ;;  %9519 = vmatmul.msk.bf16.gmra.mxu3 %vm334_vm1, %v4208_v61  ;;  %v12120_v19 = vadd.f32 %v3989_v60, %v3758_v30  ;;  %v4209_v28 = vrot.slane %v14041_v13, 1  ;;  %v14042_v60 = vshll.u32 %v11806_v29, 16  ;;  %v4663_v57 = vor.u32 %v13978_v47, %v4659_v5 }
 0x3a4   : > { %v3411_v38 = vpop.f32.mrf.mxu2  ;;  %v4367_v5 = vrot.slane %v11806_v29, 2 }
 0x3a5   : > { %v3451_v27 = vadd.f32 %v3411_v38, %v11821_v41  ;;  %v4210_v18 = vrot.slane %v14042_v60, 2 }
 0x3a6   : > { %v3538_v4 = vpop.f32.mrf.mxu3  ;;  %v3722_v52 = vpop.f32.mrf.mxu0 }
 0x3a7   : > { %v3575_v7 = vadd.f32 %v3535_v56, %v3451_v27  ;;  %v4211_v61 = vor.u32 %v4210_v18, %v4209_v28  ;;  %v12147_v28 = vld [vmem:[%s10600_s29 + $0x78] sm:$0xff] }
 0x3a8   : > { %v3996_v33 = vpop.f32.mrf.mxu1 }
 0x3a9   : > { %9530 = vmatmul.msk.bf16.gmra.mxu0 %vm334_vm1, %v4366_v46  ;;  %9508 = vmatmul.msk.bf16.gmra.mxu2 %vm334_vm1, %v4056_v21  ;;  %v3759_v41 = vadd.f32 %v3719_v62, %v3575_v7  ;;  %v4668_v46 = vsel %vm249_vm2, %v4663_v57, %v4667_v9  ;;  %v4212_v62 = vsel %vm656_vm3, %v4207_v50, %v4211_v61 }
 0x3aa   : > { %v4368_v50 = vsel %vm828_vm5, %v4365_v22, %v4367_v5 }
 0x3ab   : > { %v12137_v56 = vadd.f32 %v3991_v54, %v3759_v41  ;;  %v4057_v54 = vrot.slane %v11806_v29, 1  ;;  %v14043_v29 = vshrl.u32 %v11833_v1, 16 }
 0x3ac   : > { %v3414_v30 = vpop.f32.mrf.mxu2 }
 0x3ad   : > { %v3452_v38 = vadd.f32 %v3414_v30, %v11835_v59  ;;  %v4058_v30 = vsel %vm516_vm4, %v4055_v15, %v4057_v54 }
 0x3ae   : > { %v3540_v27 = vpop.f32.mrf.mxu3  ;;  %v3724_v13 = vpop.f32.mrf.mxu0 }
 0x3af   : > { %v3576_v21 = vadd.f32 %v3538_v4, %v3452_v38 }
 0x3b0   : > { %v3999_v60 = vpop.f32.mrf.mxu1 }
 0x3b1   : > { %v3760_v7 = vadd.f32 %v3722_v52, %v3576_v21  ;;  %v13971_v52 = vshrl.u32 %v12118_v8, 16 }
 0x3b3   : > { %9578 = vmatmul.msk.bf16.gmra.mxu1 %vm334_vm1, %v4668_v46  ;;  %9520 = vmatmul.msk.bf16.gmra.mxu3 %vm334_vm1, %v4212_v62  ;;  %v12149_v59 = vadd.f32 %v3994_v16, %v3760_v7  ;;  %v13970_v46 = vshll.u32 %v12147_v28, 16  ;;  %v4213_v62 = vrot.slane %v14043_v29, 1  ;;  %v14044_v16 = vshll.u32 %v11833_v1, 16 }
 0x3b4   : > { %v3416_v18 = vpop.f32.mrf.mxu2  ;;  %v4671_v22 = vor.u32 %v13971_v52, %v4667_v9  ;;  %v4369_v9 = vrot.slane %v11833_v1, 2 }
 0x3b5   : > { %v3453_v41 = vadd.f32 %v3416_v18, %v11848_v42  ;;  %v4214_v7 = vrot.slane %v14044_v16, 2  ;;  %v4675_v15 = vrot.slane %v13970_v46, 1 }
 0x3b6   : > { %v3543_v57 = vpop.f32.mrf.mxu3  ;;  %v3727_v4 = vpop.f32.mrf.mxu0 }
 0x3b7   : > { %v3577_v21 = vadd.f32 %v3540_v27, %v3453_v41  ;;  %v4215_v18 = vor.u32 %v4214_v7, %v4213_v62  ;;  %v12176_v62 = vld [vmem:[%s10600_s29 + $0x80] sm:$0xff] }
 0x3b8   : > { %v4001_v38 = vpop.f32.mrf.mxu1 }
 0x3b9   : > { %9531 = vmatmul.msk.bf16.gmra.mxu0 %vm334_vm1, %v4368_v50  ;;  %9509 = vmatmul.msk.bf16.gmra.mxu2 %vm334_vm1, %v4058_v30  ;;  %v3761_v42 = vadd.f32 %v3724_v13, %v3577_v21  ;;  %v4676_v50 = vsel %vm249_vm2, %v4671_v22, %v4675_v15  ;;  %v4216_v13 = vsel %vm656_vm3, %v4211_v61, %v4215_v18 }
 0x3ba   : > { %v4370_v61 = vsel %vm828_vm5, %v4367_v5, %v4369_v9 }
 0x3bb   : > { %v12166_v27 = vadd.f32 %v3996_v33, %v3761_v42  ;;  %v4059_v33 = vrot.slane %v11833_v1, 1  ;;  %v14045_v1 = vshrl.u32 %v11860_v0, 16 }
 0x3bc   : > { %v3419_v41 = vpop.f32.mrf.mxu2 }
 0x3bd   : > { %v3454_v29 = vadd.f32 %v3419_v41, %v11862_v14  ;;  %v4060_v41 = vsel %vm516_vm4, %v4057_v54, %v4059_v33 }
 0x3be   : > { %v3545_v25 = vpop.f32.mrf.mxu3  ;;  %v3729_v16 = vpop.f32.mrf.mxu0 }
 0x3bf   : > { %v3578_v30 = vadd.f32 %v3543_v57, %v3454_v29 }
 0x3c0   : > { %v4004_v35 = vpop.f32.mrf.mxu1 }
 0x3c1   : > { %v3762_v21 = vadd.f32 %v3727_v4, %v3578_v30  ;;  %v13973_v4 = vshrl.u32 %v12147_v28, 16 }
 0x3c3   : > { %9579 = vmatmul.msk.bf16.gmra.mxu1 %vm334_vm1, %v4676_v50  ;;  %9521 = vmatmul.msk.bf16.gmra.mxu3 %vm334_vm1, %v4216_v13  ;;  %v12178_v14 = vadd.f32 %v3999_v60, %v3762_v21  ;;  %v13972_v50 = vshll.u32 %v12176_v62, 16  ;;  %v4217_v13 = vrot.slane %v14045_v1, 1  ;;  %v14046_v60 = vshll.u32 %v11860_v0, 16 }
 0x3c4   : > { %v3421_v7 = vpop.f32.mrf.mxu2  ;;  %v4679_v5 = vor.u32 %v13973_v4, %v4675_v15  ;;  %v4371_v15 = vrot.slane %v11860_v0, 2 }
 0x3c5   : > { %v3455_v42 = vadd.f32 %v3421_v7, %v11875_v36  ;;  %v4218_v21 = vrot.slane %v14046_v60, 2  ;;  %v4683_v54 = vrot.slane %v13972_v50, 1 }
 0x3c6   : > { %v3548_v22 = vpop.f32.mrf.mxu3  ;;  %v3732_v57 = vpop.f32.mrf.mxu0 }
 0x3c7   : > { %v3579_v30 = vadd.f32 %v3545_v25, %v3455_v42  ;;  %v4219_v7 = vor.u32 %v4218_v21, %v4217_v13  ;;  %v12205_v13 = vld [vmem:[%s10600_s29 + $0x88] sm:$0xff] }
 0x3c8   : > { %v4006_v29 = vpop.f32.mrf.mxu1 }
 0x3c9   : > { %9532 = vmatmul.msk.bf16.gmra.mxu0 %vm334_vm1, %v4370_v61  ;;  %9510 = vmatmul.msk.bf16.gmra.mxu2 %vm334_vm1, %v4060_v41  ;;  %v3763_v36 = vadd.f32 %v3729_v16, %v3579_v30  ;;  %v4684_v61 = vsel %vm249_vm2, %v4679_v5, %v4683_v54  ;;  %v4220_v16 = vsel %vm656_vm3, %v4215_v18, %v4219_v7 }
 0x3ca   : > { %v4372_v18 = vsel %vm828_vm5, %v4369_v9, %v4371_v15 }
 0x3cb   : > { %v12195_v25 = vadd.f32 %v4001_v38, %v3763_v36  ;;  %v4061_v38 = vrot.slane %v11860_v0, 1  ;;  %v14047_v0 = vshrl.u32 %v11887_v48, 16 }
 0x3cc   : > { %v3424_v42 = vpop.f32.mrf.mxu2 }
 0x3cd   : > { %v3456_v1 = vadd.f32 %v3424_v42, %v11889_v53  ;;  %v4062_v42 = vsel %vm516_vm4, %v4059_v33, %v4061_v38 }
 0x3ce   : > { %v3550_v46 = vpop.f32.mrf.mxu3  ;;  %v3734_v60 = vpop.f32.mrf.mxu0 }
 0x3cf   : > { %v3580_v41 = vadd.f32 %v3548_v22, %v3456_v1 }
 0x3d0   : > { %v4009_v52 = vpop.f32.mrf.mxu1 }
 0x3d1   : > { %v3764_v30 = vadd.f32 %v3732_v57, %v3580_v41  ;;  %v13975_v57 = vshrl.u32 %v12176_v62, 16 }
 0x3d3   : > { %9580 = vmatmul.msk.bf16.gmra.mxu1 %vm334_vm1, %v4684_v61  ;;  %9522 = vmatmul.msk.bf16.gmra.mxu3 %vm334_vm1, %v4220_v16  ;;  %v12207_v53 = vadd.f32 %v4004_v35, %v3764_v30  ;;  %v13974_v61 = vshll.u32 %v12205_v13, 16  ;;  %v4221_v16 = vrot.slane %v14047_v0, 1  ;;  %v14048_v35 = vshll.u32 %v11887_v48, 16 }
 0x3d4   : > { %v3426_v21 = vpop.f32.mrf.mxu2  ;;  %v4687_v9 = vor.u32 %v13975_v57, %v4683_v54  ;;  %v4373_v54 = vrot.slane %v11887_v48, 2 }
 0x3d5   : > { %v3457_v36 = vadd.f32 %v3426_v21, %v11902_v31  ;;  %v4222_v30 = vrot.slane %v14048_v35, 2  ;;  %v4691_v33 = vrot.slane %v13974_v61, 1 }
 0x3d6   : > { %v3553_v5 = vpop.f32.mrf.mxu3  ;;  %v3737_v22 = vpop.f32.mrf.mxu0 }
 0x3d7   : > { %v3581_v41 = vadd.f32 %v3550_v46, %v3457_v36  ;;  %v4223_v21 = vor.u32 %v4222_v30, %v4221_v16  ;;  %v12234_v16 = vld [vmem:[%s10600_s29 + $0x90] sm:$0xff] }
 0x3d8   : > { %v4011_v1 = vpop.f32.mrf.mxu1 }
 0x3d9   : > { %9533 = vmatmul.msk.bf16.gmra.mxu0 %vm334_vm1, %v4372_v18  ;;  %9511 = vmatmul.msk.bf16.gmra.mxu2 %vm334_vm1, %v4062_v42  ;;  %v3765_v31 = vadd.f32 %v3734_v60, %v3581_v41  ;;  %v4692_v18 = vsel %vm249_vm2, %v4687_v9, %v4691_v33  ;;  %v4224_v60 = vsel %vm656_vm3, %v4219_v7, %v4223_v21 }
 0x3da   : > { %v4374_v7 = vsel %vm828_vm5, %v4371_v15, %v4373_v54 }
 0x3db   : > { %v12224_v46 = vadd.f32 %v4006_v29, %v3765_v31  ;;  %v4063_v29 = vrot.slane %v11887_v48, 1  ;;  %v14049_v48 = vshrl.u32 %v11917_v2, 16 }
 0x3dc   : > { %v3429_v36 = vpop.f32.mrf.mxu2 }
 0x3dd   : > { %v3458_v0 = vadd.f32 %v3429_v36, %v11919_v17  ;;  %v4064_v36 = vsel %vm516_vm4, %v4061_v38, %v4063_v29 }
 0x3de   : > { %v3555_v50 = vpop.f32.mrf.mxu3  ;;  %v3739_v35 = vpop.f32.mrf.mxu0 }
 0x3df   : > { %v3582_v42 = vadd.f32 %v3553_v5, %v3458_v0 }
 0x3e0   : > { %v4014_v4 = vpop.f32.mrf.mxu1 }
 0x3e1   : > { %v3766_v41 = vadd.f32 %v3737_v22, %v3582_v42  ;;  %v13977_v22 = vshrl.u32 %v12205_v13, 16 }
 0x3e3   : > { %9581 = vmatmul.msk.bf16.gmra.mxu1 %vm334_vm1, %v4692_v18  ;;  %9523 = vmatmul.msk.bf16.gmra.mxu3 %vm334_vm1, %v4224_v60  ;;  %v12236_v17 = vadd.f32 %v4009_v52, %v3766_v41  ;;  %v13976_v18 = vshll.u32 %v12234_v16, 16  ;;  %v4225_v60 = vrot.slane %v14049_v48, 1  ;;  %v14050_v52 = vshll.u32 %v11917_v2, 16 }
 0x3e4   : > { %v3431_v30 = vpop.f32.mrf.mxu2  ;;  %v4695_v15 = vor.u32 %v13977_v22, %v4691_v33  ;;  %v4375_v33 = vrot.slane %v11917_v2, 2 }
 0x3e5   : > { %v3459_v31 = vadd.f32 %v3431_v30, %v11932_v24  ;;  %v4226_v41 = vrot.slane %v14050_v52, 2  ;;  %v4699_v38 = vrot.slane %v13976_v18, 1 }
 0x3e6   : > { %v3558_v9 = vpop.f32.mrf.mxu3  ;;  %v3742_v5 = vpop.f32.mrf.mxu0 }
 0x3e7   : > { %v3583_v42 = vadd.f32 %v3555_v50, %v3459_v31  ;;  %v4227_v30 = vor.u32 %v4226_v41, %v4225_v60  ;;  %v12263_v60 = vld [vmem:[%s10600_s29 + $0x98] sm:$0xff] }
 0x3e8   : > { %v4016_v0 = vpop.f32.mrf.mxu1 }
 0x3e9   : > { %9534 = vmatmul.msk.bf16.gmra.mxu0 %vm334_vm1, %v4374_v7  ;;  %9512 = vmatmul.msk.bf16.gmra.mxu2 %vm334_vm1, %v4064_v36  ;;  %v3767_v24 = vadd.f32 %v3739_v35, %v3583_v42  ;;  %v4700_v7 = vsel %vm249_vm2, %v4695_v15, %v4699_v38  ;;  %v4228_v35 = vsel %vm656_vm3, %v4223_v21, %v4227_v30 }
 0x3ea   : > { %v4376_v21 = vsel %vm828_vm5, %v4373_v54, %v4375_v33 }
 0x3eb   : > { %v12253_v50 = vadd.f32 %v4011_v1, %v3767_v24  ;;  %v4065_v1 = vrot.slane %v11917_v2, 1  ;;  %v13980_v2 = vshll.u32 %v12263_v60, 16 }
 0x3ec   : > { %v3434_v31 = vpop.f32.mrf.mxu2 }
 0x3ed   : > { %v3460_v48 = vadd.f32 %v3434_v31, %v11946_v6  ;;  %v4066_v31 = vsel %vm516_vm4, %v4063_v29, %v4065_v1 }
 0x3ee   : > { %v3560_v61 = vpop.f32.mrf.mxu3  ;;  %v3744_v52 = vpop.f32.mrf.mxu0 }
 0x3ef   : > { %v3584_v36 = vadd.f32 %v3558_v9, %v3460_v48  ;;  %v13979_v48 = vshrl.u32 %v12234_v16, 16 }
 0x3f0   : > { %v4019_v57 = vpop.f32.mrf.mxu1 }
 0x3f1   : > { %v3768_v42 = vadd.f32 %v3742_v5, %v3584_v36  ;;  %v14051_v36 = vshll.u32 %v11943_v39, 16  ;;  %v4703_v29 = vor.u32 %v13979_v48, %v4699_v38 }
 0x3f3   : > { %9582 = vmatmul.msk.bf16.gmra.mxu1 %vm334_vm1, %v4700_v7  ;;  %9524 = vmatmul.msk.bf16.gmra.mxu3 %vm334_vm1, %v4228_v35  ;;  %v12265_v6 = vadd.f32 %v4014_v4, %v3768_v42  ;;  %v4229_v4 = vrot.slane %v3924_v43, 1  ;;  %v4230_v35 = vrot.slane %v14051_v36, 2  ;;  %v4707_v42 = vrot.slane %v13980_v2, 1 }
 0x3f4   : > { %v3436_v41 = vpop.f32.mrf.mxu2 }
 0x3f5   : > { %v3461_v24 = vadd.f32 %v3436_v41, %v11968_v37  ;;  %v4183_v37 = vld [vmem:[%s10600_s29 + $0x78] sm:$0x3]  ;;  %v4231_v41 = vor.u32 %v4230_v35, %v4229_v4  ;;  %v4377_v4 = vrot.slane %v11943_v39, 2 }
 0x3f6   : > { %v3563_v9 = vpop.f32.mrf.mxu3  ;;  %v3747_v15 = vpop.f32.mrf.mxu0 }
 0x3f7   : > { %v3585_v7 = vadd.f32 %v3560_v61, %v3461_v24  ;;  %v4187_v61 = vunpack.c.l.b16 %v4183_v37  ;;  %v4578_v24 = vld [vmem:[%s10600_s29 + $0xa0] sm:$0x1]  ;;  %v4232_v38 = vsel %vm656_vm3, %v4227_v30, %v4231_v41 }
 0x3f8   : > { %v4021_v5 = vpop.f32.mrf.mxu1 }
 0x3f9   : > { %9535 = vmatmul.msk.bf16.gmra.mxu0 %vm334_vm1, %v4376_v21  ;;  %9513 = vmatmul.msk.bf16.gmra.mxu2 %vm334_vm1, %v4066_v31  ;;  %v3769_v54 = vadd.f32 %v3744_v52, %v3585_v7  ;;  %v4708_v52 = vsel %vm249_vm2, %v4703_v29, %v4707_v42  ;;  %v4621_v31 = vunpack.c.l.b16 %v4578_v24  ;;  %v4188_v48 = vpack.c.b16 %v4187_v61, %v4187_v61 }
 0x3fa   : > { %v4378_v24 = vsel %vm828_vm5, %v4375_v33, %v4377_v4 }
 0x3fb   : > { %v12284_v18 = vadd.f32 %v4016_v0, %v3769_v54  ;;  %v12295_v35 = vpack.c.b16 %v4621_v31, %v4621_v31  ;;  %v4234_v37 = vshrl.u32 %v4188_v48, 16  ;;  %v4237_v54 = vshll.u32 %v4188_v48, 16 }
 0x3fc   : > { %v3439_v43 = vpop.f32.mrf.mxu2 }
 0x3fd   : > { %v3462_v36 = vadd.f32 %v3439_v43, %v11994_v10  ;;  %v4067_v10 = vrot.slane %v11943_v39, 1  ;;  %v4713_v39 = vshll.u32 %v12295_v35, 16 }
 0x3fe   : > { %v3565_v22 = vpop.f32.mrf.mxu3  ;;  %v3749_v21 = vpop.f32.mrf.mxu0 }
 0x3ff   : > { %v3586_v7 = vadd.f32 %v3563_v9, %v3462_v36  ;;  %v4068_v36 = vsel %vm516_vm4, %v4065_v1, %v4067_v10  ;;  %v4715_v1 = vrot.slane %v4713_v39, 1  ;;  %v5199_v39 = vld [vmem:[%s10600_s29 + $0x50] sm:$0xc] }
 0x400   : > { %v12287_v47 = vpop.f32.mrf.mxu1 }
 0x401   : > { %v3770_v0 = vadd.f32 %v3747_v15, %v3586_v7  ;;  %v4236_v7 = vrot.slane %v4234_v37, 1 }
 0x403   : > { %9583 = vmatmul.msk.bf16.gmra.mxu1 %vm334_vm1, %v4708_v52  ;;  %9525 = vmatmul.msk.bf16.gmra.mxu3 %vm334_vm1, %v4232_v38  ;;  %v12297_v43 = vadd.f32 %v4019_v57, %v3770_v0  ;;  %v4709_v52 = vshrl.u32 %v12263_v60, 16  ;;  %v4239_v57 = vrot.slane %v4237_v54, 2  ;;  %v12316_v54 = vld [vmem:[%s13933_s2] ss:$0 sm:$0xff] }
 0x404   : > { %v3441_v29 = vpop.f32.mrf.mxu2 }
 0x405   : > { %v3463_v9 = vadd.f32 %v3441_v29, %v12014_v63  ;;  %v4711_v33 = vor.u32 %v4709_v52, %v4707_v42  ;;  %v4240_v38 = vor.u32 %v4239_v57, %v4236_v7  ;;  %v4891_v42 = vld [vmem:[%s10600_s29 + $0x50] sm:$0xe] }
 0x406   : > { %v4284_v30 = vpop.f32.mrf.mxu3  ;;  %v4423_v61 = vpop.f32.mrf.mxu0 }
 0x407   : > { %v3587_v31 = vadd.f32 %v3565_v22, %v3463_v9 }
 0x408   : > { %v12302_v15 = vpop.f32.mrf.mxu1 }
 0x409   : > { %9536 = vmatmul.msk.bf16.gmra.mxu0 %vm334_vm1, %v4378_v24  ;;  %9514 = vmatmul.msk.bf16.gmra.mxu2 %vm334_vm1, %v4068_v36  ;;  %v3771_v63 = vadd.f32 %v3749_v21, %v3587_v31  ;;  %v4716_v21 = vsel %vm249_vm2, %v4711_v33, %v4715_v1  ;;  %v4241_v36 = vsel %vm656_vm3, %v4231_v41, %v4240_v38  ;;  %v10180_v41 = vunpack.c.h.b16 %v11911_v26 }
 0x40a   : > { %v5202_v33 = vunpack.c.l.b16 %v5199_v39 }
 0x40b   : > { %v12310_v0 = vadd.f32 %v4021_v5, %v3771_v63  ;;  %v9628_v5 = vld [vmem:[%s13932_s1 + $0xa] sm:$0x3]  ;;  %v4379_v63 = vrot.slane %v4188_v48, 2 }
 0x40c   : > { %v4113_v29 = vpop.f32.mrf.mxu2  ;;  %v5464_v31 = vsel %vm365_vm0, %v9628_v5, 0 }
 0x40d   : > { %v4163_v2 = vadd.f32 %v4113_v29, %v12030_v32  ;;  %v9639_v32 = vld [vmem:[%s13932_s1 + $0xc] sm:$0x3]  ;;  %5473 = vmatpush.bf16.msra.mxu2 %v5464_v31 }
 0x40e   : > { %v4286_v22 = vpop.f32.mrf.mxu3  ;;  %v4425_v37 = vpop.f32.mrf.mxu0  ;;  %v5679_v7 = vsel %vm365_vm0, %v9639_v32, 0  ;;  %v5203_v32 = vpack.c.b16 %v10180_v41, %v5202_v33 }
 0x40f   : > { %v4334_v24 = vadd.f32 %v4284_v30, %v4163_v2  ;;  %v4069_v2 = vrot.slane %v11988_v23, 1  ;;  %v4894_v30 = vunpack.c.l.b16 %v4891_v42  ;;  %5688 = vmatpush.bf16.msra.mxu3 %v5679_v7  ;;  %v5205_v7 = vrot.slane %v12023_v55, 2 }
 0x410   : > { %v12318_v9 = vpop.f32.mrf.mxu1  ;;  %v5204_v31 = vrot.slane %v5203_v32, 2 }
 0x411   : > { %v4473_v57 = vadd.f32 %v4423_v61, %v4334_v24  ;;  %v4070_v24 = vsel %vm516_vm4, %v4067_v10, %v4069_v2  ;;  %v4895_v23 = vpack.c.b16 %v10180_v41, %v4894_v30 }
 0x413   : > { %9584 = vmatmul.msk.bf16.gmra.mxu1 %vm334_vm1, %v4716_v21  ;;  %9526 = vmatmul.msk.bf16.gmra.mxu3 %vm334_vm1, %v4241_v36  ;;  %v4497_v1 = vadd.f32 %v12316_v54, %v4473_v57  ;;  %v4380_v21 = vsel %vm828_vm5, %v4377_v4, %v4379_v63  ;;  %v5035_v42 = vshrl.u32 %v4895_v23, 16  ;;  %v4896_v10 = vrot.slane %v4895_v23, 1 }
 0x414   : > { %v4115_v38 = vpop.f32.mrf.mxu2  ;;  %v4897_v57 = vrot.slane %v12023_v55, 1  ;;  %v5042_v63 = vrot.slane %v4645_v34, 1 }
 0x415   : > { %v4517_v29 = vmax.f32 %v4497_v1, 0.0  ;;  %v4164_v5 = vadd.f32 %v4115_v38, %v12046_v12  ;;  %v5038_v12 = vshll.u32 %v4895_v23, 16  ;;  %v5043_v38 = vrot.slane %v4641_v20, 2 }
 0x416   : > { %v4289_v61 = vpop.f32.mrf.mxu3  ;;  %v4428_v48 = vpop.f32.mrf.mxu0  ;;  %v4898_v34 = vsel %vm516_vm4, %v4896_v10, %v4897_v57 }
 0x417   : > { %4537 = vst.msk [vmem:[#allocation2] sm:$0xff] %vm334_vm1, %v4517_v29  ;;  %v4335_v26 = vadd.f32 %v4286_v22, %v4164_v5  ;;  %v5037_v22 = vrot.slane %v5035_v42, 1  ;;  %v5040_v1 = vrot.slane %v5038_v12, 2  ;;  %v5206_v5 = vsel %vm828_vm5, %v5204_v31, %v5205_v7  ;;  %v9661_v31 = vld [vmem:[%s13932_s1 + $0x10] sm:$0x3] }
 0x418   : > { %v12340_v36 = vpop.f32.mrf.mxu1  ;;  %v5044_v32 = vor.u32 %v5043_v38, %v5042_v63  ;;  %v5987_v63 = vsel %vm365_vm0, %v9661_v31, 0 }
 0x419   : > { %9537 = vmatmul.msk.bf16.gmra.mxu0 %vm334_vm1, %v4380_v21  ;;  %v4474_v39 = vadd.f32 %v4425_v37, %v4335_v26  ;;  %9515 = vmatmul.msk.bf16.gmra.mxu2 %vm334_vm1, %v4070_v24  ;;  %v5041_v23 = vor.u32 %v5040_v1, %v5037_v22  ;;  %v10533_v22 = vld [vmem:[%s10600_s29 + $0x50] sm:$0xff]   ;;  %v4899_v1 = vrot.slane %v12059_v49, 1 }
 0x41a   : > { %5996 = vmatpush.bf16.msra.mxu1 %v5987_v63 }
 0x41b   : > { %v4498_v4 = vadd.f32 %v12316_v54, %v4474_v39 }
 0x41c   : > { %v4118_v2 = vpop.f32.mrf.mxu2 }
 0x41d   : > { %v4518_v41 = vmax.f32 %v4498_v4, 0.0  ;;  %v4165_v30 = vadd.f32 %v4118_v2, %v12061_v40 }
 0x41e   : > { %v4291_v37 = vpop.f32.mrf.mxu3  ;;  %v4430_v33 = vpop.f32.mrf.mxu0 }
 0x41f   : > { %4538 = vst.msk [vmem:[#allocation2 + $0x8] sm:$0xff] %vm334_vm1, %v4518_v41  ;;  %v4336_v21 = vadd.f32 %v4289_v61, %v4165_v30  ;;  %v5045_v61 = vsel %vm656_vm3, %v5041_v23, %v5044_v32  ;;  %v5207_v41 = vrot.slane %v12059_v49, 2 }
 0x420   : > { %v12353_v29 = vpop.f32.mrf.mxu1 }
 0x421   : > { %v4475_v24 = vadd.f32 %v4428_v48, %v4336_v21  ;;  %v9650_v48 = vld [vmem:[%s13932_s1 + $0xe] sm:$0x3] }
 0x422   : > { %v5817_v10 = vsel %vm365_vm0, %v9650_v48, 0 }
 0x423   : > { %9618 = vmatmul.msk.bf16.vlgmr.msrb.gmra.mxu1 %vm334_vm1, %v5206_v5  ;;  %9596 = vmatmul.msk.bf16.vlgmr.msrb.gmra.mxu3 %vm334_vm1, %v4898_v34  ;;  %v4499_v40 = vadd.f32 %v12316_v54, %v4475_v24  ;;  %v5046_v24 = vrot.slane %v4653_v51, 1 }
 0x424   : > { %v4120_v26 = vpop.f32.mrf.mxu2  ;;  %5826 = vmatpush.bf16.msra.mxu0 %v5817_v10 }
 0x425   : > { %v4519_v20 = vmax.f32 %v4499_v40, 0.0  ;;  %v4166_v42 = vadd.f32 %v4120_v26, %v12078_v11  ;;  %v5208_v40 = vsel %vm828_vm5, %v5205_v7, %v5207_v41 }
 0x426   : > { %v4294_v39 = vpop.f32.mrf.mxu3  ;;  %v4433_v12 = vpop.f32.mrf.mxu0 }
 0x427   : > { %4539 = vst.msk [vmem:[#allocation2 + $0x10] sm:$0xff] %vm334_vm1, %v4519_v20  ;;  %v4337_v11 = vadd.f32 %v4291_v37, %v4166_v42  ;;  %v4900_v20 = vsel %vm516_vm4, %v4897_v57, %v4899_v1 }
 0x428   : > { %v12369_v4 = vpop.f32.mrf.mxu1 }
 0x429   : > { %9607 = vmatmul.msk.bf16.vlgmr.msrb.gmra.mxu0 %vm334_vm1, %v5045_v61  ;;  %v4476_v2 = vadd.f32 %v4430_v33, %v4337_v11  ;;  %9585 = vmatmul.msk.bf16.vlgmr.msrb.gmra.mxu2 %vm334_vm1, %v10533_v22  ;;  %v5047_v33 = vrot.slane %v4649_v45, 2 }
 0x42b   : > { %v4500_v30 = vadd.f32 %v12316_v54, %v4476_v2  ;;  %v5048_v61 = vor.u32 %v5047_v33, %v5046_v24 }
 0x42c   : > { %v4123_v38 = vpop.f32.mrf.mxu2 }
 0x42d   : > { %v4520_v5 = vmax.f32 %v4500_v30, 0.0  ;;  %v4167_v21 = vadd.f32 %v4123_v38, %v12091_v44  ;;  %v5049_v7 = vsel %vm656_vm3, %v5044_v32, %v5048_v61  ;;  %v4901_v32 = vrot.slane %v12089_v3, 1 }
 0x42e   : > { %v4296_v34 = vpop.f32.mrf.mxu3  ;;  %v4435_v37 = vpop.f32.mrf.mxu0  ;;  %v8912_v11 = vld [vmem:[#allocation2 + $0x3] ss:$2 sm:$0xff]  ;;  %v14052_v30 = vshrl.u32 %v12089_v3, 16 }
 0x42f   : > { %4540 = vst.msk [vmem:[#allocation2 + $0x18] sm:$0xff] %vm334_vm1, %v4520_v5  ;;  %v4338_v26 = vadd.f32 %v4294_v39, %v4167_v21 }
 0x430   : > { %v12385_v23 = vpop.f32.mrf.mxu1  ;;  %v5050_v38 = vrot.slane %v14052_v30, 1 }
 0x431   : > { %v4477_v42 = vadd.f32 %v4433_v12, %v4338_v26  ;;  %v8910_v12 = vld [vmem:[#allocation2 + $0x2] ss:$2 sm:$0xff] }
 0x432   : > { %v8917_v5 = vadd.f32 %v8912_v11, %v8910_v12 }
 0x433   : > { %9619 = vmatmul.msk.bf16.gmra.mxu1 %vm334_vm1, %v5208_v40  ;;  %9597 = vmatmul.msk.bf16.gmra.mxu3 %vm334_vm1, %v4900_v20  ;;  %v4501_v44 = vadd.f32 %v12316_v54, %v4477_v42 }
 0x434   : > { %v4125_v51 = vpop.f32.mrf.mxu2 }
 0x435   : > { %v4521_v48 = vmax.f32 %v4501_v44, 0.0  ;;  %v4168_v45 = vadd.f32 %v4125_v51, %v12108_v58  ;;  %v5209_v58 = vrot.slane %v12089_v3, 2  ;;  %v4902_v51 = vsel %vm516_vm4, %v4899_v1, %v4901_v32 }
 0x436   : > { %v4299_v31 = vpop.f32.mrf.mxu3  ;;  %v4438_v10 = vpop.f32.mrf.mxu0 }
 0x437   : > { %4541 = vst.msk [vmem:[#allocation2 + $0x20] sm:$0xff] %vm334_vm1, %v4521_v48  ;;  %v4339_v57 = vadd.f32 %v4296_v34, %v4168_v45  ;;  %v5210_v20 = vsel %vm828_vm5, %v5207_v41, %v5209_v58 }
 0x438   : > { %v12395_v63 = vpop.f32.mrf.mxu1 }
 0x439   : > { %9608 = vmatmul.msk.bf16.gmra.mxu0 %vm334_vm1, %v5049_v7  ;;  %v4478_v39 = vadd.f32 %v4435_v37, %v4339_v57  ;;  %9586 = vmatmul.msk.bf16.gmra.mxu2 %vm334_vm1, %v12023_v55  ;;  %v14053_v55 = vshll.u32 %v12089_v3, 16 }
 0x43b   : > { %v4502_v2 = vadd.f32 %v12316_v54, %v4478_v39  ;;  %v5051_v33 = vrot.slane %v14053_v55, 2 }
 0x43c   : > { %v4128_v22 = vpop.f32.mrf.mxu2 }
 0x43d   : > { %v4522_v21 = vmax.f32 %v4502_v2, 0.0  ;;  %v4169_v34 = vadd.f32 %v4128_v22, %v12120_v19  ;;  %v5052_v7 = vor.u32 %v5051_v33, %v5050_v38  ;;  %v5211_v38 = vrot.slane %v12118_v8, 2 }
 0x43e   : > { %v4301_v37 = vpop.f32.mrf.mxu3  ;;  %v4440_v24 = vpop.f32.mrf.mxu0  ;;  %v8914_v40 = vld [vmem:[#allocation2 + $0x16] ss:$2 sm:$0xff]  ;;  %v8916_v48 = vld [vmem:[#allocation2 + $0x17] ss:$2 sm:$0xff] }
 0x43f   : > { %v8918_v42 = vadd.f32 %v8917_v5, %v8914_v40  ;;  %4542 = vst.msk [vmem:[#allocation2 + $0x28] sm:$0xff] %vm334_vm1, %v4522_v21  ;;  %v4340_v44 = vadd.f32 %v4299_v31, %v4169_v34  ;;  %v5053_v11 = vsel %vm656_vm3, %v5048_v61, %v5052_v7 }
 0x440   : > { %v12409_v26 = vpop.f32.mrf.mxu1 }
 0x441   : > { %v8919_v45 = vadd.f32 %v8918_v42, %v8916_v48  ;;  %v4479_v19 = vadd.f32 %v4438_v10, %v4340_v44 }
 0x443   : > { %9620 = vmatmul.msk.bf16.gmra.mxu1 %vm334_vm1, %v5210_v20  ;;  %9598 = vmatmul.msk.bf16.gmra.mxu3 %vm334_vm1, %v4902_v51  ;;  %v8920_v41 = vmul.f32 0.25, %v8919_v45  ;;  %v4503_v57 = vadd.f32 %v12316_v54, %v4479_v19 }
 0x444   : > { %v4130_v31 = vpop.f32.mrf.mxu2 }
 0x445   : > { %8921 = vst.msk [vmem:[%s12419_s18] sm:$0xff] %vm334_vm1, %v8920_v41  ;;  %v4523_v1 = vmax.f32 %v4503_v57, 0.0  ;;  %v4170_v10 = vadd.f32 %v4130_v31, %v12137_v56  ;;  %v4903_v56 = vrot.slane %v12118_v8, 1 }
 0x446   : > { %v4304_v39 = vpop.f32.mrf.mxu3  ;;  %v4443_v12 = vpop.f32.mrf.mxu0 }
 0x447   : > { %4543 = vst.msk [vmem:[#allocation2 + $0x30] sm:$0xff] %vm334_vm1, %v4523_v1  ;;  %v4341_v22 = vadd.f32 %v4301_v37, %v4170_v10  ;;  %v14054_v37 = vshrl.u32 %v12118_v8, 16  ;;  %v4904_v51 = vsel %vm516_vm4, %v4901_v32, %v4903_v56 }
 0x448   : > { %v12427_v2 = vpop.f32.mrf.mxu1 }
 0x449   : > { %9609 = vmatmul.msk.bf16.gmra.mxu0 %vm334_vm1, %v5053_v11  ;;  %v4480_v30 = vadd.f32 %v4440_v24, %v4341_v22  ;;  %9587 = vmatmul.msk.bf16.gmra.mxu2 %vm334_vm1, %v12059_v49  ;;  %v5054_v40 = vrot.slane %v14054_v37, 1  ;;  %v14055_v24 = vshll.u32 %v12118_v8, 16  ;;  %v5212_v49 = vsel %vm828_vm5, %v5209_v58, %v5211_v38 }
 0x44b   : > { %v4504_v5 = vadd.f32 %v12316_v54, %v4480_v30  ;;  %v5055_v20 = vrot.slane %v14055_v24, 2 }
 0x44c   : > { %v4133_v21 = vpop.f32.mrf.mxu2 }
 0x44d   : > { %v4524_v34 = vmax.f32 %v4504_v5, 0.0  ;;  %v4171_v61 = vadd.f32 %v4133_v21, %v12149_v59  ;;  %v5056_v45 = vor.u32 %v5055_v20, %v5054_v40 }
 0x44e   : > { %v4306_v55 = vpop.f32.mrf.mxu3  ;;  %v4445_v33 = vpop.f32.mrf.mxu0 }
 0x44f   : > { %4544 = vst.msk [vmem:[#allocation2 + $0x38] sm:$0xff] %vm334_vm1, %v4524_v34  ;;  %v4342_v44 = vadd.f32 %v4304_v39, %v4171_v61  ;;  %v5057_v58 = vsel %vm656_vm3, %v5052_v7, %v5056_v45  ;;  %v14056_v34 = vshrl.u32 %v12147_v28, 16 }
 0x450   : > { %v12441_v42 = vpop.f32.mrf.mxu1 }
 0x451   : > { %v4481_v48 = vadd.f32 %v4443_v12, %v4342_v44  ;;  %v5213_v12 = vrot.slane %v12147_v28, 2  ;;  %v5058_v61 = vrot.slane %v14056_v34, 1 }
 0x453   : > { %9621 = vmatmul.msk.bf16.gmra.mxu1 %vm334_vm1, %v5212_v49  ;;  %9599 = vmatmul.msk.bf16.gmra.mxu3 %vm334_vm1, %v4904_v51  ;;  %v4505_v59 = vadd.f32 %v12316_v54, %v4481_v48 }
 0x454   : > { %v4135_v19 = vpop.f32.mrf.mxu2 }
 0x455   : > { %v4525_v41 = vmax.f32 %v4505_v59, 0.0  ;;  %v4172_v57 = vadd.f32 %v4135_v19, %v12166_v27  ;;  %v4905_v27 = vrot.slane %v12147_v28, 1 }
 0x456   : > { %v4309_v31 = vpop.f32.mrf.mxu3  ;;  %v4448_v1 = vpop.f32.mrf.mxu0  ;;  %v8925_v44 = vld [vmem:[#allocation2 + $0x2b] ss:$2 sm:$0xff] }
 0x457   : > { %4545 = vst.msk [vmem:[#allocation2 + $0x40] sm:$0xff] %vm334_vm1, %v4525_v41  ;;  %v4343_v32 = vadd.f32 %v4306_v55, %v4172_v57  ;;  %v14057_v55 = vshll.u32 %v12147_v28, 16  ;;  %v4906_v24 = vsel %vm516_vm4, %v4903_v56, %v4905_v27 }
 0x458   : > { %v12451_v10 = vpop.f32.mrf.mxu1 }
 0x459   : > { %9610 = vmatmul.msk.bf16.gmra.mxu0 %vm334_vm1, %v5057_v58  ;;  %v4482_v39 = vadd.f32 %v4445_v33, %v4343_v32  ;;  %9588 = vmatmul.msk.bf16.gmra.mxu2 %vm334_vm1, %v12089_v3  ;;  %v5059_v33 = vrot.slane %v14057_v55, 2  ;;  %v5214_v3 = vsel %vm828_vm5, %v5211_v38, %v5213_v12 }
 0x45b   : > { %v4506_v11 = vadd.f32 %v12316_v54, %v4482_v39  ;;  %v5060_v49 = vor.u32 %v5059_v33, %v5058_v61 }
 0x45c   : > { %v4138_v22 = vpop.f32.mrf.mxu2 }
 0x45d   : > { %v4526_v30 = vmax.f32 %v4506_v11, 0.0  ;;  %v4173_v7 = vadd.f32 %v4138_v22, %v12178_v14  ;;  %v8923_v14 = vld [vmem:[#allocation2 + $0x2a] ss:$2 sm:$0xff] }
 0x45e   : > { %v4311_v5 = vpop.f32.mrf.mxu3  ;;  %v4450_v21 = vpop.f32.mrf.mxu0  ;;  %v8930_v59 = vadd.f32 %v8925_v44, %v8923_v14 }
 0x45f   : > { %4546 = vst.msk [vmem:[#allocation2 + $0x48] sm:$0xff] %vm334_vm1, %v4526_v30  ;;  %v4344_v40 = vadd.f32 %v4309_v31, %v4173_v7  ;;  %v5061_v31 = vsel %vm656_vm3, %v5056_v45, %v5060_v49  ;;  %v4907_v7 = vrot.slane %v12176_v62, 1 }
 0x460   : > { %v12465_v37 = vpop.f32.mrf.mxu1 }
 0x461   : > { %v4483_v20 = vadd.f32 %v4448_v1, %v4344_v40  ;;  %v4908_v44 = vsel %vm516_vm4, %v4905_v27, %v4907_v7 }
 0x463   : > { %9622 = vmatmul.msk.bf16.gmra.mxu1 %vm334_vm1, %v5214_v3  ;;  %9600 = vmatmul.msk.bf16.gmra.mxu3 %vm334_vm1, %v4906_v24  ;;  %v4507_v51 = vadd.f32 %v12316_v54, %v4483_v20 }
 0x464   : > { %v4140_v48 = vpop.f32.mrf.mxu2 }
 0x465   : > { %v4527_v19 = vmax.f32 %v4507_v51, 0.0  ;;  %v4174_v38 = vadd.f32 %v4140_v48, %v12195_v25  ;;  %v5215_v25 = vrot.slane %v12176_v62, 2 }
 0x466   : > { %v4314_v41 = vpop.f32.mrf.mxu3  ;;  %v4453_v57 = vpop.f32.mrf.mxu0  ;;  %v8927_v56 = vld [vmem:[#allocation2 + $0x3e] ss:$2 sm:$0xff]  ;;  %v8929_v39 = vld [vmem:[#allocation2 + $0x3f] ss:$2 sm:$0xff] }
 0x467   : > { %v8931_v58 = vadd.f32 %v8930_v59, %v8927_v56  ;;  %4547 = vst.msk [vmem:[#allocation2 + $0x50] sm:$0xff] %vm334_vm1, %v4527_v19  ;;  %v4345_v32 = vadd.f32 %v4311_v5, %v4174_v38  ;;  %v5216_v20 = vsel %vm828_vm5, %v5213_v12, %v5215_v25 }
 0x468   : > { %v12475_v1 = vpop.f32.mrf.mxu1 }
 0x469   : > { %9611 = vmatmul.msk.bf16.gmra.mxu0 %vm334_vm1, %v5061_v31  ;;  %v8932_v11 = vadd.f32 %v8931_v58, %v8929_v39  ;;  %v4484_v22 = vadd.f32 %v4450_v21, %v4345_v32  ;;  %9589 = vmatmul.msk.bf16.gmra.mxu2 %vm334_vm1, %v12118_v8  ;;  %v14058_v21 = vshrl.u32 %v12176_v62, 16  ;;  %v14059_v8 = vshll.u32 %v12176_v62, 16 }
 0x46b   : > { %v8933_v30 = vmul.f32 0.25, %v8932_v11  ;;  %v4508_v45 = vadd.f32 %v12316_v54, %v4484_v22  ;;  %v5062_v3 = vrot.slane %v14058_v21, 1  ;;  %v5063_v40 = vrot.slane %v14059_v8, 2 }
 0x46c   : > { %v4143_v34 = vpop.f32.mrf.mxu2 }
 0x46d   : > { %8934 = vst.msk [vmem:[%s12419_s18 + $0x8] sm:$0xff] %vm334_vm1, %v8933_v30  ;;  %v4528_v61 = vmax.f32 %v4508_v45, 0.0  ;;  %v4175_v5 = vadd.f32 %v4143_v34, %v12207_v53  ;;  %v5064_v48 = vor.u32 %v5063_v40, %v5062_v3  ;;  %v14060_v45 = vshrl.u32 %v12205_v13, 16 }
 0x46e   : > { %v4316_v55 = vpop.f32.mrf.mxu3  ;;  %v4455_v33 = vpop.f32.mrf.mxu0 }
 0x46f   : > { %4548 = vst.msk [vmem:[#allocation2 + $0x58] sm:$0xff] %vm334_vm1, %v4528_v61  ;;  %v4346_v14 = vadd.f32 %v4314_v41, %v4175_v5  ;;  %v5065_v12 = vsel %vm656_vm3, %v5060_v49, %v5064_v48  ;;  %v5066_v34 = vrot.slane %v14060_v45, 1  ;;  %v14061_v61 = vshll.u32 %v12205_v13, 16 }
 0x470   : > { %v12491_v24 = vpop.f32.mrf.mxu1 }
 0x471   : > { %v4485_v51 = vadd.f32 %v4453_v57, %v4346_v14  ;;  %v5217_v57 = vrot.slane %v12205_v13, 2  ;;  %v5067_v5 = vrot.slane %v14061_v61, 2 }
 0x473   : > { %9623 = vmatmul.msk.bf16.gmra.mxu1 %vm334_vm1, %v5216_v20  ;;  %9601 = vmatmul.msk.bf16.gmra.mxu3 %vm334_vm1, %v4908_v44  ;;  %v4509_v53 = vadd.f32 %v12316_v54, %v4485_v51  ;;  %v5068_v8 = vor.u32 %v5067_v5, %v5066_v34 }
 0x474   : > { %v4145_v59 = vpop.f32.mrf.mxu2 }
 0x475   : > { %v4529_v19 = vmax.f32 %v4509_v53, 0.0  ;;  %v4176_v38 = vadd.f32 %v4145_v59, %v12224_v46  ;;  %v4909_v46 = vrot.slane %v12205_v13, 1 }
 0x476   : > { %v4319_v31 = vpop.f32.mrf.mxu3  ;;  %v4458_v56 = vpop.f32.mrf.mxu0 }
 0x477   : > { %4549 = vst.msk [vmem:[#allocation2 + $0x60] sm:$0xff] %vm334_vm1, %v4529_v19  ;;  %v4347_v27 = vadd.f32 %v4316_v55, %v4176_v38  ;;  %v4910_v21 = vsel %vm516_vm4, %v4907_v7, %v4909_v46 }
 0x478   : > { %v12501_v58 = vpop.f32.mrf.mxu1 }
 0x479   : > { %9612 = vmatmul.msk.bf16.gmra.mxu0 %vm334_vm1, %v5065_v12  ;;  %v4486_v41 = vadd.f32 %v4455_v33, %v4347_v27  ;;  %9590 = vmatmul.msk.bf16.gmra.mxu2 %vm334_vm1, %v12147_v28  ;;  %v5218_v28 = vsel %vm828_vm5, %v5215_v25, %v5217_v57  ;;  %v5069_v25 = vsel %vm656_vm3, %v5064_v48, %v5068_v8  ;;  %v14062_v12 = vshrl.u32 %v12234_v16, 16 }
 0x47b   : > { %v4510_v32 = vadd.f32 %v12316_v54, %v4486_v41  ;;  %v5070_v27 = vrot.slane %v14062_v12, 1 }
 0x47c   : > { %v4148_v39 = vpop.f32.mrf.mxu2 }
 0x47d   : > { %v4530_v11 = vmax.f32 %v4510_v32, 0.0  ;;  %v4177_v49 = vadd.f32 %v4148_v39, %v12236_v17 }
 0x47e   : > { %v4321_v22 = vpop.f32.mrf.mxu3  ;;  %v4460_v30 = vpop.f32.mrf.mxu0  ;;  %v8936_v19 = vld [vmem:[#allocation2 + $0x52] ss:$2 sm:$0xff]  ;;  %v8938_v38 = vld [vmem:[#allocation2 + $0x53] ss:$2 sm:$0xff] }
 0x47f   : > { %4550 = vst.msk [vmem:[#allocation2 + $0x68] sm:$0xff] %vm334_vm1, %v4530_v11  ;;  %v4348_v33 = vadd.f32 %v4319_v31, %v4177_v49  ;;  %v5219_v31 = vrot.slane %v12234_v16, 2  ;;  %v8943_v41 = vadd.f32 %v8938_v38, %v8936_v19  ;;  %v5221_v19 = vrot.slane %v12263_v60, 2 }
 0x480   : > { %v12515_v55 = vpop.f32.mrf.mxu1  ;;  %v4913_v38 = vrot.slane %v12263_v60, 1 }
 0x481   : > { %v4487_v3 = vadd.f32 %v4458_v56, %v4348_v33  ;;  %v4911_v56 = vrot.slane %v12234_v16, 1  ;;  %v5220_v34 = vsel %vm828_vm5, %v5217_v57, %v5219_v31 }
 0x483   : > { %9624 = vmatmul.msk.bf16.gmra.mxu1 %vm334_vm1, %v5218_v28  ;;  %9602 = vmatmul.msk.bf16.gmra.mxu3 %vm334_vm1, %v4910_v21  ;;  %v4511_v17 = vadd.f32 %v12316_v54, %v4487_v3  ;;  %v4912_v28 = vsel %vm516_vm4, %v4909_v46, %v4911_v56 }
 0x484   : > { %v4150_v40 = vpop.f32.mrf.mxu2 }
 0x485   : > { %v4531_v20 = vmax.f32 %v4511_v17, 0.0  ;;  %v4178_v14 = vadd.f32 %v4150_v40, %v12253_v50 }
 0x486   : > { %v4324_v44 = vpop.f32.mrf.mxu3  ;;  %v4463_v51 = vpop.f32.mrf.mxu0 }
 0x487   : > { %4551 = vst.msk [vmem:[#allocation2 + $0x70] sm:$0xff] %vm334_vm1, %v4531_v20  ;;  %v4349_v7 = vadd.f32 %v4321_v22, %v4178_v14 }
 0x488   : > { %v12525_v53 = vpop.f32.mrf.mxu1 }
 0x489   : > { %9613 = vmatmul.msk.bf16.gmra.mxu0 %vm334_vm1, %v5069_v25  ;;  %v4488_v59 = vadd.f32 %v4460_v30, %v4349_v7  ;;  %9591 = vmatmul.msk.bf16.gmra.mxu2 %vm334_vm1, %v12176_v62  ;;  %v14063_v62 = vshll.u32 %v12234_v16, 16 }
 0x48b   : > { %v4512_v50 = vadd.f32 %v12316_v54, %v4488_v59  ;;  %v5071_v22 = vrot.slane %v14063_v62, 2 }
 0x48c   : > { %v4153_v48 = vpop.f32.mrf.mxu2 }
 0x48d   : > { %v4532_v32 = vmax.f32 %v4512_v50, 0.0  ;;  %v4179_v39 = vadd.f32 %v4153_v48, %v12265_v6  ;;  %v5072_v3 = vor.u32 %v5071_v22, %v5070_v27 }
 0x48e   : > { %v4326_v11 = vpop.f32.mrf.mxu3  ;;  %v4465_v49 = vpop.f32.mrf.mxu0  ;;  %v8940_v30 = vld [vmem:[#allocation2 + $0x66] ss:$2 sm:$0xff]  ;;  %v8942_v33 = vld [vmem:[#allocation2 + $0x67] ss:$2 sm:$0xff] }
 0x48f   : > { %v8944_v61 = vadd.f32 %v8943_v41, %v8940_v30  ;;  %4552 = vst.msk [vmem:[#allocation2 + $0x78] sm:$0xff] %vm334_vm1, %v4532_v32  ;;  %v4350_v5 = vadd.f32 %v4324_v44, %v4179_v39  ;;  %v5073_v46 = vsel %vm656_vm3, %v5068_v8, %v5072_v3  ;;  %v5074_v41 = vrot.slane %v4709_v52, 1 }
 0x490   : > { %v12539_v45 = vpop.f32.mrf.mxu1  ;;  %v14064_v32 = vshll.u32 %v12263_v60, 16 }
 0x491   : > { %v8945_v21 = vadd.f32 %v8944_v61, %v8942_v33  ;;  %v4489_v6 = vadd.f32 %v4463_v51, %v4350_v5 }
 0x492   : > { %v5075_v39 = vrot.slane %v14064_v32, 2 }
 0x493   : > { %9625 = vmatmul.msk.bf16.gmra.mxu1 %vm334_vm1, %v5220_v34  ;;  %9603 = vmatmul.msk.bf16.gmra.mxu3 %vm334_vm1, %v4912_v28  ;;  %v8946_v17 = vmul.f32 0.25, %v8945_v21  ;;  %v4513_v40 = vadd.f32 %v12316_v54, %v4489_v6 }
 0x494   : > { %v4155_v20 = vpop.f32.mrf.mxu2  ;;  %v12573_v52 = vor.u32 %v5075_v39, %v5074_v41 }
 0x495   : > { %8947 = vst.msk [vmem:[%s12419_s18 + $0x10] sm:$0xff] %vm334_vm1, %v8946_v17  ;;  %v4533_v57 = vmax.f32 %v4513_v40, 0.0  ;;  %v4180_v14 = vadd.f32 %v4155_v20, %v12284_v18  ;;  %v5337_v17 = vld [vmem:[%s10600_s29 + $0x58] sm:$0xc]  ;;  %v5338_v40 = vld [vmem:[%s10600_s29 + $0x5c] sm:$0xf] }
 0x496   : > { %v4329_v44 = vpop.f32.mrf.mxu3  ;;  %v4468_v25 = vpop.f32.mrf.mxu0 }
 0x497   : > { %4553 = vst.msk [vmem:[#allocation2 + $0x80] sm:$0xff] %vm334_vm1, %v4533_v57  ;;  %v4351_v51 = vadd.f32 %v4326_v11, %v4180_v14  ;;  %v5029_v11 = vld [vmem:[%s10600_s29 + $0xa0] sm:$0x3]  ;;  %v5760_v57 = vld [vmem:[%s10600_s29 + $0x58] sm:$0x8] }
 0x498   : > { %v12551_v7 = vpop.f32.mrf.mxu1  ;;  %v5032_v22 = vunpack.c.l.b16 %v5029_v11 }
 0x499   : > { %9614 = vmatmul.msk.bf16.gmra.mxu0 %vm334_vm1, %v5073_v46  ;;  %v4490_v59 = vadd.f32 %v4465_v49, %v4351_v51  ;;  %9592 = vmatmul.msk.bf16.gmra.mxu2 %vm334_vm1, %v12205_v13  ;;  %v5222_v49 = vsel %vm828_vm5, %v5219_v31, %v5221_v19  ;;  %v12590_v46 = vunpack.c.l.b16 %v5338_v40  ;;  %v9683_v51 = vld [vmem:[%s13932_s1 + $0x14] sm:$0x3] }
 0x49a   : > { %v5033_v61 = vpack.c.b16 %v5032_v22, %v5032_v22 }
 0x49b   : > { %v4514_v18 = vadd.f32 %v12316_v54, %v4490_v59 }
 0x49c   : > { %v4158_v50 = vpop.f32.mrf.mxu2  ;;  %v5079_v14 = vshrl.u32 %v5033_v61, 16  ;;  %v5223_v59 = vrot.slane %v5033_v61, 2 }
 0x49d   : > { %v4534_v8 = vmax.f32 %v4514_v18, 0.0  ;;  %v4181_v48 = vadd.f32 %v4158_v50, %v12297_v43  ;;  %v4914_v43 = vsel %vm516_vm4, %v4911_v56, %v4913_v38  ;;  %v5077_v56 = vsel %vm656_vm3, %v5072_v3, %v12573_v52  ;;  %v9672_v3 = vld [vmem:[%s13932_s1 + $0x12] sm:$0x3] }
 0x49e   : > { %v4331_v12 = vpop.f32.mrf.mxu3  ;;  %v4470_v27 = vpop.f32.mrf.mxu0  ;;  %v6110_v18 = vsel %vm365_vm0, %v9672_v3, 0  ;;  %v5763_v50 = vunpack.c.l.b16 %v5760_v57 }
 0x49f   : > { %4554 = vst.msk [vmem:[#allocation2 + $0x88] sm:$0xff] %vm334_vm1, %v4534_v8  ;;  %v4352_v62 = vadd.f32 %v4329_v44, %v4181_v48  ;;  %v5082_v44 = vshll.u32 %v5033_v61, 16  ;;  %v6293_v8 = vsel %vm365_vm0, %v9683_v51, 0  ;;  %6119 = vmatpush.bf16.msrb.mxu2 %v6110_v18 }
 0x4a0   : > { %v12566_v13 = vpop.f32.mrf.mxu1  ;;  %6302 = vmatpush.bf16.msrb.mxu3 %v6293_v8 }
 0x4a1   : > { %v4491_v30 = vadd.f32 %v4468_v25, %v4352_v62  ;;  %v5084_v41 = vrot.slane %v5082_v44, 2 }
 0x4a3   : > { %9626 = vmatmul.msk.bf16.gmra.mxu1 %vm334_vm1, %v5222_v49  ;;  %9604 = vmatmul.msk.bf16.gmra.mxu3 %vm334_vm1, %v4914_v43  ;;  %v4515_v31 = vadd.f32 %v12316_v54, %v4491_v30 }
 0x4a4   : > { %v4160_v34 = vpop.f32.mrf.mxu2 }
 0x4a5   : > { %v4535_v5 = vmax.f32 %v4515_v31, 0.0  ;;  %v4182_v28 = vadd.f32 %v4160_v34, %v12310_v0  ;;  %v5380_v0 = vunpack.c.l.b16 %v5337_v17  ;;  %v12617_v31 = vld [vmem:[%s10600_s29 + $0x60] sm:$0xff]  }
 0x4a6   : > { %v4959_v33 = vpop.f32.mrf.mxu3  ;;  %v5129_v21 = vpop.f32.mrf.mxu0  ;;  %v8949_v34 = vld [vmem:[#allocation2 + $0x7a] ss:$2 sm:$0xff]  ;;  %v5559_v17 = vshrl.u32 %v12617_v31, 16  ;;  %v5562_v40 = vshll.u32 %v12617_v31, 16 }
 0x4a7   : > { %4555 = vst.msk [vmem:[#allocation2 + $0x90] sm:$0xff] %vm334_vm1, %v4535_v5  ;;  %v4353_v20 = vadd.f32 %v4331_v12, %v4182_v28  ;;  %v12604_v62 = vpack.c.b16 %v12590_v46, %v5380_v0  ;;  %v8951_v28 = vld [vmem:[#allocation2 + $0x7b] ss:$2 sm:$0xff] }
 0x4a8   : > { %v12581_v6 = vpop.f32.mrf.mxu1  ;;  %v8956_v44 = vadd.f32 %v8951_v28, %v8949_v34 }
 0x4a9   : > { %9615 = vmatmul.msk.bf16.gmra.mxu0 %vm334_vm1, %v5077_v56  ;;  %v4492_v25 = vadd.f32 %v4470_v27, %v4353_v20  ;;  %9593 = vmatmul.msk.bf16.gmra.mxu2 %vm334_vm1, %v12234_v16  ;;  %v4915_v16 = vrot.slane %v12295_v35, 1  ;;  %v5081_v27 = vrot.slane %v5079_v14, 1  ;;  %v12610_v35 = vpack.c.b16 %v12590_v46, %v5763_v50 }
 0x4aa   : > { %v5551_v61 = vshrl.u32 %v12604_v62, 16 }
 0x4ab   : > { %v4516_v48 = vadd.f32 %v12316_v54, %v4492_v25  ;;  %v5224_v54 = vsel %vm828_vm5, %v5221_v19, %v5223_v59  ;;  %v4916_v30 = vsel %vm516_vm4, %v4913_v38, %v4915_v16  ;;  %v5554_v19 = vshll.u32 %v12604_v62, 16  ;;  %v9734_v38 = vld [vmem:[%s13932_s1 + $0x16] sm:$0x3] }
 0x4ac   : > { %v4841_v12 = vpop.f32.mrf.mxu2  ;;  %v5907_v56 = vshll.u32 %v12610_v35, 16  ;;  %v6564_v20 = vsel %vm365_vm0, %v9734_v38, 0  ;;  %v5553_v51 = vrot.slane %v5551_v61, 2  ;;  %v5911_v16 = vrot.slane %v5559_v17, 3 }
 0x4ad   : > { %v4536_v32 = vmax.f32 %v4516_v48, 0.0  ;;  %v4842_v39 = vadd.f32 %v4841_v12, %v12287_v47  ;;  %v5085_v47 = vor.u32 %v5084_v41, %v5081_v27  ;;  %6573 = vmatpush.bf16.msrb.mxu0 %v6564_v20  ;;  %v5556_v59 = vrot.slane %v5554_v19, 3 }
 0x4ae   : > { %v4961_v11 = vpop.f32.mrf.mxu3  ;;  %v5131_v49 = vpop.f32.mrf.mxu0  ;;  %v5909_v48 = vrot.slane %v5907_v56, 4  ;;  %v5912_v12 = vrot.slane %v5562_v40, 4  ;;  %v5561_v41 = vrot.slane %v5559_v17, 2  ;;  %v5765_v20 = vrot.slane %v12610_v35, 3 }
 0x4af   : > { %4556 = vst.msk [vmem:[#allocation2 + $0x98] sm:$0xff] %vm334_vm1, %v4536_v32  ;;  %v5009_v22 = vadd.f32 %v4959_v33, %v4842_v39  ;;  %v5904_v33 = vshrl.u32 %v12610_v35, 16  ;;  %v5086_v14 = vsel %vm656_vm3, %v12573_v52, %v5085_v47  ;;  %v5564_v32 = vrot.slane %v5562_v40, 3  ;;  %v9781_v52 = vld [vmem:[%s13932_s1 + $0x18] sm:$0x3]  ;;  %v12653_v40 = vld [vmem:[%s10600_s29 + $0x68] sm:$0xff]  }
 0x4b0   : > { %v12606_v43 = vpop.f32.mrf.mxu1  ;;  %v6702_v39 = vsel %vm365_vm0, %v9781_v52, 0  ;;  %v5557_v34 = vor.u32 %v5556_v59, %v5553_v51 }
 0x4b1   : > { %v5179_v5 = vadd.f32 %v5129_v21, %v5009_v22  ;;  %v5906_v8 = vrot.slane %v5904_v33, 3  ;;  %6711 = vmatpush.bf16.msrb.mxu1 %v6702_v39  ;;  %v5565_v61 = vor.u32 %v5564_v32, %v5561_v41 }
 0x4b3   : > { %9627 = vmatmul.msk.bf16.gmra.mxu1 %vm334_vm1, %v5224_v54  ;;  %9605 = vmatmul.msk.bf16.gmra.mxu3 %vm334_vm1, %v4916_v30  ;;  %v12632_v57 = vadd.f32 %v12566_v13, %v5179_v5  ;;  %v5913_v30 = vor.u32 %v5912_v12, %v5911_v16  ;;  %v5566_v17 = vsel %vm1177_vm8, %v5557_v34, %v5565_v61 }
 0x4b4   : > { %v4843_v21 = vpop.f32.mrf.mxu2 }
 0x4b5   : > { %v4844_v25 = vadd.f32 %v4843_v21, %v12302_v15 }
 0x4b6   : > { %v4964_v0 = vpop.f32.mrf.mxu3  ;;  %v5134_v3 = vpop.f32.mrf.mxu0  ;;  %v8953_v18 = vld [vmem:[#allocation2 + $0x8e] ss:$2 sm:$0xff]  ;;  %v8955_v15 = vld [vmem:[#allocation2 + $0x8f] ss:$2 sm:$0xff] }
 0x4b7   : > { %v8957_v13 = vadd.f32 %v8956_v44, %v8953_v18  ;;  %v5010_v27 = vadd.f32 %v4961_v11, %v4844_v25  ;;  %v5910_v11 = vor.u32 %v5909_v48, %v5906_v8  ;;  %v5568_v44 = vshrl.u32 %v12653_v40, 16 }
 0x4b8   : > { %v5274_v50 = vpop.f32.mrf.mxu1  ;;  %v5571_v25 = vshll.u32 %v12653_v40, 16 }
 0x4b9   : > { %9616 = vmatmul.msk.bf16.gmra.mxu0 %vm334_vm1, %v5086_v14  ;;  %v8958_v54 = vadd.f32 %v8957_v13, %v8955_v15  ;;  %9594 = vmatmul.msk.bf16.gmra.mxu2 %vm334_vm1, %v12263_v60  ;;  %v5180_v22 = vadd.f32 %v5131_v49, %v5010_v27  ;;  %v5914_v60 = vsel %vm1534_vm7, %v5910_v11, %v5913_v30  ;;  %v5413_v14 = vrot.slane %v12617_v31, 2 }
 0x4ba   : > { %v5916_v16 = vrot.slane %v5571_v25, 4  ;;  %v5570_v13 = vrot.slane %v5568_v44, 2  ;;  %v5573_v27 = vrot.slane %v5571_v25, 3 }
 0x4bb   : > { %v8959_v47 = vmul.f32 0.25, %v8958_v54  ;;  %v12645_v19 = vadd.f32 %v12581_v6, %v5180_v22  ;;  %v5766_v6 = vrot.slane %v12617_v31, 3 }
 0x4bc   : > { %v4846_v5 = vpop.f32.mrf.mxu2 }
 0x4bd   : > { %8960 = vst.msk [vmem:[%s12419_s18 + $0x18] sm:$0xff] %vm334_vm1, %v8959_v47  ;;  %v4847_v28 = vadd.f32 %v4846_v5, %v12318_v9  ;;  %v5412_v9 = vrot.slane %v12604_v62, 2  ;;  %v5915_v62 = vrot.slane %v5568_v44, 3  ;;  %v12677_v5 = vld [vmem:[%s10600_s29 + $0x70] sm:$0xff]  }
 0x4be   : > { %v4966_v33 = vpop.f32.mrf.mxu3  ;;  %v5136_v56 = vpop.f32.mrf.mxu0 }
 0x4bf   : > { %v5011_v49 = vadd.f32 %v4964_v0, %v4847_v28  ;;  %v5414_v8 = vsel %vm828_vm5, %v5412_v9, %v5413_v14  ;;  %v5917_v41 = vor.u32 %v5916_v16, %v5915_v62  ;;  %v5768_v28 = vrot.slane %v12653_v40, 3 }
 0x4c0   : > { %v5277_v38 = vpop.f32.mrf.mxu1 }
 0x4c1   : > { %v5181_v21 = vadd.f32 %v5134_v3, %v5011_v49  ;;  %v5767_v3 = vsel %vm1394_vm6, %v5765_v20, %v5766_v6  ;;  %v5918_v11 = vsel %vm1534_vm7, %v5913_v30, %v5917_v41  ;;  %v5769_v20 = vsel %vm1394_vm6, %v5766_v6, %v5768_v28 }
 0x4c3   : > { %9662 = vmatmul.msk.bf16.vlgmr.msra.gmra.mxu1 %vm334_vm1, %v5914_v60  ;;  %9640 = vmatmul.msk.bf16.vlgmr.msra.gmra.mxu3 %vm334_vm1, %v5566_v17  ;;  %v12664_v0 = vadd.f32 %v12606_v43, %v5181_v21 }
 0x4c4   : > { %v4848_v51 = vpop.f32.mrf.mxu2 }
 0x4c5   : > { %v4849_v35 = vadd.f32 %v4848_v51, %v12340_v36  ;;  %v5574_v36 = vor.u32 %v5573_v27, %v5570_v13  ;;  %v12698_v27 = vld [vmem:[%s10600_s29 + $0x78] sm:$0xff]  }
 0x4c6   : > { %v4969_v59 = vpop.f32.mrf.mxu3  ;;  %v5139_v18 = vpop.f32.mrf.mxu0 }
 0x4c7   : > { %v5012_v12 = vadd.f32 %v4966_v33, %v4849_v35  ;;  %v5575_v34 = vsel %vm1177_vm8, %v5565_v61, %v5574_v36 }
 0x4c8   : > { %v5279_v48 = vpop.f32.mrf.mxu1 }
 0x4c9   : > { %9651 = vmatmul.msk.bf16.vlgmr.msra.gmra.mxu0 %vm334_vm1, %v5767_v3  ;;  %9629 = vmatmul.msk.bf16.vlgmr.msra.gmra.mxu2 %vm334_vm1, %v5414_v8  ;;  %v5182_v43 = vadd.f32 %v5136_v56, %v5012_v12  ;;  %v5580_v56 = vshll.u32 %v12677_v5, 16 }
 0x4cb   : > { %v12671_v32 = vadd.f32 %v5274_v50, %v5182_v43  ;;  %v5415_v50 = vrot.slane %v12653_v40, 2  ;;  %v5920_v25 = vrot.slane %v5580_v56, 4  ;;  %v5582_v35 = vrot.slane %v5580_v56, 3 }
 0x4cc   : > { %v4851_v52 = vpop.f32.mrf.mxu2  ;;  %v5770_v43 = vrot.slane %v12677_v5, 3 }
 0x4cd   : > { %v4852_v15 = vadd.f32 %v4851_v52, %v12353_v29  ;;  %v5577_v29 = vshrl.u32 %v12677_v5, 16  ;;  %v5416_v21 = vsel %vm828_vm5, %v5413_v14, %v5415_v50 }
 0x4ce   : > { %v4971_v39 = vpop.f32.mrf.mxu3  ;;  %v5141_v54 = vpop.f32.mrf.mxu0 }
 0x4cf   : > { %v5013_v47 = vadd.f32 %v4969_v59, %v4852_v15  ;;  %v5919_v44 = vrot.slane %v5577_v29, 3  ;;  %v5579_v40 = vrot.slane %v5577_v29, 2  ;;  %v5589_v15 = vshll.u32 %v12698_v27, 16 }
 0x4d0   : > { %v5282_v22 = vpop.f32.mrf.mxu1 }
 0x4d1   : > { %v5183_v33 = vadd.f32 %v5139_v18, %v5013_v47  ;;  %v5921_v59 = vor.u32 %v5920_v25, %v5919_v44  ;;  %v5771_v47 = vsel %vm1394_vm6, %v5768_v28, %v5770_v43  ;;  %v5924_v56 = vrot.slane %v5589_v15, 4 }
 0x4d3   : > { %9663 = vmatmul.msk.bf16.gmra.mxu1 %vm334_vm1, %v5918_v11  ;;  %9641 = vmatmul.msk.bf16.gmra.mxu3 %vm334_vm1, %v5575_v34  ;;  %v12685_v60 = vadd.f32 %v5277_v38, %v5183_v33  ;;  %v5922_v16 = vsel %vm1534_vm7, %v5917_v41, %v5921_v59 }
 0x4d4   : > { %v4853_v30 = vpop.f32.mrf.mxu2 }
 0x4d5   : > { %v4854_v61 = vadd.f32 %v4853_v30, %v12369_v4  ;;  %v5583_v4 = vor.u32 %v5582_v35, %v5579_v40  ;;  %v12719_v35 = vld [vmem:[%s10600_s29 + $0x80] sm:$0xff]  }
 0x4d6   : > { %v4974_v49 = vpop.f32.mrf.mxu3  ;;  %v5144_v17 = vpop.f32.mrf.mxu0 }
 0x4d7   : > { %v5014_v51 = vadd.f32 %v4971_v39, %v4854_v61  ;;  %v5584_v13 = vsel %vm1177_vm8, %v5574_v36, %v5583_v4  ;;  %v5591_v61 = vrot.slane %v5589_v15, 3 }
 0x4d8   : > { %v5284_v9 = vpop.f32.mrf.mxu1 }
 0x4d9   : > { %9652 = vmatmul.msk.bf16.gmra.mxu0 %vm334_vm1, %v5769_v20  ;;  %9630 = vmatmul.msk.bf16.gmra.mxu2 %vm334_vm1, %v5416_v21  ;;  %v5184_v38 = vadd.f32 %v5141_v54, %v5014_v51 }
 0x4db   : > { %v12692_v18 = vadd.f32 %v5279_v48, %v5184_v38  ;;  %v5417_v48 = vrot.slane %v12677_v5, 2  ;;  %v5772_v38 = vrot.slane %v12698_v27, 3 }
 0x4dc   : > { %v4856_v3 = vpop.f32.mrf.mxu2 }
 0x4dd   : > { %v4857_v6 = vadd.f32 %v4856_v3, %v12385_v23  ;;  %v5586_v23 = vshrl.u32 %v12698_v27, 16  ;;  %v5418_v34 = vsel %vm828_vm5, %v5415_v50, %v5417_v48 }
 0x4de   : > { %v4976_v14 = vpop.f32.mrf.mxu3  ;;  %v5146_v8 = vpop.f32.mrf.mxu0 }
 0x4df   : > { %v5015_v12 = vadd.f32 %v4974_v49, %v4857_v6  ;;  %v5923_v29 = vrot.slane %v5586_v23, 3  ;;  %v5588_v5 = vrot.slane %v5586_v23, 2  ;;  %v5598_v6 = vshll.u32 %v12719_v35, 16 }
 0x4e0   : > { %v5287_v62 = vpop.f32.mrf.mxu1 }
 0x4e1   : > { %v5185_v52 = vadd.f32 %v5144_v17, %v5015_v12  ;;  %v5925_v49 = vor.u32 %v5924_v56, %v5923_v29  ;;  %v5773_v12 = vsel %vm1394_vm6, %v5770_v43, %v5772_v38  ;;  %v5928_v15 = vrot.slane %v5598_v6, 4 }
 0x4e3   : > { %9664 = vmatmul.msk.bf16.gmra.mxu1 %vm334_vm1, %v5922_v16  ;;  %9642 = vmatmul.msk.bf16.gmra.mxu3 %vm334_vm1, %v5584_v13  ;;  %v12706_v39 = vadd.f32 %v5282_v22, %v5185_v52  ;;  %v5926_v25 = vsel %vm1534_vm7, %v5921_v59, %v5925_v49 }
 0x4e4   : > { %v4858_v41 = vpop.f32.mrf.mxu2 }
 0x4e5   : > { %v4859_v36 = vadd.f32 %v4858_v41, %v12395_v63  ;;  %v5592_v63 = vor.u32 %v5591_v61, %v5588_v5  ;;  %v12740_v61 = vld [vmem:[%s10600_s29 + $0x88] sm:$0xff]  }
 0x4e6   : > { %v4979_v54 = vpop.f32.mrf.mxu3  ;;  %v5149_v11 = vpop.f32.mrf.mxu0 }
 0x4e7   : > { %v5016_v30 = vadd.f32 %v4976_v14, %v4859_v36  ;;  %v5593_v40 = vsel %vm1177_vm8, %v5583_v4, %v5592_v63  ;;  %v5600_v36 = vrot.slane %v5598_v6, 3 }
 0x4e8   : > { %v5289_v33 = vpop.f32.mrf.mxu1 }
 0x4e9   : > { %9653 = vmatmul.msk.bf16.gmra.mxu0 %vm334_vm1, %v5771_v47  ;;  %9631 = vmatmul.msk.bf16.gmra.mxu2 %vm334_vm1, %v5418_v34  ;;  %v5186_v22 = vadd.f32 %v5146_v8, %v5016_v30 }
 0x4eb   : > { %v12713_v17 = vadd.f32 %v5284_v9, %v5186_v22  ;;  %v5419_v9 = vrot.slane %v12698_v27, 2  ;;  %v5774_v22 = vrot.slane %v12719_v35, 3 }
 0x4ec   : > { %v4861_v20 = vpop.f32.mrf.mxu2 }
 0x4ed   : > { %v4862_v28 = vadd.f32 %v4861_v20, %v12409_v26  ;;  %v5595_v26 = vshrl.u32 %v12719_v35, 16  ;;  %v5420_v13 = vsel %vm828_vm5, %v5417_v48, %v5419_v9 }
 0x4ee   : > { %v4981_v50 = vpop.f32.mrf.mxu3  ;;  %v5151_v21 = vpop.f32.mrf.mxu0 }
 0x4ef   : > { %v5017_v51 = vadd.f32 %v4979_v54, %v4862_v28  ;;  %v5927_v23 = vrot.slane %v5595_v26, 3  ;;  %v5597_v27 = vrot.slane %v5595_v26, 2  ;;  %v5607_v28 = vshll.u32 %v12740_v61, 16 }
 0x4f0   : > { %v5292_v44 = vpop.f32.mrf.mxu1 }
 0x4f1   : > { %v5187_v3 = vadd.f32 %v5149_v11, %v5017_v51  ;;  %v5929_v54 = vor.u32 %v5928_v15, %v5927_v23  ;;  %v5775_v51 = vsel %vm1394_vm6, %v5772_v38, %v5774_v22  ;;  %v5932_v6 = vrot.slane %v5607_v28, 4 }
 0x4f3   : > { %9665 = vmatmul.msk.bf16.gmra.mxu1 %vm334_vm1, %v5926_v25  ;;  %9643 = vmatmul.msk.bf16.gmra.mxu3 %vm334_vm1, %v5593_v40  ;;  %v12727_v14 = vadd.f32 %v5287_v62, %v5187_v3  ;;  %v5930_v56 = vsel %vm1534_vm7, %v5925_v49, %v5929_v54 }
 0x4f4   : > { %v4863_v59 = vpop.f32.mrf.mxu2 }
 0x4f5   : > { %v4864_v4 = vadd.f32 %v4863_v59, %v12427_v2  ;;  %v5601_v2 = vor.u32 %v5600_v36, %v5597_v27  ;;  %v12761_v36 = vld [vmem:[%s10600_s29 + $0x90] sm:$0xff]  }
 0x4f6   : > { %v4984_v8 = vpop.f32.mrf.mxu3  ;;  %v5154_v16 = vpop.f32.mrf.mxu0 }
 0x4f7   : > { %v5018_v41 = vadd.f32 %v4981_v50, %v4864_v4  ;;  %v5602_v5 = vsel %vm1177_vm8, %v5592_v63, %v5601_v2  ;;  %v5609_v4 = vrot.slane %v5607_v28, 3 }
 0x4f8   : > { %v5294_v52 = vpop.f32.mrf.mxu1 }
 0x4f9   : > { %9654 = vmatmul.msk.bf16.gmra.mxu0 %vm334_vm1, %v5773_v12  ;;  %9632 = vmatmul.msk.bf16.gmra.mxu2 %vm334_vm1, %v5420_v13  ;;  %v5188_v62 = vadd.f32 %v5151_v21, %v5018_v41 }
 0x4fb   : > { %v12734_v11 = vadd.f32 %v5289_v33, %v5188_v62  ;;  %v5421_v33 = vrot.slane %v12719_v35, 2  ;;  %v5776_v62 = vrot.slane %v12740_v61, 3 }
 0x4fc   : > { %v4866_v47 = vpop.f32.mrf.mxu2 }
 0x4fd   : > { %v4867_v43 = vadd.f32 %v4866_v47, %v12441_v42  ;;  %v5604_v42 = vshrl.u32 %v12740_v61, 16  ;;  %v5422_v40 = vsel %vm828_vm5, %v5419_v9, %v5421_v33 }
 0x4fe   : > { %v4986_v48 = vpop.f32.mrf.mxu3  ;;  %v5156_v34 = vpop.f32.mrf.mxu0 }
 0x4ff   : > { %v5019_v30 = vadd.f32 %v4984_v8, %v4867_v43  ;;  %v5931_v26 = vrot.slane %v5604_v42, 3  ;;  %v5606_v35 = vrot.slane %v5604_v42, 2  ;;  %v5616_v43 = vshll.u32 %v12761_v36, 16 }
 0x500   : > { %v5297_v29 = vpop.f32.mrf.mxu1 }
 0x501   : > { %v5189_v20 = vadd.f32 %v5154_v16, %v5019_v30  ;;  %v5933_v8 = vor.u32 %v5932_v6, %v5931_v26  ;;  %v5777_v30 = vsel %vm1394_vm6, %v5774_v22, %v5776_v62  ;;  %v5936_v28 = vrot.slane %v5616_v43, 4 }
 0x503   : > { %9666 = vmatmul.msk.bf16.gmra.mxu1 %vm334_vm1, %v5930_v56  ;;  %9644 = vmatmul.msk.bf16.gmra.mxu3 %vm334_vm1, %v5602_v5  ;;  %v12748_v50 = vadd.f32 %v5292_v44, %v5189_v20  ;;  %v5934_v15 = vsel %vm1534_vm7, %v5929_v54, %v5933_v8 }
 0x504   : > { %v4868_v49 = vpop.f32.mrf.mxu2 }
 0x505   : > { %v4869_v63 = vadd.f32 %v4868_v49, %v12451_v10  ;;  %v5610_v10 = vor.u32 %v5609_v4, %v5606_v35  ;;  %v12782_v4 = vld [vmem:[%s10600_s29 + $0x98] sm:$0xff]  }
 0x506   : > { %v4989_v21 = vpop.f32.mrf.mxu3  ;;  %v5159_v25 = vpop.f32.mrf.mxu0 }
 0x507   : > { %v5020_v59 = vadd.f32 %v4986_v48, %v4869_v63  ;;  %v5611_v27 = vsel %vm1177_vm8, %v5601_v2, %v5610_v10  ;;  %v5618_v63 = vrot.slane %v5616_v43, 3 }
 0x508   : > { %v5299_v3 = vpop.f32.mrf.mxu1 }
 0x509   : > { %9655 = vmatmul.msk.bf16.gmra.mxu0 %vm334_vm1, %v5775_v51  ;;  %9633 = vmatmul.msk.bf16.gmra.mxu2 %vm334_vm1, %v5422_v40  ;;  %v5190_v44 = vadd.f32 %v5156_v34, %v5020_v59 }
 0x50b   : > { %v12755_v16 = vadd.f32 %v5294_v52, %v5190_v44  ;;  %v5423_v52 = vrot.slane %v12740_v61, 2  ;;  %v5778_v44 = vrot.slane %v12761_v36, 3 }
 0x50c   : > { %v4871_v12 = vpop.f32.mrf.mxu2 }
 0x50d   : > { %v4872_v38 = vadd.f32 %v4871_v12, %v12465_v37  ;;  %v5613_v37 = vshrl.u32 %v12761_v36, 16  ;;  %v5424_v5 = vsel %vm828_vm5, %v5421_v33, %v5423_v52 }
 0x50e   : > { %v4991_v9 = vpop.f32.mrf.mxu3  ;;  %v5161_v13 = vpop.f32.mrf.mxu0 }
 0x50f   : > { %v5021_v41 = vadd.f32 %v4989_v21, %v4872_v38  ;;  %v5935_v42 = vrot.slane %v5613_v37, 3  ;;  %v5615_v61 = vrot.slane %v5613_v37, 2  ;;  %v5625_v38 = vshll.u32 %v12782_v4, 16 }
 0x510   : > { %v5302_v23 = vpop.f32.mrf.mxu1 }
 0x511   : > { %v5191_v47 = vadd.f32 %v5159_v25, %v5021_v41  ;;  %v5937_v21 = vor.u32 %v5936_v28, %v5935_v42  ;;  %v5779_v41 = vsel %vm1394_vm6, %v5776_v62, %v5778_v44  ;;  %v5940_v43 = vrot.slane %v5625_v38, 4 }
 0x513   : > { %9667 = vmatmul.msk.bf16.gmra.mxu1 %vm334_vm1, %v5934_v15  ;;  %9645 = vmatmul.msk.bf16.gmra.mxu3 %vm334_vm1, %v5611_v27  ;;  %v12769_v48 = vadd.f32 %v5297_v29, %v5191_v47  ;;  %v5938_v6 = vsel %vm1534_vm7, %v5933_v8, %v5937_v21 }
 0x514   : > { %v4873_v54 = vpop.f32.mrf.mxu2 }
 0x515   : > { %v4874_v2 = vadd.f32 %v4873_v54, %v12475_v1  ;;  %v5619_v1 = vor.u32 %v5618_v63, %v5615_v61  ;;  %v12803_v63 = vld [vmem:[%s10600_s29 + $0xa0] sm:$0xff]  }
 0x516   : > { %v4994_v34 = vpop.f32.mrf.mxu3  ;;  %v5164_v56 = vpop.f32.mrf.mxu0 }
 0x517   : > { %v5022_v49 = vadd.f32 %v4991_v9, %v4874_v2  ;;  %v5620_v35 = vsel %vm1177_vm8, %v5610_v10, %v5619_v1  ;;  %v5627_v2 = vrot.slane %v5625_v38, 3 }
 0x518   : > { %v5304_v20 = vpop.f32.mrf.mxu1 }
 0x519   : > { %9656 = vmatmul.msk.bf16.gmra.mxu0 %vm334_vm1, %v5777_v30  ;;  %9634 = vmatmul.msk.bf16.gmra.mxu2 %vm334_vm1, %v5424_v5  ;;  %v5192_v29 = vadd.f32 %v5161_v13, %v5022_v49 }
 0x51b   : > { %v12776_v25 = vadd.f32 %v5299_v3, %v5192_v29  ;;  %v5425_v3 = vrot.slane %v12761_v36, 2  ;;  %v5780_v29 = vrot.slane %v12782_v4, 3 }
 0x51c   : > { %v4876_v51 = vpop.f32.mrf.mxu2 }
 0x51d   : > { %v4877_v22 = vadd.f32 %v4876_v51, %v12491_v24  ;;  %v5622_v24 = vshrl.u32 %v12782_v4, 16  ;;  %v5426_v27 = vsel %vm828_vm5, %v5423_v52, %v5425_v3 }
 0x51e   : > { %v4996_v33 = vpop.f32.mrf.mxu3  ;;  %v5166_v40 = vpop.f32.mrf.mxu0 }
 0x51f   : > { %v5023_v59 = vadd.f32 %v4994_v34, %v4877_v22  ;;  %v5939_v37 = vrot.slane %v5622_v24, 3  ;;  %v5624_v36 = vrot.slane %v5622_v24, 2  ;;  %v5634_v22 = vshll.u32 %v12803_v63, 16 }
 0x520   : > { %v5307_v26 = vpop.f32.mrf.mxu1 }
 0x521   : > { %v5193_v12 = vadd.f32 %v5164_v56, %v5023_v59  ;;  %v5941_v34 = vor.u32 %v5940_v43, %v5939_v37  ;;  %v5781_v59 = vsel %vm1394_vm6, %v5778_v44, %v5780_v29 }
 0x523   : > { %9668 = vmatmul.msk.bf16.gmra.mxu1 %vm334_vm1, %v5938_v6  ;;  %9646 = vmatmul.msk.bf16.gmra.mxu3 %vm334_vm1, %v5620_v35  ;;  %v12790_v9 = vadd.f32 %v5302_v23, %v5193_v12  ;;  %v5942_v28 = vsel %vm1534_vm7, %v5937_v21, %v5941_v34 }
 0x524   : > { %v4878_v8 = vpop.f32.mrf.mxu2 }
 0x525   : > { %v4879_v10 = vadd.f32 %v4878_v8, %v12501_v58  ;;  %v5628_v58 = vor.u32 %v5627_v2, %v5624_v36 }
 0x526   : > { %v4999_v13 = vpop.f32.mrf.mxu3  ;;  %v5169_v15 = vpop.f32.mrf.mxu0 }
 0x527   : > { %v5024_v54 = vadd.f32 %v4996_v33, %v4879_v10  ;;  %v5629_v61 = vsel %vm1177_vm8, %v5619_v1, %v5628_v58  ;;  %v5636_v10 = vrot.slane %v5634_v22, 3 }
 0x528   : > { %v5309_v47 = vpop.f32.mrf.mxu1 }
 0x529   : > { %9657 = vmatmul.msk.bf16.gmra.mxu0 %vm334_vm1, %v5779_v41  ;;  %9635 = vmatmul.msk.bf16.gmra.mxu2 %vm334_vm1, %v5426_v27  ;;  %v5194_v23 = vadd.f32 %v5166_v40, %v5024_v54 }
 0x52b   : > { %v12797_v56 = vadd.f32 %v5304_v20, %v5194_v23  ;;  %v5427_v20 = vrot.slane %v12782_v4, 2  ;;  %v5944_v4 = vrot.slane %v5634_v22, 4 }
 0x52c   : > { %v4881_v30 = vpop.f32.mrf.mxu2 }
 0x52d   : > { %v4882_v62 = vadd.f32 %v4881_v30, %v12515_v55  ;;  %v5631_v55 = vshrl.u32 %v12803_v63, 16  ;;  %v5428_v35 = vsel %vm828_vm5, %v5425_v3, %v5427_v20 }
 0x52e   : > { %v5001_v52 = vpop.f32.mrf.mxu3  ;;  %v5171_v5 = vpop.f32.mrf.mxu0 }
 0x52f   : > { %v5025_v49 = vadd.f32 %v4999_v13, %v4882_v62  ;;  %v5943_v24 = vrot.slane %v5631_v55, 3  ;;  %v5633_v8 = vrot.slane %v5631_v55, 2  ;;  %v5898_v13 = vld [vmem:[%s10600_s29 + $0xa8] sm:$0xf] }
 0x530   : > { %v5312_v42 = vpop.f32.mrf.mxu1  ;;  %v12820_v41 = vunpack.c.l.b16 %v5898_v13 }
 0x531   : > { %v5195_v51 = vadd.f32 %v5169_v15, %v5025_v49  ;;  %v5637_v27 = vor.u32 %v5636_v10, %v5633_v8  ;;  %v5357_v10 = vld [vmem:[%s10600_s29 + $0xa8] sm:$0x3] }
 0x532   : > { %v5902_v30 = vpack.c.b16 %v12820_v41, %v12820_v41 }
 0x533   : > { %9669 = vmatmul.msk.bf16.gmra.mxu1 %vm334_vm1, %v5942_v28  ;;  %9647 = vmatmul.msk.bf16.gmra.mxu3 %vm334_vm1, %v5629_v61  ;;  %v12811_v21 = vadd.f32 %v5307_v26, %v5195_v51  ;;  %v5545_v26 = vld [vmem:[%s10600_s29 + $0xa8] sm:$0x7]  ;;  %v5782_v28 = vrot.slane %v12803_v63, 3 }
 0x534   : > { %v4883_v1 = vpop.f32.mrf.mxu2  ;;  %v5548_v44 = vunpack.c.l.b16 %v5545_v26  ;;  %v5948_v49 = vshrl.u32 %v5902_v30, 16  ;;  %v5951_v61 = vshll.u32 %v5902_v30, 16 }
 0x535   : > { %v4884_v33 = vadd.f32 %v4883_v1, %v12525_v53  ;;  %v5945_v53 = vor.u32 %v5944_v4, %v5943_v24 }
 0x536   : > { %v5004_v40 = vpop.f32.mrf.mxu3  ;;  %v5174_v6 = vpop.f32.mrf.mxu0  ;;  %v5953_v24 = vrot.slane %v5951_v61, 4 }
 0x537   : > { %v5026_v38 = vadd.f32 %v5001_v52, %v4884_v33  ;;  %v5946_v23 = vsel %vm1534_vm7, %v5941_v34, %v5945_v53  ;;  %v5638_v52 = vsel %vm1177_vm8, %v5628_v58, %v5637_v27 }
 0x538   : > { %v5314_v12 = vpop.f32.mrf.mxu1 }
 0x539   : > { %9658 = vmatmul.msk.bf16.gmra.mxu0 %vm334_vm1, %v5781_v59  ;;  %9636 = vmatmul.msk.bf16.gmra.mxu2 %vm334_vm1, %v5428_v35  ;;  %v5196_v15 = vadd.f32 %v5171_v5, %v5026_v38  ;;  %v12829_v5 = vpack.c.b16 %v5548_v44, %v5548_v44  ;;  %v5950_v35 = vrot.slane %v5948_v49, 3 }
 0x53b   : > { %v12822_v37 = vadd.f32 %v5309_v47, %v5196_v15  ;;  %v5640_v34 = vshrl.u32 %v12829_v5, 16  ;;  %v5643_v51 = vshll.u32 %v12829_v5, 16  ;;  %v5954_v13 = vor.u32 %v5953_v24, %v5950_v35 }
 0x53c   : > { %v4886_v3 = vpop.f32.mrf.mxu2 }
 0x53d   : > { %v4887_v43 = vadd.f32 %v4886_v3, %v12539_v45  ;;  %v5429_v45 = vrot.slane %v12803_v63, 2  ;;  %v5642_v38 = vrot.slane %v5640_v34, 2  ;;  %v5645_v8 = vrot.slane %v5643_v51, 3  ;;  %v6645_v34 = vld [vmem:[%s10600_s29 + $0x64] sm:$0xe] }
 0x53e   : > { %v5006_v54 = vpop.f32.mrf.mxu3  ;;  %v5176_v36 = vpop.f32.mrf.mxu0  ;;  %v5784_v51 = vrot.slane %v12829_v5, 3 }
 0x53f   : > { %v5027_v62 = vadd.f32 %v5004_v40, %v4887_v43  ;;  %v5783_v40 = vsel %vm1394_vm6, %v5780_v29, %v5782_v28  ;;  %v5646_v44 = vor.u32 %v5645_v8, %v5642_v38 }
 0x540   : > { %v5998_v2 = vpop.f32.mrf.mxu1 }
 0x541   : > { %v5197_v47 = vadd.f32 %v5174_v6, %v5027_v62  ;;  %v5430_v6 = vsel %vm828_vm5, %v5427_v20, %v5429_v45  ;;  %v5400_v20 = vunpack.c.l.b16 %v5357_v10  ;;  %v5647_v61 = vsel %vm1177_vm8, %v5637_v27, %v5646_v44 }
 0x543   : > { %9670 = vmatmul.msk.bf16.gmra.mxu1 %vm334_vm1, %v5946_v23  ;;  %9648 = vmatmul.msk.bf16.gmra.mxu3 %vm334_vm1, %v5638_v52  ;;  %v12837_v55 = vadd.f32 %v5312_v42, %v5197_v47  ;;  %v9803_v42 = vld [vmem:[%s13932_s1 + $0x1c] sm:$0x3]  ;;  %v5411_v62 = vpack.c.b16 %v5400_v20, %v5400_v20  ;;  %v5955_v52 = vsel %vm1534_vm7, %v5945_v53, %v5954_v13  ;;  %v12860_v47 = vld [vmem:[%s10600_s29 + $0x64] sm:$0xff]   ;;  %v9814_v53 = vld [vmem:[%s13932_s1 + $0x1e] sm:$0x3] }
 0x544   : > { %v4888_v58 = vpop.f32.mrf.mxu2  ;;  %v7010_v15 = vsel %vm365_vm0, %v9803_v42, 0  ;;  %v6450_v44 = vshrl.u32 %v12860_v47, 16 }
 0x545   : > { %v4889_v22 = vadd.f32 %v4888_v58, %v12551_v7  ;;  %v9792_v7 = vld [vmem:[%s13932_s1 + $0x1a] sm:$0x3]  ;;  %7019 = vmatpush.bf16.msra.mxu3 %v7010_v15 }
 0x546   : > { %v5690_v1 = vpop.f32.mrf.mxu3  ;;  %v5828_v33 = vpop.f32.mrf.mxu0  ;;  %v6872_v26 = vsel %vm365_vm0, %v9792_v7, 0 }
 0x547   : > { %v5028_v4 = vadd.f32 %v5006_v54, %v4889_v22  ;;  %6881 = vmatpush.bf16.msra.mxu2 %v6872_v26  ;;  %v6648_v22 = vunpack.c.l.b16 %v6645_v34 }
 0x548   : > { %v6000_v59 = vpop.f32.mrf.mxu1 }
 0x549   : > { %9659 = vmatmul.msk.bf16.gmra.mxu0 %vm334_vm1, %v5783_v40  ;;  %9637 = vmatmul.msk.bf16.gmra.mxu2 %vm334_vm1, %v5430_v6  ;;  %v5198_v29 = vadd.f32 %v5176_v36, %v5028_v4 }
 0x54b   : > { %v12855_v3 = vadd.f32 %v5314_v12, %v5198_v29  ;;  %v6418_v12 = vunpack.c.h.b16 %v12860_v47 }
 0x54c   : > { %v5475_v43 = vpop.f32.mrf.mxu2 }
 0x54d   : > { %v5525_v54 = vadd.f32 %v5475_v43, %v12632_v57  ;;  %v5431_v57 = vrot.slane %v5411_v62, 2  ;;  %v12881_v38 = vpack.c.b16 %v6418_v12, %v6648_v22 }
 0x54e   : > { %v5692_v23 = vpop.f32.mrf.mxu3  ;;  %v5830_v30 = vpop.f32.mrf.mxu0 }
 0x54f   : > { %v5740_v49 = vadd.f32 %v5690_v1, %v5525_v54  ;;  %v7218_v1 = vsel %vm365_vm0, %v9814_v53, 0  ;;  %v5432_v24 = vsel %vm828_vm5, %v5429_v45, %v5431_v57  ;;  %v6650_v7 = vrot.slane %v12881_v38, 1 }
 0x550   : > { %v6003_v36 = vpop.f32.mrf.mxu1  ;;  %7227 = vmatpush.bf16.msra.mxu0 %v7218_v1 }
 0x551   : > { %v5878_v58 = vadd.f32 %v5828_v33, %v5740_v49  ;;  %v5785_v33 = vsel %vm1394_vm6, %v5782_v28, %v5784_v51  ;;  %v6452_v28 = vshll.u32 %v12860_v47, 16  ;;  %v10183_v49 = vunpack.c.l.b16 %v12617_v31 }
 0x553   : > { %9671 = vmatmul.msk.bf16.gmra.mxu1 %vm334_vm1, %v5955_v52  ;;  %9649 = vmatmul.msk.bf16.gmra.mxu3 %vm334_vm1, %v5647_v61  ;;  %v12872_v27 = vadd.f32 %v5998_v2, %v5878_v58  ;;  %v9825_v2 = vld [vmem:[%s13932_s1 + $0x20] sm:$0x3]  ;;  %v6454_v43 = vrot.slane %v6452_v28, 1  ;;  %v6069_v53 = vpack.c.b16 %v10183_v49, %v12590_v46 }
 0x554   : > { %v5477_v40 = vpop.f32.mrf.mxu2  ;;  %v7433_v10 = vsel %vm365_vm0, %v9825_v2, 0  ;;  %v12938_v49 = vld [vmem:[%s10600_s29 + $0x7c] sm:$0xff] }
 0x555   : > { %v5526_v5 = vadd.f32 %v5477_v40, %v12645_v19  ;;  %v12888_v19 = vld [vmem:[%s10600_s29 + $0x6c] sm:$0xff]  ;;  %7442 = vmatpush.bf16.msra.mxu1 %v7433_v10 }
 0x556   : > { %v5695_v6 = vpop.f32.mrf.mxu3  ;;  %v5833_v35 = vpop.f32.mrf.mxu0  ;;  %v6651_v42 = vrot.slane %v12888_v19, 1  ;;  %v6457_v54 = vshll.u32 %v12888_v19, 16  ;;  %v10060_v10 = vld [vmem:[%s10600_s29 + $0x6c] sm:$0xff] }
 0x557   : > { %v5741_v8 = vadd.f32 %v5692_v23, %v5526_v5  ;;  %v10059_v23 = vld [vmem:[%s10600_s29 + $0x64] sm:$0xff]  ;;  %v12914_v5 = vld [vmem:[%s10600_s29 + $0x74] sm:$0xff] }
 0x558   : > { %v6005_v4 = vpop.f32.mrf.mxu1  ;;  %v6459_v61 = vrot.slane %v6457_v54, 1  ;;  %v13996_v2 = vshll.u32 %v12914_v5, 16 }
 0x559   : > { %9660 = vmatmul.msk.bf16.gmra.mxu0 %vm334_vm1, %v5785_v33  ;;  %9638 = vmatmul.msk.bf16.gmra.mxu2 %vm334_vm1, %v5432_v24  ;;  %v5879_v45 = vadd.f32 %v5830_v30, %v5741_v8  ;;  %v6652_v30 = vsel %vm516_vm4, %v6650_v7, %v6651_v42  ;;  %v6461_v8 = vshrl.u32 %v12888_v19, 16 }
 0x55b   : > { %v12895_v29 = vadd.f32 %v6000_v59, %v5879_v45  ;;  %v6455_v59 = vor.u32 %v6454_v43, %v6450_v44  ;;  %v10434_v43 = vld [vmem:[%s10600_s29 + $0x64] sm:$0xff]  }
 0x55c   : > { %v5480_v20 = vpop.f32.mrf.mxu2 }
 0x55d   : > { %v5527_v13 = vadd.f32 %v5480_v20, %v12664_v0  ;;  %v6460_v31 = vsel %vm249_vm2, %v6455_v59, %v6459_v61  ;;  %v6467_v20 = vrot.slane %v13996_v2, 1 }
 0x55e   : > { %v5697_v26 = vpop.f32.mrf.mxu3  ;;  %v5835_v15 = vpop.f32.mrf.mxu0 }
 0x55f   : > { %v5742_v52 = vadd.f32 %v5695_v6, %v5527_v13  ;;  %v6653_v6 = vrot.slane %v12914_v5, 1 }
 0x560   : > { %v6008_v62 = vpop.f32.mrf.mxu1 }
 0x561   : > { %v5880_v0 = vadd.f32 %v5833_v35, %v5742_v52  ;;  %v6654_v45 = vsel %vm516_vm4, %v6651_v42, %v6653_v6 }
 0x563   : > { %9782 = vmatmul.msk.bf16.vlgmr.msrb.gmra.mxu1 %vm334_vm1, %v6652_v30  ;;  %9724 = vmatmul.msk.bf16.vlgmr.msrb.gmra.mxu3 %vm334_vm1, %v10059_v23  ;;  %v12907_v34 = vadd.f32 %v6003_v36, %v5880_v0 }
 0x564   : > { %v5482_v51 = vpop.f32.mrf.mxu2 }
 0x565   : > { %v5528_v58 = vadd.f32 %v5482_v51, %v12671_v32 }
 0x566   : > { %v5700_v57 = vpop.f32.mrf.mxu3  ;;  %v5838_v22 = vpop.f32.mrf.mxu0 }
 0x567   : > { %v5743_v40 = vadd.f32 %v5697_v26, %v5528_v58 }
 0x568   : > { %v6010_v1 = vpop.f32.mrf.mxu1 }
 0x569   : > { %9771 = vmatmul.msk.bf16.vlgmr.msrb.gmra.mxu0 %vm334_vm1, %v6460_v31  ;;  %9673 = vmatmul.msk.bf16.vlgmr.msrb.gmra.mxu2 %vm334_vm1, %v6069_v53  ;;  %v5881_v36 = vadd.f32 %v5835_v15, %v5743_v40  ;;  %v10061_v53 = vld [vmem:[%s10600_s29 + $0x74] sm:$0xff] }
 0x56b   : > { %v12918_v35 = vadd.f32 %v6005_v4, %v5881_v36  ;;  %v6463_v4 = vor.u32 %v6461_v8, %v6459_v61 }
 0x56c   : > { %v5485_v32 = vpop.f32.mrf.mxu2 }
 0x56d   : > { %v5529_v33 = vadd.f32 %v5485_v32, %v12685_v60  ;;  %v6468_v23 = vsel %vm249_vm2, %v6463_v4, %v6467_v20 }
 0x56e   : > { %v5702_v46 = vpop.f32.mrf.mxu3  ;;  %v5840_v24 = vpop.f32.mrf.mxu0 }
 0x56f   : > { %v5744_v7 = vadd.f32 %v5700_v57, %v5529_v33  ;;  %v13997_v57 = vshrl.u32 %v12914_v5, 16 }
 0x570   : > { %v6013_v28 = vpop.f32.mrf.mxu1 }
 0x571   : > { %v5882_v60 = vadd.f32 %v5838_v22, %v5744_v7  ;;  %v13992_v22 = vshll.u32 %v12938_v49, 16 }
 0x573   : > { %9783 = vmatmul.msk.bf16.gmra.mxu1 %vm334_vm1, %v6654_v45  ;;  %9725 = vmatmul.msk.bf16.gmra.mxu3 %vm334_vm1, %v10060_v10  ;;  %v12931_v13 = vadd.f32 %v6008_v62, %v5882_v60  ;;  %v6655_v62 = vrot.slane %v12938_v49, 1  ;;  %v6475_v32 = vrot.slane %v13992_v22, 1  ;;  %v10436_v45 = vld [vmem:[%s10600_s29 + $0x6c] sm:$0xff]   ;;  %v12962_v60 = vld [vmem:[%s10600_s29 + $0x84] sm:$0xff] }
 0x574   : > { %v5487_v26 = vpop.f32.mrf.mxu2  ;;  %v7091_v22 = vld [vmem:[%s10600_s29 + $0x6c] sm:$0xc] }
 0x575   : > { %v5530_v15 = vadd.f32 %v5487_v26, %v12692_v18  ;;  %v6656_v40 = vsel %vm516_vm4, %v6653_v6, %v6655_v62 }
 0x576   : > { %v5705_v44 = vpop.f32.mrf.mxu3  ;;  %v5843_v42 = vpop.f32.mrf.mxu0 }
 0x577   : > { %v5745_v52 = vadd.f32 %v5702_v46, %v5530_v15 }
 0x578   : > { %v6015_v30 = vpop.f32.mrf.mxu1 }
 0x579   : > { %9772 = vmatmul.msk.bf16.gmra.mxu0 %vm334_vm1, %v6468_v23  ;;  %9674 = vmatmul.msk.bf16.gmra.mxu2 %vm334_vm1, %v10434_v43  ;;  %v5883_v59 = vadd.f32 %v5840_v24, %v5745_v52  ;;  %v13993_v23 = vshrl.u32 %v12938_v49, 16  ;;  %v13988_v52 = vshll.u32 %v12962_v60, 16 }
 0x57b   : > { %v12942_v61 = vadd.f32 %v6010_v1, %v5883_v59  ;;  %v6471_v1 = vor.u32 %v13997_v57, %v6467_v20  ;;  %v10062_v59 = vld [vmem:[%s10600_s29 + $0x7c] sm:$0xff] }
 0x57c   : > { %v5490_v18 = vpop.f32.mrf.mxu2 }
 0x57d   : > { %v5531_v0 = vadd.f32 %v5490_v18, %v12706_v39  ;;  %v6476_v7 = vsel %vm249_vm2, %v6471_v1, %v6475_v32 }
 0x57e   : > { %v5707_v51 = vpop.f32.mrf.mxu3  ;;  %v5845_v58 = vpop.f32.mrf.mxu0 }
 0x57f   : > { %v5746_v36 = vadd.f32 %v5705_v44, %v5531_v0 }
 0x580   : > { %v6018_v31 = vpop.f32.mrf.mxu1 }
 0x581   : > { %v5884_v39 = vadd.f32 %v5843_v42, %v5746_v36 }
 0x583   : > { %9784 = vmatmul.msk.bf16.gmra.mxu1 %vm334_vm1, %v6656_v40  ;;  %9726 = vmatmul.msk.bf16.gmra.mxu3 %vm334_vm1, %v10061_v53  ;;  %v12955_v33 = vadd.f32 %v6013_v28, %v5884_v39  ;;  %v6657_v28 = vrot.slane %v12962_v60, 1  ;;  %v10438_v39 = vld [vmem:[%s10600_s29 + $0x74] sm:$0xff]  }
 0x584   : > { %v5492_v46 = vpop.f32.mrf.mxu2 }
 0x585   : > { %v5532_v24 = vadd.f32 %v5492_v46, %v12713_v17  ;;  %v6658_v0 = vsel %vm516_vm4, %v6655_v62, %v6657_v28 }
 0x586   : > { %v5710_v10 = vpop.f32.mrf.mxu3  ;;  %v5848_v6 = vpop.f32.mrf.mxu0 }
 0x587   : > { %v5747_v20 = vadd.f32 %v5707_v51, %v5532_v24 }
 0x588   : > { %v6020_v4 = vpop.f32.mrf.mxu1 }
 0x589   : > { %9773 = vmatmul.msk.bf16.gmra.mxu0 %vm334_vm1, %v6476_v7  ;;  %9675 = vmatmul.msk.bf16.gmra.mxu2 %vm334_vm1, %v10436_v45  ;;  %v5885_v26 = vadd.f32 %v5845_v58, %v5747_v20  ;;  %v6483_v58 = vrot.slane %v13988_v52, 1  ;;  %v10447_v52 = vld [vmem:[%s10600_s29 + $0x9c] sm:$0xff]  }
 0x58b   : > { %v12966_v15 = vadd.f32 %v6015_v30, %v5885_v26  ;;  %v6479_v30 = vor.u32 %v13993_v23, %v6475_v32  ;;  %v13131_v23 = vld [vmem:[%s10600_s29 + $0x74] sm:$0xff]  }
 0x58c   : > { %v5495_v17 = vpop.f32.mrf.mxu2 }
 0x58d   : > { %v5533_v44 = vadd.f32 %v5495_v17, %v12727_v14  ;;  %v6484_v46 = vsel %vm249_vm2, %v6479_v30, %v6483_v58  ;;  %v13991_v17 = vshrl.u32 %v12962_v60, 16 }
 0x58e   : > { %v5712_v42 = vpop.f32.mrf.mxu3  ;;  %v5850_v43 = vpop.f32.mrf.mxu0 }
 0x58f   : > { %v5748_v51 = vadd.f32 %v5710_v10, %v5533_v44  ;;  %v12986_v10 = vld [vmem:[%s10600_s29 + $0x8c] sm:$0xff] }
 0x590   : > { %v6023_v18 = vpop.f32.mrf.mxu1  ;;  %v13984_v44 = vshll.u32 %v12986_v10, 16 }
 0x591   : > { %v5886_v14 = vadd.f32 %v5848_v6, %v5748_v51 }
 0x593   : > { %9785 = vmatmul.msk.bf16.gmra.mxu1 %vm334_vm1, %v6658_v0  ;;  %9727 = vmatmul.msk.bf16.gmra.mxu3 %vm334_vm1, %v10062_v59  ;;  %v12979_v53 = vadd.f32 %v6018_v31, %v5886_v14  ;;  %v6659_v31 = vrot.slane %v12986_v10, 1 }
 0x594   : > { %v5497_v40 = vpop.f32.mrf.mxu2 }
 0x595   : > { %v5534_v36 = vadd.f32 %v5497_v40, %v12734_v11  ;;  %v6660_v0 = vsel %vm516_vm4, %v6657_v28, %v6659_v31 }
 0x596   : > { %v5715_v1 = vpop.f32.mrf.mxu3  ;;  %v5853_v62 = vpop.f32.mrf.mxu0 }
 0x597   : > { %v5749_v24 = vadd.f32 %v5712_v42, %v5534_v36  ;;  %v10063_v42 = vld [vmem:[%s10600_s29 + $0x84] sm:$0xff] }
 0x598   : > { %v6025_v32 = vpop.f32.mrf.mxu1 }
 0x599   : > { %9774 = vmatmul.msk.bf16.gmra.mxu0 %vm334_vm1, %v6484_v46  ;;  %9676 = vmatmul.msk.bf16.gmra.mxu2 %vm334_vm1, %v10438_v39  ;;  %v5887_v6 = vadd.f32 %v5850_v43, %v5749_v24  ;;  %v6491_v43 = vrot.slane %v13984_v44, 1  ;;  %v13010_v24 = vld [vmem:[%s10600_s29 + $0x94] sm:$0xff] }
 0x59b   : > { %v12990_v45 = vadd.f32 %v6020_v4, %v5887_v6  ;;  %v6487_v4 = vor.u32 %v13991_v17, %v6483_v58 }
 0x59c   : > { %v5500_v11 = vpop.f32.mrf.mxu2 }
 0x59d   : > { %v5535_v7 = vadd.f32 %v5500_v11, %v12748_v50  ;;  %v6492_v39 = vsel %vm249_vm2, %v6487_v4, %v6491_v43 }
 0x59e   : > { %v5717_v20 = vpop.f32.mrf.mxu3  ;;  %v5855_v26 = vpop.f32.mrf.mxu0 }
 0x59f   : > { %v5750_v51 = vadd.f32 %v5715_v1, %v5535_v7  ;;  %v10440_v1 = vld [vmem:[%s10600_s29 + $0x7c] sm:$0xff]  }
 0x5a0   : > { %v6028_v59 = vpop.f32.mrf.mxu1 }
 0x5a1   : > { %v5888_v50 = vadd.f32 %v5853_v62, %v5750_v51  ;;  %v10064_v51 = vld [vmem:[%s10600_s29 + $0x8c] sm:$0xff] }
 0x5a3   : > { %9786 = vmatmul.msk.bf16.gmra.mxu1 %vm334_vm1, %v6660_v0  ;;  %9728 = vmatmul.msk.bf16.gmra.mxu3 %vm334_vm1, %v10063_v42  ;;  %v13003_v30 = vadd.f32 %v6023_v18, %v5888_v50  ;;  %v6661_v18 = vrot.slane %v13010_v24, 1  ;;  %v13987_v0 = vshrl.u32 %v12986_v10, 16 }
 0x5a4   : > { %v5502_v14 = vpop.f32.mrf.mxu2 }
 0x5a5   : > { %v5536_v40 = vadd.f32 %v5502_v14, %v12755_v16  ;;  %v6662_v50 = vsel %vm516_vm4, %v6659_v31, %v6661_v18 }
 0x5a6   : > { %v5720_v36 = vpop.f32.mrf.mxu3  ;;  %v5858_v28 = vpop.f32.mrf.mxu0 }
 0x5a7   : > { %v5751_v46 = vadd.f32 %v5717_v20, %v5536_v40  ;;  %v13981_v20 = vshll.u32 %v13010_v24, 16 }
 0x5a8   : > { %v6030_v58 = vpop.f32.mrf.mxu1 }
 0x5a9   : > { %9775 = vmatmul.msk.bf16.gmra.mxu0 %vm334_vm1, %v6492_v39  ;;  %9677 = vmatmul.msk.bf16.gmra.mxu2 %vm334_vm1, %v10440_v1  ;;  %v5889_v62 = vadd.f32 %v5855_v26, %v5751_v46  ;;  %v6499_v26 = vrot.slane %v13981_v20, 1 }
 0x5ab   : > { %v13014_v6 = vadd.f32 %v6025_v32, %v5889_v62  ;;  %v6495_v32 = vor.u32 %v13987_v0, %v6491_v43 }
 0x5ac   : > { %v5505_v16 = vpop.f32.mrf.mxu2 }
 0x5ad   : > { %v5537_v11 = vadd.f32 %v5505_v16, %v12769_v48  ;;  %v6500_v62 = vsel %vm249_vm2, %v6495_v32, %v6499_v26  ;;  %v13982_v32 = vshrl.u32 %v13010_v24, 16 }
 0x5ae   : > { %v5722_v7 = vpop.f32.mrf.mxu3  ;;  %v5860_v42 = vpop.f32.mrf.mxu0 }
 0x5af   : > { %v5752_v14 = vadd.f32 %v5720_v36, %v5537_v11  ;;  %v10442_v36 = vld [vmem:[%s10600_s29 + $0x84] sm:$0xff]   ;;  %v13034_v11 = vld [vmem:[%s10600_s29 + $0x9c] sm:$0xff] }
 0x5b0   : > { %v6033_v4 = vpop.f32.mrf.mxu1 }
 0x5b1   : > { %v5890_v48 = vadd.f32 %v5858_v28, %v5752_v14 }
 0x5b3   : > { %9787 = vmatmul.msk.bf16.gmra.mxu1 %vm334_vm1, %v6662_v50  ;;  %9729 = vmatmul.msk.bf16.gmra.mxu3 %vm334_vm1, %v10064_v51  ;;  %v13027_v40 = vadd.f32 %v6028_v59, %v5890_v48  ;;  %v6663_v59 = vrot.slane %v13034_v11, 1 }
 0x5b4   : > { %v5507_v1 = vpop.f32.mrf.mxu2 }
 0x5b5   : > { %v5538_v39 = vadd.f32 %v5507_v1, %v12776_v25  ;;  %v10065_v1 = vld [vmem:[%s10600_s29 + $0x94] sm:$0xff] }
 0x5b6   : > { %v5725_v46 = vpop.f32.mrf.mxu3  ;;  %v5863_v31 = vpop.f32.mrf.mxu0 }
 0x5b7   : > { %v5753_v16 = vadd.f32 %v5722_v7, %v5538_v39  ;;  %v13983_v7 = vshll.u32 %v13034_v11, 16 }
 0x5b8   : > { %v6035_v43 = vpop.f32.mrf.mxu1 }
 0x5b9   : > { %9776 = vmatmul.msk.bf16.gmra.mxu0 %vm334_vm1, %v6500_v62  ;;  %9678 = vmatmul.msk.bf16.gmra.mxu2 %vm334_vm1, %v10442_v36  ;;  %v5891_v28 = vadd.f32 %v5860_v42, %v5753_v16  ;;  %v6664_v62 = vsel %vm516_vm4, %v6661_v18, %v6663_v59  ;;  %v6507_v42 = vrot.slane %v13983_v7, 1  ;;  %v13058_v7 = vld [vmem:[%s10600_s29 + $0xa4] sm:$0xff] }
 0x5bb   : > { %v13038_v51 = vadd.f32 %v6030_v58, %v5891_v28  ;;  %v6503_v58 = vor.u32 %v13982_v32, %v6499_v26 }
 0x5bc   : > { %v5510_v25 = vpop.f32.mrf.mxu2 }
 0x5bd   : > { %v5539_v50 = vadd.f32 %v5510_v25, %v12790_v9 }
 0x5be   : > { %v5727_v14 = vpop.f32.mrf.mxu3  ;;  %v5865_v48 = vpop.f32.mrf.mxu0 }
 0x5bf   : > { %v5754_v36 = vadd.f32 %v5725_v46, %v5539_v50  ;;  %v10444_v46 = vld [vmem:[%s10600_s29 + $0x8c] sm:$0xff]   ;;  %v6508_v50 = vsel %vm249_vm2, %v6503_v58, %v6507_v42  ;;  %v13985_v58 = vshrl.u32 %v13034_v11, 16 }
 0x5c0   : > { %v6038_v39 = vpop.f32.mrf.mxu1 }
 0x5c1   : > { %v5892_v9 = vadd.f32 %v5863_v31, %v5754_v36 }
 0x5c3   : > { %9788 = vmatmul.msk.bf16.gmra.mxu1 %vm334_vm1, %v6664_v62  ;;  %9730 = vmatmul.msk.bf16.gmra.mxu3 %vm334_vm1, %v10065_v1  ;;  %v13051_v16 = vadd.f32 %v6033_v4, %v5892_v9  ;;  %v6665_v4 = vrot.slane %v13058_v7, 1 }
 0x5c4   : > { %v5512_v28 = vpop.f32.mrf.mxu2 }
 0x5c5   : > { %v5540_v25 = vadd.f32 %v5512_v28, %v12797_v56  ;;  %v10066_v28 = vld [vmem:[%s10600_s29 + $0x9c] sm:$0xff] }
 0x5c6   : > { %v5730_v20 = vpop.f32.mrf.mxu3  ;;  %v5868_v18 = vpop.f32.mrf.mxu0 }
 0x5c7   : > { %v5755_v32 = vadd.f32 %v5727_v14, %v5540_v25  ;;  %v13986_v14 = vshll.u32 %v13058_v7, 16 }
 0x5c8   : > { %v6040_v26 = vpop.f32.mrf.mxu1 }
 0x5c9   : > { %9777 = vmatmul.msk.bf16.gmra.mxu0 %vm334_vm1, %v6508_v50  ;;  %9679 = vmatmul.msk.bf16.gmra.mxu2 %vm334_vm1, %v10444_v46  ;;  %v5893_v31 = vadd.f32 %v5865_v48, %v5755_v32  ;;  %v6666_v50 = vsel %vm516_vm4, %v6663_v59, %v6665_v4  ;;  %v6515_v48 = vrot.slane %v13986_v14, 1 }
 0x5cb   : > { %v13062_v1 = vadd.f32 %v6035_v43, %v5893_v31  ;;  %v6511_v43 = vor.u32 %v13985_v58, %v6507_v42 }
 0x5cc   : > { %v5515_v56 = vpop.f32.mrf.mxu2 }
 0x5cd   : > { %v5541_v62 = vadd.f32 %v5515_v56, %v12811_v21 }
 0x5ce   : > { %v5732_v36 = vpop.f32.mrf.mxu3  ;;  %v5870_v9 = vpop.f32.mrf.mxu0 }
 0x5cf   : > { %v5756_v46 = vadd.f32 %v5730_v20, %v5541_v62  ;;  %v10446_v20 = vld [vmem:[%s10600_s29 + $0x94] sm:$0xff]   ;;  %v6516_v62 = vsel %vm249_vm2, %v6511_v43, %v6515_v48  ;;  %v13989_v43 = vshrl.u32 %v13058_v7, 16 }
 0x5d0   : > { %v6043_v25 = vpop.f32.mrf.mxu1 }
 0x5d1   : > { %v5894_v21 = vadd.f32 %v5868_v18, %v5756_v46 }
 0x5d3   : > { %9789 = vmatmul.msk.bf16.gmra.mxu1 %vm334_vm1, %v6666_v50  ;;  %9731 = vmatmul.msk.bf16.gmra.mxu3 %vm334_vm1, %v10066_v28  ;;  %v13075_v32 = vadd.f32 %v6038_v39, %v5894_v21  ;;  %v13082_v50 = vld [vmem:[%s10600_s29 + $0xac] sm:$0xff] }
 0x5d4   : > { %v5517_v31 = vpop.f32.mrf.mxu2  ;;  %v6667_v18 = vrot.slane %v13082_v50, 1 }
 0x5d5   : > { %v5542_v56 = vadd.f32 %v5517_v31, %v12822_v37 }
 0x5d6   : > { %v5735_v44 = vpop.f32.mrf.mxu3  ;;  %v5873_v59 = vpop.f32.mrf.mxu0  ;;  %v6668_v14 = vsel %vm516_vm4, %v6665_v4, %v6667_v18 }
 0x5d7   : > { %v5757_v58 = vadd.f32 %v5732_v36, %v5542_v56  ;;  %v13990_v36 = vshll.u32 %v13082_v50, 16  ;;  %v10067_v56 = vld [vmem:[%s10600_s29 + $0xa4] sm:$0xff] }
 0x5d8   : > { %v6045_v42 = vpop.f32.mrf.mxu1 }
 0x5d9   : > { %9778 = vmatmul.msk.bf16.gmra.mxu0 %vm334_vm1, %v6516_v62  ;;  %9680 = vmatmul.msk.bf16.gmra.mxu2 %vm334_vm1, %v10446_v20  ;;  %v5895_v39 = vadd.f32 %v5870_v9, %v5757_v58  ;;  %v6394_v9 = vld [vmem:[%s10600_s29 + $0xb4] sm:$0x1] }
 0x5db   : > { %v13086_v28 = vadd.f32 %v6040_v26, %v5895_v39  ;;  %v6519_v26 = vor.u32 %v13989_v43, %v6515_v48  ;;  %v6437_v39 = vunpack.c.l.b16 %v6394_v9 }
 0x5dc   : > { %v5520_v37 = vpop.f32.mrf.mxu2 }
 0x5dd   : > { %v5543_v46 = vadd.f32 %v5520_v37, %v12837_v55  ;;  %v6523_v55 = vrot.slane %v13990_v36, 1  ;;  %v6448_v17 = vpack.c.b16 %v6437_v39, %v6437_v39 }
 0x5de   : > { %v5737_v21 = vpop.f32.mrf.mxu3  ;;  %v5875_v31 = vpop.f32.mrf.mxu0 }
 0x5df   : > { %v5758_v20 = vadd.f32 %v5735_v44, %v5543_v46  ;;  %v6524_v48 = vsel %vm249_vm2, %v6519_v26, %v6523_v55 }
 0x5e0   : > { %v6713_v62 = vpop.f32.mrf.mxu1 }
 0x5e1   : > { %v5896_v58 = vadd.f32 %v5873_v59, %v5758_v20  ;;  %v7134_v20 = vunpack.c.l.b16 %v7091_v22 }
 0x5e3   : > { %9790 = vmatmul.msk.bf16.gmra.mxu1 %vm334_vm1, %v6668_v14  ;;  %9732 = vmatmul.msk.bf16.gmra.mxu3 %vm334_vm1, %v10067_v56  ;;  %v13100_v37 = vadd.f32 %v6043_v25, %v5896_v58  ;;  %v13109_v14 = vld [vmem:[%s10600_s29 + $0x70] sm:$0xff]   ;;  %v6669_v25 = vrot.slane %v6448_v17, 1 }
 0x5e4   : > { %v5522_v0 = vpop.f32.mrf.mxu2  ;;  %v13994_v56 = vunpack.c.l.b16 %v13109_v14 }
 0x5e5   : > { %v5544_v44 = vadd.f32 %v5522_v0, %v12855_v3  ;;  %v9836_v3 = vld [vmem:[%s13932_s1 + $0x22] sm:$0x3]  ;;  %v9847_v0 = vld [vmem:[%s13932_s1 + $0x24] sm:$0x3]  ;;  %v6670_v22 = vsel %vm516_vm4, %v6667_v18, %v6669_v25 }
 0x5e6   : > { %v6304_v4 = vpop.f32.mrf.mxu3  ;;  %v6575_v46 = vpop.f32.mrf.mxu0  ;;  %v7741_v9 = vsel %vm365_vm0, %v9847_v0, 0  ;;  %v13135_v0 = vpack.c.b16 %v13994_v56, %v7134_v20  ;;  %v14016_v20 = vshrl.u32 %v13131_v23, 16 }
 0x5e7   : > { %v5759_v36 = vadd.f32 %v5737_v21, %v5544_v44  ;;  %v7571_v21 = vsel %vm365_vm0, %v9836_v3, 0  ;;  %7750 = vmatpush.bf16.msrb.mxu3 %v7741_v9 }
 0x5e8   : > { %v13105_v43 = vpop.f32.mrf.mxu1  ;;  %7580 = vmatpush.bf16.msrb.mxu2 %v7571_v21  ;;  %v7305_v18 = vshrl.u32 %v13135_v0, 16  ;;  %v7308_v25 = vshll.u32 %v13135_v0, 16 }
 0x5e9   : > { %9779 = vmatmul.msk.bf16.gmra.mxu0 %vm334_vm1, %v6524_v48  ;;  %9681 = vmatmul.msk.bf16.gmra.mxu2 %vm334_vm1, %v10447_v52  ;;  %v5897_v59 = vadd.f32 %v5875_v31, %v5759_v36  ;;  %v13995_v31 = vshrl.u32 %v13082_v50, 16  ;;  %v6529_v36 = vshll.u32 %v6448_v17, 16  ;;  %v10068_v48 = vld [vmem:[%s10600_s29 + $0xac] sm:$0xff] }
 0x5ea   : > { %v7307_v2 = vrot.slane %v7305_v18, 2  ;;  %v7310_v57 = vrot.slane %v7308_v25, 3  ;;  %v6959_v18 = vrot.slane %v12888_v19, 2 }
 0x5eb   : > { %v13122_v52 = vadd.f32 %v6045_v42, %v5897_v59  ;;  %v6953_v59 = vld [vmem:[%s10600_s29 + $0x64] sm:$0xc]  ;;  %v6527_v21 = vor.u32 %v13995_v31, %v6523_v55  ;;  %v6531_v9 = vrot.slane %v6529_v36, 1 }
 0x5ec   : > { %v6121_v26 = vpop.f32.mrf.mxu2 }
 0x5ed   : > { %v6171_v58 = vadd.f32 %v6121_v26, %v12872_v27  ;;  %v10216_v27 = vunpack.c.h.b16 %v12803_v63  ;;  %v9858_v63 = vld [vmem:[%s13932_s1 + $0x26] sm:$0x3]  ;;  %v6956_v26 = vunpack.c.l.b16 %v6953_v59  ;;  %v6532_v56 = vsel %vm249_vm2, %v6527_v21, %v6531_v9 }
 0x5ee   : > { %v6306_v39 = vpop.f32.mrf.mxu3  ;;  %v6577_v44 = vpop.f32.mrf.mxu0  ;;  %v7864_v55 = vsel %vm365_vm0, %v9858_v63, 0  ;;  %v7315_v59 = vrot.slane %v14016_v20, 2  ;;  %v6789_v21 = vshrl.u32 %v12881_v38, 16  ;;  %v6792_v9 = vshll.u32 %v12881_v38, 16 }
 0x5ef   : > { %v6354_v42 = vadd.f32 %v6304_v4, %v6171_v58  ;;  %v14015_v4 = vshll.u32 %v13131_v23, 16  ;;  %7873 = vmatpush.bf16.msrb.mxu0 %v7864_v55  ;;  %v6957_v63 = vpack.c.b16 %v6418_v12, %v6956_v26  ;;  %v6796_v26 = vrot.slane %v6461_v8, 1 }
 0x5f0   : > { %v13127_v3 = vpop.f32.mrf.mxu1  ;;  %v6797_v38 = vrot.slane %v6457_v54, 2  ;;  %v7167_v8 = vrot.slane %v13131_v23, 2 }
 0x5f1   : > { %v6625_v17 = vadd.f32 %v6575_v46, %v6354_v42  ;;  %v6078_v42 = vpack.c.b16 %v12820_v41, %v10216_v27  ;;  %v6958_v12 = vrot.slane %v6957_v63, 2 }
 0x5f2   : > { %v6798_v19 = vor.u32 %v6797_v38, %v6796_v26 }
 0x5f3   : > { %9791 = vmatmul.msk.bf16.gmra.mxu1 %vm334_vm1, %v6670_v22  ;;  %9733 = vmatmul.msk.bf16.gmra.mxu3 %vm334_vm1, %v10068_v48  ;;  %v13151_v58 = vadd.f32 %v6713_v62, %v6625_v17  ;;  %v7318_v62 = vrot.slane %v14015_v4, 3 }
 0x5f4   : > { %v6123_v46 = vpop.f32.mrf.mxu2 }
 0x5f5   : > { %v6172_v36 = vadd.f32 %v6123_v46, %v12895_v29  ;;  %v9869_v29 = vld [vmem:[%s13932_s1 + $0x28] sm:$0x3]  ;;  %v7319_v47 = vor.u32 %v7318_v62, %v7315_v59  ;;  %v13181_v59 = vld [vmem:[%s10600_s29 + $0x7c] sm:$0xff]   ;;  %v6960_v62 = vsel %vm828_vm5, %v6958_v12, %v6959_v18 }
 0x5f6   : > { %v6309_v48 = vpop.f32.mrf.mxu3  ;;  %v6580_v22 = vpop.f32.mrf.mxu0  ;;  %v8047_v41 = vsel %vm365_vm0, %v9869_v29, 0  ;;  %v14014_v54 = vshrl.u32 %v13181_v59, 16  ;;  %v14013_v29 = vshll.u32 %v13181_v59, 16 }
 0x5f7   : > { %v6355_v17 = vadd.f32 %v6306_v39, %v6172_v36  ;;  %8056 = vmatpush.bf16.msrb.mxu1 %v8047_v41  ;;  %v7311_v39 = vor.u32 %v7310_v57, %v7307_v2  ;;  %v6791_v36 = vrot.slane %v6789_v21, 1 }
 0x5f8   : > { %v6720_v31 = vpop.f32.mrf.mxu1  ;;  %v7324_v12 = vrot.slane %v14014_v54, 2 }
 0x5f9   : > { %9780 = vmatmul.msk.bf16.gmra.mxu0 %vm334_vm1, %v6532_v56  ;;  %9682 = vmatmul.msk.bf16.gmra.mxu2 %vm334_vm1, %v6078_v42  ;;  %v6626_v27 = vadd.f32 %v6577_v44, %v6355_v17  ;;  %v6794_v42 = vrot.slane %v6792_v9, 2  ;;  %v7320_v57 = vsel %vm1177_vm8, %v7311_v39, %v7319_v47  ;;  %v7166_v17 = vrot.slane %v13135_v0, 2 }
 0x5fb   : > { %v13172_v25 = vadd.f32 %v13105_v43, %v6626_v27  ;;  %v6795_v63 = vor.u32 %v6794_v42, %v6791_v36  ;;  %v7168_v9 = vsel %vm828_vm5, %v7166_v17, %v7167_v8 }
 0x5fc   : > { %v6126_v56 = vpop.f32.mrf.mxu2 }
 0x5fd   : > { %v6173_v55 = vadd.f32 %v6126_v56, %v12907_v34  ;;  %v7327_v56 = vrot.slane %v14013_v29, 3 }
 0x5fe   : > { %v6311_v44 = vpop.f32.mrf.mxu3  ;;  %v6582_v46 = vpop.f32.mrf.mxu0 }
 0x5ff   : > { %v6356_v43 = vadd.f32 %v6309_v48, %v6173_v55  ;;  %v6961_v55 = vrot.slane %v12914_v5, 2 }
 0x600   : > { %v6723_v2 = vpop.f32.mrf.mxu1 }
 0x601   : > { %v6627_v34 = vadd.f32 %v6580_v22, %v6356_v43  ;;  %v6799_v22 = vsel %vm656_vm3, %v6795_v63, %v6798_v19 }
 0x603   : > { %9826 = vmatmul.msk.bf16.vlgmr.msra.gmra.mxu1 %vm334_vm1, %v7320_v57  ;;  %9804 = vmatmul.msk.bf16.vlgmr.msra.gmra.mxu3 %vm334_vm1, %v6960_v62  ;;  %v13191_v41 = vadd.f32 %v13127_v3, %v6627_v34  ;;  %v7328_v3 = vor.u32 %v7327_v56, %v7324_v12  ;;  %v14065_v62 = vshrl.u32 %v12914_v5, 16 }
 0x604   : > { %v6128_v48 = vpop.f32.mrf.mxu2 }
 0x605   : > { %v6174_v27 = vadd.f32 %v6128_v48, %v12918_v35  ;;  %v6800_v17 = vrot.slane %v14065_v62, 1  ;;  %v7329_v48 = vsel %vm1177_vm8, %v7319_v47, %v7328_v3 }
 0x606   : > { %v6314_v0 = vpop.f32.mrf.mxu3  ;;  %v6585_v21 = vpop.f32.mrf.mxu0 }
 0x607   : > { %v6357_v26 = vadd.f32 %v6311_v44, %v6174_v27  ;;  %v14066_v44 = vshll.u32 %v12914_v5, 16 }
 0x608   : > { %v6725_v39 = vpop.f32.mrf.mxu1 }
 0x609   : > { %9815 = vmatmul.msk.bf16.vlgmr.msra.gmra.mxu0 %vm334_vm1, %v7168_v9  ;;  %9793 = vmatmul.msk.bf16.vlgmr.msra.gmra.mxu2 %vm334_vm1, %v6799_v22  ;;  %v6628_v35 = vadd.f32 %v6582_v46, %v6357_v26  ;;  %v6801_v34 = vrot.slane %v14066_v44, 2  ;;  %v13212_v46 = vld [vmem:[%s10600_s29 + $0x84] sm:$0xff]   ;;  %v7169_v9 = vrot.slane %v13181_v59, 2  ;;  %v6963_v44 = vrot.slane %v12938_v49, 2 }
 0x60a   : > { %v14012_v12 = vshrl.u32 %v13212_v46, 16  ;;  %v14010_v5 = vshll.u32 %v13212_v46, 16 }
 0x60b   : > { %v13203_v36 = vadd.f32 %v6720_v31, %v6628_v35  ;;  %v6962_v31 = vsel %vm828_vm5, %v6959_v18, %v6961_v55  ;;  %v6802_v22 = vor.u32 %v6801_v34, %v6800_v17  ;;  %v7170_v18 = vsel %vm828_vm5, %v7167_v8, %v7169_v9 }
 0x60c   : > { %v6131_v42 = vpop.f32.mrf.mxu2  ;;  %v7336_v62 = vrot.slane %v14010_v5, 3 }
 0x60d   : > { %v6175_v38 = vadd.f32 %v6131_v42, %v12931_v13  ;;  %v6803_v42 = vsel %vm656_vm3, %v6798_v19, %v6802_v22 }
 0x60e   : > { %v6316_v57 = vpop.f32.mrf.mxu3  ;;  %v6587_v43 = vpop.f32.mrf.mxu0 }
 0x60f   : > { %v6358_v27 = vadd.f32 %v6314_v0, %v6175_v38 }
 0x610   : > { %v6728_v63 = vpop.f32.mrf.mxu1 }
 0x611   : > { %v6629_v13 = vadd.f32 %v6585_v21, %v6358_v27  ;;  %v7333_v21 = vrot.slane %v14012_v12, 2 }
 0x613   : > { %9827 = vmatmul.msk.bf16.gmra.mxu1 %vm334_vm1, %v7329_v48  ;;  %9805 = vmatmul.msk.bf16.gmra.mxu3 %vm334_vm1, %v6962_v31  ;;  %v13220_v56 = vadd.f32 %v6723_v2, %v6629_v13  ;;  %v7337_v2 = vor.u32 %v7336_v62, %v7333_v21  ;;  %v14067_v31 = vshrl.u32 %v12938_v49, 16  ;;  %v7171_v21 = vrot.slane %v13212_v46, 2 }
 0x614   : > { %v6133_v47 = vpop.f32.mrf.mxu2 }
 0x615   : > { %v6176_v26 = vadd.f32 %v6133_v47, %v12942_v61  ;;  %v6804_v13 = vrot.slane %v14067_v31, 1 }
 0x616   : > { %v6319_v0 = vpop.f32.mrf.mxu3  ;;  %v6590_v35 = vpop.f32.mrf.mxu0 }
 0x617   : > { %v6359_v17 = vadd.f32 %v6316_v57, %v6176_v26  ;;  %v14068_v57 = vshll.u32 %v12938_v49, 16 }
 0x618   : > { %v6730_v38 = vpop.f32.mrf.mxu1 }
 0x619   : > { %9816 = vmatmul.msk.bf16.gmra.mxu0 %vm334_vm1, %v7170_v18  ;;  %9794 = vmatmul.msk.bf16.gmra.mxu2 %vm334_vm1, %v6803_v42  ;;  %v6630_v61 = vadd.f32 %v6587_v43, %v6359_v17  ;;  %v6805_v47 = vrot.slane %v14068_v57, 2  ;;  %v7338_v18 = vsel %vm1177_vm8, %v7328_v3, %v7337_v2  ;;  %v13241_v43 = vld [vmem:[%s10600_s29 + $0x8c] sm:$0xff]  }
 0x61a   : > { %v14007_v17 = vshrl.u32 %v13241_v43, 16  ;;  %v13998_v49 = vshll.u32 %v13241_v43, 16 }
 0x61b   : > { %v13232_v8 = vadd.f32 %v6725_v39, %v6630_v61  ;;  %v6964_v39 = vsel %vm828_vm5, %v6961_v55, %v6963_v44  ;;  %v6806_v62 = vor.u32 %v6805_v47, %v6804_v13  ;;  %v7172_v55 = vsel %vm828_vm5, %v7169_v9, %v7171_v21 }
 0x61c   : > { %v6136_v19 = vpop.f32.mrf.mxu2  ;;  %v7345_v13 = vrot.slane %v13998_v49, 3 }
 0x61d   : > { %v6177_v34 = vadd.f32 %v6136_v19, %v12955_v33  ;;  %v6807_v31 = vsel %vm656_vm3, %v6802_v22, %v6806_v62 }
 0x61e   : > { %v6321_v48 = vpop.f32.mrf.mxu3  ;;  %v6592_v27 = vpop.f32.mrf.mxu0 }
 0x61f   : > { %v6360_v42 = vadd.f32 %v6319_v0, %v6177_v34 }
 0x620   : > { %v6733_v26 = vpop.f32.mrf.mxu1 }
 0x621   : > { %v6631_v33 = vadd.f32 %v6590_v35, %v6360_v42  ;;  %v7342_v35 = vrot.slane %v14007_v17, 2  ;;  %v14077_v17 = vshrl.u32 %v13058_v7, 16 }
 0x623   : > { %9828 = vmatmul.msk.bf16.gmra.mxu1 %vm334_vm1, %v7338_v18  ;;  %9806 = vmatmul.msk.bf16.gmra.mxu3 %vm334_vm1, %v6964_v39  ;;  %v13249_v61 = vadd.f32 %v6728_v63, %v6631_v33  ;;  %v7346_v63 = vor.u32 %v7345_v13, %v7342_v35  ;;  %v6965_v18 = vrot.slane %v12962_v60, 2  ;;  %v7173_v13 = vrot.slane %v13241_v43, 2 }
 0x624   : > { %v6138_v3 = vpop.f32.mrf.mxu2 }
 0x625   : > { %v6178_v19 = vadd.f32 %v6138_v3, %v12966_v15  ;;  %v14069_v3 = vshrl.u32 %v12962_v60, 16 }
 0x626   : > { %v6324_v0 = vpop.f32.mrf.mxu3  ;;  %v6595_v34 = vpop.f32.mrf.mxu0 }
 0x627   : > { %v6361_v47 = vadd.f32 %v6321_v48, %v6178_v19  ;;  %v6808_v49 = vrot.slane %v14069_v3, 1  ;;  %v14070_v48 = vshll.u32 %v12962_v60, 16 }
 0x628   : > { %v6735_v57 = vpop.f32.mrf.mxu1 }
 0x629   : > { %9817 = vmatmul.msk.bf16.gmra.mxu0 %vm334_vm1, %v7172_v55  ;;  %9795 = vmatmul.msk.bf16.gmra.mxu2 %vm334_vm1, %v6807_v31  ;;  %v6632_v15 = vadd.f32 %v6592_v27, %v6361_v47  ;;  %v6809_v19 = vrot.slane %v14070_v48, 2  ;;  %v7347_v31 = vsel %vm1177_vm8, %v7337_v2, %v7346_v63  ;;  %v13270_v27 = vld [vmem:[%s10600_s29 + $0x94] sm:$0xff]  }
 0x62a   : > { %v14000_v60 = vshll.u32 %v13270_v27, 16 }
 0x62b   : > { %v13261_v9 = vadd.f32 %v6730_v38, %v6632_v15  ;;  %v6966_v38 = vsel %vm828_vm5, %v6963_v44, %v6965_v18  ;;  %v6810_v47 = vor.u32 %v6809_v19, %v6808_v49  ;;  %v13999_v15 = vshrl.u32 %v13270_v27, 16 }
 0x62c   : > { %v6141_v22 = vpop.f32.mrf.mxu2  ;;  %v7174_v44 = vsel %vm828_vm5, %v7171_v21, %v7173_v13  ;;  %v7354_v49 = vrot.slane %v14000_v60, 3 }
 0x62d   : > { %v6179_v42 = vadd.f32 %v6141_v22, %v12979_v53  ;;  %v6811_v48 = vsel %vm656_vm3, %v6806_v62, %v6810_v47 }
 0x62e   : > { %v6326_v39 = vpop.f32.mrf.mxu3  ;;  %v6597_v33 = vpop.f32.mrf.mxu0 }
 0x62f   : > { %v6362_v35 = vadd.f32 %v6324_v0, %v6179_v42 }
 0x630   : > { %v6738_v55 = vpop.f32.mrf.mxu1 }
 0x631   : > { %v6633_v53 = vadd.f32 %v6595_v34, %v6362_v35  ;;  %v7351_v34 = vrot.slane %v13999_v15, 2  ;;  %v6967_v35 = vrot.slane %v12986_v10, 2  ;;  %v14071_v15 = vshrl.u32 %v12986_v10, 16 }
 0x633   : > { %9829 = vmatmul.msk.bf16.gmra.mxu1 %vm334_vm1, %v7347_v31  ;;  %9807 = vmatmul.msk.bf16.gmra.mxu3 %vm334_vm1, %v6966_v38  ;;  %v13278_v22 = vadd.f32 %v6733_v26, %v6633_v53  ;;  %v7355_v26 = vor.u32 %v7354_v49, %v7351_v34  ;;  %v6812_v60 = vrot.slane %v14071_v15, 1  ;;  %v7175_v49 = vrot.slane %v13270_v27, 2 }
 0x634   : > { %v6143_v2 = vpop.f32.mrf.mxu2 }
 0x635   : > { %v6180_v3 = vadd.f32 %v6143_v2, %v12990_v45 }
 0x636   : > { %v6329_v0 = vpop.f32.mrf.mxu3  ;;  %v6600_v42 = vpop.f32.mrf.mxu0 }
 0x637   : > { %v6363_v19 = vadd.f32 %v6326_v39, %v6180_v3  ;;  %v14072_v39 = vshll.u32 %v12986_v10, 16 }
 0x638   : > { %v6740_v31 = vpop.f32.mrf.mxu1 }
 0x639   : > { %9818 = vmatmul.msk.bf16.gmra.mxu0 %vm334_vm1, %v7174_v44  ;;  %9796 = vmatmul.msk.bf16.gmra.mxu2 %vm334_vm1, %v6811_v48  ;;  %v6634_v45 = vadd.f32 %v6597_v33, %v6363_v19  ;;  %v6813_v3 = vrot.slane %v14072_v39, 2  ;;  %v7356_v48 = vsel %vm1177_vm8, %v7346_v63, %v7355_v26  ;;  %v13299_v33 = vld [vmem:[%s10600_s29 + $0x9c] sm:$0xff]  }
 0x63a   : > { %v14001_v15 = vshrl.u32 %v13299_v33, 16  ;;  %v14002_v10 = vshll.u32 %v13299_v33, 16 }
 0x63b   : > { %v13290_v21 = vadd.f32 %v6735_v57, %v6634_v45  ;;  %v6968_v57 = vsel %vm828_vm5, %v6965_v18, %v6967_v35  ;;  %v6814_v19 = vor.u32 %v6813_v3, %v6812_v60  ;;  %v7176_v18 = vsel %vm828_vm5, %v7173_v13, %v7175_v49 }
 0x63c   : > { %v6146_v62 = vpop.f32.mrf.mxu2  ;;  %v7363_v60 = vrot.slane %v14002_v10, 3 }
 0x63d   : > { %v6181_v38 = vadd.f32 %v6146_v62, %v13003_v30  ;;  %v6815_v39 = vsel %vm656_vm3, %v6810_v47, %v6814_v19 }
 0x63e   : > { %v6331_v53 = vpop.f32.mrf.mxu3  ;;  %v6602_v2 = vpop.f32.mrf.mxu0 }
 0x63f   : > { %v6364_v34 = vadd.f32 %v6329_v0, %v6181_v38 }
 0x640   : > { %v6743_v44 = vpop.f32.mrf.mxu1 }
 0x641   : > { %v6635_v30 = vadd.f32 %v6600_v42, %v6364_v34  ;;  %v7360_v42 = vrot.slane %v14001_v15, 2  ;;  %v6969_v34 = vrot.slane %v13010_v24, 2  ;;  %v14073_v15 = vshrl.u32 %v13010_v24, 16 }
 0x643   : > { %9830 = vmatmul.msk.bf16.gmra.mxu1 %vm334_vm1, %v7356_v48  ;;  %9808 = vmatmul.msk.bf16.gmra.mxu3 %vm334_vm1, %v6968_v57  ;;  %v13307_v45 = vadd.f32 %v6738_v55, %v6635_v30  ;;  %v7364_v55 = vor.u32 %v7363_v60, %v7360_v42  ;;  %v6816_v10 = vrot.slane %v14073_v15, 1  ;;  %v7177_v60 = vrot.slane %v13299_v33, 2 }
 0x644   : > { %v6148_v63 = vpop.f32.mrf.mxu2 }
 0x645   : > { %v6182_v62 = vadd.f32 %v6148_v63, %v13014_v6 }
 0x646   : > { %v6334_v0 = vpop.f32.mrf.mxu3  ;;  %v6605_v38 = vpop.f32.mrf.mxu0 }
 0x647   : > { %v6365_v3 = vadd.f32 %v6331_v53, %v6182_v62  ;;  %v14074_v53 = vshll.u32 %v13010_v24, 16 }
 0x648   : > { %v6745_v48 = vpop.f32.mrf.mxu1 }
 0x649   : > { %9819 = vmatmul.msk.bf16.gmra.mxu0 %vm334_vm1, %v7176_v18  ;;  %9797 = vmatmul.msk.bf16.gmra.mxu2 %vm334_vm1, %v6815_v39  ;;  %v6636_v6 = vadd.f32 %v6602_v2, %v6365_v3  ;;  %v6817_v62 = vrot.slane %v14074_v53, 2  ;;  %v7365_v39 = vsel %vm1177_vm8, %v7355_v26, %v7364_v55  ;;  %v13328_v2 = vld [vmem:[%s10600_s29 + $0xa4] sm:$0xff]  }
 0x64a   : > { %v14003_v15 = vshrl.u32 %v13328_v2, 16  ;;  %v14004_v24 = vshll.u32 %v13328_v2, 16 }
 0x64b   : > { %v13319_v13 = vadd.f32 %v6740_v31, %v6636_v6  ;;  %v6970_v31 = vsel %vm828_vm5, %v6967_v35, %v6969_v34  ;;  %v6818_v3 = vor.u32 %v6817_v62, %v6816_v10  ;;  %v7178_v35 = vsel %vm828_vm5, %v7175_v49, %v7177_v60 }
 0x64c   : > { %v6151_v47 = vpop.f32.mrf.mxu2  ;;  %v7372_v10 = vrot.slane %v14004_v24, 3 }
 0x64d   : > { %v6183_v57 = vadd.f32 %v6151_v47, %v13027_v40  ;;  %v6819_v53 = vsel %vm656_vm3, %v6814_v19, %v6818_v3 }
 0x64e   : > { %v6336_v30 = vpop.f32.mrf.mxu3  ;;  %v6607_v63 = vpop.f32.mrf.mxu0 }
 0x64f   : > { %v6366_v42 = vadd.f32 %v6334_v0, %v6183_v57 }
 0x650   : > { %v6748_v18 = vpop.f32.mrf.mxu1 }
 0x651   : > { %v6637_v40 = vadd.f32 %v6605_v38, %v6366_v42  ;;  %v7369_v38 = vrot.slane %v14003_v15, 2  ;;  %v6971_v42 = vrot.slane %v13034_v11, 2  ;;  %v14075_v15 = vshrl.u32 %v13034_v11, 16 }
 0x653   : > { %9831 = vmatmul.msk.bf16.gmra.mxu1 %vm334_vm1, %v7365_v39  ;;  %9809 = vmatmul.msk.bf16.gmra.mxu3 %vm334_vm1, %v6970_v31  ;;  %v13336_v6 = vadd.f32 %v6743_v44, %v6637_v40  ;;  %v7373_v44 = vor.u32 %v7372_v10, %v7369_v38  ;;  %v6820_v24 = vrot.slane %v14075_v15, 1  ;;  %v7179_v10 = vrot.slane %v13328_v2, 2 }
 0x654   : > { %v6153_v26 = vpop.f32.mrf.mxu2 }
 0x655   : > { %v6184_v47 = vadd.f32 %v6153_v26, %v13038_v51 }
 0x656   : > { %v6339_v0 = vpop.f32.mrf.mxu3  ;;  %v6610_v57 = vpop.f32.mrf.mxu0 }
 0x657   : > { %v6367_v62 = vadd.f32 %v6336_v30, %v6184_v47  ;;  %v14076_v30 = vshll.u32 %v13034_v11, 16 }
 0x658   : > { %v6750_v39 = vpop.f32.mrf.mxu1 }
 0x659   : > { %9820 = vmatmul.msk.bf16.gmra.mxu0 %vm334_vm1, %v7178_v35  ;;  %9798 = vmatmul.msk.bf16.gmra.mxu2 %vm334_vm1, %v6819_v53  ;;  %v6638_v51 = vadd.f32 %v6607_v63, %v6367_v62  ;;  %v6821_v47 = vrot.slane %v14076_v30, 2  ;;  %v7374_v53 = vsel %vm1177_vm8, %v7364_v55, %v7373_v44  ;;  %v13357_v63 = vld [vmem:[%s10600_s29 + $0xac] sm:$0xff]  }
 0x65a   : > { %v14006_v11 = vshrl.u32 %v13357_v63, 16  ;;  %v14005_v62 = vshll.u32 %v13357_v63, 16 }
 0x65b   : > { %v13348_v49 = vadd.f32 %v6745_v48, %v6638_v51  ;;  %v6972_v48 = vsel %vm828_vm5, %v6969_v34, %v6971_v42  ;;  %v6822_v15 = vor.u32 %v6821_v47, %v6820_v24 }
 0x65c   : > { %v6156_v19 = vpop.f32.mrf.mxu2  ;;  %v7381_v24 = vrot.slane %v14005_v62, 3 }
 0x65d   : > { %v6185_v31 = vadd.f32 %v6156_v19, %v13051_v16 }
 0x65e   : > { %v6341_v40 = vpop.f32.mrf.mxu3  ;;  %v6612_v26 = vpop.f32.mrf.mxu0 }
 0x65f   : > { %v6368_v38 = vadd.f32 %v6339_v0, %v6185_v31  ;;  %v7180_v31 = vsel %vm828_vm5, %v7177_v60, %v7179_v10 }
 0x660   : > { %v6753_v35 = vpop.f32.mrf.mxu1 }
 0x661   : > { %v6639_v16 = vadd.f32 %v6610_v57, %v6368_v38  ;;  %v6823_v57 = vsel %vm656_vm3, %v6818_v3, %v6822_v15  ;;  %v13375_v38 = vld [vmem:[%s10600_s29 + $0xb0] sm:$0xff]  }
 0x662   : > { %v10252_v3 = vunpack.c.h.b16 %v13375_v38 }
 0x663   : > { %9832 = vmatmul.msk.bf16.gmra.mxu1 %vm334_vm1, %v7374_v53  ;;  %9810 = vmatmul.msk.bf16.gmra.mxu3 %vm334_vm1, %v6972_v48  ;;  %v13365_v55 = vadd.f32 %v6748_v18, %v6639_v16  ;;  %v7378_v53 = vrot.slane %v14006_v11, 2  ;;  %v13378_v18 = vld [vmem:[%s10600_s29 + $0xb8] sm:$0xf]  ;;  %v6973_v16 = vrot.slane %v13058_v7, 2 }
 0x664   : > { %v6158_v51 = vpop.f32.mrf.mxu2  ;;  %v14008_v48 = vunpack.c.l.b16 %v13378_v18 }
 0x665   : > { %v6186_v0 = vadd.f32 %v6158_v51, %v13062_v1  ;;  %v7382_v60 = vor.u32 %v7381_v24, %v7378_v53 }
 0x666   : > { %v6344_v34 = vpop.f32.mrf.mxu3  ;;  %v6615_v19 = vpop.f32.mrf.mxu0 }
 0x667   : > { %v6369_v47 = vadd.f32 %v6341_v40, %v6186_v0  ;;  %v7383_v24 = vsel %vm1177_vm8, %v7373_v44, %v7382_v60 }
 0x668   : > { %v6755_v30 = vpop.f32.mrf.mxu1 }
 0x669   : > { %9821 = vmatmul.msk.bf16.gmra.mxu0 %vm334_vm1, %v7180_v31  ;;  %9799 = vmatmul.msk.bf16.gmra.mxu2 %vm334_vm1, %v6823_v57  ;;  %v6640_v1 = vadd.f32 %v6612_v26, %v6369_v47  ;;  %v6824_v31 = vrot.slane %v14077_v17, 1  ;;  %v14078_v57 = vshll.u32 %v13058_v7, 16  ;;  %v13395_v47 = vpack.c.b16 %v14008_v48, %v10252_v3 }
 0x66b   : > { %v13385_v51 = vadd.f32 %v6750_v39, %v6640_v1  ;;  %v6825_v26 = vrot.slane %v14078_v57, 2  ;;  %v6974_v1 = vsel %vm828_vm5, %v6971_v42, %v6973_v16  ;;  %v14009_v17 = vshrl.u32 %v13395_v47, 16 }
 0x66c   : > { %v6161_v62 = vpop.f32.mrf.mxu2  ;;  %v14011_v44 = vshll.u32 %v13395_v47, 16 }
 0x66d   : > { %v6187_v40 = vadd.f32 %v6161_v62, %v13075_v32  ;;  %v7181_v32 = vrot.slane %v13357_v63, 2  ;;  %v6826_v7 = vor.u32 %v6825_v26, %v6824_v31 }
 0x66e   : > { %v6346_v0 = vpop.f32.mrf.mxu3  ;;  %v6617_v11 = vpop.f32.mrf.mxu0  ;;  %v7390_v31 = vrot.slane %v14011_v44, 3 }
 0x66f   : > { %v6370_v39 = vadd.f32 %v6344_v34, %v6187_v40  ;;  %v7182_v48 = vsel %vm828_vm5, %v7179_v10, %v7181_v32 }
 0x670   : > { %v6758_v53 = vpop.f32.mrf.mxu1 }
 0x671   : > { %v6641_v62 = vadd.f32 %v6615_v19, %v6370_v39  ;;  %v7387_v39 = vrot.slane %v14009_v17, 2 }
 0x673   : > { %9833 = vmatmul.msk.bf16.gmra.mxu1 %vm334_vm1, %v7383_v24  ;;  %9811 = vmatmul.msk.bf16.gmra.mxu3 %vm334_vm1, %v6974_v1  ;;  %v13403_v57 = vadd.f32 %v6753_v35, %v6641_v62  ;;  %v6827_v24 = vsel %vm656_vm3, %v6822_v15, %v6826_v7  ;;  %v7299_v1 = vld [vmem:[%s10600_s29 + $0xbc] sm:$0x7]  ;;  %v13415_v35 = vor.u32 %v7390_v31, %v7387_v39  ;;  %v14018_v15 = vrot.slane %v13082_v50, 2 }
 0x674   : > { %v6163_v3 = vpop.f32.mrf.mxu2  ;;  %v7302_v10 = vunpack.c.l.b16 %v7299_v1  ;;  %v14017_v1 = vrot.slane %v13395_v47, 2 }
 0x675   : > { %v6188_v34 = vadd.f32 %v6163_v3, %v13086_v28  ;;  %v7392_v39 = vsel %vm1177_vm8, %v7382_v60, %v13415_v35 }
 0x676   : > { %v6349_v40 = vpop.f32.mrf.mxu3  ;;  %v6620_v42 = vpop.f32.mrf.mxu0  ;;  %v13429_v31 = vpack.c.b16 %v7302_v10, %v7302_v10 }
 0x677   : > { %v6371_v26 = vadd.f32 %v6346_v0, %v6188_v34  ;;  %v14079_v0 = vshrl.u32 %v13082_v50, 16 }
 0x678   : > { %v6760_v19 = vpop.f32.mrf.mxu1  ;;  %v7394_v60 = vshrl.u32 %v13429_v31, 16  ;;  %v7397_v10 = vshll.u32 %v13429_v31, 16 }
 0x679   : > { %9822 = vmatmul.msk.bf16.gmra.mxu0 %vm334_vm1, %v7182_v48  ;;  %9800 = vmatmul.msk.bf16.gmra.mxu2 %vm334_vm1, %v6827_v24  ;;  %v6642_v28 = vadd.f32 %v6617_v11, %v6371_v26  ;;  %v6828_v34 = vrot.slane %v14079_v0, 1  ;;  %v14080_v48 = vshll.u32 %v13082_v50, 16  ;;  %v6783_v26 = vld [vmem:[%s10600_s29 + $0xb4] sm:$0x3] }
 0x67b   : > { %v13418_v62 = vadd.f32 %v6755_v30, %v6642_v28  ;;  %v6829_v24 = vrot.slane %v14080_v48, 2 }
 0x67c   : > { %v6166_v3 = vpop.f32.mrf.mxu2 }
 0x67d   : > { %v6189_v17 = vadd.f32 %v6166_v3, %v13100_v37  ;;  %v6976_v37 = vsel %vm828_vm5, %v6973_v16, %v14018_v15  ;;  %v13438_v3 = vor.u32 %v6829_v24, %v6828_v34 }
 0x67e   : > { %v6351_v5 = vpop.f32.mrf.mxu3  ;;  %v6622_v44 = vpop.f32.mrf.mxu0 }
 0x67f   : > { %v6372_v30 = vadd.f32 %v6349_v40, %v6189_v17  ;;  %v6786_v17 = vunpack.c.l.b16 %v6783_v26  ;;  %v6831_v34 = vsel %vm656_vm3, %v6826_v7, %v13438_v3  ;;  %v9967_v7 = vld [vmem:[%s13932_s1 + $0x2c] sm:$0x3] }
 0x680   : > { %v13425_v11 = vpop.f32.mrf.mxu1 }
 0x681   : > { %v6643_v28 = vadd.f32 %v6620_v42, %v6372_v30  ;;  %v7184_v42 = vsel %vm828_vm5, %v7181_v32, %v14017_v1  ;;  %v7396_v30 = vrot.slane %v7394_v60, 2  ;;  %v9920_v32 = vld [vmem:[%s13932_s1 + $0x2a] sm:$0x3] }
 0x683   : > { %9834 = vmatmul.msk.bf16.gmra.mxu1 %vm334_vm1, %v7392_v39  ;;  %9812 = vmatmul.msk.bf16.gmra.mxu3 %vm334_vm1, %v6976_v37  ;;  %v13442_v40 = vadd.f32 %v6758_v53, %v6643_v28  ;;  %v7111_v39 = vld [vmem:[%s10600_s29 + $0xbc] sm:$0x3]  ;;  %v7399_v37 = vrot.slane %v7397_v10, 3  ;;  %v6787_v53 = vpack.c.b16 %v6786_v17, %v6786_v17  ;;  %v7514_v28 = vld [vmem:[%s10600_s29 + $0x6c] sm:$0x8]  ;;  %v8456_v17 = vsel %vm365_vm0, %v9967_v7, 0 }
 0x684   : > { %v6168_v16 = vpop.f32.mrf.mxu2  ;;  %8465 = vmatpush.bf16.msra.mxu3 %v8456_v17 }
 0x685   : > { %v6190_v0 = vadd.f32 %v6168_v16, %v13122_v52  ;;  %v6833_v52 = vshrl.u32 %v6787_v53, 16  ;;  %v7154_v16 = vunpack.c.l.b16 %v7111_v39  ;;  %v6836_v60 = vshll.u32 %v6787_v53, 16 }
 0x686   : > { %v7021_v48 = vpop.f32.mrf.mxu3  ;;  %v7229_v12 = vpop.f32.mrf.mxu0  ;;  %v7400_v10 = vor.u32 %v7399_v37, %v7396_v30 }
 0x687   : > { %v6373_v26 = vadd.f32 %v6351_v5, %v6190_v0  ;;  %v8318_v5 = vsel %vm365_vm0, %v9920_v32, 0  ;;  %v6977_v0 = vrot.slane %v6787_v53, 2  ;;  %v7165_v1 = vpack.c.b16 %v7154_v16, %v7154_v16  ;;  %v9978_v16 = vld [vmem:[%s13932_s1 + $0x2e] sm:$0x3] }
 0x688   : > { %v13450_v24 = vpop.f32.mrf.mxu1  ;;  %8327 = vmatpush.bf16.msra.mxu2 %v8318_v5  ;;  %v6835_v15 = vrot.slane %v6833_v52, 1  ;;  %v7401_v30 = vsel %vm1177_vm8, %v13415_v35, %v7400_v10  ;;  %v14081_v53 = vrot.slane %v13082_v50, 2  ;;  %v8626_v50 = vsel %vm365_vm0, %v9978_v16, 0 }
 0x689   : > { %9823 = vmatmul.msk.bf16.gmra.mxu0 %vm334_vm1, %v7184_v42  ;;  %9801 = vmatmul.msk.bf16.gmra.mxu2 %vm334_vm1, %v6831_v34  ;;  %v6644_v29 = vadd.f32 %v6622_v44, %v6373_v26  ;;  %v7517_v42 = vunpack.c.l.b16 %v7514_v28  ;;  %v6838_v44 = vrot.slane %v6836_v60, 2  ;;  %v7185_v32 = vrot.slane %v7165_v1, 2 }
 0x68a   : > { %v6978_v28 = vsel %vm828_vm5, %v14081_v53, %v6977_v0  ;;  %8635 = vmatpush.bf16.msra.mxu0 %v8626_v50  ;;  %v14083_v10 = vrot.slane %v13395_v47, 2  ;;  %v14084_v0 = vshrl.u32 %v13131_v23, 16 }
 0x68b   : > { %v13464_v34 = vadd.f32 %v6760_v19, %v6644_v29  ;;  %v14082_v29 = vunpack.c.l.b16 %v13109_v14  ;;  %v6839_v52 = vor.u32 %v6838_v44, %v6835_v15 }
 0x68c   : > { %v6883_v39 = vpop.f32.mrf.mxu2  ;;  %v7186_v15 = vsel %vm828_vm5, %v14083_v10, %v7185_v32  ;;  %v7520_v10 = vrot.slane %v13131_v23, 3 }
 0x68d   : > { %v6933_v54 = vadd.f32 %v6883_v39, %v13151_v58  ;;  %v7518_v19 = vpack.c.b16 %v14082_v29, %v7517_v42  ;;  %v6840_v5 = vsel %vm656_vm3, %v13438_v3, %v6839_v52  ;;  %v7665_v42 = vrot.slane %v14084_v0, 3 }
 0x68e   : > { %v7023_v4 = vpop.f32.mrf.mxu3  ;;  %v7231_v20 = vpop.f32.mrf.mxu0 }
 0x68f   : > { %v7071_v37 = vadd.f32 %v7021_v48, %v6933_v54  ;;  %v7658_v35 = vshrl.u32 %v7518_v19, 16  ;;  %v7661_v54 = vshll.u32 %v7518_v19, 16 }
 0x690   : > { %v7449_v26 = vpop.f32.mrf.mxu1 }
 0x691   : > { %v7279_v58 = vadd.f32 %v7229_v12, %v7071_v37  ;;  %v7663_v44 = vrot.slane %v7661_v54, 4  ;;  %v9989_v37 = vld [vmem:[%s13932_s1 + $0x30] sm:$0x3] }
 0x692   : > { %v8764_v53 = vsel %vm365_vm0, %v9989_v37, 0 }
 0x693   : > { %9835 = vmatmul.msk.bf16.gmra.mxu1 %vm334_vm1, %v7401_v30  ;;  %9813 = vmatmul.msk.bf16.gmra.mxu3 %vm334_vm1, %v6978_v28  ;;  %v13481_v48 = vadd.f32 %v13425_v11, %v7279_v58  ;;  %v7660_v11 = vrot.slane %v7658_v35, 3  ;;  %v14085_v30 = vshll.u32 %v13131_v23, 16  ;;  %v10078_v35 = vld [vmem:[%s10600_s29 + $0x78] sm:$0xff] }
 0x694   : > { %v6885_v7 = vpop.f32.mrf.mxu2  ;;  %8773 = vmatpush.bf16.msra.mxu1 %v8764_v53 }
 0x695   : > { %v6934_v1 = vadd.f32 %v6885_v7, %v13172_v25  ;;  %v7666_v25 = vrot.slane %v14085_v30, 4  ;;  %v7664_v28 = vor.u32 %v7663_v44, %v7660_v11  ;;  %v14086_v11 = vshrl.u32 %v13181_v59, 16 }
 0x696   : > { %v7026_v60 = vpop.f32.mrf.mxu3  ;;  %v7234_v12 = vpop.f32.mrf.mxu0  ;;  %v14087_v44 = vshll.u32 %v13181_v59, 16 }
 0x697   : > { %v7072_v39 = vadd.f32 %v7023_v4, %v6934_v1  ;;  %v7667_v4 = vor.u32 %v7666_v25, %v7665_v42 }
 0x698   : > { %v7451_v17 = vpop.f32.mrf.mxu1 }
 0x699   : > { %9824 = vmatmul.msk.bf16.gmra.mxu0 %vm334_vm1, %v7186_v15  ;;  %9802 = vmatmul.msk.bf16.gmra.mxu2 %vm334_vm1, %v6840_v5  ;;  %v7280_v3 = vadd.f32 %v7231_v20, %v7072_v39  ;;  %v7668_v7 = vsel %vm1534_vm7, %v7664_v28, %v7667_v4  ;;  %v7519_v20 = vrot.slane %v7518_v19, 3  ;;  %v7670_v19 = vrot.slane %v14087_v44, 4 }
 0x69b   : > { %v13500_v29 = vadd.f32 %v13450_v24, %v7280_v3  ;;  %v10079_v3 = vld [vmem:[%s10600_s29 + $0x80] sm:$0xff] }
 0x69c   : > { %v6888_v32 = vpop.f32.mrf.mxu2 }
 0x69d   : > { %v6935_v58 = vadd.f32 %v6888_v32, %v13191_v41 }
 0x69e   : > { %v7028_v52 = vpop.f32.mrf.mxu3  ;;  %v7236_v16 = vpop.f32.mrf.mxu0 }
 0x69f   : > { %v7073_v50 = vadd.f32 %v7026_v60, %v6935_v58  ;;  %v7521_v60 = vsel %vm1394_vm6, %v7519_v20, %v7520_v10 }
 0x6a0   : > { %v7454_v54 = vpop.f32.mrf.mxu1 }
 0x6a1   : > { %v7281_v1 = vadd.f32 %v7234_v12, %v7073_v50  ;;  %v7669_v12 = vrot.slane %v14086_v11, 3 }
 0x6a3   : > { %9910 = vmatmul.msk.bf16.vlgmr.msrb.gmra.mxu1 %vm334_vm1, %v10078_v35  ;;  %9848 = vmatmul.msk.bf16.vlgmr.msrb.gmra.mxu3 %vm334_vm1, %v7668_v7  ;;  %v13508_v24 = vadd.f32 %v7449_v26, %v7281_v1  ;;  %v13531_v7 = vld [vmem:[%s10600_s29 + $0x78] sm:$0xff]  }
 0x6a4   : > { %v6890_v15 = vpop.f32.mrf.mxu2 }
 0x6a5   : > { %v6936_v41 = vadd.f32 %v6890_v15, %v13203_v36  ;;  %v7671_v36 = vor.u32 %v7670_v19, %v7669_v12  ;;  %v14088_v15 = vshrl.u32 %v13212_v46, 16  ;;  %v10080_v12 = vld [vmem:[%s10600_s29 + $0x88] sm:$0xff] }
 0x6a6   : > { %v7031_v5 = vpop.f32.mrf.mxu3  ;;  %v7239_v0 = vpop.f32.mrf.mxu0 }
 0x6a7   : > { %v7074_v39 = vadd.f32 %v7028_v52, %v6936_v41  ;;  %v7672_v58 = vsel %vm1534_vm7, %v7667_v4, %v7671_v36  ;;  %v7522_v52 = vrot.slane %v13181_v59, 3  ;;  %v7673_v41 = vrot.slane %v14088_v15, 3 }
 0x6a8   : > { %v7456_v42 = vpop.f32.mrf.mxu1 }
 0x6a9   : > { %9859 = vmatmul.msk.bf16.vlgmr.msrb.gmra.mxu0 %vm334_vm1, %v13109_v14  ;;  %9837 = vmatmul.msk.bf16.vlgmr.msrb.gmra.mxu2 %vm334_vm1, %v7521_v60  ;;  %v7282_v23 = vadd.f32 %v7236_v16, %v7074_v39  ;;  %v7523_v1 = vsel %vm1394_vm6, %v7520_v10, %v7522_v52 }
 0x6ab   : > { %v13519_v26 = vadd.f32 %v7451_v17, %v7282_v23 }
 0x6ac   : > { %v6893_v30 = vpop.f32.mrf.mxu2 }
 0x6ad   : > { %v6937_v25 = vadd.f32 %v6893_v30, %v13220_v56 }
 0x6ae   : > { %v7033_v37 = vpop.f32.mrf.mxu3  ;;  %v7241_v53 = vpop.f32.mrf.mxu0 }
 0x6af   : > { %v7075_v32 = vadd.f32 %v7031_v5, %v6937_v25  ;;  %v14089_v5 = vshll.u32 %v13212_v46, 16  ;;  %v7524_v25 = vrot.slane %v13212_v46, 3 }
 0x6b0   : > { %v7459_v28 = vpop.f32.mrf.mxu1 }
 0x6b1   : > { %v7283_v14 = vadd.f32 %v7239_v0, %v7075_v32  ;;  %v7674_v59 = vrot.slane %v14089_v5, 4  ;;  %v10368_v32 = vld [vmem:[%s10600_s29 + $0x80] sm:$0xff]  }
 0x6b3   : > { %9911 = vmatmul.msk.bf16.gmra.mxu1 %vm334_vm1, %v10079_v3  ;;  %9849 = vmatmul.msk.bf16.gmra.mxu3 %vm334_vm1, %v7672_v58  ;;  %v13527_v17 = vadd.f32 %v7454_v54, %v7283_v14  ;;  %v7675_v54 = vor.u32 %v7674_v59, %v7673_v41  ;;  %v7525_v58 = vsel %vm1394_vm6, %v7522_v52, %v7524_v25  ;;  %v10081_v41 = vld [vmem:[%s10600_s29 + $0x90] sm:$0xff] }
 0x6b4   : > { %v6895_v16 = vpop.f32.mrf.mxu2 }
 0x6b5   : > { %v6938_v56 = vadd.f32 %v6895_v16, %v13232_v8  ;;  %v7676_v23 = vsel %vm1534_vm7, %v7671_v36, %v7675_v54  ;;  %v14090_v16 = vshrl.u32 %v13241_v43, 16 }
 0x6b6   : > { %v7036_v35 = vpop.f32.mrf.mxu3  ;;  %v7244_v50 = vpop.f32.mrf.mxu0 }
 0x6b7   : > { %v7076_v20 = vadd.f32 %v7033_v37, %v6938_v56  ;;  %v7677_v56 = vrot.slane %v14090_v16, 3  ;;  %v10082_v16 = vld [vmem:[%s10600_s29 + $0x98] sm:$0xff] }
 0x6b8   : > { %v7461_v4 = vpop.f32.mrf.mxu1 }
 0x6b9   : > { %9860 = vmatmul.msk.bf16.gmra.mxu0 %vm334_vm1, %v13531_v7  ;;  %9838 = vmatmul.msk.bf16.gmra.mxu2 %vm334_vm1, %v7523_v1  ;;  %v7284_v8 = vadd.f32 %v7241_v53, %v7076_v20 }
 0x6bb   : > { %v13541_v0 = vadd.f32 %v7456_v42, %v7284_v8 }
 0x6bc   : > { %v6898_v60 = vpop.f32.mrf.mxu2 }
 0x6bd   : > { %v6939_v10 = vadd.f32 %v6898_v60, %v13249_v61 }
 0x6be   : > { %v7038_v39 = vpop.f32.mrf.mxu3  ;;  %v7246_v11 = vpop.f32.mrf.mxu0 }
 0x6bf   : > { %v7077_v19 = vadd.f32 %v7036_v35, %v6939_v10  ;;  %v14091_v35 = vshll.u32 %v13241_v43, 16  ;;  %v7526_v10 = vrot.slane %v13241_v43, 3 }
 0x6c0   : > { %v7464_v44 = vpop.f32.mrf.mxu1 }
 0x6c1   : > { %v7285_v30 = vadd.f32 %v7244_v50, %v7077_v19  ;;  %v7678_v50 = vrot.slane %v14091_v35, 4  ;;  %v10369_v19 = vld [vmem:[%s10600_s29 + $0x88] sm:$0xff]  }
 0x6c3   : > { %9912 = vmatmul.msk.bf16.gmra.mxu1 %vm334_vm1, %v10080_v12  ;;  %9850 = vmatmul.msk.bf16.gmra.mxu3 %vm334_vm1, %v7676_v23  ;;  %v13549_v42 = vadd.f32 %v7459_v28, %v7285_v30  ;;  %v7527_v23 = vsel %vm1394_vm6, %v7524_v25, %v7526_v10 }
 0x6c4   : > { %v6900_v37 = vpop.f32.mrf.mxu2 }
 0x6c5   : > { %v6940_v61 = vadd.f32 %v6900_v37, %v13261_v9  ;;  %v7679_v9 = vor.u32 %v7678_v50, %v7677_v56  ;;  %v14092_v37 = vshrl.u32 %v13270_v27, 16 }
 0x6c6   : > { %v7041_v53 = vpop.f32.mrf.mxu3  ;;  %v7249_v3 = vpop.f32.mrf.mxu0 }
 0x6c7   : > { %v7078_v36 = vadd.f32 %v7038_v39, %v6940_v61  ;;  %v7680_v8 = vsel %vm1534_vm7, %v7675_v54, %v7679_v9  ;;  %v7681_v61 = vrot.slane %v14092_v37, 3 }
 0x6c8   : > { %v7466_v14 = vpop.f32.mrf.mxu1 }
 0x6c9   : > { %9861 = vmatmul.msk.bf16.gmra.mxu0 %vm334_vm1, %v10368_v32  ;;  %9839 = vmatmul.msk.bf16.gmra.mxu2 %vm334_vm1, %v7525_v58  ;;  %v7286_v46 = vadd.f32 %v7246_v11, %v7078_v36 }
 0x6cb   : > { %v13560_v28 = vadd.f32 %v7461_v4, %v7286_v46 }
 0x6cc   : > { %v6903_v1 = vpop.f32.mrf.mxu2 }
 0x6cd   : > { %v6941_v20 = vadd.f32 %v6903_v1, %v13278_v22  ;;  %v7528_v1 = vrot.slane %v13270_v27, 3 }
 0x6ce   : > { %v7043_v52 = vpop.f32.mrf.mxu3  ;;  %v7251_v15 = vpop.f32.mrf.mxu0 }
 0x6cf   : > { %v7079_v59 = vadd.f32 %v7041_v53, %v6941_v20  ;;  %v14093_v53 = vshll.u32 %v13270_v27, 16 }
 0x6d0   : > { %v7469_v5 = vpop.f32.mrf.mxu1 }
 0x6d1   : > { %v7287_v60 = vadd.f32 %v7249_v3, %v7079_v59  ;;  %v7682_v3 = vrot.slane %v14093_v53, 4  ;;  %v7529_v59 = vsel %vm1394_vm6, %v7526_v10, %v7528_v1 }
 0x6d3   : > { %9913 = vmatmul.msk.bf16.gmra.mxu1 %vm334_vm1, %v10081_v41  ;;  %9851 = vmatmul.msk.bf16.gmra.mxu3 %vm334_vm1, %v7680_v8  ;;  %v13568_v4 = vadd.f32 %v7464_v44, %v7287_v60  ;;  %v10370_v41 = vld [vmem:[%s10600_s29 + $0x90] sm:$0xff]   ;;  %v14094_v60 = vshrl.u32 %v13299_v33, 16 }
 0x6d4   : > { %v6905_v39 = vpop.f32.mrf.mxu2 }
 0x6d5   : > { %v6942_v22 = vadd.f32 %v6905_v39, %v13290_v21  ;;  %v7683_v21 = vor.u32 %v7682_v3, %v7681_v61  ;;  %v7685_v39 = vrot.slane %v14094_v60, 3 }
 0x6d6   : > { %v7046_v11 = vpop.f32.mrf.mxu3  ;;  %v7254_v12 = vpop.f32.mrf.mxu0 }
 0x6d7   : > { %v7080_v54 = vadd.f32 %v7043_v52, %v6942_v22  ;;  %v7684_v50 = vsel %vm1534_vm7, %v7679_v9, %v7683_v21  ;;  %v14095_v22 = vshll.u32 %v13299_v33, 16 }
 0x6d8   : > { %v7471_v30 = vpop.f32.mrf.mxu1 }
 0x6d9   : > { %9862 = vmatmul.msk.bf16.gmra.mxu0 %vm334_vm1, %v10369_v19  ;;  %9840 = vmatmul.msk.bf16.gmra.mxu2 %vm334_vm1, %v7527_v23  ;;  %v7288_v43 = vadd.f32 %v7251_v15, %v7080_v54  ;;  %v10083_v54 = vld [vmem:[%s10600_s29 + $0xa0] sm:$0xff] }
 0x6db   : > { %v13579_v44 = vadd.f32 %v7466_v14, %v7288_v43  ;;  %v7530_v43 = vrot.slane %v13299_v33, 3 }
 0x6dc   : > { %v6908_v32 = vpop.f32.mrf.mxu2 }
 0x6dd   : > { %v6943_v58 = vadd.f32 %v6908_v32, %v13307_v45 }
 0x6de   : > { %v7048_v25 = vpop.f32.mrf.mxu3  ;;  %v7256_v36 = vpop.f32.mrf.mxu0 }
 0x6df   : > { %v7081_v35 = vadd.f32 %v7046_v11, %v6943_v58  ;;  %v7686_v11 = vrot.slane %v14095_v22, 4 }
 0x6e0   : > { %v7474_v56 = vpop.f32.mrf.mxu1 }
 0x6e1   : > { %v7289_v46 = vadd.f32 %v7254_v12, %v7081_v35 }
 0x6e3   : > { %9914 = vmatmul.msk.bf16.gmra.mxu1 %vm334_vm1, %v10082_v16  ;;  %9852 = vmatmul.msk.bf16.gmra.mxu3 %vm334_vm1, %v7684_v50  ;;  %v13587_v14 = vadd.f32 %v7469_v5, %v7289_v46  ;;  %v7531_v16 = vsel %vm1394_vm6, %v7528_v1, %v7530_v43  ;;  %v14096_v50 = vshrl.u32 %v13328_v2, 16 }
 0x6e4   : > { %v6910_v20 = vpop.f32.mrf.mxu2 }
 0x6e5   : > { %v6944_v45 = vadd.f32 %v6910_v20, %v13319_v13  ;;  %v7687_v13 = vor.u32 %v7686_v11, %v7685_v39  ;;  %v7689_v46 = vrot.slane %v14096_v50, 3  ;;  %v14097_v20 = vshll.u32 %v13328_v2, 16 }
 0x6e6   : > { %v7051_v52 = vpop.f32.mrf.mxu3  ;;  %v7259_v15 = vpop.f32.mrf.mxu0  ;;  %v7532_v11 = vrot.slane %v13328_v2, 3 }
 0x6e7   : > { %v7082_v9 = vadd.f32 %v7048_v25, %v6944_v45  ;;  %v7688_v53 = vsel %vm1534_vm7, %v7683_v21, %v7687_v13  ;;  %v7690_v45 = vrot.slane %v14097_v20, 4 }
 0x6e8   : > { %v7476_v8 = vpop.f32.mrf.mxu1 }
 0x6e9   : > { %9863 = vmatmul.msk.bf16.gmra.mxu0 %vm334_vm1, %v10370_v41  ;;  %9841 = vmatmul.msk.bf16.gmra.mxu2 %vm334_vm1, %v7529_v59  ;;  %v7290_v27 = vadd.f32 %v7256_v36, %v7082_v9  ;;  %v10371_v36 = vld [vmem:[%s10600_s29 + $0x98] sm:$0xff]   ;;  %v10084_v59 = vld [vmem:[%s10600_s29 + $0xa8] sm:$0xff] }
 0x6eb   : > { %v13598_v5 = vadd.f32 %v7471_v30, %v7290_v27 }
 0x6ec   : > { %v6913_v12 = vpop.f32.mrf.mxu2 }
 0x6ed   : > { %v6945_v19 = vadd.f32 %v6913_v12, %v13336_v6 }
 0x6ee   : > { %v7053_v10 = vpop.f32.mrf.mxu3  ;;  %v7261_v23 = vpop.f32.mrf.mxu0 }
 0x6ef   : > { %v7083_v61 = vadd.f32 %v7051_v52, %v6945_v19 }
 0x6f0   : > { %v7479_v37 = vpop.f32.mrf.mxu1 }
 0x6f1   : > { %v7291_v3 = vadd.f32 %v7259_v15, %v7083_v61  ;;  %v14098_v61 = vshrl.u32 %v13357_v63, 16 }
 0x6f3   : > { %9915 = vmatmul.msk.bf16.gmra.mxu1 %vm334_vm1, %v10083_v54  ;;  %9853 = vmatmul.msk.bf16.gmra.mxu3 %vm334_vm1, %v7688_v53  ;;  %v13606_v30 = vadd.f32 %v7474_v56, %v7291_v3  ;;  %v7693_v53 = vrot.slane %v14098_v61, 3  ;;  %v14099_v3 = vshll.u32 %v13357_v63, 16 }
 0x6f4   : > { %v6915_v32 = vpop.f32.mrf.mxu2 }
 0x6f5   : > { %v6946_v6 = vadd.f32 %v6915_v32, %v13348_v49  ;;  %v7691_v49 = vor.u32 %v7690_v45, %v7689_v46  ;;  %v7694_v32 = vrot.slane %v14099_v3, 4 }
 0x6f6   : > { %v7056_v58 = vpop.f32.mrf.mxu3  ;;  %v7264_v25 = vpop.f32.mrf.mxu0 }
 0x6f7   : > { %v7084_v21 = vadd.f32 %v7053_v10, %v6946_v6  ;;  %v7692_v39 = vsel %vm1534_vm7, %v7687_v13, %v7691_v49  ;;  %v10372_v10 = vld [vmem:[%s10600_s29 + $0xa0] sm:$0xff]  }
 0x6f8   : > { %v7481_v35 = vpop.f32.mrf.mxu1 }
 0x6f9   : > { %9864 = vmatmul.msk.bf16.gmra.mxu0 %vm334_vm1, %v10371_v36  ;;  %9842 = vmatmul.msk.bf16.gmra.mxu2 %vm334_vm1, %v7531_v16  ;;  %v7292_v33 = vadd.f32 %v7261_v23, %v7084_v21  ;;  %v7533_v23 = vsel %vm1394_vm6, %v7530_v43, %v7532_v11  ;;  %v10085_v36 = vld [vmem:[%s10600_s29 + $0xb0] sm:$0xff] }
 0x6fb   : > { %v13617_v56 = vadd.f32 %v7476_v8, %v7292_v33 }
 0x6fc   : > { %v6918_v52 = vpop.f32.mrf.mxu2 }
 0x6fd   : > { %v6947_v15 = vadd.f32 %v6918_v52, %v13365_v55 }
 0x6fe   : > { %v7058_v1 = vpop.f32.mrf.mxu3  ;;  %v7266_v41 = vpop.f32.mrf.mxu0 }
 0x6ff   : > { %v7085_v60 = vadd.f32 %v7056_v58, %v6947_v15  ;;  %v10373_v15 = vld [vmem:[%s10600_s29 + $0xa8] sm:$0xff]  }
 0x700   : > { %v7484_v9 = vpop.f32.mrf.mxu1 }
 0x701   : > { %v7293_v22 = vadd.f32 %v7264_v25, %v7085_v60 }
 0x703   : > { %9916 = vmatmul.msk.bf16.gmra.mxu1 %vm334_vm1, %v10084_v59  ;;  %9854 = vmatmul.msk.bf16.gmra.mxu3 %vm334_vm1, %v7692_v39  ;;  %v13625_v8 = vadd.f32 %v7479_v37, %v7293_v22  ;;  %v14100_v59 = vshrl.u32 %v13395_v47, 16  ;;  %v14101_v39 = vshll.u32 %v13395_v47, 16 }
 0x704   : > { %v6920_v27 = vpop.f32.mrf.mxu2 }
 0x705   : > { %v6948_v55 = vadd.f32 %v6920_v27, %v13385_v51  ;;  %v7695_v51 = vor.u32 %v7694_v32, %v7693_v53  ;;  %v7697_v60 = vrot.slane %v14100_v59, 3  ;;  %v7698_v22 = vrot.slane %v14101_v39, 4  ;;  %v8399_v39 = vld [vmem:[%s10600_s29 + $0x78] sm:$0xe] }
 0x706   : > { %v7061_v12 = vpop.f32.mrf.mxu3  ;;  %v7269_v19 = vpop.f32.mrf.mxu0 }
 0x707   : > { %v7086_v13 = vadd.f32 %v7058_v1, %v6948_v55  ;;  %v7696_v50 = vsel %vm1534_vm7, %v7691_v49, %v7695_v51 }
 0x708   : > { %v7486_v54 = vpop.f32.mrf.mxu1 }
 0x709   : > { %9865 = vmatmul.msk.bf16.gmra.mxu0 %vm334_vm1, %v10372_v10  ;;  %9843 = vmatmul.msk.bf16.gmra.mxu2 %vm334_vm1, %v7533_v23  ;;  %v7294_v2 = vadd.f32 %v7266_v41, %v7086_v13  ;;  %v10086_v23 = vld [vmem:[%s10600_s29 + $0xb8] sm:$0xff] }
 0x70b   : > { %v13636_v37 = vadd.f32 %v7481_v35, %v7294_v2  ;;  %v7534_v35 = vrot.slane %v13357_v63, 3  ;;  %v7652_v63 = vld [vmem:[%s10600_s29 + $0xbc] sm:$0xf]  ;;  %v7536_v2 = vrot.slane %v13395_v47, 3 }
 0x70c   : > { %v6923_v6 = vpop.f32.mrf.mxu2  ;;  %v7655_v27 = vunpack.c.l.b16 %v7652_v63  ;;  %v8402_v63 = vunpack.c.l.b16 %v8399_v39 }
 0x70d   : > { %v6949_v58 = vadd.f32 %v6923_v6, %v13403_v57  ;;  %v7535_v1 = vsel %vm1394_vm6, %v7532_v11, %v7534_v35 }
 0x70e   : > { %v7063_v43 = vpop.f32.mrf.mxu3  ;;  %v7271_v25 = vpop.f32.mrf.mxu0  ;;  %v7656_v3 = vpack.c.b16 %v7655_v27, %v7655_v27 }
 0x70f   : > { %v7087_v21 = vadd.f32 %v7061_v12, %v6949_v58 }
 0x710   : > { %v7489_v16 = vpop.f32.mrf.mxu1  ;;  %v7705_v6 = vshll.u32 %v7656_v3, 16 }
 0x711   : > { %v7295_v46 = vadd.f32 %v7269_v19, %v7087_v21 }
 0x713   : > { %9917 = vmatmul.msk.bf16.gmra.mxu1 %vm334_vm1, %v10085_v36  ;;  %9855 = vmatmul.msk.bf16.gmra.mxu3 %vm334_vm1, %v7696_v50  ;;  %v13644_v20 = vadd.f32 %v7484_v9, %v7295_v46  ;;  %v7699_v9 = vor.u32 %v7698_v22, %v7697_v60  ;;  %v8707_v60 = vld [vmem:[%s10600_s29 + $0x78] sm:$0xc] }
 0x714   : > { %v6925_v45 = vpop.f32.mrf.mxu2  ;;  %v8710_v22 = vunpack.c.l.b16 %v8707_v60 }
 0x715   : > { %v6950_v57 = vadd.f32 %v6925_v45, %v13418_v62  ;;  %v7700_v53 = vsel %vm1534_vm7, %v7695_v51, %v7699_v9  ;;  %v7537_v51 = vsel %vm1394_vm6, %v7534_v35, %v7536_v2  ;;  %v7707_v45 = vrot.slane %v7705_v6, 4 }
 0x716   : > { %v7066_v33 = vpop.f32.mrf.mxu3  ;;  %v7274_v52 = vpop.f32.mrf.mxu0 }
 0x717   : > { %v7088_v41 = vadd.f32 %v7063_v43, %v6950_v57 }
 0x718   : > { %v7491_v49 = vpop.f32.mrf.mxu1 }
 0x719   : > { %9866 = vmatmul.msk.bf16.gmra.mxu0 %vm334_vm1, %v10373_v15  ;;  %9844 = vmatmul.msk.bf16.gmra.mxu2 %vm334_vm1, %v7535_v1  ;;  %v7296_v62 = vadd.f32 %v7271_v25, %v7088_v41  ;;  %v10087_v15 = vld [vmem:[%s10600_s29 + $0xc0] sm:$0xff] }
 0x71b   : > { %v13656_v55 = vadd.f32 %v7486_v54, %v7296_v62  ;;  %v7702_v54 = vshrl.u32 %v7656_v3, 16  ;;  %v13689_v3 = vld [vmem:[%s10600_s29 + $0x80] sm:$0xff] }
 0x71c   : > { %v6928_v11 = vpop.f32.mrf.mxu2 }
 0x71d   : > { %v6951_v12 = vadd.f32 %v6928_v11, %v13442_v40  ;;  %v7704_v46 = vrot.slane %v7702_v54, 3 }
 0x71e   : > { %v7068_v19 = vpop.f32.mrf.mxu3  ;;  %v7276_v10 = vpop.f32.mrf.mxu0 }
 0x71f   : > { %v7089_v61 = vadd.f32 %v7066_v33, %v6951_v12  ;;  %v14102_v12 = vunpack.c.l.b16 %v13378_v18  ;;  %v8211_v18 = vshll.u32 %v13689_v3, 16 }
 0x720   : > { %v8058_v13 = vpop.f32.mrf.mxu1 }
 0x721   : > { %v7297_v32 = vadd.f32 %v7274_v52, %v7089_v61 }
 0x723   : > { %9918 = vmatmul.msk.bf16.gmra.mxu1 %vm334_vm1, %v10086_v23  ;;  %9856 = vmatmul.msk.bf16.gmra.mxu3 %vm334_vm1, %v7700_v53  ;;  %v13664_v58 = vadd.f32 %v7489_v16, %v7297_v32  ;;  %v7708_v16 = vor.u32 %v7707_v45, %v7704_v46 }
 0x724   : > { %v6930_v40 = vpop.f32.mrf.mxu2 }
 0x725   : > { %v6952_v43 = vadd.f32 %v6930_v40, %v13464_v34  ;;  %v7709_v59 = vsel %vm1534_vm7, %v7699_v9, %v7708_v16  ;;  %v7832_v9 = vpack.c.b16 %v7655_v27, %v14102_v12  ;;  %v8206_v40 = vshll.u32 %v13531_v7, 16 }
 0x726   : > { %v7752_v25 = vpop.f32.mrf.mxu3  ;;  %v7875_v36 = vpop.f32.mrf.mxu0 }
 0x727   : > { %v7090_v50 = vadd.f32 %v7068_v19, %v6952_v43  ;;  %v8713_v43 = vrot.slane %v13689_v3, 2 }
 0x728   : > { %v8060_v21 = vpop.f32.mrf.mxu1 }
 0x729   : > { %9867 = vmatmul.msk.bf16.gmra.mxu0 %vm334_vm1, %v13375_v38  ;;  %9845 = vmatmul.msk.bf16.gmra.mxu2 %vm334_vm1, %v7537_v51  ;;  %v7298_v47 = vadd.f32 %v7276_v10, %v7090_v50 }
 0x72b   : > { %v13671_v57 = vadd.f32 %v7491_v49, %v7298_v47  ;;  %v7538_v49 = vrot.slane %v13429_v31, 3 }
 0x72c   : > { %v7582_v34 = vpop.f32.mrf.mxu2 }
 0x72d   : > { %v7632_v33 = vadd.f32 %v7582_v34, %v13481_v48  ;;  %v10256_v48 = vunpack.c.h.b16 %v13531_v7  ;;  %v7539_v61 = vsel %vm1394_vm6, %v7536_v2, %v7538_v49 }
 0x72e   : > { %v7754_v52 = vpop.f32.mrf.mxu3  ;;  %v7877_v35 = vpop.f32.mrf.mxu0 }
 0x72f   : > { %v7802_v41 = vadd.f32 %v7752_v25, %v7632_v33  ;;  %v8711_v31 = vpack.c.b16 %v10256_v48, %v8710_v22  ;;  %v8403_v54 = vpack.c.b16 %v10256_v48, %v8402_v63  ;;  %v8213_v22 = vrot.slane %v8211_v18, 1 }
 0x730   : > { %v8063_v1 = vpop.f32.mrf.mxu1 }
 0x731   : > { %v7925_v38 = vadd.f32 %v7875_v36, %v7802_v41  ;;  %v8543_v27 = vshrl.u32 %v8403_v54, 16  ;;  %v8712_v2 = vrot.slane %v8711_v31, 2  ;;  %v8404_v25 = vrot.slane %v8403_v54, 1  ;;  %v10089_v31 = vld [vmem:[%s10600_s29 + $0x88] sm:$0xff] }
 0x732   : > { %v8405_v36 = vrot.slane %v13689_v3, 1 }
 0x733   : > { %9919 = vmatmul.msk.bf16.gmra.mxu1 %vm334_vm1, %v10087_v15  ;;  %9857 = vmatmul.msk.bf16.gmra.mxu3 %vm334_vm1, %v7709_v59  ;;  %v13682_v62 = vadd.f32 %v8058_v13, %v7925_v38  ;;  %v8215_v13 = vshrl.u32 %v13689_v3, 16  ;;  %v8545_v34 = vrot.slane %v8543_v27, 1  ;;  %v8208_v15 = vrot.slane %v8206_v40, 1 }
 0x734   : > { %v7584_v11 = vpop.f32.mrf.mxu2  ;;  %v8714_v59 = vsel %vm828_vm5, %v8712_v2, %v8713_v43 }
 0x735   : > { %v7633_v19 = vadd.f32 %v7584_v11, %v13500_v29  ;;  %v8546_v29 = vshll.u32 %v8403_v54, 16  ;;  %v8550_v46 = vrot.slane %v8215_v13, 1  ;;  %v8715_v54 = vrot.slane %v10089_v31, 2 }
 0x736   : > { %v7757_v10 = vpop.f32.mrf.mxu3  ;;  %v7880_v23 = vpop.f32.mrf.mxu0 }
 0x737   : > { %v7803_v32 = vadd.f32 %v7754_v52, %v7633_v19  ;;  %v8548_v33 = vrot.slane %v8546_v29, 2  ;;  %v8551_v52 = vrot.slane %v8211_v18, 2  ;;  %v8407_v18 = vrot.slane %v10089_v31, 1 }
 0x738   : > { %v8065_v53 = vpop.f32.mrf.mxu1 }
 0x739   : > { %9868 = vmatmul.msk.bf16.gmra.mxu0 %vm334_vm1, %v7832_v9  ;;  %9846 = vmatmul.msk.bf16.gmra.mxu2 %vm334_vm1, %v7539_v61  ;;  %v7926_v6 = vadd.f32 %v7877_v35, %v7803_v32  ;;  %v8204_v35 = vshrl.u32 %v13531_v7, 16  ;;  %v8549_v39 = vor.u32 %v8548_v33, %v8545_v34  ;;  %v8552_v38 = vor.u32 %v8551_v52, %v8550_v46 }
 0x73a   : > { %v8223_v32 = vshrl.u32 %v10089_v31, 16  ;;  %v8716_v46 = vsel %vm828_vm5, %v8713_v43, %v8715_v54 }
 0x73b   : > { %v13698_v51 = vadd.f32 %v8060_v21, %v7926_v6  ;;  %v8406_v21 = vsel %vm516_vm4, %v8404_v25, %v8405_v36  ;;  %v8209_v49 = vor.u32 %v8208_v15, %v8204_v35  ;;  %v8553_v9 = vsel %vm656_vm3, %v8549_v39, %v8552_v38  ;;  %v10090_v39 = vld [vmem:[%s10600_s29 + $0x90] sm:$0xff] }
 0x73c   : > { %v7587_v50 = vpop.f32.mrf.mxu2  ;;  %v8554_v2 = vrot.slane %v8223_v32, 1  ;;  %v8227_v3 = vshll.u32 %v10090_v39, 16 }
 0x73d   : > { %v7634_v45 = vadd.f32 %v7587_v50, %v13508_v24  ;;  %v8214_v19 = vsel %vm249_vm2, %v8209_v49, %v8213_v22  ;;  %v8409_v49 = vrot.slane %v10090_v39, 1 }
 0x73e   : > { %v7759_v47 = vpop.f32.mrf.mxu3  ;;  %v7882_v16 = vpop.f32.mrf.mxu0 }
 0x73f   : > { %v7804_v60 = vadd.f32 %v7757_v10, %v7634_v45 }
 0x740   : > { %v8068_v41 = vpop.f32.mrf.mxu1 }
 0x741   : > { %v7927_v24 = vadd.f32 %v7880_v23, %v7804_v60  ;;  %v8219_v23 = vshll.u32 %v10089_v31, 16  ;;  %v8410_v31 = vsel %vm516_vm4, %v8407_v18, %v8409_v49 }
 0x743   : > { %9990 = vmatmul.msk.bf16.vlgmr.msra.gmra.mxu1 %vm334_vm1, %v8714_v59  ;;  %9968 = vmatmul.msk.bf16.vlgmr.msra.gmra.mxu3 %vm334_vm1, %v8406_v21  ;;  %v13708_v48 = vadd.f32 %v8063_v1, %v7927_v24  ;;  %v8555_v25 = vrot.slane %v8219_v23, 2  ;;  %v8717_v24 = vrot.slane %v10090_v39, 2 }
 0x744   : > { %v7589_v7 = vpop.f32.mrf.mxu2 }
 0x745   : > { %v7635_v63 = vadd.f32 %v7589_v7, %v13519_v26  ;;  %v8556_v34 = vor.u32 %v8555_v25, %v8554_v2 }
 0x746   : > { %v7762_v11 = vpop.f32.mrf.mxu3  ;;  %v7885_v12 = vpop.f32.mrf.mxu0 }
 0x747   : > { %v7805_v61 = vadd.f32 %v7759_v47, %v7635_v63  ;;  %v8408_v47 = vsel %vm516_vm4, %v8405_v36, %v8407_v18  ;;  %v8557_v36 = vsel %vm656_vm3, %v8552_v38, %v8556_v34 }
 0x748   : > { %v8070_v10 = vpop.f32.mrf.mxu1 }
 0x749   : > { %9979 = vmatmul.msk.bf16.vlgmr.msra.gmra.mxu0 %vm334_vm1, %v8553_v9  ;;  %9957 = vmatmul.msk.bf16.vlgmr.msra.gmra.mxu2 %vm334_vm1, %v8214_v19  ;;  %v7928_v1 = vadd.f32 %v7882_v16, %v7805_v61  ;;  %v8718_v19 = vsel %vm828_vm5, %v8715_v54, %v8717_v24 }
 0x74b   : > { %v13716_v27 = vadd.f32 %v8065_v53, %v7928_v1  ;;  %v8221_v53 = vrot.slane %v8219_v23, 1 }
 0x74c   : > { %v7592_v26 = vpop.f32.mrf.mxu2 }
 0x74d   : > { %v7636_v29 = vadd.f32 %v7592_v26, %v13527_v17  ;;  %v8217_v17 = vor.u32 %v8215_v13, %v8213_v22  ;;  %v8231_v13 = vshrl.u32 %v10090_v39, 16  ;;  %v8229_v26 = vrot.slane %v8227_v3, 1 }
 0x74e   : > { %v7764_v6 = vpop.f32.mrf.mxu3  ;;  %v7887_v40 = vpop.f32.mrf.mxu0 }
 0x74f   : > { %v7806_v45 = vadd.f32 %v7762_v11, %v7636_v29  ;;  %v8222_v59 = vsel %vm249_vm2, %v8217_v17, %v8221_v53  ;;  %v8558_v11 = vrot.slane %v8231_v13, 1 }
 0x750   : > { %v8073_v50 = vpop.f32.mrf.mxu1 }
 0x751   : > { %v7929_v16 = vadd.f32 %v7885_v12, %v7806_v45  ;;  %v8559_v12 = vrot.slane %v8227_v3, 2  ;;  %v10091_v45 = vld [vmem:[%s10600_s29 + $0x98] sm:$0xff] }
 0x752   : > { %v8411_v17 = vrot.slane %v10091_v45, 1 }
 0x753   : > { %9991 = vmatmul.msk.bf16.gmra.mxu1 %vm334_vm1, %v8716_v46  ;;  %9969 = vmatmul.msk.bf16.gmra.mxu3 %vm334_vm1, %v8408_v47  ;;  %v13725_v33 = vadd.f32 %v8068_v41, %v7929_v16  ;;  %v8560_v23 = vor.u32 %v8559_v12, %v8558_v11  ;;  %v8239_v47 = vshrl.u32 %v10091_v45, 16  ;;  %v8719_v16 = vrot.slane %v10091_v45, 2 }
 0x754   : > { %v7594_v52 = vpop.f32.mrf.mxu2  ;;  %v8412_v39 = vsel %vm516_vm4, %v8409_v49, %v8411_v17 }
 0x755   : > { %v7637_v35 = vadd.f32 %v7594_v52, %v13541_v0  ;;  %v8561_v54 = vsel %vm656_vm3, %v8556_v34, %v8560_v23 }
 0x756   : > { %v7767_v43 = vpop.f32.mrf.mxu3  ;;  %v7890_v15 = vpop.f32.mrf.mxu0 }
 0x757   : > { %v7807_v21 = vadd.f32 %v7764_v6, %v7637_v35 }
 0x758   : > { %v8075_v60 = vpop.f32.mrf.mxu1 }
 0x759   : > { %9980 = vmatmul.msk.bf16.gmra.mxu0 %vm334_vm1, %v8557_v36  ;;  %9958 = vmatmul.msk.bf16.gmra.mxu2 %vm334_vm1, %v8222_v59  ;;  %v7930_v41 = vadd.f32 %v7887_v40, %v7807_v21  ;;  %v8720_v59 = vsel %vm828_vm5, %v8717_v24, %v8719_v16 }
 0x75b   : > { %v13733_v22 = vadd.f32 %v8070_v10, %v7930_v41  ;;  %v8225_v10 = vor.u32 %v8223_v32, %v8221_v53  ;;  %v8235_v32 = vshll.u32 %v10091_v45, 16 }
 0x75c   : > { %v7597_v0 = vpop.f32.mrf.mxu2 }
 0x75d   : > { %v7638_v7 = vadd.f32 %v7597_v0, %v13549_v42  ;;  %v8230_v18 = vsel %vm249_vm2, %v8225_v10, %v8229_v26  ;;  %v8237_v0 = vrot.slane %v8235_v32, 1 }
 0x75e   : > { %v7769_v38 = vpop.f32.mrf.mxu3  ;;  %v7892_v63 = vpop.f32.mrf.mxu0 }
 0x75f   : > { %v7808_v61 = vadd.f32 %v7767_v43, %v7638_v7  ;;  %v8562_v43 = vrot.slane %v8239_v47, 1 }
 0x760   : > { %v8078_v9 = vpop.f32.mrf.mxu1 }
 0x761   : > { %v7931_v1 = vadd.f32 %v7890_v15, %v7808_v61  ;;  %v8563_v15 = vrot.slane %v8235_v32, 2  ;;  %v10092_v61 = vld [vmem:[%s10600_s29 + $0xa0] sm:$0xff] }
 0x762   : > { %v8413_v10 = vrot.slane %v10092_v61, 1 }
 0x763   : > { %9992 = vmatmul.msk.bf16.gmra.mxu1 %vm334_vm1, %v8718_v19  ;;  %9970 = vmatmul.msk.bf16.gmra.mxu3 %vm334_vm1, %v8410_v31  ;;  %v13740_v42 = vadd.f32 %v8073_v50, %v7931_v1  ;;  %v8564_v3 = vor.u32 %v8563_v15, %v8562_v43  ;;  %v8247_v31 = vshrl.u32 %v10092_v61, 16  ;;  %v8721_v1 = vrot.slane %v10092_v61, 2 }
 0x764   : > { %v7599_v29 = vpop.f32.mrf.mxu2  ;;  %v8414_v45 = vsel %vm516_vm4, %v8411_v17, %v8413_v10 }
 0x765   : > { %v7639_v6 = vadd.f32 %v7599_v29, %v13560_v28  ;;  %v8565_v24 = vsel %vm656_vm3, %v8560_v23, %v8564_v3 }
 0x766   : > { %v7772_v40 = vpop.f32.mrf.mxu3  ;;  %v7895_v2 = vpop.f32.mrf.mxu0 }
 0x767   : > { %v7809_v46 = vadd.f32 %v7769_v38, %v7639_v6 }
 0x768   : > { %v8080_v25 = vpop.f32.mrf.mxu1 }
 0x769   : > { %9981 = vmatmul.msk.bf16.gmra.mxu0 %vm334_vm1, %v8561_v54  ;;  %9959 = vmatmul.msk.bf16.gmra.mxu2 %vm334_vm1, %v8230_v18  ;;  %v7932_v50 = vadd.f32 %v7892_v63, %v7809_v46  ;;  %v8722_v18 = vsel %vm828_vm5, %v8719_v16, %v8721_v1 }
 0x76b   : > { %v13748_v53 = vadd.f32 %v8075_v60, %v7932_v50  ;;  %v8233_v60 = vor.u32 %v8231_v13, %v8229_v26  ;;  %v8243_v13 = vshll.u32 %v10092_v61, 16 }
 0x76c   : > { %v7602_v28 = vpop.f32.mrf.mxu2 }
 0x76d   : > { %v7640_v52 = vadd.f32 %v7602_v28, %v13568_v4  ;;  %v8238_v49 = vsel %vm249_vm2, %v8233_v60, %v8237_v0  ;;  %v8245_v28 = vrot.slane %v8243_v13, 1 }
 0x76e   : > { %v7774_v34 = vpop.f32.mrf.mxu3  ;;  %v7897_v35 = vpop.f32.mrf.mxu0 }
 0x76f   : > { %v7810_v21 = vadd.f32 %v7772_v40, %v7640_v52  ;;  %v8566_v40 = vrot.slane %v8247_v31, 1 }
 0x770   : > { %v8083_v36 = vpop.f32.mrf.mxu1 }
 0x771   : > { %v7933_v41 = vadd.f32 %v7895_v2, %v7810_v21  ;;  %v8567_v2 = vrot.slane %v8243_v13, 2  ;;  %v10093_v21 = vld [vmem:[%s10600_s29 + $0xa8] sm:$0xff] }
 0x772   : > { %v8415_v60 = vrot.slane %v10093_v21, 1 }
 0x773   : > { %9993 = vmatmul.msk.bf16.gmra.mxu1 %vm334_vm1, %v8720_v59  ;;  %9971 = vmatmul.msk.bf16.gmra.mxu3 %vm334_vm1, %v8412_v39  ;;  %v13755_v4 = vadd.f32 %v8078_v9, %v7933_v41  ;;  %v8568_v32 = vor.u32 %v8567_v2, %v8566_v40  ;;  %v8255_v39 = vshrl.u32 %v10093_v21, 16  ;;  %v8723_v41 = vrot.slane %v10093_v21, 2 }
 0x774   : > { %v7604_v7 = vpop.f32.mrf.mxu2  ;;  %v8416_v61 = vsel %vm516_vm4, %v8413_v10, %v8415_v60 }
 0x775   : > { %v7641_v38 = vadd.f32 %v7604_v7, %v13579_v44  ;;  %v8569_v16 = vsel %vm656_vm3, %v8564_v3, %v8568_v32 }
 0x776   : > { %v7777_v63 = vpop.f32.mrf.mxu3  ;;  %v7900_v11 = vpop.f32.mrf.mxu0 }
 0x777   : > { %v7811_v19 = vadd.f32 %v7774_v34, %v7641_v38 }
 0x778   : > { %v8085_v12 = vpop.f32.mrf.mxu1 }
 0x779   : > { %9982 = vmatmul.msk.bf16.gmra.mxu0 %vm334_vm1, %v8565_v24  ;;  %9960 = vmatmul.msk.bf16.gmra.mxu2 %vm334_vm1, %v8238_v49  ;;  %v7934_v9 = vadd.f32 %v7897_v35, %v7811_v19  ;;  %v8724_v49 = vsel %vm828_vm5, %v8721_v1, %v8723_v41 }
 0x77b   : > { %v13763_v26 = vadd.f32 %v8080_v25, %v7934_v9  ;;  %v8241_v25 = vor.u32 %v8239_v47, %v8237_v0  ;;  %v8251_v47 = vshll.u32 %v10093_v21, 16 }
 0x77c   : > { %v7607_v44 = vpop.f32.mrf.mxu2 }
 0x77d   : > { %v7642_v29 = vadd.f32 %v7607_v44, %v13587_v14  ;;  %v8246_v17 = vsel %vm249_vm2, %v8241_v25, %v8245_v28  ;;  %v8253_v44 = vrot.slane %v8251_v47, 1 }
 0x77e   : > { %v7779_v23 = vpop.f32.mrf.mxu3  ;;  %v7902_v6 = vpop.f32.mrf.mxu0 }
 0x77f   : > { %v7812_v46 = vadd.f32 %v7777_v63, %v7642_v29  ;;  %v8570_v63 = vrot.slane %v8255_v39, 1 }
 0x780   : > { %v8088_v54 = vpop.f32.mrf.mxu1 }
 0x781   : > { %v7935_v50 = vadd.f32 %v7900_v11, %v7812_v46  ;;  %v8571_v11 = vrot.slane %v8251_v47, 2  ;;  %v10094_v46 = vld [vmem:[%s10600_s29 + $0xb0] sm:$0xff] }
 0x782   : > { %v8417_v25 = vrot.slane %v10094_v46, 1 }
 0x783   : > { %9994 = vmatmul.msk.bf16.gmra.mxu1 %vm334_vm1, %v8722_v18  ;;  %9972 = vmatmul.msk.bf16.gmra.mxu3 %vm334_vm1, %v8414_v45  ;;  %v13770_v14 = vadd.f32 %v8083_v36, %v7935_v50  ;;  %v8572_v13 = vor.u32 %v8571_v11, %v8570_v63  ;;  %v8263_v45 = vshrl.u32 %v10094_v46, 16  ;;  %v8725_v50 = vrot.slane %v10094_v46, 2 }
 0x784   : > { %v7609_v52 = vpop.f32.mrf.mxu2  ;;  %v8418_v21 = vsel %vm516_vm4, %v8415_v60, %v8417_v25 }
 0x785   : > { %v7643_v34 = vadd.f32 %v7609_v52, %v13598_v5  ;;  %v8573_v1 = vsel %vm656_vm3, %v8568_v32, %v8572_v13 }
 0x786   : > { %v7782_v35 = vpop.f32.mrf.mxu3  ;;  %v7905_v43 = vpop.f32.mrf.mxu0 }
 0x787   : > { %v7813_v59 = vadd.f32 %v7779_v23, %v7643_v34 }
 0x788   : > { %v8090_v15 = vpop.f32.mrf.mxu1 }
 0x789   : > { %9983 = vmatmul.msk.bf16.gmra.mxu0 %vm334_vm1, %v8569_v16  ;;  %9961 = vmatmul.msk.bf16.gmra.mxu2 %vm334_vm1, %v8246_v17  ;;  %v7936_v36 = vadd.f32 %v7902_v6, %v7813_v59  ;;  %v8726_v17 = vsel %vm828_vm5, %v8723_v41, %v8725_v50 }
 0x78b   : > { %v13778_v0 = vadd.f32 %v8085_v12, %v7936_v36  ;;  %v8249_v12 = vor.u32 %v8247_v31, %v8245_v28  ;;  %v8259_v31 = vshll.u32 %v10094_v46, 16 }
 0x78c   : > { %v7612_v5 = vpop.f32.mrf.mxu2 }
 0x78d   : > { %v7644_v7 = vadd.f32 %v7612_v5, %v13606_v30  ;;  %v8254_v10 = vsel %vm249_vm2, %v8249_v12, %v8253_v44  ;;  %v8261_v5 = vrot.slane %v8259_v31, 1 }
 0x78e   : > { %v7784_v3 = vpop.f32.mrf.mxu3  ;;  %v7907_v38 = vpop.f32.mrf.mxu0 }
 0x78f   : > { %v7814_v19 = vadd.f32 %v7782_v35, %v7644_v7  ;;  %v8574_v35 = vrot.slane %v8263_v45, 1 }
 0x790   : > { %v8093_v24 = vpop.f32.mrf.mxu1 }
 0x791   : > { %v7937_v9 = vadd.f32 %v7905_v43, %v7814_v19  ;;  %v8575_v43 = vrot.slane %v8259_v31, 2  ;;  %v10095_v19 = vld [vmem:[%s10600_s29 + $0xb8] sm:$0xff] }
 0x792   : > { %v8419_v12 = vrot.slane %v10095_v19, 1 }
 0x793   : > { %9995 = vmatmul.msk.bf16.gmra.mxu1 %vm334_vm1, %v8724_v49  ;;  %9973 = vmatmul.msk.bf16.gmra.mxu3 %vm334_vm1, %v8416_v61  ;;  %v13785_v30 = vadd.f32 %v8088_v54, %v7937_v9  ;;  %v8576_v47 = vor.u32 %v8575_v43, %v8574_v35  ;;  %v8271_v61 = vshrl.u32 %v10095_v19, 16  ;;  %v8727_v9 = vrot.slane %v10095_v19, 2 }
 0x794   : > { %v7614_v29 = vpop.f32.mrf.mxu2  ;;  %v8420_v46 = vsel %vm516_vm4, %v8417_v25, %v8419_v12 }
 0x795   : > { %v7645_v23 = vadd.f32 %v7614_v29, %v13617_v56  ;;  %v8577_v41 = vsel %vm656_vm3, %v8572_v13, %v8576_v47 }
 0x796   : > { %v7787_v6 = vpop.f32.mrf.mxu3  ;;  %v7910_v40 = vpop.f32.mrf.mxu0 }
 0x797   : > { %v7815_v18 = vadd.f32 %v7784_v3, %v7645_v23 }
 0x798   : > { %v8095_v2 = vpop.f32.mrf.mxu1 }
 0x799   : > { %9984 = vmatmul.msk.bf16.gmra.mxu0 %vm334_vm1, %v8573_v1  ;;  %9962 = vmatmul.msk.bf16.gmra.mxu2 %vm334_vm1, %v8254_v10  ;;  %v7938_v54 = vadd.f32 %v7907_v38, %v7815_v18  ;;  %v8728_v10 = vsel %vm828_vm5, %v8725_v50, %v8727_v9 }
 0x79b   : > { %v13793_v28 = vadd.f32 %v8090_v15, %v7938_v54  ;;  %v8257_v15 = vor.u32 %v8255_v39, %v8253_v44  ;;  %v8267_v39 = vshll.u32 %v10095_v19, 16 }
 0x79c   : > { %v7617_v56 = vpop.f32.mrf.mxu2 }
 0x79d   : > { %v7646_v52 = vadd.f32 %v7617_v56, %v13625_v8  ;;  %v8262_v60 = vsel %vm249_vm2, %v8257_v15, %v8261_v5  ;;  %v8269_v56 = vrot.slane %v8267_v39, 1 }
 0x79e   : > { %v7789_v32 = vpop.f32.mrf.mxu3  ;;  %v7912_v34 = vpop.f32.mrf.mxu0 }
 0x79f   : > { %v7816_v59 = vadd.f32 %v7787_v6, %v7646_v52  ;;  %v8578_v6 = vrot.slane %v8271_v61, 1 }
 0x7a0   : > { %v8098_v16 = vpop.f32.mrf.mxu1 }
 0x7a1   : > { %v7939_v36 = vadd.f32 %v7910_v40, %v7816_v59  ;;  %v8579_v40 = vrot.slane %v8267_v39, 2  ;;  %v13821_v59 = vld [vmem:[%s10600_s29 + $0xc0] sm:$0xff] }
 0x7a3   : > { %9996 = vmatmul.msk.bf16.gmra.mxu1 %vm334_vm1, %v8726_v17  ;;  %9974 = vmatmul.msk.bf16.gmra.mxu3 %vm334_vm1, %v8418_v21  ;;  %v13800_v8 = vadd.f32 %v8093_v24, %v7939_v36  ;;  %v8580_v31 = vor.u32 %v8579_v40, %v8578_v6  ;;  %v8729_v21 = vrot.slane %v13821_v59, 2 }
 0x7a4   : > { %v7619_v7 = vpop.f32.mrf.mxu2 }
 0x7a5   : > { %v7647_v3 = vadd.f32 %v7619_v7, %v13636_v37  ;;  %v8581_v50 = vsel %vm656_vm3, %v8576_v47, %v8580_v31  ;;  %v8421_v47 = vrot.slane %v13821_v59, 1 }
 0x7a6   : > { %v7792_v38 = vpop.f32.mrf.mxu3  ;;  %v7915_v63 = vpop.f32.mrf.mxu0 }
 0x7a7   : > { %v7817_v49 = vadd.f32 %v7789_v32, %v7647_v3  ;;  %v8422_v39 = vsel %vm516_vm4, %v8419_v12, %v8421_v47 }
 0x7a8   : > { %v8100_v11 = vpop.f32.mrf.mxu1 }
 0x7a9   : > { %9985 = vmatmul.msk.bf16.gmra.mxu0 %vm334_vm1, %v8577_v41  ;;  %9963 = vmatmul.msk.bf16.gmra.mxu2 %vm334_vm1, %v8262_v60  ;;  %v7940_v24 = vadd.f32 %v7912_v34, %v7817_v49  ;;  %v8730_v60 = vsel %vm828_vm5, %v8727_v9, %v8729_v21  ;;  %v8537_v49 = vld [vmem:[%s10600_s29 + $0xc8] sm:$0x3] }
 0x7ab   : > { %v13808_v44 = vadd.f32 %v8095_v2, %v7940_v24  ;;  %v8265_v2 = vor.u32 %v8263_v45, %v8261_v5  ;;  %v8275_v45 = vshll.u32 %v13821_v59, 16  ;;  %v8148_v24 = vld [vmem:[%s10600_s29 + $0xc8] sm:$0x1] }
 0x7ac   : > { %v7622_v37 = vpop.f32.mrf.mxu2 }
 0x7ad   : > { %v7648_v29 = vadd.f32 %v7622_v37, %v13644_v20  ;;  %v8270_v25 = vsel %vm249_vm2, %v8265_v2, %v8269_v56 }
 0x7ae   : > { %v7794_v13 = vpop.f32.mrf.mxu3  ;;  %v7917_v23 = vpop.f32.mrf.mxu0 }
 0x7af   : > { %v7818_v18 = vadd.f32 %v7792_v38, %v7648_v29 }
 0x7b0   : > { %v8103_v1 = vpop.f32.mrf.mxu1 }
 0x7b1   : > { %v7941_v54 = vadd.f32 %v7915_v63, %v7818_v18  ;;  %v8583_v63 = vrot.slane %v8275_v45, 2 }
 0x7b3   : > { %9997 = vmatmul.msk.bf16.gmra.mxu1 %vm334_vm1, %v8728_v10  ;;  %9975 = vmatmul.msk.bf16.gmra.mxu3 %vm334_vm1, %v8420_v46  ;;  %v13815_v20 = vadd.f32 %v8098_v16, %v7941_v54  ;;  %v8279_v16 = vshrl.u32 %v13821_v59, 16 }
 0x7b4   : > { %v7624_v52 = vpop.f32.mrf.mxu2 }
 0x7b5   : > { %v7649_v32 = vadd.f32 %v7624_v52, %v13656_v55  ;;  %v8582_v38 = vrot.slane %v8279_v16, 1 }
 0x7b6   : > { %v7797_v34 = vpop.f32.mrf.mxu3  ;;  %v7920_v35 = vpop.f32.mrf.mxu0 }
 0x7b7   : > { %v7819_v17 = vadd.f32 %v7794_v13, %v7649_v32  ;;  %v8584_v37 = vor.u32 %v8583_v63, %v8582_v38  ;;  %v8277_v13 = vrot.slane %v8275_v45, 1 }
 0x7b8   : > { %v8105_v43 = vpop.f32.mrf.mxu1 }
 0x7b9   : > { %9986 = vmatmul.msk.bf16.gmra.mxu0 %vm334_vm1, %v8581_v50  ;;  %9964 = vmatmul.msk.bf16.gmra.mxu2 %vm334_vm1, %v8270_v25  ;;  %v7942_v55 = vadd.f32 %v7917_v23, %v7819_v17  ;;  %v8191_v23 = vunpack.c.l.b16 %v8148_v24  ;;  %v8585_v12 = vsel %vm656_vm3, %v8580_v31, %v8584_v37 }
 0x7bb   : > { %v13829_v36 = vadd.f32 %v8100_v11, %v7942_v55  ;;  %v8540_v11 = vunpack.c.l.b16 %v8537_v49  ;;  %v8202_v32 = vpack.c.b16 %v8191_v23, %v8191_v23 }
 0x7bc   : > { %v7627_v15 = vpop.f32.mrf.mxu2 }
 0x7bd   : > { %v7650_v5 = vadd.f32 %v7627_v15, %v13664_v58  ;;  %v8273_v58 = vor.u32 %v8271_v61, %v8269_v56  ;;  %v8541_v46 = vpack.c.b16 %v8540_v11, %v8540_v11  ;;  %v8283_v55 = vshll.u32 %v8202_v32, 16 }
 0x7be   : > { %v7799_v7 = vpop.f32.mrf.mxu3  ;;  %v7922_v3 = vpop.f32.mrf.mxu0 }
 0x7bf   : > { %v7820_v19 = vadd.f32 %v7797_v34, %v7650_v5  ;;  %v8278_v54 = vsel %vm249_vm2, %v8273_v58, %v8277_v13  ;;  %v8587_v61 = vshrl.u32 %v8541_v46, 16  ;;  %v8731_v34 = vrot.slane %v8541_v46, 2 }
 0x7c0   : > { %v8775_v41 = vpop.f32.mrf.mxu1 }
 0x7c1   : > { %v7943_v29 = vadd.f32 %v7920_v35, %v7820_v19  ;;  %v8423_v35 = vrot.slane %v8202_v32, 1  ;;  %v8589_v59 = vrot.slane %v8587_v61, 1  ;;  %v8732_v5 = vsel %vm828_vm5, %v8729_v21, %v8731_v34 }
 0x7c3   : > { %9998 = vmatmul.msk.bf16.gmra.mxu1 %vm334_vm1, %v8730_v60  ;;  %9976 = vmatmul.msk.bf16.gmra.mxu3 %vm334_vm1, %v8422_v39  ;;  %v13838_v6 = vadd.f32 %v8103_v1, %v7943_v29  ;;  %v8590_v1 = vshll.u32 %v8541_v46, 16  ;;  %v8424_v38 = vsel %vm516_vm4, %v8421_v47, %v8423_v35  ;;  %v8285_v60 = vrot.slane %v8283_v55, 1 }
 0x7c4   : > { %v7629_v40 = vpop.f32.mrf.mxu2 }
 0x7c5   : > { %v7651_v9 = vadd.f32 %v7629_v40, %v13671_v57  ;;  %v8592_v45 = vrot.slane %v8590_v1, 2 }
 0x7c6   : > { %v8467_v10 = vpop.f32.mrf.mxu3  ;;  %v8637_v18 = vpop.f32.mrf.mxu0 }
 0x7c7   : > { %v7821_v52 = vadd.f32 %v7799_v7, %v7651_v9 }
 0x7c8   : > { %v8777_v2 = vpop.f32.mrf.mxu1 }
 0x7c9   : > { %9987 = vmatmul.msk.bf16.gmra.mxu0 %vm334_vm1, %v8585_v12  ;;  %9965 = vmatmul.msk.bf16.gmra.mxu2 %vm334_vm1, %v8278_v54  ;;  %v7944_v56 = vadd.f32 %v7922_v3, %v7821_v52  ;;  %v8593_v3 = vor.u32 %v8592_v45, %v8589_v59 }
 0x7cb   : > { %v13845_v57 = vadd.f32 %v8105_v43, %v7944_v56  ;;  %v13853_v43 = vld [vmem:[%s13933_s2] ss:$0 sm:$0xff]  ;;  %v8594_v11 = vsel %vm656_vm3, %v8584_v37, %v8593_v3 }
 0x7cc   : > { %v8329_v50 = vpop.f32.mrf.mxu2 }
 0x7cd   : > { %v8379_v31 = vadd.f32 %v8329_v50, %v13682_v62  ;;  %v8281_v62 = vor.u32 %v8279_v16, %v8277_v13 }
 0x7ce   : > { %v8469_v25 = vpop.f32.mrf.mxu3  ;;  %v8639_v17 = vpop.f32.mrf.mxu0 }
 0x7cf   : > { %v8517_v7 = vadd.f32 %v8467_v10, %v8379_v31  ;;  %v8286_v29 = vsel %vm249_vm2, %v8281_v62, %v8285_v60 }
 0x7d0   : > { %v8780_v15 = vpop.f32.mrf.mxu1 }
 0x7d1   : > { %v8687_v63 = vadd.f32 %v8637_v18, %v8517_v7 }
 0x7d3   : > { %9999 = vmatmul.msk.bf16.gmra.mxu1 %vm334_vm1, %v8732_v5  ;;  %9977 = vmatmul.msk.bf16.gmra.mxu3 %vm334_vm1, %v8424_v38  ;;  %v8825_v49 = vadd.f32 %v8775_v41, %v8687_v63 }
 0x7d4   : > { %v8331_v19 = vpop.f32.mrf.mxu2 }
 0x7d5   : > { %v8849_v21 = vadd.f32 %v13853_v43, %v8825_v49  ;;  %v8380_v39 = vadd.f32 %v8331_v19, %v13698_v51 }
 0x7d6   : > { %v8472_v47 = vpop.f32.mrf.mxu3  ;;  %v8642_v24 = vpop.f32.mrf.mxu0 }
 0x7d7   : > { %v8869_v23 = vmax.f32 %v8849_v21, 0.0  ;;  %v8518_v40 = vadd.f32 %v8469_v25, %v8380_v39 }
 0x7d8   : > { %v8782_v58 = vpop.f32.mrf.mxu1 }
 0x7d9   : > { %9988 = vmatmul.msk.bf16.gmra.mxu0 %vm334_vm1, %v8594_v11  ;;  %8889 = vst.msk [vmem:[#allocation2 + $0xa0] sm:$0xff] %vm334_vm1, %v8869_v23  ;;  %v8688_v16 = vadd.f32 %v8639_v17, %v8518_v40  ;;  %9966 = vmatmul.msk.bf16.gmra.mxu2 %vm334_vm1, %v8286_v29 }
 0x7db   : > { %v8826_v41 = vadd.f32 %v8777_v2, %v8688_v16 }
 0x7dc   : > { %v8334_v13 = vpop.f32.mrf.mxu2 }
 0x7dd   : > { %v8850_v51 = vadd.f32 %v13853_v43, %v8826_v41  ;;  %v8381_v9 = vadd.f32 %v8334_v13, %v13708_v48 }
 0x7de   : > { %v8474_v10 = vpop.f32.mrf.mxu3  ;;  %v8644_v37 = vpop.f32.mrf.mxu0 }
 0x7df   : > { %v8870_v12 = vmax.f32 %v8850_v51, 0.0  ;;  %v8519_v46 = vadd.f32 %v8472_v47, %v8381_v9 }
 0x7e0   : > { %v8785_v18 = vpop.f32.mrf.mxu1 }
 0x7e1   : > { %8890 = vst.msk [vmem:[#allocation2 + $0xa8] sm:$0xff] %vm334_vm1, %v8870_v12  ;;  %v8689_v54 = vadd.f32 %v8642_v24, %v8519_v46 }
 0x7e3   : > { %v8827_v52 = vadd.f32 %v8780_v15, %v8689_v54 }
 0x7e4   : > { %v8336_v32 = vpop.f32.mrf.mxu2 }
 0x7e5   : > { %v8851_v61 = vadd.f32 %v13853_v43, %v8827_v52  ;;  %v8382_v1 = vadd.f32 %v8336_v32, %v13716_v27 }
 0x7e6   : > { %v8477_v2 = vpop.f32.mrf.mxu3  ;;  %v8647_v56 = vpop.f32.mrf.mxu0 }
 0x7e7   : > { %v8871_v35 = vmax.f32 %v8851_v61, 0.0  ;;  %v8520_v50 = vadd.f32 %v8474_v10, %v8382_v1 }
 0x7e8   : > { %v8787_v34 = vpop.f32.mrf.mxu1 }
 0x7e9   : > { %8891 = vst.msk [vmem:[#allocation2 + $0xb0] sm:$0xff] %vm334_vm1, %v8871_v35  ;;  %v8690_v48 = vadd.f32 %v8644_v37, %v8520_v50 }
 0x7eb   : > { %v8828_v31 = vadd.f32 %v8782_v58, %v8690_v48 }
 0x7ec   : > { %v8339_v25 = vpop.f32.mrf.mxu2 }
 0x7ed   : > { %v8852_v17 = vadd.f32 %v13853_v43, %v8828_v31  ;;  %v8383_v59 = vadd.f32 %v8339_v25, %v13725_v33 }
 0x7ee   : > { %v8479_v45 = vpop.f32.mrf.mxu3  ;;  %v8649_v55 = vpop.f32.mrf.mxu0 }
 0x7ef   : > { %v8872_v5 = vmax.f32 %v8852_v17, 0.0  ;;  %v8521_v7 = vadd.f32 %v8477_v2, %v8383_v59 }
 0x7f0   : > { %v8790_v15 = vpop.f32.mrf.mxu1  ;;  %v8962_v24 = vld [vmem:[#allocation2 + $0xa2] ss:$2 sm:$0xff]  ;;  %v8964_v11 = vld [vmem:[#allocation2 + $0xa3] ss:$2 sm:$0xff] }
 0x7f1   : > { %8892 = vst.msk [vmem:[#allocation2 + $0xb8] sm:$0xff] %vm334_vm1, %v8872_v5  ;;  %v8691_v27 = vadd.f32 %v8647_v56, %v8521_v7 }
 0x7f3   : > { %v8829_v38 = vadd.f32 %v8785_v18, %v8691_v27 }
 0x7f4   : > { %v8341_v63 = vpop.f32.mrf.mxu2 }
 0x7f5   : > { %v8853_v3 = vadd.f32 %v13853_v43, %v8829_v38  ;;  %v8384_v62 = vadd.f32 %v8341_v63, %v13733_v22  ;;  %v8969_v22 = vadd.f32 %v8964_v11, %v8962_v24 }
 0x7f6   : > { %v8482_v60 = vpop.f32.mrf.mxu3  ;;  %v8652_v49 = vpop.f32.mrf.mxu0 }
 0x7f7   : > { %v8873_v21 = vmax.f32 %v8853_v3, 0.0  ;;  %v8522_v39 = vadd.f32 %v8479_v45, %v8384_v62 }
 0x7f8   : > { %v8792_v19 = vpop.f32.mrf.mxu1 }
 0x7f9   : > { %8893 = vst.msk [vmem:[#allocation2 + $0xc0] sm:$0xff] %vm334_vm1, %v8873_v21  ;;  %v8692_v33 = vadd.f32 %v8649_v55, %v8522_v39 }
 0x7fb   : > { %v8830_v47 = vadd.f32 %v8787_v34, %v8692_v33 }
 0x7fc   : > { %v8344_v29 = vpop.f32.mrf.mxu2 }
 0x7fd   : > { %v8854_v58 = vadd.f32 %v13853_v43, %v8830_v47  ;;  %v8385_v23 = vadd.f32 %v8344_v29, %v13740_v42 }
 0x7fe   : > { %v8484_v40 = vpop.f32.mrf.mxu3  ;;  %v8654_v16 = vpop.f32.mrf.mxu0 }
 0x7ff   : > { %v8874_v13 = vmax.f32 %v8854_v58, 0.0  ;;  %v8523_v51 = vadd.f32 %v8482_v60, %v8385_v23 }
 0x800   : > { %v8795_v41 = vpop.f32.mrf.mxu1  ;;  %v8966_v9 = vld [vmem:[#allocation2 + $0xb6] ss:$2 sm:$0xff]  ;;  %v8968_v18 = vld [vmem:[#allocation2 + $0xb7] ss:$2 sm:$0xff] }
 0x801   : > { %v8970_v10 = vadd.f32 %v8969_v22, %v8966_v9  ;;  %8894 = vst.msk [vmem:[#allocation2 + $0xc8] sm:$0xff] %vm334_vm1, %v8874_v13  ;;  %v8693_v37 = vadd.f32 %v8652_v49, %v8523_v51 }
 0x803   : > { %v8971_v12 = vadd.f32 %v8970_v10, %v8968_v18  ;;  %v8831_v46 = vadd.f32 %v8790_v15, %v8693_v37 }
 0x804   : > { %v8346_v54 = vpop.f32.mrf.mxu2 }
 0x805   : > { %v8972_v52 = vmul.f32 0.25, %v8971_v12  ;;  %v8855_v32 = vadd.f32 %v13853_v43, %v8831_v46  ;;  %v8386_v42 = vadd.f32 %v8346_v54, %v13748_v53 }
 0x806   : > { %v8487_v61 = vpop.f32.mrf.mxu3  ;;  %v8657_v1 = vpop.f32.mrf.mxu0 }
 0x807   : > { %8973 = vst.msk [vmem:[%s12419_s18 + $0x20] sm:$0xff] %vm334_vm1, %v8972_v52  ;;  %v8875_v56 = vmax.f32 %v8855_v32, 0.0  ;;  %v8524_v34 = vadd.f32 %v8484_v40, %v8386_v42 }
 0x808   : > { %v8797_v2 = vpop.f32.mrf.mxu1 }
 0x809   : > { %8895 = vst.msk [vmem:[#allocation2 + $0xd0] sm:$0xff] %vm334_vm1, %v8875_v56  ;;  %v8694_v35 = vadd.f32 %v8654_v16, %v8524_v34 }
 0x80b   : > { %v8832_v50 = vadd.f32 %v8792_v19, %v8694_v35 }
 0x80c   : > { %v8349_v48 = vpop.f32.mrf.mxu2 }
 0x80d   : > { %v8856_v31 = vadd.f32 %v13853_v43, %v8832_v50  ;;  %v8387_v25 = vadd.f32 %v8349_v48, %v13755_v4 }
 0x80e   : > { %v8489_v17 = vpop.f32.mrf.mxu3  ;;  %v8659_v59 = vpop.f32.mrf.mxu0 }
 0x80f   : > { %v8876_v45 = vmax.f32 %v8856_v31, 0.0  ;;  %v8525_v53 = vadd.f32 %v8487_v61, %v8387_v25 }
 0x810   : > { %v8800_v55 = vpop.f32.mrf.mxu1 }
 0x811   : > { %8896 = vst.msk [vmem:[#allocation2 + $0xd8] sm:$0xff] %vm334_vm1, %v8876_v45  ;;  %v8695_v15 = vadd.f32 %v8657_v1, %v8525_v53 }
 0x813   : > { %v8833_v5 = vadd.f32 %v8795_v41, %v8695_v15 }
 0x814   : > { %v8351_v7 = vpop.f32.mrf.mxu2 }
 0x815   : > { %v8857_v27 = vadd.f32 %v13853_v43, %v8833_v5  ;;  %v8388_v38 = vadd.f32 %v8351_v7, %v13763_v26 }
 0x816   : > { %v8492_v63 = vpop.f32.mrf.mxu3  ;;  %v8662_v3 = vpop.f32.mrf.mxu0 }
 0x817   : > { %v8877_v62 = vmax.f32 %v8857_v27, 0.0  ;;  %v8526_v60 = vadd.f32 %v8489_v17, %v8388_v38 }
 0x818   : > { %v8802_v49 = vpop.f32.mrf.mxu1  ;;  %v8975_v23 = vld [vmem:[#allocation2 + $0xca] ss:$2 sm:$0xff]  ;;  %v8977_v40 = vld [vmem:[#allocation2 + $0xcb] ss:$2 sm:$0xff] }
 0x819   : > { %8897 = vst.msk [vmem:[#allocation2 + $0xe0] sm:$0xff] %vm334_vm1, %v8877_v62  ;;  %v8696_v4 = vadd.f32 %v8659_v59, %v8526_v60  ;;  %v8982_v10 = vadd.f32 %v8977_v40, %v8975_v23 }
 0x81b   : > { %v8834_v19 = vadd.f32 %v8797_v2, %v8696_v4 }
 0x81c   : > { %v8354_v21 = vpop.f32.mrf.mxu2 }
 0x81d   : > { %v8858_v39 = vadd.f32 %v13853_v43, %v8834_v19  ;;  %v8389_v33 = vadd.f32 %v8354_v21, %v13770_v14 }
 0x81e   : > { %v8494_v47 = vpop.f32.mrf.mxu3  ;;  %v8664_v24 = vpop.f32.mrf.mxu0 }
 0x81f   : > { %v8878_v11 = vmax.f32 %v8858_v39, 0.0  ;;  %v8527_v29 = vadd.f32 %v8492_v63, %v8389_v33 }
 0x820   : > { %v8805_v41 = vpop.f32.mrf.mxu1 }
 0x821   : > { %8898 = vst.msk [vmem:[#allocation2 + $0xe8] sm:$0xff] %vm334_vm1, %v8878_v11  ;;  %v8697_v26 = vadd.f32 %v8662_v3, %v8527_v29 }
 0x823   : > { %v8835_v58 = vadd.f32 %v8800_v55, %v8697_v26 }
 0x824   : > { %v8356_v16 = vpop.f32.mrf.mxu2 }
 0x825   : > { %v8859_v22 = vadd.f32 %v13853_v43, %v8835_v58  ;;  %v8390_v13 = vadd.f32 %v8356_v16, %v13778_v0 }
 0x826   : > { %v8497_v51 = vpop.f32.mrf.mxu3  ;;  %v8667_v9 = vpop.f32.mrf.mxu0 }
 0x827   : > { %v8879_v14 = vmax.f32 %v8859_v22, 0.0  ;;  %v8528_v37 = vadd.f32 %v8494_v47, %v8390_v13 }
 0x828   : > { %v8979_v18 = vld [vmem:[#allocation2 + $0xde] ss:$2 sm:$0xff]  ;;  %v8981_v54 = vld [vmem:[#allocation2 + $0xdf] ss:$2 sm:$0xff]  ;;  %v8807_v34 = vpop.f32.mrf.mxu1 }
 0x829   : > { %v8983_v12 = vadd.f32 %v8982_v10, %v8979_v18  ;;  %8899 = vst.msk [vmem:[#allocation2 + $0xf0] sm:$0xff] %vm334_vm1, %v8879_v14  ;;  %v8698_v46 = vadd.f32 %v8664_v24, %v8528_v37 }
 0x82b   : > { %v8984_v52 = vadd.f32 %v8983_v12, %v8981_v54  ;;  %v8836_v32 = vadd.f32 %v8802_v49, %v8698_v46 }
 0x82c   : > { %v8359_v42 = vpop.f32.mrf.mxu2 }
 0x82d   : > { %v8985_v61 = vmul.f32 0.25, %v8984_v52  ;;  %v8860_v1 = vadd.f32 %v13853_v43, %v8836_v32  ;;  %v8391_v0 = vadd.f32 %v8359_v42, %v13785_v30 }
 0x82e   : > { %v8499_v2 = vpop.f32.mrf.mxu3  ;;  %v8669_v56 = vpop.f32.mrf.mxu0 }
 0x82f   : > { %8986 = vst.msk [vmem:[%s12419_s18 + $0x28] sm:$0xff] %vm334_vm1, %v8985_v61  ;;  %v8880_v35 = vmax.f32 %v8860_v1, 0.0  ;;  %v8529_v50 = vadd.f32 %v8497_v51, %v8391_v0 }
 0x830   : > { %v8810_v15 = vpop.f32.mrf.mxu1 }
 0x831   : > { %8900 = vst.msk [vmem:[#allocation2 + $0xf8] sm:$0xff] %vm334_vm1, %v8880_v35  ;;  %v8699_v48 = vadd.f32 %v8667_v9, %v8529_v50 }
 0x833   : > { %v8837_v31 = vadd.f32 %v8805_v41, %v8699_v48 }
 0x834   : > { %v8361_v25 = vpop.f32.mrf.mxu2 }
 0x835   : > { %v8861_v17 = vadd.f32 %v13853_v43, %v8837_v31  ;;  %v8392_v59 = vadd.f32 %v8361_v25, %v13793_v28 }
 0x836   : > { %v8502_v45 = vpop.f32.mrf.mxu3  ;;  %v8672_v53 = vpop.f32.mrf.mxu0 }
 0x837   : > { %v8881_v55 = vmax.f32 %v8861_v17, 0.0  ;;  %v8530_v30 = vadd.f32 %v8499_v2, %v8392_v59 }
 0x838   : > { %v8812_v49 = vpop.f32.mrf.mxu1 }
 0x839   : > { %8901 = vst.msk [vmem:[#allocation2 + $0x100] sm:$0xff] %vm334_vm1, %v8881_v55  ;;  %v8700_v5 = vadd.f32 %v8669_v56, %v8530_v30 }
 0x83b   : > { %v8838_v7 = vadd.f32 %v8807_v34, %v8700_v5 }
 0x83c   : > { %v8364_v27 = vpop.f32.mrf.mxu2 }
 0x83d   : > { %v8862_v38 = vadd.f32 %v13853_v43, %v8838_v7  ;;  %v8393_v63 = vadd.f32 %v8364_v27, %v13800_v8 }
 0x83e   : > { %v8504_v3 = vpop.f32.mrf.mxu3  ;;  %v8674_v4 = vpop.f32.mrf.mxu0 }
 0x83f   : > { %v8882_v62 = vmax.f32 %v8862_v38, 0.0  ;;  %v8531_v60 = vadd.f32 %v8502_v45, %v8393_v63 }
 0x840   : > { %v8988_v58 = vld [vmem:[#allocation2 + $0xf2] ss:$2 sm:$0xff]  ;;  %v8990_v23 = vld [vmem:[#allocation2 + $0xf3] ss:$2 sm:$0xff]  ;;  %v8815_v40 = vpop.f32.mrf.mxu1 }
 0x841   : > { %8902 = vst.msk [vmem:[#allocation2 + $0x108] sm:$0xff] %vm334_vm1, %v8882_v62  ;;  %v8701_v28 = vadd.f32 %v8672_v53, %v8531_v60  ;;  %v8995_v13 = vadd.f32 %v8990_v23, %v8988_v58 }
 0x843   : > { %v8839_v19 = vadd.f32 %v8810_v15, %v8701_v28 }
 0x844   : > { %v8366_v21 = vpop.f32.mrf.mxu2 }
 0x845   : > { %v8863_v39 = vadd.f32 %v13853_v43, %v8839_v19  ;;  %v8394_v33 = vadd.f32 %v8366_v21, %v13808_v44 }
 0x846   : > { %v8507_v11 = vpop.f32.mrf.mxu3  ;;  %v8677_v29 = vpop.f32.mrf.mxu0 }
 0x847   : > { %v8883_v47 = vmax.f32 %v8863_v39, 0.0  ;;  %v8532_v24 = vadd.f32 %v8504_v3, %v8394_v33 }
 0x848   : > { %v8817_v61 = vpop.f32.mrf.mxu1 }
 0x849   : > { %8903 = vst.msk [vmem:[#allocation2 + $0x110] sm:$0xff] %vm334_vm1, %v8883_v47  ;;  %v8702_v8 = vadd.f32 %v8674_v4, %v8532_v24 }
 0x84b   : > { %v8840_v26 = vadd.f32 %v8812_v49, %v8702_v8 }
 0x84c   : > { %v8369_v16 = vpop.f32.mrf.mxu2 }
 0x84d   : > { %v8864_v41 = vadd.f32 %v13853_v43, %v8840_v26  ;;  %v8395_v22 = vadd.f32 %v8369_v16, %v13815_v20 }
 0x84e   : > { %v8509_v18 = vpop.f32.mrf.mxu3  ;;  %v8679_v54 = vpop.f32.mrf.mxu0 }
 0x84f   : > { %v8884_v51 = vmax.f32 %v8864_v41, 0.0  ;;  %v8533_v44 = vadd.f32 %v8507_v11, %v8395_v22 }
 0x850   : > { %v8992_v9 = vld [vmem:[#allocation2 + $0x106] ss:$2 sm:$0xff]  ;;  %v8994_v37 = vld [vmem:[#allocation2 + $0x107] ss:$2 sm:$0xff]  ;;  %v8820_v59 = vpop.f32.mrf.mxu1 }
 0x851   : > { %v8996_v10 = vadd.f32 %v8995_v13, %v8992_v9  ;;  %8904 = vst.msk [vmem:[#allocation2 + $0x118] sm:$0xff] %vm334_vm1, %v8884_v51  ;;  %v8703_v14 = vadd.f32 %v8677_v29, %v8533_v44 }
 0x853   : > { %v8997_v12 = vadd.f32 %v8996_v10, %v8994_v37  ;;  %v8841_v46 = vadd.f32 %v8815_v40, %v8703_v14 }
 0x854   : > { %v8371_v52 = vpop.f32.mrf.mxu2 }
 0x855   : > { %v8998_v32 = vmul.f32 0.25, %v8997_v12  ;;  %v8865_v42 = vadd.f32 %v13853_v43, %v8841_v46  ;;  %v8396_v20 = vadd.f32 %v8371_v52, %v13829_v36 }
 0x856   : > { %v8512_v34 = vpop.f32.mrf.mxu3  ;;  %v8682_v31 = vpop.f32.mrf.mxu0 }
 0x857   : > { %8999 = vst.msk [vmem:[%s12419_s18 + $0x30] sm:$0xff] %vm334_vm1, %v8998_v32  ;;  %v8885_v1 = vmax.f32 %v8865_v42, 0.0  ;;  %v8534_v0 = vadd.f32 %v8509_v18, %v8396_v20 }
 0x858   : > { %v8822_v38 = vpop.f32.mrf.mxu1 }
 0x859   : > { %8905 = vst.msk [vmem:[#allocation2 + $0x120] sm:$0xff] %vm334_vm1, %v8885_v1  ;;  %v8704_v2 = vadd.f32 %v8679_v54, %v8534_v0 }
 0x85b   : > { %v8842_v56 = vadd.f32 %v8817_v61, %v8704_v2 }
 0x85c   : > { %v8374_v35 = vpop.f32.mrf.mxu2 }
 0x85d   : > { %v8866_v50 = vadd.f32 %v13853_v43, %v8842_v56  ;;  %v8397_v48 = vadd.f32 %v8374_v35, %v13838_v6 }
 0x85e   : > { %v8514_v15 = vpop.f32.mrf.mxu3  ;;  %v8684_v27 = vpop.f32.mrf.mxu0 }
 0x85f   : > { %v8886_v25 = vmax.f32 %v8866_v50, 0.0  ;;  %v8535_v17 = vadd.f32 %v8512_v34, %v8397_v48 }
 0x861   : > { %8906 = vst.msk [vmem:[#allocation2 + $0x128] sm:$0xff] %vm334_vm1, %v8886_v25  ;;  %v8705_v36 = vadd.f32 %v8682_v31, %v8535_v17 }
 0x863   : > { %v8843_v45 = vadd.f32 %v8820_v59, %v8705_v36 }
 0x864   : > { %v8376_v53 = vpop.f32.mrf.mxu2 }
 0x865   : > { %v8867_v55 = vadd.f32 %v13853_v43, %v8843_v45  ;;  %v8398_v30 = vadd.f32 %v8376_v53, %v13845_v57 }
 0x867   : > { %v8887_v5 = vmax.f32 %v8867_v55, 0.0  ;;  %v8536_v7 = vadd.f32 %v8514_v15, %v8398_v30 }
 0x868   : > { %v9001_v60 = vld [vmem:[#allocation2 + $0x11a] ss:$2 sm:$0xff]  ;;  %v9003_v4 = vld [vmem:[#allocation2 + $0x11b] ss:$2 sm:$0xff] }
 0x869   : > { %8907 = vst.msk [vmem:[#allocation2 + $0x130] sm:$0xff] %vm334_vm1, %v8887_v5  ;;  %v8706_v6 = vadd.f32 %v8684_v27, %v8536_v7  ;;  %v9008_v28 = vadd.f32 %v9003_v4, %v9001_v60 }
 0x86b   : > { %v8844_v63 = vadd.f32 %v8822_v38, %v8706_v6 }
 0x86d   : > { %v8868_v3 = vadd.f32 %v13853_v43, %v8844_v63 }
 0x86f   : > { %v8888_v62 = vmax.f32 %v8868_v3, 0.0 }
 0x871   : > { %8908 = vst.msk [vmem:[#allocation2 + $0x138] sm:$0xff] %vm334_vm1, %v8888_v62 }
 0x878   : > { %v9005_v49 = vld [vmem:[#allocation2 + $0x12e] ss:$2 sm:$0xff]  ;;  %v9007_v19 = vld [vmem:[#allocation2 + $0x12f] ss:$2 sm:$0xff] }
 0x879   : > { %v9009_v57 = vadd.f32 %v9008_v28, %v9005_v49 }
 0x87b   : > { %v9010_v21 = vadd.f32 %v9009_v57, %v9007_v19 }
 0x87d   : > { %v9011_v39 = vmul.f32 0.25, %v9010_v21 }
 0x87f   : > { %9012 = vst.msk [vmem:[%s12419_s18 + $0x38] sm:$0xff] %vm334_vm1, %v9011_v39 }
 0x880 PF: > { %s13_s12 = sadd.s32 1, %s10540_s12  }
 0x881   : > { %p10_p4 = scmp.ge.s32.totalorder %s13_s12, 4  }
 0x883   :  { %12 = sbr.rel (!%p10_p4) target bundleno = 1 (0x1), region = 118 }

</bundles_post_ra>
